<compile_context>
chip_gen: v5e
topology: v5e:2x2
jax: 0.10.0
libtpu: 0.0.40
codegen_flags: <defaults>
</compile_context>

<pallas_src>
import jax
import jax.numpy as jnp
from jax.experimental import pallas as pl
from jax.experimental.pallas import tpu as pltpu


NEG_SLOPE = 0.2
DROP_P = 0.3
KEEP_P = 1.0 - DROP_P
_DROP_THR = int(DROP_P * (1 << 32))     # bits < THR  ->  dropped  (P = 0.3)
_INV_KEEP = 1.0 / KEEP_P


def _leaky_relu(h):
    return jnp.where(h >= 0.0, h, jnp.float32(NEG_SLOPE) * h)


def _dropout(h, seed_u32, row_off_u32, salt):
    # Counter-based hash PRNG (murmur-style finalizer). Rows are offset by the
    # grid tile so every batch tile gets an independent Bernoulli(keep=0.7) mask.
    rows = jax.lax.broadcasted_iota(jnp.uint32, h.shape, 0) + row_off_u32
    cols = jax.lax.broadcasted_iota(jnp.uint32, h.shape, 1)
    x = rows * jnp.uint32(0x9E3779B1) + cols * jnp.uint32(0x85EBCA77)
    x = x ^ (seed_u32 + jnp.uint32((salt * 0x9E3779B9) & 0xFFFFFFFF))
    x = x ^ (x >> 16)
    x = x * jnp.uint32(0x7FEB352D)
    x = x ^ (x >> 15)
    x = x * jnp.uint32(0x846CA68B)
    x = x ^ (x >> 16)
    # Single fused select: keep (scaled by 1/keep_p) or zero.
    return jnp.where(x >= jnp.uint32(_DROP_THR),
                     h * jnp.float32(_INV_KEEP), jnp.float32(0.0))


def discriminator_kernel(seed_ref,                    # SMEM (1,) int32 (scalar prefetch)
                         x_ref,                       # (TM, D_pad)   f32
                         w1_ref, b1_ref,              # (D_pad, 1024) bf16, (1, 1024) f32
                         w2_ref, b2_ref,              # (1024, 512)   bf16, (1, 512)  f32
                         w3_ref, b3_ref,              # (512, 256)    bf16, (1, 256)  f32
                         w4_ref, b4_ref,              # (1, 256)      bf16, (1, 1)    f32
                         out_ref):                    # (1, TM)       f32  (lane-dense)
    tm = x_ref.shape[0]
    seed_u32 = seed_ref[0].astype(jnp.uint32)
    row_off = (pl.program_id(0) * tm).astype(jnp.uint32)

    # fc1 -> leaky_relu -> dropout   (bf16 MXU operands, f32 accumulate/elementwise)
    h = jnp.dot(x_ref[...].astype(jnp.bfloat16), w1_ref[...],
                preferred_element_type=jnp.float32)
    h = _dropout(_leaky_relu(h + b1_ref[...]), seed_u32, row_off, salt=1)

    # fc2 -> leaky_relu -> dropout
    h = jnp.dot(h.astype(jnp.bfloat16), w2_ref[...],
                preferred_element_type=jnp.float32)
    h = _dropout(_leaky_relu(h + b2_ref[...]), seed_u32, row_off, salt=2)

    # fc3 -> leaky_relu -> dropout
    h = jnp.dot(h.astype(jnp.bfloat16), w3_ref[...],
                preferred_element_type=jnp.float32)
    h = _dropout(_leaky_relu(h + b3_ref[...]), seed_u32, row_off, salt=3)

    # fc4 (out_features = 1) + sigmoid, computed lane-dense:
    # (1, 256) @ (256, TM) -> (1, TM) so the output store is a full-lane slab.
    logits = jnp.dot(w4_ref[...], h.astype(jnp.bfloat16).T,
                     preferred_element_type=jnp.float32) + b4_ref[...]
    out_ref[...] = 1.0 / (1.0 + jnp.exp(-logits))


def _round_up(n, m):
    return (n + m - 1) // m * m


def discriminator_forward(x, params, seed, *, tm_max=256):
    """x: (B, d_input_dim) f32. params: dict of (in,out)-layout weights (bf16) and
    f32 biases. seed: int. Returns (B, 1) f32 probabilities."""
    B, d_in = x.shape
    d_pad = _round_up(d_in, 128)

    # Batch tile: full (padded) batch when small, 256 rows otherwise.
    tm = min(tm_max, _round_up(B, 8))
    b_pad = _round_up(B, tm)

    w1 = params["w1"]
    if d_pad != d_in:
        x = jnp.pad(x, ((0, 0), (0, d_pad - d_in)))
        w1 = jnp.pad(w1, ((0, d_pad - d_in), (0, 0)))
    if b_pad != B:
        x = jnp.pad(x, ((0, b_pad - B), (0, 0)))

    grid = (b_pad // tm,)
    seed_arr = jnp.asarray([seed], dtype=jnp.int32)

    weights = (w1, params["b1"], params["w2"], params["b2"],
               params["w3"], params["b3"], params["w4"], params["b4"])

    def resident(shape):
        # Same block every grid step -> weights/biases stay VMEM-resident.
        return pl.BlockSpec(shape, lambda i, *_: (0, 0))

    out = pl.pallas_call(
        discriminator_kernel,
        out_shape=jax.ShapeDtypeStruct((1, b_pad), jnp.float32),
        grid_spec=pltpu.PrefetchScalarGridSpec(
            num_scalar_prefetch=1,
            grid=grid,
            in_specs=[pl.BlockSpec((tm, d_pad), lambda i, *_: (i, 0))]
                     + [resident(w.shape) for w in weights],
            out_specs=pl.BlockSpec((1, tm), lambda i, *_: (0, i)),
        ),
        compiler_params=pltpu.CompilerParams(
            dimension_semantics=("parallel",),
        ),
    )(seed_arr, x, *weights)

    return out[0, :B][:, None]


def init_params(key, d_input_dim):
    """Deterministic init matching nn.Linear's default U(-1/sqrt(fan_in), 1/sqrt(fan_in)).
    Weights stored transposed (in_features, out_features) in bf16; biases f32."""
    dims = [(d_input_dim, 1024), (1024, 512), (512, 256), (256, 1)]
    params = {}
    for i, (fan_in, fan_out) in enumerate(dims, start=1):
        key, kw, kb = jax.random.split(key, 3)
        bound = 1.0 / (fan_in ** 0.5)
        w = jax.random.uniform(kw, (fan_in, fan_out), jnp.float32, -bound, bound)
        b = jax.random.uniform(kb, (1, fan_out), jnp.float32, -bound, bound)
        params[f"w{i}"] = w.astype(jnp.bfloat16)
        params[f"b{i}"] = b                      # biases stay f32 (post-accumulate add)
    # fc4 weight is used as a (1, 256) bf16 row inside the kernel.
    params["w4"] = params["w4"].T
    return params


if __name__ == "__main__":
    B = 8
    D_IN = 784  # d_input_dim (e.g. flattened 28x28 image); padded to 896 in-wrapper

    key = jax.random.PRNGKey(0)
    key_x, key_p = jax.random.split(key)
    x = jax.random.normal(key_x, (B, D_IN), dtype=jnp.float32)
    params = init_params(key_p, D_IN)

    out = discriminator_forward(x, params, seed=1234)
    out = jax.block_until_ready(out)

    assert out.shape == (B, 1), out.shape
    assert bool(jnp.all(jnp.isfinite(out)))
    assert bool(jnp.all((out >= 0.0) & (out <= 1.0)))
    print("KERNEL_OK")
</pallas_src>

<mosaic_0001>
module attributes {stable_mosaic.version = 11 : i64} {
  func.func @discriminator_kernel(%arg0: i32, %arg1: memref<1xi32, #tpu.memory_space<smem>>, %arg2: memref<8x896xf32, #tpu.memory_space<vmem>>, %arg3: memref<896x1024xbf16, #tpu.memory_space<vmem>>, %arg4: memref<1x1024xf32, #tpu.memory_space<vmem>>, %arg5: memref<1024x512xbf16, #tpu.memory_space<vmem>>, %arg6: memref<1x512xf32, #tpu.memory_space<vmem>>, %arg7: memref<512x256xbf16, #tpu.memory_space<vmem>>, %arg8: memref<1x256xf32, #tpu.memory_space<vmem>>, %arg9: memref<1x256xbf16, #tpu.memory_space<vmem>>, %arg10: memref<1x1xf32, #tpu.memory_space<vmem>>, %arg11: memref<1x8xf32, #tpu.memory_space<vmem>>) attributes {dimension_semantics = [#tpu.dimension_semantics<parallel>], iteration_bounds = array<i64: 1>, scalar_prefetch = 1 : i64, scratch_operands = 0 : i64, tpu.core_type = #tpu.core_type<tc>, window_params = [{transform_indices = @transform_0, window_bounds = array<i64: 8, 896>}, {pipeline_mode = #tpu.pipeline_mode<synchronous>, transform_indices = @transform_1, window_bounds = array<i64: 896, 1024>}, {pipeline_mode = #tpu.pipeline_mode<synchronous>, transform_indices = @transform_2, window_bounds = array<i64: 1, 1024>}, {pipeline_mode = #tpu.pipeline_mode<synchronous>, transform_indices = @transform_3, window_bounds = array<i64: 1024, 512>}, {pipeline_mode = #tpu.pipeline_mode<synchronous>, transform_indices = @transform_4, window_bounds = array<i64: 1, 512>}, {pipeline_mode = #tpu.pipeline_mode<synchronous>, transform_indices = @transform_5, window_bounds = array<i64: 512, 256>}, {pipeline_mode = #tpu.pipeline_mode<synchronous>, transform_indices = @transform_6, window_bounds = array<i64: 1, 256>}, {pipeline_mode = #tpu.pipeline_mode<synchronous>, transform_indices = @transform_7, window_bounds = array<i64: 1, 256>}, {pipeline_mode = #tpu.pipeline_mode<synchronous>, transform_indices = @transform_8, window_bounds = array<i64: 1, 1>}, {transform_indices = @transform_9, window_bounds = array<i64: 1, 8>}]} {
    %c0 = arith.constant 0 : index
    %0 = memref.load %arg1[%c0] : memref<1xi32, #tpu.memory_space<smem>>
    %c8_i32 = arith.constant 8 : i32
    %1 = arith.muli %arg0, %c8_i32 : i32
    %c0_0 = arith.constant 0 : index
    %c0_1 = arith.constant 0 : index
    %2 = vector.load %arg2[%c0_0, %c0_1] : memref<8x896xf32, #tpu.memory_space<vmem>>, vector<8x896xf32>
    %3 = arith.truncf %2 : vector<8x896xf32> to vector<8x896xbf16>
    %c0_2 = arith.constant 0 : index
    %c0_3 = arith.constant 0 : index
    %4 = vector.load %arg3[%c0_2, %c0_3] : memref<896x1024xbf16, #tpu.memory_space<vmem>>, vector<896x1024xbf16>
    %cst = arith.constant dense<0.000000e+00> : vector<8x1024xf32>
    %5 = tpu.matmul %3, %4, %cst {dimension_numbers = #tpu.dot_dimension_numbers<[1], [0], [0], [1], [0, 0, 1, 1], [], []>} : vector<8x896xbf16>, vector<896x1024xbf16>, vector<8x1024xf32> -> vector<8x1024xf32>
    %c0_4 = arith.constant 0 : index
    %c0_5 = arith.constant 0 : index
    %6 = vector.load %arg4[%c0_4, %c0_5] : memref<1x1024xf32, #tpu.memory_space<vmem>>, vector<1x1024xf32>
    %7 = vector.broadcast %6 : vector<1x1024xf32> to vector<8x1024xf32>
    %8 = arith.addf %5, %7 : vector<8x1024xf32>
    %cst_6 = arith.constant 0.000000e+00 : f32
    %9 = vector.broadcast %cst_6 : f32 to vector<8x1024xf32>
    %10 = arith.cmpf oge, %8, %9 : vector<8x1024xf32>
    %cst_7 = arith.constant 2.000000e-01 : f32
    %11 = vector.broadcast %cst_7 : f32 to vector<8x1024xf32>
    %12 = arith.mulf %11, %8 : vector<8x1024xf32>
    %13 = arith.select %10, %8, %12 : vector<8x1024xi1>, vector<8x1024xf32>
    %14 = tpu.iota {dimensions = array<i32: 0>} : vector<8x1024xi32>
    %15 = vector.broadcast %1 : i32 to vector<8x1024xi32>
    %16 = arith.addi %14, %15 : vector<8x1024xi32>
    %17 = tpu.iota {dimensions = array<i32: 1>} : vector<8x1024xi32>
    %c-1640531535_i32 = arith.constant -1640531535 : i32
    %18 = vector.broadcast %c-1640531535_i32 : i32 to vector<8x1024xi32>
    %19 = arith.muli %16, %18 : vector<8x1024xi32>
    %c-2048144777_i32 = arith.constant -2048144777 : i32
    %20 = vector.broadcast %c-2048144777_i32 : i32 to vector<8x1024xi32>
    %21 = arith.muli %17, %20 : vector<8x1024xi32>
    %22 = arith.addi %19, %21 : vector<8x1024xi32>
    %c-1640531527_i32 = arith.constant -1640531527 : i32
    %23 = arith.addi %0, %c-1640531527_i32 : i32
    %24 = vector.broadcast %23 : i32 to vector<8x1024xi32>
    %25 = arith.xori %22, %24 : vector<8x1024xi32>
    %c16_i32 = arith.constant 16 : i32
    %26 = vector.broadcast %c16_i32 : i32 to vector<8x1024xi32>
    %27 = arith.shrui %25, %26 : vector<8x1024xi32>
    %28 = arith.xori %25, %27 : vector<8x1024xi32>
    %c2146121005_i32 = arith.constant 2146121005 : i32
    %29 = vector.broadcast %c2146121005_i32 : i32 to vector<8x1024xi32>
    %30 = arith.muli %28, %29 : vector<8x1024xi32>
    %c15_i32 = arith.constant 15 : i32
    %31 = vector.broadcast %c15_i32 : i32 to vector<8x1024xi32>
    %32 = arith.shrui %30, %31 : vector<8x1024xi32>
    %33 = arith.xori %30, %32 : vector<8x1024xi32>
    %c-2073254261_i32 = arith.constant -2073254261 : i32
    %34 = vector.broadcast %c-2073254261_i32 : i32 to vector<8x1024xi32>
    %35 = arith.muli %33, %34 : vector<8x1024xi32>
    %c16_i32_8 = arith.constant 16 : i32
    %36 = vector.broadcast %c16_i32_8 : i32 to vector<8x1024xi32>
    %37 = arith.shrui %35, %36 : vector<8x1024xi32>
    %38 = arith.xori %35, %37 : vector<8x1024xi32>
    %c1288490188_i32 = arith.constant 1288490188 : i32
    %39 = vector.broadcast %c1288490188_i32 : i32 to vector<8x1024xi32>
    %40 = arith.cmpi uge, %38, %39 : vector<8x1024xi32>
    %cst_9 = arith.constant 1.42857146 : f32
    %41 = vector.broadcast %cst_9 : f32 to vector<8x1024xf32>
    %42 = arith.mulf %13, %41 : vector<8x1024xf32>
    %cst_10 = arith.constant 0.000000e+00 : f32
    %43 = vector.broadcast %cst_10 : f32 to vector<8x1024xf32>
    %44 = arith.select %40, %42, %43 : vector<8x1024xi1>, vector<8x1024xf32>
    %45 = arith.truncf %44 : vector<8x1024xf32> to vector<8x1024xbf16>
    %c0_11 = arith.constant 0 : index
    %c0_12 = arith.constant 0 : index
    %46 = vector.load %arg5[%c0_11, %c0_12] : memref<1024x512xbf16, #tpu.memory_space<vmem>>, vector<1024x512xbf16>
    %cst_13 = arith.constant dense<0.000000e+00> : vector<8x512xf32>
    %47 = tpu.matmul %45, %46, %cst_13 {dimension_numbers = #tpu.dot_dimension_numbers<[1], [0], [0], [1], [0, 0, 1, 1], [], []>} : vector<8x1024xbf16>, vector<1024x512xbf16>, vector<8x512xf32> -> vector<8x512xf32>
    %c0_14 = arith.constant 0 : index
    %c0_15 = arith.constant 0 : index
    %48 = vector.load %arg6[%c0_14, %c0_15] : memref<1x512xf32, #tpu.memory_space<vmem>>, vector<1x512xf32>
    %49 = vector.broadcast %48 : vector<1x512xf32> to vector<8x512xf32>
    %50 = arith.addf %47, %49 : vector<8x512xf32>
    %cst_16 = arith.constant 0.000000e+00 : f32
    %51 = vector.broadcast %cst_16 : f32 to vector<8x512xf32>
    %52 = arith.cmpf oge, %50, %51 : vector<8x512xf32>
    %cst_17 = arith.constant 2.000000e-01 : f32
    %53 = vector.broadcast %cst_17 : f32 to vector<8x512xf32>
    %54 = arith.mulf %53, %50 : vector<8x512xf32>
    %55 = arith.select %52, %50, %54 : vector<8x512xi1>, vector<8x512xf32>
    %56 = tpu.iota {dimensions = array<i32: 0>} : vector<8x512xi32>
    %57 = vector.broadcast %1 : i32 to vector<8x512xi32>
    %58 = arith.addi %56, %57 : vector<8x512xi32>
    %59 = tpu.iota {dimensions = array<i32: 1>} : vector<8x512xi32>
    %c-1640531535_i32_18 = arith.constant -1640531535 : i32
    %60 = vector.broadcast %c-1640531535_i32_18 : i32 to vector<8x512xi32>
    %61 = arith.muli %58, %60 : vector<8x512xi32>
    %c-2048144777_i32_19 = arith.constant -2048144777 : i32
    %62 = vector.broadcast %c-2048144777_i32_19 : i32 to vector<8x512xi32>
    %63 = arith.muli %59, %62 : vector<8x512xi32>
    %64 = arith.addi %61, %63 : vector<8x512xi32>
    %c1013904242_i32 = arith.constant 1013904242 : i32
    %65 = arith.addi %0, %c1013904242_i32 : i32
    %66 = vector.broadcast %65 : i32 to vector<8x512xi32>
    %67 = arith.xori %64, %66 : vector<8x512xi32>
    %c16_i32_20 = arith.constant 16 : i32
    %68 = vector.broadcast %c16_i32_20 : i32 to vector<8x512xi32>
    %69 = arith.shrui %67, %68 : vector<8x512xi32>
    %70 = arith.xori %67, %69 : vector<8x512xi32>
    %c2146121005_i32_21 = arith.constant 2146121005 : i32
    %71 = vector.broadcast %c2146121005_i32_21 : i32 to vector<8x512xi32>
    %72 = arith.muli %70, %71 : vector<8x512xi32>
    %c15_i32_22 = arith.constant 15 : i32
    %73 = vector.broadcast %c15_i32_22 : i32 to vector<8x512xi32>
    %74 = arith.shrui %72, %73 : vector<8x512xi32>
    %75 = arith.xori %72, %74 : vector<8x512xi32>
    %c-2073254261_i32_23 = arith.constant -2073254261 : i32
    %76 = vector.broadcast %c-2073254261_i32_23 : i32 to vector<8x512xi32>
    %77 = arith.muli %75, %76 : vector<8x512xi32>
    %c16_i32_24 = arith.constant 16 : i32
    %78 = vector.broadcast %c16_i32_24 : i32 to vector<8x512xi32>
    %79 = arith.shrui %77, %78 : vector<8x512xi32>
    %80 = arith.xori %77, %79 : vector<8x512xi32>
    %c1288490188_i32_25 = arith.constant 1288490188 : i32
    %81 = vector.broadcast %c1288490188_i32_25 : i32 to vector<8x512xi32>
    %82 = arith.cmpi uge, %80, %81 : vector<8x512xi32>
    %cst_26 = arith.constant 1.42857146 : f32
    %83 = vector.broadcast %cst_26 : f32 to vector<8x512xf32>
    %84 = arith.mulf %55, %83 : vector<8x512xf32>
    %cst_27 = arith.constant 0.000000e+00 : f32
    %85 = vector.broadcast %cst_27 : f32 to vector<8x512xf32>
    %86 = arith.select %82, %84, %85 : vector<8x512xi1>, vector<8x512xf32>
    %87 = arith.truncf %86 : vector<8x512xf32> to vector<8x512xbf16>
    %c0_28 = arith.constant 0 : index
    %c0_29 = arith.constant 0 : index
    %88 = vector.load %arg7[%c0_28, %c0_29] : memref<512x256xbf16, #tpu.memory_space<vmem>>, vector<512x256xbf16>
    %cst_30 = arith.constant dense<0.000000e+00> : vector<8x256xf32>
    %89 = tpu.matmul %87, %88, %cst_30 {dimension_numbers = #tpu.dot_dimension_numbers<[1], [0], [0], [1], [0, 0, 1, 1], [], []>} : vector<8x512xbf16>, vector<512x256xbf16>, vector<8x256xf32> -> vector<8x256xf32>
    %c0_31 = arith.constant 0 : index
    %c0_32 = arith.constant 0 : index
    %90 = vector.load %arg8[%c0_31, %c0_32] : memref<1x256xf32, #tpu.memory_space<vmem>>, vector<1x256xf32>
    %91 = vector.broadcast %90 : vector<1x256xf32> to vector<8x256xf32>
    %92 = arith.addf %89, %91 : vector<8x256xf32>
    %cst_33 = arith.constant 0.000000e+00 : f32
    %93 = vector.broadcast %cst_33 : f32 to vector<8x256xf32>
    %94 = arith.cmpf oge, %92, %93 : vector<8x256xf32>
    %cst_34 = arith.constant 2.000000e-01 : f32
    %95 = vector.broadcast %cst_34 : f32 to vector<8x256xf32>
    %96 = arith.mulf %95, %92 : vector<8x256xf32>
    %97 = arith.select %94, %92, %96 : vector<8x256xi1>, vector<8x256xf32>
    %98 = tpu.iota {dimensions = array<i32: 0>} : vector<8x256xi32>
    %99 = vector.broadcast %1 : i32 to vector<8x256xi32>
    %100 = arith.addi %98, %99 : vector<8x256xi32>
    %101 = tpu.iota {dimensions = array<i32: 1>} : vector<8x256xi32>
    %c-1640531535_i32_35 = arith.constant -1640531535 : i32
    %102 = vector.broadcast %c-1640531535_i32_35 : i32 to vector<8x256xi32>
    %103 = arith.muli %100, %102 : vector<8x256xi32>
    %c-2048144777_i32_36 = arith.constant -2048144777 : i32
    %104 = vector.broadcast %c-2048144777_i32_36 : i32 to vector<8x256xi32>
    %105 = arith.muli %101, %104 : vector<8x256xi32>
    %106 = arith.addi %103, %105 : vector<8x256xi32>
    %c-626627285_i32 = arith.constant -626627285 : i32
    %107 = arith.addi %0, %c-626627285_i32 : i32
    %108 = vector.broadcast %107 : i32 to vector<8x256xi32>
    %109 = arith.xori %106, %108 : vector<8x256xi32>
    %c16_i32_37 = arith.constant 16 : i32
    %110 = vector.broadcast %c16_i32_37 : i32 to vector<8x256xi32>
    %111 = arith.shrui %109, %110 : vector<8x256xi32>
    %112 = arith.xori %109, %111 : vector<8x256xi32>
    %c2146121005_i32_38 = arith.constant 2146121005 : i32
    %113 = vector.broadcast %c2146121005_i32_38 : i32 to vector<8x256xi32>
    %114 = arith.muli %112, %113 : vector<8x256xi32>
    %c15_i32_39 = arith.constant 15 : i32
    %115 = vector.broadcast %c15_i32_39 : i32 to vector<8x256xi32>
    %116 = arith.shrui %114, %115 : vector<8x256xi32>
    %117 = arith.xori %114, %116 : vector<8x256xi32>
    %c-2073254261_i32_40 = arith.constant -2073254261 : i32
    %118 = vector.broadcast %c-2073254261_i32_40 : i32 to vector<8x256xi32>
    %119 = arith.muli %117, %118 : vector<8x256xi32>
    %c16_i32_41 = arith.constant 16 : i32
    %120 = vector.broadcast %c16_i32_41 : i32 to vector<8x256xi32>
    %121 = arith.shrui %119, %120 : vector<8x256xi32>
    %122 = arith.xori %119, %121 : vector<8x256xi32>
    %c1288490188_i32_42 = arith.constant 1288490188 : i32
    %123 = vector.broadcast %c1288490188_i32_42 : i32 to vector<8x256xi32>
    %124 = arith.cmpi uge, %122, %123 : vector<8x256xi32>
    %cst_43 = arith.constant 1.42857146 : f32
    %125 = vector.broadcast %cst_43 : f32 to vector<8x256xf32>
    %126 = arith.mulf %97, %125 : vector<8x256xf32>
    %cst_44 = arith.constant 0.000000e+00 : f32
    %127 = vector.broadcast %cst_44 : f32 to vector<8x256xf32>
    %128 = arith.select %124, %126, %127 : vector<8x256xi1>, vector<8x256xf32>
    %c0_45 = arith.constant 0 : index
    %c0_46 = arith.constant 0 : index
    %129 = vector.load %arg9[%c0_45, %c0_46] : memref<1x256xbf16, #tpu.memory_space<vmem>>, vector<1x256xbf16>
    %130 = arith.truncf %128 : vector<8x256xf32> to vector<8x256xbf16>
    %131 = tpu.transpose %130, [1, 0] : vector<8x256xbf16> -> vector<256x8xbf16>
    %cst_47 = arith.constant dense<0.000000e+00> : vector<1x8xf32>
    %132 = tpu.matmul %129, %131, %cst_47 {dimension_numbers = #tpu.dot_dimension_numbers<[1], [0], [0], [1], [0, 0, 1, 1], [], []>} : vector<1x256xbf16>, vector<256x8xbf16>, vector<1x8xf32> -> vector<1x8xf32>
    %c0_48 = arith.constant 0 : index
    %c0_49 = arith.constant 0 : index
    %133 = vector.load %arg10[%c0_48, %c0_49] : memref<1x1xf32, #tpu.memory_space<vmem>>, vector<1x1xf32>
    %134 = vector.broadcast %133 : vector<1x1xf32> to vector<1x8xf32>
    %135 = arith.addf %132, %134 : vector<1x8xf32>
    %cst_50 = arith.constant 0.000000e+00 : f32
    %136 = vector.broadcast %cst_50 : f32 to vector<1x8xf32>
    %137 = arith.subf %136, %135 : vector<1x8xf32>
    %138 = math.exp %137 : vector<1x8xf32>
    %cst_51 = arith.constant 1.000000e+00 : f32
    %139 = vector.broadcast %cst_51 : f32 to vector<1x8xf32>
    %140 = arith.addf %139, %138 : vector<1x8xf32>
    %cst_52 = arith.constant 1.000000e+00 : f32
    %141 = vector.broadcast %cst_52 : f32 to vector<1x8xf32>
    %142 = arith.divf %141, %140 : vector<1x8xf32>
    %c0_53 = arith.constant 0 : index
    %c0_54 = arith.constant 0 : index
    %143 = vector.load %arg11[%c0_53, %c0_54] : memref<1x8xf32, #tpu.memory_space<vmem>>, vector<1x8xf32>
    tpu.vector_store %arg11[%c0_53, %c0_54], %142 {strides = array<i32>} : memref<1x8xf32, #tpu.memory_space<vmem>>, vector<1x8xf32>,
    return
  }
  func.func @transform_0(%arg0: i32, %arg1: memref<1xi32, #tpu.memory_space<smem>>) -> (i32, i32) {
    %c0_i32 = arith.constant 0 : i32
    %c0_i32_0 = arith.constant 0 : i32
    return %arg0, %c0_i32 : i32, i32
  }
  func.func @transform_1(%arg0: i32, %arg1: memref<1xi32, #tpu.memory_space<smem>>) -> (i32, i32) {
    %c0_i32 = arith.constant 0 : i32
    %c0_i32_0 = arith.constant 0 : i32
    %c0_i32_1 = arith.constant 0 : i32
    return %c0_i32, %c0_i32_0 : i32, i32
  }
  func.func @transform_2(%arg0: i32, %arg1: memref<1xi32, #tpu.memory_space<smem>>) -> (i32, i32) {
    %c0_i32 = arith.constant 0 : i32
    %c0_i32_0 = arith.constant 0 : i32
    %c0_i32_1 = arith.constant 0 : i32
    return %c0_i32, %c0_i32_0 : i32, i32
  }
  func.func @transform_3(%arg0: i32, %arg1: memref<1xi32, #tpu.memory_space<smem>>) -> (i32, i32) {
    %c0_i32 = arith.constant 0 : i32
    %c0_i32_0 = arith.constant 0 : i32
    %c0_i32_1 = arith.constant 0 : i32
    return %c0_i32, %c0_i32_0 : i32, i32
  }
  func.func @transform_4(%arg0: i32, %arg1: memref<1xi32, #tpu.memory_space<smem>>) -> (i32, i32) {
    %c0_i32 = arith.constant 0 : i32
    %c0_i32_0 = arith.constant 0 : i32
    %c0_i32_1 = arith.constant 0 : i32
    return %c0_i32, %c0_i32_0 : i32, i32
  }
  func.func @transform_5(%arg0: i32, %arg1: memref<1xi32, #tpu.memory_space<smem>>) -> (i32, i32) {
    %c0_i32 = arith.constant 0 : i32
    %c0_i32_0 = arith.constant 0 : i32
    %c0_i32_1 = arith.constant 0 : i32
    return %c0_i32, %c0_i32_0 : i32, i32
  }
  func.func @transform_6(%arg0: i32, %arg1: memref<1xi32, #tpu.memory_space<smem>>) -> (i32, i32) {
    %c0_i32 = arith.constant 0 : i32
    %c0_i32_0 = arith.constant 0 : i32
    %c0_i32_1 = arith.constant 0 : i32
    return %c0_i32, %c0_i32_0 : i32, i32
  }
  func.func @transform_7(%arg0: i32, %arg1: memref<1xi32, #tpu.memory_space<smem>>) -> (i32, i32) {
    %c0_i32 = arith.constant 0 : i32
    %c0_i32_0 = arith.constant 0 : i32
    %c0_i32_1 = arith.constant 0 : i32
    return %c0_i32, %c0_i32_0 : i32, i32
  }
  func.func @transform_8(%arg0: i32, %arg1: memref<1xi32, #tpu.memory_space<smem>>) -> (i32, i32) {
    %c0_i32 = arith.constant 0 : i32
    %c0_i32_0 = arith.constant 0 : i32
    %c0_i32_1 = arith.constant 0 : i32
    return %c0_i32, %c0_i32_0 : i32, i32
  }
  func.func @transform_9(%arg0: i32, %arg1: memref<1xi32, #tpu.memory_space<smem>>) -> (i32, i32) {
    %c0_i32 = arith.constant 0 : i32
    %c0_i32_0 = arith.constant 0 : i32
    return %c0_i32, %arg0 : i32, i32
  }
}

</mosaic_0001>

<bundles_post_ra>
// kernel: tpu_custom_call.1
= control target key start
LH: loop header
LB: loop body
LE: loop exit
PB: predicated region body
PF: predicated region fallthrough
CT: control target
= control target key end

     0   :  { %s11331_s0 = inlined_call_operand.<no memory space> [shape: s32[1], index: 0, kind: input, shape index: {}]   ;;  %s11332_s1 = inlined_call_operand.hbm [shape: f32[8,896], index: 1, kind: input, shape index: {}]   ;;  %s11333_s2 = inlined_call_operand.hbm [shape: bf16[896,1024], index: 2, kind: input, shape index: {}]   ;;  %s11334_s3 = inlined_call_operand.hbm [shape: f32[1,1024], index: 3, kind: input, shape index: {}]   ;;  %s11335_s4 = inlined_call_operand.hbm [shape: bf16[1024,512], index: 4, kind: input, shape index: {}]   ;;  %s11336_s5 = inlined_call_operand.hbm [shape: f32[1,512], index: 5, kind: input, shape index: {}]   ;;  %s11337_s6 = inlined_call_operand.hbm [shape: bf16[512,256], index: 6, kind: input, shape index: {}]   ;;  %s11338_s7 = inlined_call_operand.hbm [shape: f32[1,256], index: 7, kind: input, shape index: {}]   ;;  %s11339_s8 = inlined_call_operand.hbm [shape: bf16[1,256], index: 8, kind: input, shape index: {}]   ;;  %s11340_s9 = inlined_call_operand.<no memory space> [shape: f32[1,1], index: 9, kind: input, shape index: {}]   ;;  %s11341_s10 = inlined_call_operand.hbm [shape: f32[1,8], index: 10, kind: output, shape index: {}]  }
   0x1   :  { %v16_v0 = vstv %s11340_s9 }
   0x2   :  { %17 = vst [vmem:[#allocation4] sm:$0x1] %v16_v0 }
   0x3   :  { %18 = vsyncpa [#allocation6], 0 }
   0x4   :  { %19 = vsyncpa [#allocation9], 0 }
   0x5   :  { %20 = vsyncpa [#allocation12], 0 }
   0x6   :  { %21 = vsyncpa [#allocation15], 0 }
   0x7   :  { %22 = vsyncpa [#allocation18], 0  ;;  %s39_s17 = sshll.u32 %s11333_s2, 4  ;;  %s40_s17 = int_to_ptr.hbm [resolvable:$true] %s39_s17 }
   0x8   :  { %23 = vsyncpa [#allocation7], 0  ;;  %s10661_s18 = smov [#allocation8]   ;;  %s63_s22 = sshll.u32 %s11335_s4, 4  ;;  %s64_s22 = int_to_ptr.hbm [resolvable:$true] %s63_s22 }
   0x9   :  { %s41_s19 = sshll.u32 %s10661_s18, 4  ;;  %s10662_s9 = smov 512   ;;  %s42_s19 = int_to_ptr.vmem [resolvable:$true] %s41_s19 }
   0xa   :  { %s10663_s23 = smov 32   ;;  %s10664_s24 = smov [#allocation11]  }
   0xb   :  { %47 = dma.hbm_to_vmem [thread:$0]  %s40_s17, 57344, %s42_s19, [#allocation9], %s10662_s9, %s10662_s9, %s10663_s23  }
   0xc   :  { %s65_s25 = sshll.u32 %s10664_s24, 4  ;;  %s10665_s26 = smov 256   ;;  %s66_s25 = int_to_ptr.vmem [resolvable:$true] %s65_s25 }
   0xd   :  { %s10666_s27 = smov 16   ;;  %s87_s29 = sshll.u32 %s11337_s6, 4  ;;  %s88_s29 = int_to_ptr.hbm [resolvable:$true] %s87_s29 }
   0xe   :  { %71 = dma.hbm_to_vmem [thread:$0]  %s64_s22, 32768, %s66_s25, [#allocation12], %s10665_s26, %s10665_s26, %s10666_s27  }
   0xf   :  { %s10667_s30 = smov [#allocation14]   ;;  %s29_s13 = sshll.u32 %s11332_s1, 4  ;;  %s30_s13 = int_to_ptr.hbm [resolvable:$true] %s29_s13 }
  0x10   :  { %s89_s11 = sshll.u32 %s10667_s30, 4  ;;  %s10668_s14 = smov 128   ;;  %s90_s11 = int_to_ptr.vmem [resolvable:$true] %s89_s11 }
  0x11   :  { %s10669_s15 = smov 8   ;;  %s10670_s16 = smov [#allocation5]  }
  0x12   :  { %95 = dma.hbm_to_vmem [thread:$0]  %s88_s29, 8192, %s90_s11, [#allocation15], %s10668_s14, %s10668_s14, %s10669_s15  }
  0x13   :  { %s31_s17 = sshll.u32 %s10670_s16, 4  ;;  %s53_s20 = sshll.u32 %s11334_s3, 4  ;;  %s32_s17 = int_to_ptr.vmem [resolvable:$true] %s31_s17  ;;  %s54_s20 = int_to_ptr.hbm [resolvable:$true] %s53_s20 }
  0x14   :  { %34 = dma.hbm_to_vmem [thread:$0]  %s30_s13, 896, %s32_s17, [#allocation6]  }
  0x15   :  { %s77_s22 = sshll.u32 %s11336_s5, 4  ;;  %s10671_s9 = smov [#allocation10]   ;;  %s78_s22 = int_to_ptr.hbm [resolvable:$true] %s77_s22 }
  0x16   :  { %s55_s23 = sshll.u32 %s10671_s9, 4  ;;  %s10672_s1 = smov [#allocation13]   ;;  %s56_s23 = int_to_ptr.vmem [resolvable:$true] %s55_s23 }
  0x17   :  { %58 = dma.hbm_to_vmem [thread:$0]  %s54_s20, 128, %s56_s23, [#allocation9]  }
  0x18   :  { %s79_s24 = sshll.u32 %s10672_s1, 4  ;;  %s101_s27 = sshll.u32 %s11338_s7, 4  ;;  %s80_s24 = int_to_ptr.vmem [resolvable:$true] %s79_s24  ;;  %s102_s27 = int_to_ptr.hbm [resolvable:$true] %s101_s27 }
  0x19   :  { %82 = dma.hbm_to_vmem [thread:$0]  %s78_s22, 64, %s80_s24, [#allocation12]  }
  0x1a   :  { %s112_s28 = sshll.u32 %s11339_s8, 4  ;;  %s10673_s29 = smov [#allocation16]   ;;  %s113_s28 = int_to_ptr.hbm [resolvable:$true] %s112_s28 }
  0x1b   :  { %s103_s5 = sshll.u32 %s10673_s29, 4  ;;  %s10674_s30 = smov [#allocation17]   ;;  %s104_s5 = int_to_ptr.vmem [resolvable:$true] %s103_s5 }
  0x1c   :  { %106 = dma.hbm_to_vmem [thread:$0]  %s102_s27, 32, %s104_s5, [#allocation15]  }
  0x1d   :  { %s114_s11 = sshll.u32 %s10674_s30, 4  ;;  %s115_s11 = int_to_ptr.vmem [resolvable:$true] %s114_s11 }
  0x1e   :  { %117 = dma.hbm_to_vmem [thread:$0]  %s113_s28, 32, %s115_s11, [#allocation18]  }
  0x1f   :  { %10649 = dma.done.wait [#allocation6], 896  }
  0x20   :  { %10650 = vsyncadd [#allocation6], 4294966400 }
  0x21   :  { %10651 = dma.done.wait [#allocation9], 57472  }
  0x22   :  { %10652 = vsyncadd [#allocation9], 4294909824 }
  0x23   :  { %10653 = dma.done.wait [#allocation12], 32832  }
  0x24   :  { %10654 = vsyncadd [#allocation12], 4294934464 }
  0x25   :  { %10655 = dma.done.wait [#allocation15], 8224  }
  0x26   :  { %10656 = vsyncadd [#allocation15], 4294959072 }
  0x27   :  { %10657 = dma.done.wait [#allocation18], 32  }
  0x28   :  { %10658 = vsyncadd [#allocation18], 4294967264  ;;  %v6655_v1 = vld [vmem:[#allocation8 + $0x1c0] sm:$0xf]  ;;  %s3657_s12 = sadd.s32 2654435769, %s11331_s0 }
  0x29   :  { %v9701_v2 = vld [vmem:[#allocation8 + $0x1dc] sm:$0xf0]  ;;  %s5753_s14 = sadd.s32 1013904242, %s11331_s0  ;;  %s6315_s17 = sadd.s32 3668340011, %s11331_s0 }
  0x2a   :  { %v6911_v3 = vld [vmem:[#allocation8 + $0x3c0] sm:$0xf]  ;;  %v6656_v4 = vor.u32 %v9701_v2, %v6655_v1  ;;  %s10676_s0 = smov [#allocation19]   ;;  %s6415_s6 = sshll.u32 %s11341_s10, 4  ;;  %s6416_s6 = int_to_ptr.hbm [resolvable:$true] %s6415_s6 }
  0x2b   :  { %v9765_v5 = vld [vmem:[#allocation8 + $0x3dc] sm:$0xf0]  ;;  %s6413_s18 = sshll.u32 %s10676_s0, 4  ;;  %s6414_s18 = int_to_ptr.vmem [resolvable:$true] %s6413_s18 }
  0x2c   :  { %v7167_v6 = vld [vmem:[#allocation8 + $0x5c0] sm:$0xf]  ;;  %v6912_v8 = vor.u32 %v9765_v5, %v6911_v3  ;;  %2875 = vmatpush.bf16.msra.mxu0 %v6656_v4 }
  0x2d   :  { %v9829_v7 = vld [vmem:[#allocation8 + $0x5dc] sm:$0xf0] }
  0x2e   :  { %v7168_v9 = vor.u32 %v9829_v7, %v7167_v6  ;;  %v7423_v10 = vld [vmem:[#allocation8 + $0x7c0] sm:$0xf]  ;;  %2888 = vmatpush.bf16.msra.mxu1 %v6912_v8 }
  0x2f   :  { %v9893_v11 = vld [vmem:[#allocation8 + $0x7dc] sm:$0xf0] }
  0x30   :  { %v6623_v12 = vld [vmem:[#allocation8 + $0x180] sm:$0xf]  ;;  %v7424_v13 = vor.u32 %v9893_v11, %v7423_v10  ;;  %2901 = vmatpush.bf16.msra.mxu2 %v7168_v9 }
  0x31   :  { %v9693_v14 = vld [vmem:[#allocation8 + $0x19c] sm:$0xf0] }
  0x32   :  { %v6879_v15 = vld [vmem:[#allocation8 + $0x380] sm:$0xf]  ;;  %v6624_v17 = vor.u32 %v9693_v14, %v6623_v12  ;;  %2914 = vmatpush.bf16.msra.mxu3 %v7424_v13 }
  0x33   :  { %v9757_v16 = vld [vmem:[#allocation8 + $0x39c] sm:$0xf0] }
  0x34   :  { %v6880_v18 = vor.u32 %v9757_v16, %v6879_v15  ;;  %v7135_v19 = vld [vmem:[#allocation8 + $0x580] sm:$0xf]  ;;  %2876 = vmatpush.bf16.msra.mxu0 %v6624_v17 }
  0x35   :  { %v9821_v20 = vld [vmem:[#allocation8 + $0x59c] sm:$0xf0] }
  0x36   :  { %v7391_v21 = vld [vmem:[#allocation8 + $0x780] sm:$0xf]  ;;  %v7136_v22 = vor.u32 %v9821_v20, %v7135_v19  ;;  %2889 = vmatpush.bf16.msra.mxu1 %v6880_v18 }
  0x37   :  { %v9885_v23 = vld [vmem:[#allocation8 + $0x79c] sm:$0xf0] }
  0x38   :  { %v6591_v24 = vld [vmem:[#allocation8 + $0x140] sm:$0xf]  ;;  %v7392_v26 = vor.u32 %v9885_v23, %v7391_v21  ;;  %2902 = vmatpush.bf16.msra.mxu2 %v7136_v22 }
  0x39   :  { %v9685_v25 = vld [vmem:[#allocation8 + $0x15c] sm:$0xf0] }
  0x3a   :  { %v6847_v27 = vld [vmem:[#allocation8 + $0x340] sm:$0xf]  ;;  %v6592_v30 = vor.u32 %v9685_v25, %v6591_v24  ;;  %2915 = vmatpush.bf16.msra.mxu3 %v7392_v26 }
  0x3b   :  { %v9749_v28 = vld [vmem:[#allocation8 + $0x35c] sm:$0xf0] }
  0x3c   :  { %v7103_v29 = vld [vmem:[#allocation8 + $0x540] sm:$0xf]  ;;  %v6848_v34 = vor.u32 %v9749_v28, %v6847_v27  ;;  %2877 = vmatpush.bf16.msra.mxu0 %v6592_v30 }
  0x3d   :  { %v9813_v31 = vld [vmem:[#allocation8 + $0x55c] sm:$0xf0] }
  0x3e   :  { %v7359_v32 = vld [vmem:[#allocation8 + $0x740] sm:$0xf]  ;;  %v7104_v35 = vor.u32 %v9813_v31, %v7103_v29  ;;  %2890 = vmatpush.bf16.msra.mxu1 %v6848_v34 }
  0x3f   :  { %v9877_v33 = vld [vmem:[#allocation8 + $0x75c] sm:$0xf0] }
  0x40   :  { %v6559_v36 = vld [vmem:[#allocation8 + $0x100] sm:$0xf]  ;;  %v7360_v39 = vor.u32 %v9877_v33, %v7359_v32  ;;  %2903 = vmatpush.bf16.msra.mxu2 %v7104_v35 }
  0x41   :  { %v9677_v37 = vld [vmem:[#allocation8 + $0x11c] sm:$0xf0] }
  0x42   :  { %v6815_v38 = vld [vmem:[#allocation8 + $0x300] sm:$0xf]  ;;  %v6560_v45 = vor.u32 %v9677_v37, %v6559_v36  ;;  %2916 = vmatpush.bf16.msra.mxu3 %v7360_v39  ;;  %v6657_v39 = vld [vmem:[#allocation8 + $0x1e0] sm:$0xf0] }
  0x43   :  { %v9741_v40 = vld [vmem:[#allocation8 + $0x31c] sm:$0xf0] }
  0x44   :  { %v7071_v41 = vld [vmem:[#allocation8 + $0x500] sm:$0xf]  ;;  %v6816_v46 = vor.u32 %v9741_v40, %v6815_v38  ;;  %2878 = vmatpush.bf16.msra.mxu0 %v6560_v45  ;;  %v9697_v38 = vld [vmem:[#allocation8 + $0x1c4] sm:$0xf] }
  0x45   :  { %v9805_v42 = vld [vmem:[#allocation8 + $0x51c] sm:$0xf0] }
  0x46   :  { %v7327_v43 = vld [vmem:[#allocation8 + $0x700] sm:$0xf]  ;;  %v7072_v47 = vor.u32 %v9805_v42, %v7071_v41  ;;  %2891 = vmatpush.bf16.msra.mxu1 %v6816_v46 }
  0x47   :  { %v9869_v44 = vld [vmem:[#allocation8 + $0x71c] sm:$0xf0] }
  0x48   :  { %v6527_v48 = vld [vmem:[#allocation8 + $0xc0] sm:$0xf]  ;;  %v7328_v51 = vor.u32 %v9869_v44, %v7327_v43  ;;  %2904 = vmatpush.bf16.msra.mxu2 %v7072_v47  ;;  %v6660_v47 = vor.u32 %v9697_v38, %v6657_v39 }
  0x49   :  { %v9669_v49 = vld [vmem:[#allocation8 + $0xdc] sm:$0xf0] }
  0x4a   :  { %v6783_v50 = vld [vmem:[#allocation8 + $0x2c0] sm:$0xf]  ;;  %v6528_v57 = vor.u32 %v9669_v49, %v6527_v48  ;;  %2917 = vmatpush.bf16.msra.mxu3 %v7328_v51  ;;  %v9689_v51 = vld [vmem:[#allocation8 + $0x184] sm:$0xf] }
  0x4b   :  { %v9733_v52 = vld [vmem:[#allocation8 + $0x2dc] sm:$0xf0] }
  0x4c   :  { %v7039_v53 = vld [vmem:[#allocation8 + $0x4c0] sm:$0xf]  ;;  %v6784_v58 = vor.u32 %v9733_v52, %v6783_v50  ;;  %2879 = vmatpush.bf16.msra.mxu0 %v6528_v57  ;;  %v6625_v52 = vld [vmem:[#allocation8 + $0x1a0] sm:$0xf0] }
  0x4d   :  { %v9797_v54 = vld [vmem:[#allocation8 + $0x4dc] sm:$0xf0] }
  0x4e   :  { %v7295_v55 = vld [vmem:[#allocation8 + $0x6c0] sm:$0xf]  ;;  %v7040_v59 = vor.u32 %v9797_v54, %v7039_v53  ;;  %2892 = vmatpush.bf16.msra.mxu1 %v6784_v58 }
  0x4f   :  { %v9861_v56 = vld [vmem:[#allocation8 + $0x6dc] sm:$0xf0] }
  0x50   :  { %v6495_v60 = vld [vmem:[#allocation8 + $0x80] sm:$0xf]  ;;  %v7296_v63 = vor.u32 %v9861_v56, %v7295_v55  ;;  %2905 = vmatpush.bf16.msra.mxu2 %v7040_v59  ;;  %v157_v59 = vld [vmem:[#allocation5 + $0x10] sm:$0xff] }
  0x51   :  { %v9661_v61 = vld [vmem:[#allocation8 + $0x9c] sm:$0xf0] }
  0x52   :  { %v6751_v62 = vld [vmem:[#allocation8 + $0x280] sm:$0xf]  ;;  %v6496_v5 = vor.u32 %v9661_v61, %v6495_v60  ;;  %2918 = vmatpush.bf16.msra.mxu3 %v7296_v63  ;;  %v6628_v60 = vor.u32 %v9689_v51, %v6625_v52 }
  0x53   :  { %v9725_v0 = vld [vmem:[#allocation8 + $0x29c] sm:$0xf0] }
  0x54   :  { %v7007_v1 = vld [vmem:[#allocation8 + $0x480] sm:$0xf]  ;;  %v6752_v6 = vor.u32 %v9725_v0, %v6751_v62  ;;  %2880 = vmatpush.bf16.msra.mxu0 %v6496_v5  ;;  %v10759_v0 = vpack.c.bf16 %v157_v59, %v157_v59 }
  0x55   :  { %v9789_v2 = vld [vmem:[#allocation8 + $0x49c] sm:$0xf0] }
  0x56   :  { %v7263_v3 = vld [vmem:[#allocation8 + $0x680] sm:$0xf]  ;;  %v7008_v7 = vor.u32 %v9789_v2, %v7007_v1  ;;  %2893 = vmatpush.bf16.msra.mxu1 %v6752_v6  ;;  %v9681_v1 = vld [vmem:[#allocation8 + $0x144] sm:$0xf]  ;;  %v155_v6 = vld [vmem:[#allocation5] sm:$0xff] }
  0x57   :  { %v9853_v4 = vld [vmem:[#allocation8 + $0x69c] sm:$0xf0]  ;;  %v6593_v2 = vld [vmem:[#allocation8 + $0x160] sm:$0xf0] }
  0x58   :  { %v6463_v8 = vld [vmem:[#allocation8 + $0x40] sm:$0xf]  ;;  %v7264_v11 = vor.u32 %v9853_v4, %v7263_v3  ;;  %2906 = vmatpush.bf16.msra.mxu2 %v7008_v7 }
  0x59   :  { %v9653_v9 = vld [vmem:[#allocation8 + $0x5c] sm:$0xf0] }
  0x5a   :  { %v6719_v10 = vld [vmem:[#allocation8 + $0x240] sm:$0xf]  ;;  %v6464_v17 = vor.u32 %v9653_v9, %v6463_v8  ;;  %2919 = vmatpush.bf16.msra.mxu3 %v7264_v11  ;;  %v156_v11 = vld [vmem:[#allocation5 + $0x8] sm:$0xff] }
  0x5b   :  { %v9717_v12 = vld [vmem:[#allocation8 + $0x25c] sm:$0xf0] }
  0x5c   :  { %v6975_v13 = vld [vmem:[#allocation8 + $0x440] sm:$0xf]  ;;  %v6720_v20 = vor.u32 %v9717_v12, %v6719_v10  ;;  %2881 = vmatpush.bf16.msra.mxu0 %v6464_v17  ;;  %v10762_v10 = vpack.c.bf16 %v155_v6, %v155_v6  ;;  %v10764_v17 = vpack.c.bf16 %v156_v11, %v156_v11  ;;  %v9761_v6 = vld [vmem:[#allocation8 + $0x3c4] sm:$0xf] }
  0x5d   :  { %v9781_v14 = vld [vmem:[#allocation8 + $0x45c] sm:$0xf0]  ;;  %v7169_v11 = vld [vmem:[#allocation8 + $0x5e0] sm:$0xf0] }
  0x5e   :  { %v7231_v15 = vld [vmem:[#allocation8 + $0x640] sm:$0xf]  ;;  %v6976_v21 = vor.u32 %v9781_v14, %v6975_v13  ;;  %2894 = vmatpush.bf16.msra.mxu1 %v6720_v20  ;;  %v6596_v13 = vor.u32 %v9681_v1, %v6593_v2 }
  0x5f   :  { %v9845_v16 = vld [vmem:[#allocation8 + $0x65c] sm:$0xf0] }
  0x60   :  { %v6431_v18 = vld [vmem:[#allocation8] sm:$0xf]  ;;  %v7232_v25 = vor.u32 %v9845_v16, %v7231_v15  ;;  %2907 = vmatpush.bf16.msra.mxu2 %v6976_v21 }
  0x61   :  { %v9645_v19 = vld [vmem:[#allocation8 + $0x1c] sm:$0xf0] }
  0x62   :  { %v6687_v22 = vld [vmem:[#allocation8 + $0x200] sm:$0xf]  ;;  %v6432_v32 = vor.u32 %v9645_v19, %v6431_v18  ;;  %2920 = vmatpush.bf16.msra.mxu3 %v7232_v25  ;;  %v9673_v18 = vld [vmem:[#allocation8 + $0x104] sm:$0xf] }
  0x63   :  { %v9709_v23 = vld [vmem:[#allocation8 + $0x21c] sm:$0xf0]  ;;  %v6561_v19 = vld [vmem:[#allocation8 + $0x120] sm:$0xf0] }
  0x64   :  { %v6943_v24 = vld [vmem:[#allocation8 + $0x400] sm:$0xf]  ;;  %v6688_v36 = vor.u32 %v9709_v23, %v6687_v22  ;;  %2882 = vmatpush.bf16.msra.mxu0 %v6432_v32  ;;  %v6529_v32 = vld [vmem:[#allocation8 + $0xe0] sm:$0xf0] }
  0x65   :  { %v9773_v26 = vld [vmem:[#allocation8 + $0x41c] sm:$0xf0] }
  0x66   :  { %v7199_v27 = vld [vmem:[#allocation8 + $0x600] sm:$0xf]  ;;  %v6944_v37 = vor.u32 %v9773_v26, %v6943_v24  ;;  %2895 = vmatpush.bf16.msra.mxu1 %v6688_v36 }
  0x67   :  { %v9837_v28 = vld [vmem:[#allocation8 + $0x61c] sm:$0xf0]  ;;  %2883 = vmatmul.bf16.vlgmr.msra.gmra.mxu0 %v10762_v10 }
  0x68   :  { %v7679_v29 = vld [vmem:[#allocation8 + $0x9c0] sm:$0xf]  ;;  %v7200_v40 = vor.u32 %v9837_v28, %v7199_v27  ;;  %2908 = vmatpush.bf16.msra.mxu2 %v6944_v37  ;;  %v6564_v27 = vor.u32 %v9673_v18, %v6561_v19  ;;  %v7681_v18 = vld [vmem:[#allocation8 + $0x9e0] sm:$0xf0]  ;;  %v161_v19 = vld [vmem:[#allocation5 + $0x30] sm:$0xff] }
  0x69   :  { %v9957_v30 = vld [vmem:[#allocation8 + $0x9dc] sm:$0xf0]  ;;  %2896 = vmatmul.bf16.vlgmr.msra.gmra.mxu1 %v10764_v17 }
  0x6a   :  { %v7935_v31 = vld [vmem:[#allocation8 + $0xbc0] sm:$0xf]  ;;  %v7680_v41 = vor.u32 %v9957_v30, %v7679_v29  ;;  %2921 = vmatpush.bf16.msra.mxu3 %v7200_v40 }
  0x6b   :  { %v10021_v33 = vld [vmem:[#allocation8 + $0xbdc] sm:$0xf0]  ;;  %2909 = vmatmul.bf16.vlgmr.msra.gmra.mxu2 %v10759_v0 }
  0x6c   :  { %v8191_v34 = vld [vmem:[#allocation8 + $0xdc0] sm:$0xf]  ;;  %v7936_v42 = vor.u32 %v10021_v33, %v7935_v31  ;;  %2927 = vmatpush.bf16.msrb.mxu0 %v7680_v41  ;;  %v9665_v31 = vld [vmem:[#allocation8 + $0xc4] sm:$0xf] }
  0x6d   :  { %v10085_v35 = vld [vmem:[#allocation8 + $0xddc] sm:$0xf0]  ;;  %v6532_v39 = vor.u32 %v9665_v31, %v6529_v32  ;;  %v7137_v31 = vld [vmem:[#allocation8 + $0x5a0] sm:$0xf0] }
  0x6e   :  { %v8192_v43 = vor.u32 %v10085_v35, %v8191_v34  ;;  %v7647_v44 = vld [vmem:[#allocation8 + $0x980] sm:$0xf]  ;;  %2940 = vmatpush.bf16.msrb.mxu1 %v7936_v42  ;;  %2966 = vmatpush.bf16.msrb.mxu3 %v6660_v47  ;;  %v9881_v32 = vld [vmem:[#allocation8 + $0x784] sm:$0xf] }
  0x6f   :  { %v9949_v45 = vld [vmem:[#allocation8 + $0x99c] sm:$0xf0] }
  0x70   :  { %v7903_v46 = vld [vmem:[#allocation8 + $0xb80] sm:$0xf]  ;;  %v7648_v53 = vor.u32 %v9949_v45, %v7647_v44  ;;  %2953 = vmatpush.bf16.msrb.mxu2 %v8192_v43  ;;  %v9657_v43 = vld [vmem:[#allocation8 + $0x84] sm:$0xf] }
  0x71   :  { %v10013_v48 = vld [vmem:[#allocation8 + $0xb9c] sm:$0xf0]  ;;  %v6497_v44 = vld [vmem:[#allocation8 + $0xa0] sm:$0xf0] }
  0x72   :  { %v8159_v49 = vld [vmem:[#allocation8 + $0xd80] sm:$0xf]  ;;  %v7904_v55 = vor.u32 %v10013_v48, %v7903_v46  ;;  %2928 = vmatpush.bf16.msrb.mxu0 %v7648_v53  ;;  %2967 = vmatpush.bf16.msrb.mxu3 %v6628_v60  ;;  %v6500_v51 = vor.u32 %v9657_v43, %v6497_v44  ;;  %v6849_v43 = vld [vmem:[#allocation8 + $0x360] sm:$0xf0] }
  0x73   :  { %v10077_v50 = vld [vmem:[#allocation8 + $0xd9c] sm:$0xf0]  ;;  %v9809_v44 = vld [vmem:[#allocation8 + $0x544] sm:$0xf] }
  0x74   :  { %v7615_v54 = vld [vmem:[#allocation8 + $0x940] sm:$0xf]  ;;  %v8160_v56 = vor.u32 %v10077_v50, %v8159_v49  ;;  %2941 = vmatpush.bf16.msrb.mxu1 %v7904_v55  ;;  %v9649_v55 = vld [vmem:[#allocation8 + $0x44] sm:$0xf] }
  0x75   :  { %v9941_v57 = vld [vmem:[#allocation8 + $0x95c] sm:$0xf0] }
  0x76   :  { %v7871_v58 = vld [vmem:[#allocation8 + $0xb40] sm:$0xf]  ;;  %v7616_v3 = vor.u32 %v9941_v57, %v7615_v54  ;;  %2954 = vmatpush.bf16.msrb.mxu2 %v8160_v56  ;;  %2968 = vmatpush.bf16.msrb.mxu3 %v6596_v13  ;;  %v6465_v56 = vld [vmem:[#allocation8 + $0x60] sm:$0xf0] }
  0x77   :  { %v10005_v61 = vld [vmem:[#allocation8 + $0xb5c] sm:$0xf0]  ;;  %v6468_v2 = vor.u32 %v9649_v55, %v6465_v56  ;;  %v7425_v13 = vld [vmem:[#allocation8 + $0x7e0] sm:$0xf0] }
  0x78   :  { %v8127_v62 = vld [vmem:[#allocation8 + $0xd40] sm:$0xf]  ;;  %v7872_v7 = vor.u32 %v10005_v61, %v7871_v58  ;;  %2929 = vmatpush.bf16.msrb.mxu0 %v7616_v3  ;;  %v6817_v55 = vld [vmem:[#allocation8 + $0x320] sm:$0xf0] }
  0x79   :  { %v10069_v63 = vld [vmem:[#allocation8 + $0xd5c] sm:$0xf0]  ;;  %v9801_v56 = vld [vmem:[#allocation8 + $0x504] sm:$0xf] }
  0x7a   :  { %v7583_v4 = vld [vmem:[#allocation8 + $0x900] sm:$0xf]  ;;  %v8128_v8 = vor.u32 %v10069_v63, %v8127_v62  ;;  %2942 = vmatpush.bf16.msrb.mxu1 %v7872_v7  ;;  %2969 = vmatpush.bf16.msrb.mxu3 %v6564_v27  ;;  %v6913_v7 = vld [vmem:[#allocation8 + $0x3e0] sm:$0xf0] }
  0x7b   :  { %v9933_v5 = vld [vmem:[#allocation8 + $0x91c] sm:$0xf0]  ;;  %v9753_v27 = vld [vmem:[#allocation8 + $0x384] sm:$0xf] }
  0x7c   :  { %v7839_v9 = vld [vmem:[#allocation8 + $0xb00] sm:$0xf]  ;;  %v7584_v21 = vor.u32 %v9933_v5, %v7583_v4  ;;  %2955 = vmatpush.bf16.msrb.mxu2 %v8128_v8  ;;  %v9641_v4 = vld [vmem:[#allocation8 + $0x4] sm:$0xf] }
  0x7d   :  { %v158_v12 = vld [vmem:[#allocation5 + $0x18] sm:$0xff] }
  0x7e   :  { %v9997_v14 = vld [vmem:[#allocation8 + $0xb1c] sm:$0xf0]  ;;  %v10767_v20 = vpack.c.bf16 %v158_v12, %v158_v12  ;;  %2930 = vmatpush.bf16.msrb.mxu0 %v7584_v21  ;;  %2970 = vmatpush.bf16.msrb.mxu3 %v6532_v39  ;;  %v6433_v5 = vld [vmem:[#allocation8 + $0x20] sm:$0xf0] }
  0x7f   :  { %v8095_v15 = vld [vmem:[#allocation8 + $0xd00] sm:$0xf]  ;;  %v7840_v22 = vor.u32 %v9997_v14, %v7839_v9  ;;  %v9825_v8 = vld [vmem:[#allocation8 + $0x5c4] sm:$0xf]  ;;  %v6436_v21 = vor.u32 %v9641_v4, %v6433_v5 }
  0x80   :  { %v10061_v16 = vld [vmem:[#allocation8 + $0xd1c] sm:$0xf0]  ;;  %2922 = vmatmul.bf16.vlgmr.msra.gmra.mxu3 %v10767_v20  ;;  %v9889_v12 = vld [vmem:[#allocation8 + $0x7c4] sm:$0xf] }
  0x81   :  { %v8096_v23 = vor.u32 %v10061_v16, %v8095_v15  ;;  %v7551_v24 = vld [vmem:[#allocation8 + $0x8c0] sm:$0xf]  ;;  %2943 = vmatpush.bf16.msrb.mxu1 %v7840_v22  ;;  %v9953_v16 = vld [vmem:[#allocation8 + $0x9c4] sm:$0xf]  ;;  %v6916_v22 = vor.u32 %v9761_v6, %v6913_v7 }
  0x82   :  { %v9925_v25 = vld [vmem:[#allocation8 + $0x8dc] sm:$0xf0]  ;;  %2971 = vmatpush.bf16.msrb.mxu3 %v6500_v51  ;;  %v6785_v4 = vld [vmem:[#allocation8 + $0x2e0] sm:$0xf0] }
  0x83   :  { %v7807_v26 = vld [vmem:[#allocation8 + $0xac0] sm:$0xf]  ;;  %v7552_v33 = vor.u32 %v9925_v25, %v7551_v24  ;;  %2956 = vmatpush.bf16.msrb.mxu2 %v8096_v23  ;;  %v159_v23 = vld [vmem:[#allocation5 + $0x20] sm:$0xff]  ;;  %v160_v24 = vld [vmem:[#allocation5 + $0x28] sm:$0xff]  ;;  %v7172_v25 = vor.u32 %v9825_v8, %v7169_v11 }
  0x84   :  { %v9989_v28 = vld [vmem:[#allocation8 + $0xadc] sm:$0xf0]  ;;  %v9793_v5 = vld [vmem:[#allocation8 + $0x4c4] sm:$0xf] }
  0x85   :  { %v8063_v29 = vld [vmem:[#allocation8 + $0xcc0] sm:$0xf]  ;;  %v7808_v34 = vor.u32 %v9989_v28, %v7807_v26  ;;  %2931 = vmatpush.bf16.msrb.mxu0 %v7552_v33  ;;  %v7428_v26 = vor.u32 %v9889_v12, %v7425_v13  ;;  %v6881_v28 = vld [vmem:[#allocation8 + $0x3a0] sm:$0xf0] }
  0x86   :  { %v10053_v30 = vld [vmem:[#allocation8 + $0xcdc] sm:$0xf0]  ;;  %2972 = vmatpush.bf16.msrb.mxu3 %v6468_v2  ;;  %v7393_v33 = vld [vmem:[#allocation8 + $0x7a0] sm:$0xf0]  ;;  %v6884_v39 = vor.u32 %v9753_v27, %v6881_v28 }
  0x87   :  { %v8064_v35 = vor.u32 %v10053_v30, %v8063_v29  ;;  %v7519_v36 = vld [vmem:[#allocation8 + $0x880] sm:$0xf]  ;;  %2944 = vmatpush.bf16.msrb.mxu1 %v7808_v34  ;;  %v9817_v29 = vld [vmem:[#allocation8 + $0x584] sm:$0xf]  ;;  %v7684_v30 = vor.u32 %v9953_v16, %v7681_v18  ;;  %v10771_v34 = vpack.c.bf16 %v161_v19, %v161_v19 }
  0x88   :  { %v9917_v37 = vld [vmem:[#allocation8 + $0x89c] sm:$0xf0]  ;;  %v7041_v7 = vld [vmem:[#allocation8 + $0x4e0] sm:$0xf0] }
  0x89   :  { %v7775_v38 = vld [vmem:[#allocation8 + $0xa80] sm:$0xf]  ;;  %v7520_v45 = vor.u32 %v9917_v37, %v7519_v36  ;;  %2957 = vmatpush.bf16.msrb.mxu2 %v8064_v35  ;;  %v9945_v35 = vld [vmem:[#allocation8 + $0x984] sm:$0xf]  ;;  %v10773_v37 = vpack.c.bf16 %v159_v23, %v159_v23 }
  0x8a   :  { %v9981_v40 = vld [vmem:[#allocation8 + $0xa9c] sm:$0xf0]  ;;  %v7649_v36 = vld [vmem:[#allocation8 + $0x9a0] sm:$0xf0]  ;;  %2973 = vmatpush.bf16.msrb.mxu3 %v6436_v21 }
  0x8b   :  { %v8031_v41 = vld [vmem:[#allocation8 + $0xc80] sm:$0xf]  ;;  %v7776_v46 = vor.u32 %v9981_v40, %v7775_v38  ;;  %2932 = vmatpush.bf16.msrb.mxu0 %v7520_v45  ;;  %v10775_v38 = vpack.c.bf16 %v160_v24, %v160_v24  ;;  %v7140_v40 = vor.u32 %v9817_v29, %v7137_v31  ;;  %v7652_v45 = vor.u32 %v9945_v35, %v7649_v36  ;;  %v9857_v8 = vld [vmem:[#allocation8 + $0x6c4] sm:$0xf] }
  0x8c   :  { %v10045_v42 = vld [vmem:[#allocation8 + $0xc9c] sm:$0xf0]  ;;  %v9921_v11 = vld [vmem:[#allocation8 + $0x8c4] sm:$0xf] }
  0x8d   :  { %v8032_v47 = vor.u32 %v10045_v42, %v8031_v41  ;;  %v7487_v48 = vld [vmem:[#allocation8 + $0x840] sm:$0xf]  ;;  %2945 = vmatpush.bf16.msrb.mxu1 %v7776_v46  ;;  %v7396_v41 = vor.u32 %v9881_v32, %v7393_v33  ;;  %v9745_v42 = vld [vmem:[#allocation8 + $0x344] sm:$0xf] }
  0x8e   :  { %v9909_v49 = vld [vmem:[#allocation8 + $0x85c] sm:$0xf0]  ;;  %3018 = vmatpush.bf16.msra.mxu3 %v7684_v30  ;;  %v7105_v46 = vld [vmem:[#allocation8 + $0x560] sm:$0xf0]  ;;  %v6852_v51 = vor.u32 %v9745_v42, %v6849_v43 }
  0x8f   :  { %v7743_v50 = vld [vmem:[#allocation8 + $0xa40] sm:$0xf]  ;;  %v7488_v57 = vor.u32 %v9909_v49, %v7487_v48  ;;  %2958 = vmatpush.bf16.msrb.mxu2 %v8032_v47  ;;  %v9873_v47 = vld [vmem:[#allocation8 + $0x744] sm:$0xf] }
  0x90   :  { %v9973_v52 = vld [vmem:[#allocation8 + $0xa5c] sm:$0xf0]  ;;  %v7361_v48 = vld [vmem:[#allocation8 + $0x760] sm:$0xf0]  ;;  %2974 = vmatmul.bf16.vlgmr.msrb.gmra.mxu3 %v10762_v10 }
  0x91   :  { %v7999_v53 = vld [vmem:[#allocation8 + $0xc40] sm:$0xf]  ;;  %v7744_v60 = vor.u32 %v9973_v52, %v7743_v50  ;;  %2933 = vmatpush.bf16.msrb.mxu0 %v7488_v57  ;;  %v9937_v49 = vld [vmem:[#allocation8 + $0x944] sm:$0xf]  ;;  %v7108_v52 = vor.u32 %v9809_v44, %v7105_v46 }
  0x92   :  { %v10037_v54 = vld [vmem:[#allocation8 + $0xc5c] sm:$0xf0]  ;;  %v7617_v50 = vld [vmem:[#allocation8 + $0x960] sm:$0xf0]  ;;  %3019 = vmatpush.bf16.msra.mxu3 %v7652_v45 }
  0x93   :  { %v7455_v58 = vld [vmem:[#allocation8 + $0x800] sm:$0xf]  ;;  %v8000_v61 = vor.u32 %v10037_v54, %v7999_v53  ;;  %2946 = vmatpush.bf16.msrb.mxu1 %v7744_v60  ;;  %v7364_v53 = vor.u32 %v9873_v47, %v7361_v48  ;;  %v9737_v54 = vld [vmem:[#allocation8 + $0x304] sm:$0xf]  ;;  %v7620_v57 = vor.u32 %v9937_v49, %v7617_v50 }
  0x94   :  { %v9901_v59 = vld [vmem:[#allocation8 + $0x81c] sm:$0xf0]  ;;  %v7329_v60 = vld [vmem:[#allocation8 + $0x720] sm:$0xf0] }
  0x95   :  { %v7711_v62 = vld [vmem:[#allocation8 + $0xa00] sm:$0xf]  ;;  %v7456_v9 = vor.u32 %v9901_v59, %v7455_v58  ;;  %2959 = vmatpush.bf16.msrb.mxu2 %v8000_v61  ;;  %v7073_v58 = vld [vmem:[#allocation8 + $0x520] sm:$0xf0] }
  0x96   :  { %v9965_v63 = vld [vmem:[#allocation8 + $0xa1c] sm:$0xf0]  ;;  %v9865_v59 = vld [vmem:[#allocation8 + $0x704] sm:$0xf]  ;;  %3020 = vmatpush.bf16.msra.mxu3 %v7620_v57 }
  0x97   :  { %v7967_v1 = vld [vmem:[#allocation8 + $0xc00] sm:$0xf]  ;;  %v7712_v14 = vor.u32 %v9965_v63, %v7711_v62  ;;  %2934 = vmatpush.bf16.msrb.mxu0 %v7456_v9  ;;  %v9929_v61 = vld [vmem:[#allocation8 + $0x904] sm:$0xf]  ;;  %v6820_v63 = vor.u32 %v9737_v54, %v6817_v55  ;;  %v7332_v2 = vor.u32 %v9865_v59, %v7329_v60  ;;  %v6663_v59 = vld [vmem:[#allocation8 + $0x1c8] sm:$0xf] }
  0x98   :  { %v10029_v3 = vld [vmem:[#allocation8 + $0xc1c] sm:$0xf0]  ;;  %v7585_v62 = vld [vmem:[#allocation8 + $0x920] sm:$0xf0]  ;;  %v9702_v60 = vld [vmem:[#allocation8 + $0x1e4] sm:$0xf0] }
  0x99   :  { %v7968_v15 = vor.u32 %v10029_v3, %v7967_v1  ;;  %2947 = vmatpush.bf16.msrb.mxu1 %v7712_v14  ;;  %v7076_v1 = vor.u32 %v9801_v56, %v7073_v58  ;;  %v9729_v3 = vld [vmem:[#allocation8 + $0x2c4] sm:$0xf]  ;;  %v7588_v6 = vor.u32 %v9929_v61, %v7585_v62  ;;  %v7044_v14 = vor.u32 %v9793_v5, %v7041_v7 }
  0x9a   :  { %2935 = vmatmul.bf16.vlgmr.msrb.gmra.mxu0 %v10773_v37  ;;  %v7297_v9 = vld [vmem:[#allocation8 + $0x6e0] sm:$0xf0]  ;;  %v6788_v13 = vor.u32 %v9729_v3, %v6785_v4  ;;  %v6664_v5 = vor.u32 %v9702_v60, %v6663_v59 }
  0x9b   :  { %2960 = vmatpush.bf16.msrb.mxu2 %v7968_v15  ;;  %2979 = vmatpush.bf16.msra.mxu0 %v6916_v22  ;;  %v7553_v12 = vld [vmem:[#allocation8 + $0x8e0] sm:$0xf0]  ;;  %v7300_v15 = vor.u32 %v9857_v8, %v7297_v9 }
  0x9c   :  { %2948 = vmatmul.bf16.vlgmr.msrb.gmra.mxu1 %v10775_v38  ;;  %v9721_v16 = vld [vmem:[#allocation8 + $0x284] sm:$0xf]  ;;  %3021 = vmatpush.bf16.msra.mxu3 %v7588_v6  ;;  %v7556_v21 = vor.u32 %v9921_v11, %v7553_v12  ;;  %v6631_v12 = vld [vmem:[#allocation8 + $0x188] sm:$0xf] }
  0x9d   :  { %2992 = vmatpush.bf16.msra.mxu1 %v7172_v25  ;;  %v6753_v18 = vld [vmem:[#allocation8 + $0x2a0] sm:$0xf0] }
  0x9e   :  { %2961 = vmatmul.bf16.vlgmr.msrb.gmra.mxu2 %v10771_v34  ;;  %v9785_v19 = vld [vmem:[#allocation8 + $0x484] sm:$0xf]  ;;  %v6756_v27 = vor.u32 %v9721_v16, %v6753_v18 }
  0x9f   :  { %3005 = vmatpush.bf16.msra.mxu2 %v7428_v26  ;;  %2980 = vmatpush.bf16.msra.mxu0 %v6884_v39  ;;  %v7009_v22 = vld [vmem:[#allocation8 + $0x4a0] sm:$0xf0] }
  0xa0   :  { %v9849_v23 = vld [vmem:[#allocation8 + $0x684] sm:$0xf]  ;;  %v7012_v28 = vor.u32 %v9785_v19, %v7009_v22  ;;  %3022 = vmatpush.bf16.msra.mxu3 %v7556_v21 }
  0xa1   :  { %2993 = vmatpush.bf16.msra.mxu1 %v7140_v40  ;;  %v7265_v24 = vld [vmem:[#allocation8 + $0x6a0] sm:$0xf0] }
  0xa2   :  { %v9913_v25 = vld [vmem:[#allocation8 + $0x884] sm:$0xf]  ;;  %v7268_v29 = vor.u32 %v9849_v23, %v7265_v24 }
  0xa3   :  { %3006 = vmatpush.bf16.msra.mxu2 %v7396_v41  ;;  %2981 = vmatpush.bf16.msra.mxu0 %v6852_v51  ;;  %v7521_v26 = vld [vmem:[#allocation8 + $0x8a0] sm:$0xf0] }
  0xa4   :  { %v9713_v30 = vld [vmem:[#allocation8 + $0x244] sm:$0xf]  ;;  %v7524_v33 = vor.u32 %v9913_v25, %v7521_v26  ;;  %v6599_v26 = vld [vmem:[#allocation8 + $0x148] sm:$0xf] }
  0xa5   :  { %2994 = vmatpush.bf16.msra.mxu1 %v7108_v52  ;;  %v6721_v31 = vld [vmem:[#allocation8 + $0x260] sm:$0xf0] }
  0xa6   :  { %v9777_v32 = vld [vmem:[#allocation8 + $0x444] sm:$0xf]  ;;  %v6724_v42 = vor.u32 %v9713_v30, %v6721_v31  ;;  %3023 = vmatpush.bf16.msra.mxu3 %v7524_v33 }
  0xa7   :  { %3007 = vmatpush.bf16.msra.mxu2 %v7364_v53  ;;  %2982 = vmatpush.bf16.msra.mxu0 %v6820_v63  ;;  %v6977_v35 = vld [vmem:[#allocation8 + $0x460] sm:$0xf0]  ;;  %v6919_v63 = vld [vmem:[#allocation8 + $0x3c8] sm:$0xf] }
  0xa8   :  { %v9841_v36 = vld [vmem:[#allocation8 + $0x644] sm:$0xf]  ;;  %v6980_v45 = vor.u32 %v9777_v32, %v6977_v35 }
  0xa9   :  { %2995 = vmatpush.bf16.msra.mxu1 %v7076_v1  ;;  %v7233_v39 = vld [vmem:[#allocation8 + $0x660] sm:$0xf0]  ;;  %v9766_v1 = vld [vmem:[#allocation8 + $0x3e4] sm:$0xf0] }
  0xaa   :  { %v9905_v40 = vld [vmem:[#allocation8 + $0x844] sm:$0xf]  ;;  %v7236_v46 = vor.u32 %v9841_v36, %v7233_v39  ;;  %v6920_v9 = vor.u32 %v9766_v1, %v6919_v63 }
  0xab   :  { %3008 = vmatpush.bf16.msra.mxu2 %v7332_v2  ;;  %2983 = vmatpush.bf16.msra.mxu0 %v6788_v13  ;;  %v7489_v41 = vld [vmem:[#allocation8 + $0x860] sm:$0xf0]  ;;  %v9694_v13 = vld [vmem:[#allocation8 + $0x1a4] sm:$0xf0] }
  0xac   :  { %v9705_v43 = vld [vmem:[#allocation8 + $0x204] sm:$0xf]  ;;  %v7492_v50 = vor.u32 %v9905_v40, %v7489_v41  ;;  %v6632_v19 = vor.u32 %v9694_v13, %v6631_v12  ;;  %v6567_v41 = vld [vmem:[#allocation8 + $0x108] sm:$0xf] }
  0xad   :  { %2996 = vmatpush.bf16.msra.mxu1 %v7044_v14  ;;  %v6689_v44 = vld [vmem:[#allocation8 + $0x220] sm:$0xf0]  ;;  %v6887_v14 = vld [vmem:[#allocation8 + $0x388] sm:$0xf] }
  0xae   :  { %v9769_v47 = vld [vmem:[#allocation8 + $0x404] sm:$0xf]  ;;  %v6692_v57 = vor.u32 %v9705_v43, %v6689_v44  ;;  %3024 = vmatpush.bf16.msra.mxu3 %v7492_v50  ;;  %v6823_v43 = vld [vmem:[#allocation8 + $0x308] sm:$0xf] }
  0xaf   :  { %3009 = vmatpush.bf16.msra.mxu2 %v7300_v15  ;;  %2984 = vmatpush.bf16.msra.mxu0 %v6756_v27  ;;  %v6945_v48 = vld [vmem:[#allocation8 + $0x420] sm:$0xf0]  ;;  %v9758_v15 = vld [vmem:[#allocation8 + $0x3a4] sm:$0xf0] }
  0xb0   :  { %v9833_v49 = vld [vmem:[#allocation8 + $0x604] sm:$0xf]  ;;  %v6948_v61 = vor.u32 %v9769_v47, %v6945_v48  ;;  %v6888_v24 = vor.u32 %v9758_v15, %v6887_v14  ;;  %v9686_v27 = vld [vmem:[#allocation8 + $0x164] sm:$0xf0] }
  0xb1   :  { %2997 = vmatpush.bf16.msra.mxu1 %v7012_v28  ;;  %v7201_v51 = vld [vmem:[#allocation8 + $0x620] sm:$0xf0]  ;;  %v6855_v28 = vld [vmem:[#allocation8 + $0x348] sm:$0xf]  ;;  %v6600_v32 = vor.u32 %v9686_v27, %v6599_v26 }
  0xb2   :  { %v9897_v52 = vld [vmem:[#allocation8 + $0x804] sm:$0xf]  ;;  %v7204_v62 = vor.u32 %v9833_v49, %v7201_v51  ;;  %v9742_v44 = vld [vmem:[#allocation8 + $0x324] sm:$0xf0] }
  0xb3   :  { %3010 = vmatpush.bf16.msra.mxu2 %v7268_v29  ;;  %v7457_v53 = vld [vmem:[#allocation8 + $0x820] sm:$0xf0]  ;;  %2985 = vmatpush.bf16.msra.mxu0 %v6724_v42  ;;  %v9750_v29 = vld [vmem:[#allocation8 + $0x364] sm:$0xf0]  ;;  %v6824_v51 = vor.u32 %v9742_v44, %v6823_v43 }
  0xb4   :  { %v10017_v54 = vld [vmem:[#allocation8 + $0xbc4] sm:$0xf]  ;;  %v7460_v2 = vor.u32 %v9897_v52, %v7457_v53  ;;  %v6856_v39 = vor.u32 %v9750_v29, %v6855_v28  ;;  %v9678_v42 = vld [vmem:[#allocation8 + $0x124] sm:$0xf0] }
  0xb5   :  { %v7937_v55 = vld [vmem:[#allocation8 + $0xbe0] sm:$0xf0]  ;;  %2998 = vmatpush.bf16.msra.mxu1 %v6980_v45  ;;  %v6568_v47 = vor.u32 %v9678_v42, %v6567_v41  ;;  %v6535_v53 = vld [vmem:[#allocation8 + $0xc8] sm:$0xf] }
  0xb6   :  { %v10081_v56 = vld [vmem:[#allocation8 + $0xdc4] sm:$0xf]  ;;  %v7940_v3 = vor.u32 %v10017_v54, %v7937_v55  ;;  %3025 = vmatpush.bf16.msra.mxu3 %v7460_v2  ;;  %v9670_v54 = vld [vmem:[#allocation8 + $0xe4] sm:$0xf0] }
  0xb7   :  { %v8193_v58 = vld [vmem:[#allocation8 + $0xde0] sm:$0xf0]  ;;  %3011 = vmatpush.bf16.msra.mxu2 %v7236_v46  ;;  %2986 = vmatpush.bf16.msra.mxu0 %v6692_v57  ;;  %v6791_v55 = vld [vmem:[#allocation8 + $0x2c8] sm:$0xf]  ;;  %v6536_v59 = vor.u32 %v9670_v54, %v6535_v53 }
  0xb8   :  { %v8196_v4 = vor.u32 %v10081_v56, %v8193_v58  ;;  %v10009_v6 = vld [vmem:[#allocation8 + $0xb84] sm:$0xf]  ;;  %v9734_v56 = vld [vmem:[#allocation8 + $0x2e4] sm:$0xf0] }
  0xb9   :  { %v7905_v7 = vld [vmem:[#allocation8 + $0xba0] sm:$0xf0]  ;;  %2999 = vmatpush.bf16.msra.mxu1 %v6948_v61  ;;  %3026 = vmatmul.bf16.vlgmr.msra.gmra.mxu3 %v10773_v37  ;;  %v6792_v63 = vor.u32 %v9734_v56, %v6791_v55  ;;  %v6503_v2 = vld [vmem:[#allocation8 + $0x88] sm:$0xf] }
  0xba   :  { %v10073_v8 = vld [vmem:[#allocation8 + $0xd84] sm:$0xf]  ;;  %v7908_v16 = vor.u32 %v10009_v6, %v7905_v7  ;;  %3070 = vmatpush.bf16.msrb.mxu3 %v6920_v9  ;;  %2987 = vmatmul.bf16.vlgmr.msra.gmra.mxu0 %v10764_v17  ;;  %v6471_v15 = vld [vmem:[#allocation8 + $0x48] sm:$0xf] }
  0xbb   :  { %v8161_v11 = vld [vmem:[#allocation8 + $0xda0] sm:$0xf0]  ;;  %3012 = vmatpush.bf16.msra.mxu2 %v7204_v62  ;;  %3031 = vmatpush.bf16.msrb.mxu0 %v7940_v3  ;;  %v9662_v3 = vld [vmem:[#allocation8 + $0xa4] sm:$0xf0] }
  0xbc   :  { %v8164_v18 = vor.u32 %v10073_v8, %v8161_v11  ;;  %v10001_v21 = vld [vmem:[#allocation8 + $0xb44] sm:$0xf]  ;;  %3000 = vmatmul.bf16.vlgmr.msra.gmra.mxu1 %v10759_v0  ;;  %v6504_v8 = vor.u32 %v9662_v3, %v6503_v2  ;;  %v6439_v28 = vld [vmem:[#allocation8 + $0x8] sm:$0xf] }
  0xbd   :  { %3044 = vmatpush.bf16.msrb.mxu1 %v8196_v4  ;;  %v7873_v22 = vld [vmem:[#allocation8 + $0xb60] sm:$0xf0]  ;;  %v6759_v4 = vld [vmem:[#allocation8 + $0x288] sm:$0xf] }
  0xbe   :  { %v10065_v23 = vld [vmem:[#allocation8 + $0xd44] sm:$0xf]  ;;  %3013 = vmatmul.bf16.vlgmr.msra.gmra.mxu2 %v10767_v20  ;;  %v7876_v30 = vor.u32 %v10001_v21, %v7873_v22  ;;  %3071 = vmatpush.bf16.msrb.mxu3 %v6888_v24  ;;  %v7687_v41 = vld [vmem:[#allocation8 + $0x9c8] sm:$0xf] }
  0xbf   :  { %3057 = vmatpush.bf16.msrb.mxu2 %v6664_v5  ;;  %v8129_v25 = vld [vmem:[#allocation8 + $0xd60] sm:$0xf0]  ;;  %3032 = vmatpush.bf16.msrb.mxu0 %v7908_v16  ;;  %v9726_v5 = vld [vmem:[#allocation8 + $0x2a4] sm:$0xf0] }
  0xc0   :  { %v8132_v31 = vor.u32 %v10065_v23, %v8129_v25  ;;  %v9993_v33 = vld [vmem:[#allocation8 + $0xb04] sm:$0xf]  ;;  %v6760_v13 = vor.u32 %v9726_v5, %v6759_v4  ;;  %v9654_v16 = vld [vmem:[#allocation8 + $0x64] sm:$0xf0] }
  0xc1   :  { %3045 = vmatpush.bf16.msrb.mxu1 %v8164_v18  ;;  %v7841_v35 = vld [vmem:[#allocation8 + $0xb20] sm:$0xf0]  ;;  %v6727_v18 = vld [vmem:[#allocation8 + $0x248] sm:$0xf]  ;;  %v6472_v25 = vor.u32 %v9654_v16, %v6471_v15 }
  0xc2   :  { %v10057_v36 = vld [vmem:[#allocation8 + $0xd04] sm:$0xf]  ;;  %v7844_v45 = vor.u32 %v9993_v33, %v7841_v35  ;;  %3072 = vmatpush.bf16.msrb.mxu3 %v6856_v39  ;;  %v7175_v33 = vld [vmem:[#allocation8 + $0x5c8] sm:$0xf] }
  0xc3   :  { %3058 = vmatpush.bf16.msrb.mxu2 %v6632_v19  ;;  %v8097_v40 = vld [vmem:[#allocation8 + $0xd20] sm:$0xf0]  ;;  %3033 = vmatpush.bf16.msrb.mxu0 %v7876_v30  ;;  %v9718_v19 = vld [vmem:[#allocation8 + $0x264] sm:$0xf0] }
  0xc4   :  { %v8100_v46 = vor.u32 %v10057_v36, %v8097_v40  ;;  %v9985_v48 = vld [vmem:[#allocation8 + $0xac4] sm:$0xf]  ;;  %v6728_v29 = vor.u32 %v9718_v19, %v6727_v18  ;;  %v9646_v30 = vld [vmem:[#allocation8 + $0x24] sm:$0xf0] }
  0xc5   :  { %3046 = vmatpush.bf16.msrb.mxu1 %v8132_v31  ;;  %v7809_v49 = vld [vmem:[#allocation8 + $0xae0] sm:$0xf0]  ;;  %v6695_v31 = vld [vmem:[#allocation8 + $0x208] sm:$0xf]  ;;  %v6440_v44 = vor.u32 %v9646_v30, %v6439_v28 }
  0xc6   :  { %v10049_v50 = vld [vmem:[#allocation8 + $0xcc4] sm:$0xf]  ;;  %v7812_v57 = vor.u32 %v9985_v48, %v7809_v49  ;;  %3073 = vmatpush.bf16.msrb.mxu3 %v6824_v51  ;;  %v9830_v35 = vld [vmem:[#allocation8 + $0x5e4] sm:$0xf0] }
  0xc7   :  { %3059 = vmatpush.bf16.msrb.mxu2 %v6600_v32  ;;  %v8065_v52 = vld [vmem:[#allocation8 + $0xce0] sm:$0xf0]  ;;  %3034 = vmatpush.bf16.msrb.mxu0 %v7844_v45  ;;  %v9710_v32 = vld [vmem:[#allocation8 + $0x224] sm:$0xf0]  ;;  %v7176_v48 = vor.u32 %v9830_v35, %v7175_v33 }
  0xc8   :  { %v8068_v58 = vor.u32 %v10049_v50, %v8065_v52  ;;  %v9977_v60 = vld [vmem:[#allocation8 + $0xa84] sm:$0xf]  ;;  %v7431_v36 = vld [vmem:[#allocation8 + $0x7c8] sm:$0xf] }
  0xc9   :  { %3047 = vmatpush.bf16.msrb.mxu1 %v8100_v46  ;;  %v7777_v61 = vld [vmem:[#allocation8 + $0xaa0] sm:$0xf0]  ;;  %v9894_v40 = vld [vmem:[#allocation8 + $0x7e4] sm:$0xf0] }
  0xca   :  { %v10041_v62 = vld [vmem:[#allocation8 + $0xc84] sm:$0xf]  ;;  %v7780_v6 = vor.u32 %v9977_v60, %v7777_v61  ;;  %3074 = vmatpush.bf16.msrb.mxu3 %v6792_v63  ;;  %v9958_v42 = vld [vmem:[#allocation8 + $0x9e4] sm:$0xf0]  ;;  %v7432_v49 = vor.u32 %v9894_v40, %v7431_v36 }
  0xcb   :  { %3060 = vmatpush.bf16.msrb.mxu2 %v6568_v47  ;;  %v8033_v1 = vld [vmem:[#allocation8 + $0xca0] sm:$0xf0]  ;;  %3035 = vmatpush.bf16.msrb.mxu0 %v7812_v57  ;;  %v7943_v45 = vld [vmem:[#allocation8 + $0xbc8] sm:$0xf]  ;;  %v6696_v47 = vor.u32 %v9710_v32, %v6695_v31  ;;  %v7688_v50 = vor.u32 %v9958_v42, %v7687_v41 }
  0xcc   :  { %v8036_v7 = vor.u32 %v10041_v62, %v8033_v1  ;;  %v9969_v9 = vld [vmem:[#allocation8 + $0xa44] sm:$0xf]  ;;  %v10022_v46 = vld [vmem:[#allocation8 + $0xbe4] sm:$0xf0] }
  0xcd   :  { %3048 = vmatpush.bf16.msrb.mxu1 %v8068_v58  ;;  %v7745_v11 = vld [vmem:[#allocation8 + $0xa60] sm:$0xf0]  ;;  %v7143_v51 = vld [vmem:[#allocation8 + $0x588] sm:$0xf]  ;;  %v7944_v54 = vor.u32 %v10022_v46, %v7943_v45 }
  0xce   :  { %v10033_v12 = vld [vmem:[#allocation8 + $0xc44] sm:$0xf]  ;;  %v7748_v21 = vor.u32 %v9969_v9, %v7745_v11  ;;  %3075 = vmatpush.bf16.msrb.mxu3 %v6760_v13  ;;  %v9822_v52 = vld [vmem:[#allocation8 + $0x5a4] sm:$0xf0] }
  0xcf   :  { %3061 = vmatpush.bf16.msrb.mxu2 %v6536_v59  ;;  %v8001_v14 = vld [vmem:[#allocation8 + $0xc60] sm:$0xf0]  ;;  %3036 = vmatpush.bf16.msrb.mxu0 %v7780_v6  ;;  %v7399_v53 = vld [vmem:[#allocation8 + $0x788] sm:$0xf]  ;;  %v7144_v60 = vor.u32 %v9822_v52, %v7143_v51 }
  0xd0   :  { %v9961_v22 = vld [vmem:[#allocation8 + $0xa04] sm:$0xf]  ;;  %v8004_v24 = vor.u32 %v10033_v12, %v8001_v14  ;;  %v9886_v55 = vld [vmem:[#allocation8 + $0x7a4] sm:$0xf0] }
  0xd1   :  { %v7713_v23 = vld [vmem:[#allocation8 + $0xa20] sm:$0xf0]  ;;  %3049 = vmatpush.bf16.msrb.mxu1 %v8036_v7  ;;  %v7655_v56 = vld [vmem:[#allocation8 + $0x988] sm:$0xf]  ;;  %v7400_v61 = vor.u32 %v9886_v55, %v7399_v53 }
  0xd2   :  { %v10025_v26 = vld [vmem:[#allocation8 + $0xc04] sm:$0xf]  ;;  %v7716_v39 = vor.u32 %v9961_v22, %v7713_v23  ;;  %3076 = vmatpush.bf16.msrb.mxu3 %v6728_v29  ;;  %v9950_v57 = vld [vmem:[#allocation8 + $0x9a4] sm:$0xf0] }
  0xd3   :  { %3062 = vmatpush.bf16.msrb.mxu2 %v6504_v8  ;;  %v7969_v27 = vld [vmem:[#allocation8 + $0xc20] sm:$0xf0]  ;;  %3037 = vmatpush.bf16.msrb.mxu0 %v7748_v21  ;;  %v7911_v58 = vld [vmem:[#allocation8 + $0xb88] sm:$0xf]  ;;  %v7656_v62 = vor.u32 %v9950_v57, %v7655_v56 }
  0xd4   :  { %v7972_v43 = vor.u32 %v10025_v26, %v7969_v27  ;;  %v10014_v59 = vld [vmem:[#allocation8 + $0xba4] sm:$0xf0] }
  0xd5   :  { %3050 = vmatpush.bf16.msrb.mxu1 %v8004_v24  ;;  %v7111_v63 = vld [vmem:[#allocation8 + $0x548] sm:$0xf]  ;;  %v7912_v3 = vor.u32 %v10014_v59, %v7911_v58 }
  0xd6   :  { %3077 = vmatpush.bf16.msrb.mxu3 %v6696_v47  ;;  %v9814_v1 = vld [vmem:[#allocation8 + $0x564] sm:$0xf0] }
  0xd7   :  { %3063 = vmatpush.bf16.msrb.mxu2 %v6472_v25  ;;  %3038 = vmatpush.bf16.msrb.mxu0 %v7716_v39  ;;  %v7367_v2 = vld [vmem:[#allocation8 + $0x748] sm:$0xf]  ;;  %v7112_v9 = vor.u32 %v9814_v1, %v7111_v63 }
  0xd8   :  { %v9878_v4 = vld [vmem:[#allocation8 + $0x764] sm:$0xf0] }
  0xd9   :  { %3051 = vmatpush.bf16.msrb.mxu1 %v7972_v43  ;;  %v7623_v5 = vld [vmem:[#allocation8 + $0x948] sm:$0xf]  ;;  %3078 = vmatmul.bf16.vlgmr.msrb.gmra.mxu3 %v10764_v17  ;;  %v7368_v11 = vor.u32 %v9878_v4, %v7367_v2 }
  0xda   :  { %3122 = vmatpush.bf16.msra.mxu3 %v7944_v54  ;;  %3039 = vmatmul.bf16.vlgmr.msrb.gmra.mxu0 %v10775_v38  ;;  %v9942_v6 = vld [vmem:[#allocation8 + $0x964] sm:$0xf0] }
  0xdb   :  { %3064 = vmatpush.bf16.msrb.mxu2 %v6440_v44  ;;  %3083 = vmatpush.bf16.msra.mxu0 %v7176_v48  ;;  %v7879_v7 = vld [vmem:[#allocation8 + $0xb48] sm:$0xf]  ;;  %v7624_v12 = vor.u32 %v9942_v6, %v7623_v5 }
  0xdc   :  { %3052 = vmatmul.bf16.vlgmr.msrb.gmra.mxu1 %v10771_v34  ;;  %v10006_v8 = vld [vmem:[#allocation8 + $0xb64] sm:$0xf0] }
  0xdd   :  { %3096 = vmatpush.bf16.msra.mxu1 %v7432_v49  ;;  %v7079_v13 = vld [vmem:[#allocation8 + $0x508] sm:$0xf]  ;;  %v7880_v16 = vor.u32 %v10006_v8, %v7879_v7 }
  0xde   :  { %3065 = vmatmul.bf16.vlgmr.msrb.gmra.mxu2 %v10762_v10  ;;  %v9806_v14 = vld [vmem:[#allocation8 + $0x524] sm:$0xf0]  ;;  %3123 = vmatpush.bf16.msra.mxu3 %v7912_v3 }
  0xdf   :  { %3109 = vmatpush.bf16.msra.mxu2 %v7688_v50  ;;  %3084 = vmatpush.bf16.msra.mxu0 %v7144_v60  ;;  %v7335_v15 = vld [vmem:[#allocation8 + $0x708] sm:$0xf]  ;;  %v7080_v24 = vor.u32 %v9806_v14, %v7079_v13 }
  0xe0   :  { %v9870_v18 = vld [vmem:[#allocation8 + $0x724] sm:$0xf0] }
  0xe1   :  { %3097 = vmatpush.bf16.msra.mxu1 %v7400_v61  ;;  %v7591_v19 = vld [vmem:[#allocation8 + $0x908] sm:$0xf]  ;;  %v7336_v25 = vor.u32 %v9870_v18, %v7335_v15  ;;  %v9698_v15 = vld [vmem:[#allocation8 + $0x1cc] sm:$0xf] }
  0xe2   :  { %v9934_v21 = vld [vmem:[#allocation8 + $0x924] sm:$0xf0]  ;;  %3124 = vmatpush.bf16.msra.mxu3 %v7880_v16  ;;  %v6665_v18 = vld [vmem:[#allocation8 + $0x1e8] sm:$0xf0] }
  0xe3   :  { %3110 = vmatpush.bf16.msra.mxu2 %v7656_v62  ;;  %v7847_v22 = vld [vmem:[#allocation8 + $0xb08] sm:$0xf]  ;;  %3085 = vmatpush.bf16.msra.mxu0 %v7112_v9  ;;  %v7592_v26 = vor.u32 %v9934_v21, %v7591_v19  ;;  %v9762_v19 = vld [vmem:[#allocation8 + $0x3cc] sm:$0xf] }
  0xe4   :  { %v9998_v23 = vld [vmem:[#allocation8 + $0xb24] sm:$0xf0]  ;;  %v6921_v21 = vld [vmem:[#allocation8 + $0x3e8] sm:$0xf0] }
  0xe5   :  { %3098 = vmatpush.bf16.msra.mxu1 %v7368_v11  ;;  %v7047_v27 = vld [vmem:[#allocation8 + $0x4c8] sm:$0xf]  ;;  %v7848_v30 = vor.u32 %v9998_v23, %v7847_v22 }
  0xe6   :  { %v9798_v28 = vld [vmem:[#allocation8 + $0x4e4] sm:$0xf0] }
  0xe7   :  { %3111 = vmatpush.bf16.msra.mxu2 %v7624_v12  ;;  %v7303_v29 = vld [vmem:[#allocation8 + $0x6c8] sm:$0xf]  ;;  %3086 = vmatpush.bf16.msra.mxu0 %v7080_v24  ;;  %v7048_v39 = vor.u32 %v9798_v28, %v7047_v27  ;;  %v9826_v24 = vld [vmem:[#allocation8 + $0x5cc] sm:$0xf]  ;;  %v6668_v28 = vor.u32 %v9698_v15, %v6665_v18 }
  0xe8   :  { %v9862_v31 = vld [vmem:[#allocation8 + $0x6e4] sm:$0xf0]  ;;  %3125 = vmatpush.bf16.msra.mxu3 %v7848_v30  ;;  %v6793_v15 = vld [vmem:[#allocation8 + $0x2e8] sm:$0xf0] }
  0xe9   :  { %v7559_v32 = vld [vmem:[#allocation8 + $0x8c8] sm:$0xf]  ;;  %3099 = vmatpush.bf16.msra.mxu1 %v7336_v25  ;;  %v7304_v40 = vor.u32 %v9862_v31, %v7303_v29  ;;  %v7177_v25 = vld [vmem:[#allocation8 + $0x5e8] sm:$0xf0]  ;;  %v6924_v29 = vor.u32 %v9762_v19, %v6921_v21  ;;  %v2884_v21 = vpop.f32.mrf.mxu0 }
  0xea   :  { %v9926_v33 = vld [vmem:[#allocation8 + $0x8e4] sm:$0xf0]  ;;  %v7049_v18 = vld [vmem:[#allocation8 + $0x4e8] sm:$0xf0] }
  0xeb   :  { %v7815_v35 = vld [vmem:[#allocation8 + $0xac8] sm:$0xf]  ;;  %3112 = vmatpush.bf16.msra.mxu2 %v7592_v26  ;;  %v7560_v41 = vor.u32 %v9926_v33, %v7559_v32  ;;  %3087 = vmatpush.bf16.msra.mxu0 %v7048_v39  ;;  %v9690_v32 = vld [vmem:[#allocation8 + $0x18c] sm:$0xf]  ;;  %v7180_v33 = vor.u32 %v9826_v24, %v7177_v25 }
  0xec   :  { %v9990_v36 = vld [vmem:[#allocation8 + $0xae4] sm:$0xf0]  ;;  %v6889_v39 = vld [vmem:[#allocation8 + $0x3a8] sm:$0xf0] }
  0xed   :  { %v7015_v42 = vld [vmem:[#allocation8 + $0x488] sm:$0xf]  ;;  %v7816_v45 = vor.u32 %v9990_v36, %v7815_v35  ;;  %3100 = vmatpush.bf16.msra.mxu1 %v7304_v40  ;;  %v6633_v35 = vld [vmem:[#allocation8 + $0x1a8] sm:$0xf0] }
  0xee   :  { %v9790_v43 = vld [vmem:[#allocation8 + $0x4a4] sm:$0xf0]  ;;  %v9754_v36 = vld [vmem:[#allocation8 + $0x38c] sm:$0xf] }
  0xef   :  { %v7271_v44 = vld [vmem:[#allocation8 + $0x688] sm:$0xf]  ;;  %v7016_v51 = vor.u32 %v9790_v43, %v7015_v42  ;;  %3113 = vmatpush.bf16.msra.mxu2 %v7560_v41  ;;  %3126 = vmatpush.bf16.msra.mxu3 %v7816_v45  ;;  %v9818_v40 = vld [vmem:[#allocation8 + $0x58c] sm:$0xf]  ;;  %v6636_v43 = vor.u32 %v9690_v32, %v6633_v35 }
  0xf0   :  { %v9854_v46 = vld [vmem:[#allocation8 + $0x6a4] sm:$0xf0]  ;;  %v7145_v41 = vld [vmem:[#allocation8 + $0x5a8] sm:$0xf0] }
  0xf1   :  { %v7527_v47 = vld [vmem:[#allocation8 + $0x888] sm:$0xf]  ;;  %v7272_v52 = vor.u32 %v9854_v46, %v7271_v44  ;;  %3088 = vmatpush.bf16.msra.mxu0 %v7016_v51  ;;  %v6892_v44 = vor.u32 %v9754_v36, %v6889_v39  ;;  %v6857_v51 = vld [vmem:[#allocation8 + $0x368] sm:$0xf0]  ;;  %v2910_v39 = vpop.f32.mrf.mxu2 }
  0xf2   :  { %v9918_v48 = vld [vmem:[#allocation8 + $0x8a4] sm:$0xf0]  ;;  %v6761_v32 = vld [vmem:[#allocation8 + $0x2a8] sm:$0xf0] }
  0xf3   :  { %v7783_v49 = vld [vmem:[#allocation8 + $0xa88] sm:$0xf]  ;;  %v7528_v53 = vor.u32 %v9918_v48, %v7527_v47  ;;  %3101 = vmatpush.bf16.msra.mxu1 %v7272_v52  ;;  %v9682_v47 = vld [vmem:[#allocation8 + $0x14c] sm:$0xf]  ;;  %v7148_v48 = vor.u32 %v9818_v40, %v7145_v41 }
  0xf4   :  { %v9982_v50 = vld [vmem:[#allocation8 + $0xaa4] sm:$0xf0]  ;;  %v9810_v52 = vld [vmem:[#allocation8 + $0x54c] sm:$0xf] }
  0xf5   :  { %v6983_v54 = vld [vmem:[#allocation8 + $0x448] sm:$0xf]  ;;  %v7784_v57 = vor.u32 %v9982_v50, %v7783_v49  ;;  %3114 = vmatpush.bf16.msra.mxu2 %v7528_v53  ;;  %v6601_v49 = vld [vmem:[#allocation8 + $0x168] sm:$0xf0] }
  0xf6   :  { %v9782_v55 = vld [vmem:[#allocation8 + $0x464] sm:$0xf0]  ;;  %v9746_v50 = vld [vmem:[#allocation8 + $0x34c] sm:$0xf] }
  0xf7   :  { %v7239_v56 = vld [vmem:[#allocation8 + $0x648] sm:$0xf]  ;;  %v6984_v63 = vor.u32 %v9782_v55, %v6983_v54  ;;  %3127 = vmatpush.bf16.msra.mxu3 %v7784_v57  ;;  %v7113_v53 = vld [vmem:[#allocation8 + $0x568] sm:$0xf0]  ;;  %v6860_v57 = vor.u32 %v9746_v50, %v6857_v51 }
  0xf8   :  { %v9846_v58 = vld [vmem:[#allocation8 + $0x664] sm:$0xf0]  ;;  %v7017_v35 = vld [vmem:[#allocation8 + $0x4a8] sm:$0xf0] }
  0xf9   :  { %v7495_v59 = vld [vmem:[#allocation8 + $0x848] sm:$0xf]  ;;  %v7240_v3 = vor.u32 %v9846_v58, %v7239_v56  ;;  %3089 = vmatpush.bf16.msra.mxu0 %v6984_v63  ;;  %v6604_v56 = vor.u32 %v9682_v47, %v6601_v49  ;;  %v6825_v63 = vld [vmem:[#allocation8 + $0x328] sm:$0xf0] }
  0xfa   :  { %v9910_v60 = vld [vmem:[#allocation8 + $0x864] sm:$0xf0]  ;;  %v9714_v49 = vld [vmem:[#allocation8 + $0x24c] sm:$0xf] }
  0xfb   :  { %v7751_v61 = vld [vmem:[#allocation8 + $0xa48] sm:$0xf]  ;;  %v7496_v4 = vor.u32 %v9910_v60, %v7495_v59  ;;  %3102 = vmatpush.bf16.msra.mxu1 %v7240_v3  ;;  %v9674_v59 = vld [vmem:[#allocation8 + $0x10c] sm:$0xf] }
  0xfc   :  { %v9974_v62 = vld [vmem:[#allocation8 + $0xa64] sm:$0xf0]  ;;  %v6569_v60 = vld [vmem:[#allocation8 + $0x128] sm:$0xf0] }
  0xfd   :  { %v6951_v1 = vld [vmem:[#allocation8 + $0x408] sm:$0xf]  ;;  %v7752_v8 = vor.u32 %v9974_v62, %v7751_v61  ;;  %3115 = vmatpush.bf16.msra.mxu2 %v7496_v4  ;;  %v7116_v61 = vor.u32 %v9810_v52, %v7113_v53  ;;  %v9738_v62 = vld [vmem:[#allocation8 + $0x30c] sm:$0xf] }
  0xfe   :  { %v9774_v2 = vld [vmem:[#allocation8 + $0x424] sm:$0xf0]  ;;  %v7081_v3 = vld [vmem:[#allocation8 + $0x528] sm:$0xf0] }
  0xff   :  { %v7207_v5 = vld [vmem:[#allocation8 + $0x608] sm:$0xf]  ;;  %v6952_v16 = vor.u32 %v9774_v2, %v6951_v1  ;;  %3128 = vmatpush.bf16.msra.mxu3 %v7752_v8  ;;  %v10793_v1 = vld [vmem:[#allocation10] sm:$0xff]  ;;  %v9802_v2 = vld [vmem:[#allocation8 + $0x50c] sm:$0xf] }
 0x100   :  { %v9838_v6 = vld [vmem:[#allocation8 + $0x624] sm:$0xf0]  ;;  %v6729_v50 = vld [vmem:[#allocation8 + $0x268] sm:$0xf0] }
 0x101   :  { %v7463_v7 = vld [vmem:[#allocation8 + $0x808] sm:$0xf]  ;;  %v7208_v22 = vor.u32 %v9838_v6, %v7207_v5  ;;  %3090 = vmatpush.bf16.msra.mxu0 %v6952_v16  ;;  %v6572_v6 = vor.u32 %v9674_v59, %v6569_v60  ;;  %v9794_v16 = vld [vmem:[#allocation8 + $0x4cc] sm:$0xf] }
 0x102   :  { %v9902_v9 = vld [vmem:[#allocation8 + $0x824] sm:$0xf0]  ;;  %v9778_v51 = vld [vmem:[#allocation8 + $0x44c] sm:$0xf] }
 0x103   :  { %v7719_v11 = vld [vmem:[#allocation8 + $0xa08] sm:$0xf]  ;;  %v7464_v23 = vor.u32 %v9902_v9, %v7463_v7  ;;  %3103 = vmatpush.bf16.msra.mxu1 %v7208_v22  ;;  %v6828_v7 = vor.u32 %v9738_v62, %v6825_v63  ;;  %v9666_v9 = vld [vmem:[#allocation8 + $0xcc] sm:$0xf] }
 0x104   :  { %v9966_v12 = vld [vmem:[#allocation8 + $0xa24] sm:$0xf0]  ;;  %3091 = vmatmul.bf16.vlgmr.msra.gmra.mxu0 %v10759_v0  ;;  %v6985_v52 = vld [vmem:[#allocation8 + $0x468] sm:$0xf0] }
 0x105   :  { %v8199_v13 = vld [vmem:[#allocation8 + $0xdc8] sm:$0xf]  ;;  %v7720_v26 = vor.u32 %v9966_v12, %v7719_v11  ;;  %3116 = vmatpush.bf16.msra.mxu2 %v7464_v23  ;;  %v619_v11 = vperm.slane %v10793_v1, 0  ;;  %v7084_v12 = vor.u32 %v9802_v2, %v7081_v3  ;;  %v9642_v59 = vld [vmem:[#allocation8 + $0xc] sm:$0xf]  ;;  %v6988_v63 = vor.u32 %v9778_v51, %v6985_v52 }
 0x106   :  { %v10086_v14 = vld [vmem:[#allocation8 + $0xde4] sm:$0xf0]  ;;  %3104 = vmatmul.bf16.vlgmr.msra.gmra.mxu1 %v10767_v20  ;;  %v6441_v60 = vld [vmem:[#allocation8 + $0x28] sm:$0xf0] }
 0x107   :  { %v8200_v27 = vor.u32 %v10086_v14, %v8199_v13  ;;  %v8167_v30 = vld [vmem:[#allocation8 + $0xd88] sm:$0xf]  ;;  %3129 = vmatpush.bf16.msra.mxu3 %v7720_v26  ;;  %3148 = vmatpush.bf16.msrb.mxu1 %v6668_v28  ;;  %v6537_v13 = vld [vmem:[#allocation8 + $0xe8] sm:$0xf0]  ;;  %v2897_v28 = vpop.f32.mrf.mxu1 }
 0x108   :  { %v10078_v31 = vld [vmem:[#allocation8 + $0xda4] sm:$0xf0]  ;;  %3117 = vmatmul.bf16.vlgmr.msra.gmra.mxu2 %v10773_v37  ;;  %v9730_v14 = vld [vmem:[#allocation8 + $0x2cc] sm:$0xf]  ;;  %v6540_v22 = vor.u32 %v9666_v9, %v6537_v13 }
 0x109   :  { %3135 = vmatpush.bf16.msrb.mxu0 %v8200_v27  ;;  %v8168_v42 = vor.u32 %v10078_v31, %v8167_v30  ;;  %3161 = vmatpush.bf16.msrb.mxu2 %v6924_v29  ;;  %v8135_v45 = vld [vmem:[#allocation8 + $0xd48] sm:$0xf]  ;;  %v6796_v23 = vor.u32 %v9730_v14, %v6793_v15  ;;  %v9658_v26 = vld [vmem:[#allocation8 + $0x8c] sm:$0xf]  ;;  %v2885_v27 = vadd.f32 %v2884_v21, %v619_v11  ;;  %v2912_v11 = vpop.f32.mrf.mxu2 }
 0x10a   :  { %v10070_v46 = vld [vmem:[#allocation8 + $0xd64] sm:$0xf0]  ;;  %3130 = vmatmul.bf16.vlgmr.msra.gmra.mxu3 %v10775_v38  ;;  %v7052_v29 = vor.u32 %v9794_v16, %v7049_v18  ;;  %v6505_v30 = vld [vmem:[#allocation8 + $0xa8] sm:$0xf0]  ;;  %v6444_v16 = vor.u32 %v9642_v59, %v6441_v60 }
 0x10b   :  { %3174 = vmatpush.bf16.msrb.mxu3 %v7180_v33  ;;  %v8136_v54 = vor.u32 %v10070_v46, %v8135_v45  ;;  %v8103_v55 = vld [vmem:[#allocation8 + $0xd08] sm:$0xf]  ;;  %3149 = vmatpush.bf16.msrb.mxu1 %v6636_v43  ;;  %v9722_v31 = vld [vmem:[#allocation8 + $0x28c] sm:$0xf]  ;;  %v2898_v36 = vadd.f32 %v2897_v28, %v2885_v27  ;;  %v6508_v41 = vor.u32 %v9658_v26, %v6505_v30 }
 0x10c   :  { %v10062_v58 = vld [vmem:[#allocation8 + $0xd24] sm:$0xf0]  ;;  %v9786_v33 = vld [vmem:[#allocation8 + $0x48c] sm:$0xf] }
 0x10d   :  { %3136 = vmatpush.bf16.msrb.mxu0 %v8168_v42  ;;  %3162 = vmatpush.bf16.msrb.mxu2 %v6892_v44  ;;  %v8104_v4 = vor.u32 %v10062_v58, %v8103_v55  ;;  %v8071_v5 = vld [vmem:[#allocation8 + $0xcc8] sm:$0xf]  ;;  %v6764_v42 = vor.u32 %v9722_v31, %v6761_v32  ;;  %v9650_v45 = vld [vmem:[#allocation8 + $0x4c] sm:$0xf]  ;;  %v2911_v46 = vadd.f32 %v2910_v39, %v2898_v36 }
 0x10e   :  { %v10054_v8 = vld [vmem:[#allocation8 + $0xce4] sm:$0xf0]  ;;  %v7020_v47 = vor.u32 %v9786_v33, %v7017_v35  ;;  %v6732_v58 = vor.u32 %v9714_v49, %v6729_v50  ;;  %v6697_v2 = vld [vmem:[#allocation8 + $0x228] sm:$0xf0] }
 0x10f   :  { %3175 = vmatpush.bf16.msrb.mxu3 %v7148_v48  ;;  %3150 = vmatpush.bf16.msrb.mxu1 %v6604_v56  ;;  %v8072_v19 = vor.u32 %v10054_v8, %v8071_v5  ;;  %v8039_v24 = vld [vmem:[#allocation8 + $0xc88] sm:$0xf]  ;;  %v6473_v48 = vld [vmem:[#allocation8 + $0x68] sm:$0xf0]  ;;  %v2886_v56 = vpop.f32.mrf.mxu0  ;;  %v2899_v62 = vpop.f32.mrf.mxu1 }
 0x110   :  { %v10046_v25 = vld [vmem:[#allocation8 + $0xca4] sm:$0xf0]  ;;  %v9770_v3 = vld [vmem:[#allocation8 + $0x40c] sm:$0xf]  ;;  %v2923_v5 = vpop.f32.mrf.mxu3 }
 0x111   :  { %3137 = vmatpush.bf16.msrb.mxu0 %v8136_v54  ;;  %3163 = vmatpush.bf16.msrb.mxu2 %v6860_v57  ;;  %v8040_v40 = vor.u32 %v10046_v25, %v8039_v24  ;;  %v8007_v43 = vld [vmem:[#allocation8 + $0xc48] sm:$0xf]  ;;  %v6476_v57 = vor.u32 %v9650_v45, %v6473_v48  ;;  %v9954_v8 = vld [vmem:[#allocation8 + $0x9cc] sm:$0xf]  ;;  %v10796_v9 = vadd.f32 %v2923_v5, %v2911_v46 }
 0x112   :  { %v10038_v44 = vld [vmem:[#allocation8 + $0xc64] sm:$0xf0]  ;;  %v7689_v13 = vld [vmem:[#allocation8 + $0x9e8] sm:$0xf0] }
 0x113   :  { %3176 = vmatpush.bf16.msrb.mxu3 %v7116_v61  ;;  %3151 = vmatpush.bf16.msrb.mxu1 %v6572_v6  ;;  %v8008_v53 = vor.u32 %v10038_v44, %v8007_v43  ;;  %v7975_v54 = vld [vmem:[#allocation8 + $0xc08] sm:$0xf]  ;;  %v9706_v61 = vld [vmem:[#allocation8 + $0x20c] sm:$0xf]  ;;  %v7692_v24 = vor.u32 %v9954_v8, %v7689_v13 }
 0x114   :  { %v10030_v55 = vld [vmem:[#allocation8 + $0xc24] sm:$0xf0]  ;;  %v9890_v6 = vld [vmem:[#allocation8 + $0x7cc] sm:$0xf]  ;;  %v6700_v18 = vor.u32 %v9706_v61, %v6697_v2 }
 0x115   :  { %3138 = vmatpush.bf16.msrb.mxu0 %v8104_v4  ;;  %3164 = vmatpush.bf16.msrb.mxu2 %v6828_v7  ;;  %v6953_v4 = vld [vmem:[#allocation8 + $0x428] sm:$0xf0] }
 0x116   :  { %v7433_v7 = vld [vmem:[#allocation8 + $0x7e8] sm:$0xf0] }
 0x117   :  { %3177 = vmatpush.bf16.msrb.mxu3 %v7084_v12  ;;  %3152 = vmatpush.bf16.msrb.mxu1 %v6540_v22  ;;  %v7976_v12 = vor.u32 %v10030_v55, %v7975_v54  ;;  %v10018_v14 = vld [vmem:[#allocation8 + $0xbcc] sm:$0xf]  ;;  %v6956_v22 = vor.u32 %v9770_v3, %v6953_v4  ;;  %v2936_v2 = vpop.f32.mrf.mxu0 }
 0x118   :  { %v7945_v15 = vld [vmem:[#allocation8 + $0xbe8] sm:$0xf0]  ;;  %v2925_v39 = vpop.f32.mrf.mxu3  ;;  %v2937_v11 = vadd.f32 %v2936_v2, %v10796_v9 }
 0x119   :  { %3139 = vmatpush.bf16.msrb.mxu0 %v8072_v19  ;;  %3165 = vmatpush.bf16.msrb.mxu2 %v6796_v23  ;;  %v10082_v19 = vld [vmem:[#allocation8 + $0xdcc] sm:$0xf]  ;;  %v7436_v23 = vor.u32 %v9890_v6, %v7433_v7  ;;  %v7948_v25 = vor.u32 %v10018_v14, %v7945_v15  ;;  %v2949_v3 = vpop.f32.mrf.mxu1 }
 0x11a   :  { %v8201_v21 = vld [vmem:[#allocation8 + $0xde8] sm:$0xf0] }
 0x11b   :  { %3178 = vmatpush.bf16.msrb.mxu3 %v7052_v29  ;;  %3153 = vmatpush.bf16.msrb.mxu1 %v6508_v41  ;;  %v9882_v26 = vld [vmem:[#allocation8 + $0x78c] sm:$0xf]  ;;  %v8204_v29 = vor.u32 %v10082_v19, %v8201_v21  ;;  %v2950_v19 = vadd.f32 %v2949_v3, %v2937_v11  ;;  %v6671_v3 = vld [vmem:[#allocation8 + $0x1d0] sm:$0xf] }
 0x11c   :  { %v7401_v27 = vld [vmem:[#allocation8 + $0x7a8] sm:$0xf0]  ;;  %v7183_v11 = vld [vmem:[#allocation8 + $0x5d0] sm:$0xf] }
 0x11d   :  { %3140 = vmatpush.bf16.msrb.mxu0 %v8040_v40  ;;  %3166 = vmatpush.bf16.msrb.mxu2 %v6764_v42  ;;  %v9946_v28 = vld [vmem:[#allocation8 + $0x98c] sm:$0xf]  ;;  %v7404_v36 = vor.u32 %v9882_v26, %v7401_v27 }
 0x11e   :  { %v7657_v30 = vld [vmem:[#allocation8 + $0x9a8] sm:$0xf0] }
 0x11f   :  { %3179 = vmatpush.bf16.msrb.mxu3 %v7020_v47  ;;  %3154 = vmatpush.bf16.msrb.mxu1 %v6476_v57  ;;  %v10010_v31 = vld [vmem:[#allocation8 + $0xb8c] sm:$0xf]  ;;  %v7660_v40 = vor.u32 %v9946_v28, %v7657_v30  ;;  %v2938_v39 = vpop.f32.mrf.mxu0 }
 0x120   :  { %v7913_v32 = vld [vmem:[#allocation8 + $0xba8] sm:$0xf0] }
 0x121   :  { %3141 = vmatpush.bf16.msrb.mxu0 %v8008_v53  ;;  %3167 = vmatpush.bf16.msrb.mxu2 %v6732_v58  ;;  %v10074_v33 = vld [vmem:[#allocation8 + $0xd8c] sm:$0xf]  ;;  %v7916_v41 = vor.u32 %v10010_v31, %v7913_v32  ;;  %v2962_v27 = vpop.f32.mrf.mxu2 }
 0x122   :  { %v8169_v35 = vld [vmem:[#allocation8 + $0xda8] sm:$0xf0]  ;;  %v10803_v31 = vadd.f32 %v2962_v27, %v2950_v19  ;;  %v9759_v27 = vld [vmem:[#allocation8 + $0x3ac] sm:$0xf0] }
 0x123   :  { %3180 = vmatpush.bf16.msrb.mxu3 %v6988_v63  ;;  %3155 = vmatpush.bf16.msrb.mxu1 %v6444_v16  ;;  %v9874_v42 = vld [vmem:[#allocation8 + $0x74c] sm:$0xf]  ;;  %v8172_v45 = vor.u32 %v10074_v33, %v8169_v35  ;;  %v10805_v35 = vpop.f32.mrf.mxu3 }
 0x124   :  { %v7369_v43 = vld [vmem:[#allocation8 + $0x768] sm:$0xf0]  ;;  %vm3603_vm0 = vcmp.ge.f32.partialorder %v10803_v31, 0.0 }
 0x125   :  { %3142 = vmatpush.bf16.msrb.mxu0 %v7976_v12  ;;  %3168 = vmatpush.bf16.msrb.mxu2 %v6700_v18  ;;  %v9938_v44 = vld [vmem:[#allocation8 + $0x94c] sm:$0xf]  ;;  %v7372_v51 = vor.u32 %v9874_v42, %v7369_v43 }
 0x126   :  { %v7625_v46 = vld [vmem:[#allocation8 + $0x968] sm:$0xf0]  ;;  %3156 = vmatmul.bf16.vlgmr.msrb.gmra.mxu1 %v10762_v10 }
 0x127   :  { %3181 = vmatpush.bf16.msrb.mxu3 %v6956_v22  ;;  %3200 = vmatpush.bf16.msra.mxu1 %v7692_v24  ;;  %v10002_v47 = vld [vmem:[#allocation8 + $0xb4c] sm:$0xf]  ;;  %v7628_v52 = vor.u32 %v9938_v44, %v7625_v46 }
 0x128   :  { %3143 = vmatmul.bf16.vlgmr.msrb.gmra.mxu0 %v10771_v34  ;;  %v7881_v48 = vld [vmem:[#allocation8 + $0xb68] sm:$0xf0]  ;;  %3169 = vmatmul.bf16.vlgmr.msrb.gmra.mxu2 %v10764_v17 }
 0x129   :  { %3187 = vmatpush.bf16.msra.mxu0 %v7436_v23  ;;  %3213 = vmatpush.bf16.msra.mxu2 %v7948_v25  ;;  %v10066_v49 = vld [vmem:[#allocation8 + $0xd4c] sm:$0xf]  ;;  %v7884_v53 = vor.u32 %v10002_v47, %v7881_v48 }
 0x12a   :  { %v8137_v50 = vld [vmem:[#allocation8 + $0xd68] sm:$0xf0]  ;;  %3182 = vmatmul.bf16.vlgmr.msrb.gmra.mxu3 %v10759_v0 }
 0x12b   :  { %3226 = vmatpush.bf16.msra.mxu3 %v8204_v29  ;;  %3201 = vmatpush.bf16.msra.mxu1 %v7660_v40  ;;  %v9866_v54 = vld [vmem:[#allocation8 + $0x70c] sm:$0xf]  ;;  %v8140_v57 = vor.u32 %v10066_v49, %v8137_v50  ;;  %v2951_v40 = vpop.f32.mrf.mxu1 }
 0x12c   :  { %v7337_v55 = vld [vmem:[#allocation8 + $0x728] sm:$0xf0]  ;;  %v9687_v40 = vld [vmem:[#allocation8 + $0x16c] sm:$0xf0] }
 0x12d   :  { %3188 = vmatpush.bf16.msra.mxu0 %v7404_v36  ;;  %3214 = vmatpush.bf16.msra.mxu2 %v7916_v41  ;;  %v9930_v56 = vld [vmem:[#allocation8 + $0x90c] sm:$0xf]  ;;  %v7340_v63 = vor.u32 %v9866_v54, %v7337_v55 }
 0x12e   :  { %v7593_v58 = vld [vmem:[#allocation8 + $0x928] sm:$0xf0] }
 0x12f   :  { %3227 = vmatpush.bf16.msra.mxu3 %v8172_v45  ;;  %v9994_v59 = vld [vmem:[#allocation8 + $0xb0c] sm:$0xf]  ;;  %3202 = vmatpush.bf16.msra.mxu1 %v7628_v52  ;;  %v7596_v4 = vor.u32 %v9930_v56, %v7593_v58 }
 0x130   :  { %v7849_v60 = vld [vmem:[#allocation8 + $0xb28] sm:$0xf0] }
 0x131   :  { %v10058_v61 = vld [vmem:[#allocation8 + $0xd0c] sm:$0xf]  ;;  %3189 = vmatpush.bf16.msra.mxu0 %v7372_v51  ;;  %3215 = vmatpush.bf16.msra.mxu2 %v7884_v53  ;;  %v7852_v5 = vor.u32 %v9994_v59, %v7849_v60  ;;  %v2964_v60 = vpop.f32.mrf.mxu2 }
 0x132   :  { %v8105_v62 = vld [vmem:[#allocation8 + $0xd28] sm:$0xf0]  ;;  %v7343_v60 = vld [vmem:[#allocation8 + $0x710] sm:$0xf] }
 0x133   :  { %v9858_v6 = vld [vmem:[#allocation8 + $0x6cc] sm:$0xf]  ;;  %3228 = vmatpush.bf16.msra.mxu3 %v8140_v57  ;;  %v8108_v12 = vor.u32 %v10058_v61, %v8105_v62  ;;  %3203 = vmatpush.bf16.msra.mxu1 %v7596_v4  ;;  %v9703_v4 = vld [vmem:[#allocation8 + $0x1ec] sm:$0xf0] }
 0x134   :  { %v7305_v7 = vld [vmem:[#allocation8 + $0x6e8] sm:$0xf0]  ;;  %v6672_v19 = vor.u32 %v9703_v4, %v6671_v3  ;;  %v6543_v4 = vld [vmem:[#allocation8 + $0xd0] sm:$0xf] }
 0x135   :  { %v9922_v8 = vld [vmem:[#allocation8 + $0x8cc] sm:$0xf]  ;;  %3190 = vmatpush.bf16.msra.mxu0 %v7340_v63  ;;  %v7308_v21 = vor.u32 %v9858_v6, %v7305_v7  ;;  %3216 = vmatpush.bf16.msra.mxu2 %v7852_v5  ;;  %v6927_v5 = vld [vmem:[#allocation8 + $0x3d0] sm:$0xf]  ;;  %v2977_v6 = vpop.f32.mrf.mxu3 }
 0x136   :  { %v7561_v13 = vld [vmem:[#allocation8 + $0x8e8] sm:$0xf0] }
 0x137   :  { %v9986_v14 = vld [vmem:[#allocation8 + $0xacc] sm:$0xf]  ;;  %v7564_v22 = vor.u32 %v9922_v8, %v7561_v13  ;;  %3229 = vmatpush.bf16.msra.mxu3 %v8108_v12  ;;  %v9767_v8 = vld [vmem:[#allocation8 + $0x3ec] sm:$0xf0] }
 0x138   :  { %v7817_v15 = vld [vmem:[#allocation8 + $0xae8] sm:$0xf0]  ;;  %v9831_v12 = vld [vmem:[#allocation8 + $0x5ec] sm:$0xf0] }
 0x139   :  { %v10050_v16 = vld [vmem:[#allocation8 + $0xccc] sm:$0xf]  ;;  %v7820_v23 = vor.u32 %v9986_v14, %v7817_v15  ;;  %3191 = vmatpush.bf16.msra.mxu0 %v7308_v21  ;;  %3204 = vmatpush.bf16.msra.mxu1 %v7564_v22  ;;  %v7439_v15 = vld [vmem:[#allocation8 + $0x7d0] sm:$0xf]  ;;  %v6928_v21 = vor.u32 %v9767_v8, %v6927_v5  ;;  %v7184_v22 = vor.u32 %v9831_v12, %v7183_v11 }
 0x13a   :  { %v8073_v18 = vld [vmem:[#allocation8 + $0xce8] sm:$0xf0]  ;;  %v9671_v5 = vld [vmem:[#allocation8 + $0xec] sm:$0xf0] }
 0x13b   :  { %v9850_v24 = vld [vmem:[#allocation8 + $0x68c] sm:$0xf]  ;;  %v8076_v9 = vor.u32 %v10050_v16, %v8073_v18  ;;  %3217 = vmatpush.bf16.msra.mxu2 %v7820_v23  ;;  %v9895_v16 = vld [vmem:[#allocation8 + $0x7ec] sm:$0xf0] }
 0x13c   :  { %v7273_v25 = vld [vmem:[#allocation8 + $0x6a8] sm:$0xf0]  ;;  %v6639_v23 = vld [vmem:[#allocation8 + $0x190] sm:$0xf] }
 0x13d   :  { %v9914_v26 = vld [vmem:[#allocation8 + $0x88c] sm:$0xf]  ;;  %v7276_v36 = vor.u32 %v9850_v24, %v7273_v25  ;;  %3230 = vmatpush.bf16.msra.mxu3 %v8076_v9  ;;  %v9695_v24 = vld [vmem:[#allocation8 + $0x1ac] sm:$0xf0] }
 0x13e   :  { %v7529_v28 = vld [vmem:[#allocation8 + $0x8a8] sm:$0xf0]  ;;  %v6895_v25 = vld [vmem:[#allocation8 + $0x390] sm:$0xf] }
 0x13f   :  { %v9978_v29 = vld [vmem:[#allocation8 + $0xa8c] sm:$0xf]  ;;  %v7532_v41 = vor.u32 %v9914_v26, %v7529_v28  ;;  %3192 = vmatpush.bf16.msra.mxu0 %v7276_v36  ;;  %v7440_v26 = vor.u32 %v9895_v16, %v7439_v15  ;;  %v7151_v9 = vld [vmem:[#allocation8 + $0x590] sm:$0xf]  ;;  %v6896_v36 = vor.u32 %v9759_v27, %v6895_v25 }
 0x140   :  { %v7785_v30 = vld [vmem:[#allocation8 + $0xaa8] sm:$0xf0]  ;;  %v9823_v28 = vld [vmem:[#allocation8 + $0x5ac] sm:$0xf0] }
 0x141   :  { %v10042_v32 = vld [vmem:[#allocation8 + $0xc8c] sm:$0xf]  ;;  %v7788_v42 = vor.u32 %v9978_v29, %v7785_v30  ;;  %3205 = vmatpush.bf16.msra.mxu1 %v7532_v41  ;;  %v7407_v29 = vld [vmem:[#allocation8 + $0x790] sm:$0xf]  ;;  %v7152_v39 = vor.u32 %v9823_v28, %v7151_v9  ;;  %v3014_v25 = vpop.f32.mrf.mxu2 }
 0x142   :  { %v8041_v33 = vld [vmem:[#allocation8 + $0xca8] sm:$0xf0]  ;;  %v9887_v30 = vld [vmem:[#allocation8 + $0x7ac] sm:$0xf0] }
 0x143   :  { %v9842_v43 = vld [vmem:[#allocation8 + $0x64c] sm:$0xf]  ;;  %v8044_v46 = vor.u32 %v10042_v32, %v8041_v33  ;;  %3218 = vmatpush.bf16.msra.mxu2 %v7788_v42  ;;  %v6640_v32 = vor.u32 %v9695_v24, %v6639_v23  ;;  %v6607_v33 = vld [vmem:[#allocation8 + $0x150] sm:$0xf]  ;;  %v620_v42 = vperm.slane %v10793_v1, 1 }
 0x144   :  { %v7241_v44 = vld [vmem:[#allocation8 + $0x668] sm:$0xf0]  ;;  %v6863_v41 = vld [vmem:[#allocation8 + $0x350] sm:$0xf] }
 0x145   :  { %v9906_v45 = vld [vmem:[#allocation8 + $0x84c] sm:$0xf]  ;;  %v7244_v52 = vor.u32 %v9842_v43, %v7241_v44  ;;  %3231 = vmatpush.bf16.msra.mxu3 %v8044_v46  ;;  %v7408_v43 = vor.u32 %v9887_v30, %v7407_v29  ;;  %v9751_v44 = vld [vmem:[#allocation8 + $0x36c] sm:$0xf0]  ;;  %v3027_v30 = vpop.f32.mrf.mxu3 }
 0x146   :  { %v7497_v47 = vld [vmem:[#allocation8 + $0x868] sm:$0xf0]  ;;  %v9815_v46 = vld [vmem:[#allocation8 + $0x56c] sm:$0xf0] }
 0x147   :  { %v9970_v48 = vld [vmem:[#allocation8 + $0xa4c] sm:$0xf]  ;;  %v7500_v55 = vor.u32 %v9906_v45, %v7497_v47  ;;  %3193 = vmatpush.bf16.msra.mxu0 %v7244_v52  ;;  %v7119_v45 = vld [vmem:[#allocation8 + $0x550] sm:$0xf]  ;;  %v2976_v52 = vadd.f32 %v10805_v35, %v620_v42 }
 0x148   :  { %v7753_v49 = vld [vmem:[#allocation8 + $0xa68] sm:$0xf0]  ;;  %v7375_v47 = vld [vmem:[#allocation8 + $0x750] sm:$0xf] }
 0x149   :  { %v10034_v50 = vld [vmem:[#allocation8 + $0xc4c] sm:$0xf]  ;;  %v7756_v56 = vor.u32 %v9970_v48, %v7753_v49  ;;  %3206 = vmatpush.bf16.msra.mxu1 %v7500_v55  ;;  %v9879_v48 = vld [vmem:[#allocation8 + $0x76c] sm:$0xf0]  ;;  %v6608_v49 = vor.u32 %v9687_v40, %v6607_v33 }
 0x14a   :  { %v8009_v51 = vld [vmem:[#allocation8 + $0xc68] sm:$0xf0]  ;;  %v6831_v55 = vld [vmem:[#allocation8 + $0x310] sm:$0xf] }
 0x14b   :  { %v9834_v53 = vld [vmem:[#allocation8 + $0x60c] sm:$0xf]  ;;  %v8012_v61 = vor.u32 %v10034_v50, %v8009_v51  ;;  %3219 = vmatpush.bf16.msra.mxu2 %v7756_v56  ;;  %v6864_v50 = vor.u32 %v9751_v44, %v6863_v41  ;;  %v7120_v51 = vor.u32 %v9815_v46, %v7119_v45  ;;  %v7376_v56 = vor.u32 %v9879_v48, %v7375_v47  ;;  %v6799_v35 = vld [vmem:[#allocation8 + $0x2d0] sm:$0xf] }
 0x14c   :  { %v7209_v54 = vld [vmem:[#allocation8 + $0x628] sm:$0xf0]  ;;  %v9735_v11 = vld [vmem:[#allocation8 + $0x2ec] sm:$0xf0] }
 0x14d   :  { %v9898_v57 = vld [vmem:[#allocation8 + $0x80c] sm:$0xf]  ;;  %v7212_v7 = vor.u32 %v9834_v53, %v7209_v54  ;;  %3232 = vmatpush.bf16.msra.mxu3 %v8012_v61  ;;  %v6575_v53 = vld [vmem:[#allocation8 + $0x110] sm:$0xf] }
 0x14e   :  { %v7465_v58 = vld [vmem:[#allocation8 + $0x828] sm:$0xf0]  ;;  %v9679_v54 = vld [vmem:[#allocation8 + $0x12c] sm:$0xf0] }
 0x14f   :  { %v9962_v59 = vld [vmem:[#allocation8 + $0xa0c] sm:$0xf]  ;;  %v7468_v13 = vor.u32 %v9898_v57, %v7465_v58  ;;  %3194 = vmatpush.bf16.msra.mxu0 %v7212_v7  ;;  %v9743_v57 = vld [vmem:[#allocation8 + $0x32c] sm:$0xf0]  ;;  %v3001_v7 = vpop.f32.mrf.mxu1 }
 0x150   :  { %v7721_v62 = vld [vmem:[#allocation8 + $0xa28] sm:$0xf0]  ;;  %v7087_v58 = vld [vmem:[#allocation8 + $0x510] sm:$0xf] }
 0x151   :  { %v10026_v63 = vld [vmem:[#allocation8 + $0xc0c] sm:$0xf]  ;;  %v7724_v14 = vor.u32 %v9962_v59, %v7721_v62  ;;  %3207 = vmatpush.bf16.msra.mxu1 %v7468_v13  ;;  %v9807_v59 = vld [vmem:[#allocation8 + $0x52c] sm:$0xf0]  ;;  %v6576_v62 = vor.u32 %v9679_v54, %v6575_v53 }
 0x152   :  { %v7977_v2 = vld [vmem:[#allocation8 + $0xc28] sm:$0xf0]  ;;  %3195 = vmatmul.bf16.vlgmr.msra.gmra.mxu0 %v10767_v20  ;;  %v9871_v61 = vld [vmem:[#allocation8 + $0x72c] sm:$0xf0]  ;;  %v7088_v3 = vor.u32 %v9807_v59, %v7087_v58 }
 0x153   :  { %v7980_v18 = vor.u32 %v10026_v63, %v7977_v2  ;;  %3220 = vmatpush.bf16.msra.mxu2 %v7724_v14  ;;  %3239 = vmatpush.bf16.msrb.mxu0 %v6672_v19  ;;  %v2988_v63 = vpop.f32.mrf.mxu0  ;;  %v6832_v2 = vor.u32 %v9743_v57, %v6831_v55  ;;  %v7344_v8 = vor.u32 %v9871_v61, %v7343_v60  ;;  %v7055_v12 = vld [vmem:[#allocation8 + $0x4d0] sm:$0xf]  ;;  %v3016_v61 = vpop.f32.mrf.mxu2 }
 0x154   :  { %3208 = vmatmul.bf16.vlgmr.msra.gmra.mxu1 %v10773_v37  ;;  %v2989_v6 = vadd.f32 %v2988_v63, %v2976_v52  ;;  %v9799_v13 = vld [vmem:[#allocation8 + $0x4ec] sm:$0xf0]  ;;  %v6800_v19 = vor.u32 %v9735_v11, %v6799_v35  ;;  %v6577_v61 = vld [vmem:[#allocation8 + $0x130] sm:$0xf0] }
 0x155   :  { %3233 = vmatpush.bf16.msra.mxu3 %v7980_v18  ;;  %3252 = vmatpush.bf16.msrb.mxu1 %v6928_v21  ;;  %v7311_v14 = vld [vmem:[#allocation8 + $0x6d0] sm:$0xf]  ;;  %v6544_v18 = vor.u32 %v9671_v5, %v6543_v4  ;;  %v7056_v21 = vor.u32 %v9799_v13, %v7055_v12  ;;  %v3029_v4 = vpop.f32.mrf.mxu3 }
 0x156   :  { %3221 = vmatmul.bf16.vlgmr.msra.gmra.mxu2 %v10775_v38  ;;  %v9863_v15 = vld [vmem:[#allocation8 + $0x6ec] sm:$0xf0]  ;;  %v3002_v16 = vadd.f32 %v3001_v7, %v2989_v6 }
 0x157   :  { %3265 = vmatpush.bf16.msrb.mxu2 %v7184_v22  ;;  %3240 = vmatpush.bf16.msrb.mxu0 %v6640_v32  ;;  %v6511_v22 = vld [vmem:[#allocation8 + $0x90] sm:$0xf]  ;;  %v3003_v46 = vpop.f32.mrf.mxu1 }
 0x158   :  { %3234 = vmatmul.bf16.vlgmr.msra.gmra.mxu3 %v10771_v34  ;;  %v9663_v23 = vld [vmem:[#allocation8 + $0xac] sm:$0xf0]  ;;  %v3015_v29 = vadd.f32 %v3014_v25, %v3002_v16  ;;  %v6673_v16 = vld [vmem:[#allocation8 + $0x1f0] sm:$0xf0] }
 0x159   :  { %3278 = vmatpush.bf16.msrb.mxu3 %v7440_v26  ;;  %3253 = vmatpush.bf16.msrb.mxu1 %v6896_v36  ;;  %v6767_v24 = vld [vmem:[#allocation8 + $0x290] sm:$0xf]  ;;  %v7312_v26 = vor.u32 %v9863_v15, %v7311_v14  ;;  %v6512_v36 = vor.u32 %v9663_v23, %v6511_v22  ;;  %v9699_v15 = vld [vmem:[#allocation8 + $0x1d4] sm:$0xf] }
 0x15a   :  { %v9727_v27 = vld [vmem:[#allocation8 + $0x2ac] sm:$0xf0] }
 0x15b   :  { %3266 = vmatpush.bf16.msrb.mxu2 %v7152_v39  ;;  %3241 = vmatpush.bf16.msrb.mxu0 %v6608_v49  ;;  %v7023_v9 = vld [vmem:[#allocation8 + $0x490] sm:$0xf]  ;;  %v10813_v39 = vadd.f32 %v3027_v30, %v3015_v29  ;;  %v2990_v40 = vpop.f32.mrf.mxu0  ;;  %v6768_v41 = vor.u32 %v9727_v27, %v6767_v24  ;;  %v9691_v29 = vld [vmem:[#allocation8 + $0x194] sm:$0xf] }
 0x15c   :  { %v9791_v28 = vld [vmem:[#allocation8 + $0x4ac] sm:$0xf0]  ;;  %v6641_v30 = vld [vmem:[#allocation8 + $0x1b0] sm:$0xf0] }
 0x15d   :  { %3279 = vmatpush.bf16.msrb.mxu3 %v7408_v43  ;;  %3254 = vmatpush.bf16.msrb.mxu1 %v6864_v50  ;;  %v7279_v32 = vld [vmem:[#allocation8 + $0x690] sm:$0xf]  ;;  %v7024_v42 = vor.u32 %v9791_v28, %v7023_v9 }
 0x15e   :  { %v9855_v33 = vld [vmem:[#allocation8 + $0x6ac] sm:$0xf0] }
 0x15f   :  { %3267 = vmatpush.bf16.msrb.mxu2 %v7120_v51  ;;  %3242 = vmatpush.bf16.msrb.mxu0 %v6576_v62  ;;  %v6479_v43 = vld [vmem:[#allocation8 + $0x50] sm:$0xf]  ;;  %v7280_v47 = vor.u32 %v9855_v33, %v7279_v32 }
 0x160   :  { %v9655_v44 = vld [vmem:[#allocation8 + $0x6c] sm:$0xf0] }
 0x161   :  { %3280 = vmatpush.bf16.msrb.mxu3 %v7376_v56  ;;  %3255 = vmatpush.bf16.msrb.mxu1 %v6832_v2  ;;  %v6735_v45 = vld [vmem:[#allocation8 + $0x250] sm:$0xf]  ;;  %v6480_v53 = vor.u32 %v9655_v44, %v6479_v43  ;;  %v6644_v43 = vor.u32 %v9691_v29, %v6641_v30  ;;  %v6513_v29 = vld [vmem:[#allocation8 + $0xb0] sm:$0xf0] }
 0x162   :  { %v9719_v48 = vld [vmem:[#allocation8 + $0x26c] sm:$0xf0] }
 0x163   :  { %3268 = vmatpush.bf16.msrb.mxu2 %v7088_v3  ;;  %3243 = vmatpush.bf16.msrb.mxu0 %v6544_v18  ;;  %v6991_v49 = vld [vmem:[#allocation8 + $0x450] sm:$0xf]  ;;  %v6736_v56 = vor.u32 %v9719_v48, %v6735_v45  ;;  %v6609_v48 = vld [vmem:[#allocation8 + $0x170] sm:$0xf0] }
 0x164   :  { %v9783_v50 = vld [vmem:[#allocation8 + $0x46c] sm:$0xf0] }
 0x165   :  { %3281 = vmatpush.bf16.msrb.mxu3 %v7344_v8  ;;  %3256 = vmatpush.bf16.msrb.mxu1 %v6800_v19  ;;  %v7247_v51 = vld [vmem:[#allocation8 + $0x650] sm:$0xf]  ;;  %v6992_v57 = vor.u32 %v9783_v50, %v6991_v49 }
 0x166   :  { %v9847_v52 = vld [vmem:[#allocation8 + $0x66c] sm:$0xf0] }
 0x167   :  { %3269 = vmatpush.bf16.msrb.mxu2 %v7056_v21  ;;  %3244 = vmatpush.bf16.msrb.mxu0 %v6512_v36  ;;  %v6447_v54 = vld [vmem:[#allocation8 + $0x10] sm:$0xf]  ;;  %v7248_v62 = vor.u32 %v9847_v52, %v7247_v51 }
 0x168   :  { %v9647_v55 = vld [vmem:[#allocation8 + $0x2c] sm:$0xf0] }
 0x169   :  { %3282 = vmatpush.bf16.msrb.mxu3 %v7312_v26  ;;  %3257 = vmatpush.bf16.msrb.mxu1 %v6768_v41  ;;  %v6703_v58 = vld [vmem:[#allocation8 + $0x210] sm:$0xf]  ;;  %v6448_v7 = vor.u32 %v9647_v55, %v6447_v54  ;;  %v6676_v26 = vor.u32 %v9699_v15, %v6673_v16  ;;  %v6545_v15 = vld [vmem:[#allocation8 + $0xf0] sm:$0xf0] }
 0x16a   :  { %v9711_v59 = vld [vmem:[#allocation8 + $0x22c] sm:$0xf0] }
 0x16b   :  { %3270 = vmatpush.bf16.msrb.mxu2 %v7024_v42  ;;  %v6959_v60 = vld [vmem:[#allocation8 + $0x410] sm:$0xf]  ;;  %3245 = vmatpush.bf16.msrb.mxu0 %v6480_v53  ;;  %v6704_v13 = vor.u32 %v9711_v59, %v6703_v58  ;;  %v3040_v59 = vpop.f32.mrf.mxu0 }
 0x16c   :  { %v9775_v63 = vld [vmem:[#allocation8 + $0x42c] sm:$0xf0] }
 0x16d   :  { %3283 = vmatpush.bf16.msrb.mxu3 %v7280_v47  ;;  %v7215_v2 = vld [vmem:[#allocation8 + $0x610] sm:$0xf]  ;;  %3258 = vmatpush.bf16.msrb.mxu1 %v6736_v56  ;;  %v6960_v14 = vor.u32 %v9775_v63, %v6959_v60  ;;  %v9683_v47 = vld [vmem:[#allocation8 + $0x154] sm:$0xf] }
 0x16e   :  { %v9839_v3 = vld [vmem:[#allocation8 + $0x62c] sm:$0xf0]  ;;  %v6612_v55 = vor.u32 %v9683_v47, %v6609_v48  ;;  %v9675_v60 = vld [vmem:[#allocation8 + $0x114] sm:$0xf] }
 0x16f   :  { %v7695_v5 = vld [vmem:[#allocation8 + $0x9d0] sm:$0xf]  ;;  %3271 = vmatpush.bf16.msrb.mxu2 %v6992_v57  ;;  %v7216_v18 = vor.u32 %v9839_v3, %v7215_v2  ;;  %3246 = vmatpush.bf16.msrb.mxu0 %v6448_v7  ;;  %v3053_v2 = vpop.f32.mrf.mxu1  ;;  %v6580_v7 = vor.u32 %v9675_v60, %v6577_v61 }
 0x170   :  { %v9959_v35 = vld [vmem:[#allocation8 + $0x9ec] sm:$0xf0] }
 0x171   :  { %v7951_v6 = vld [vmem:[#allocation8 + $0xbd0] sm:$0xf]  ;;  %3284 = vmatpush.bf16.msrb.mxu3 %v7248_v62  ;;  %v7696_v19 = vor.u32 %v9959_v35, %v7695_v5  ;;  %3259 = vmatpush.bf16.msrb.mxu1 %v6704_v13  ;;  %v3041_v62 = vadd.f32 %v3040_v59, %v10813_v39  ;;  %v621_v39 = vperm.slane %v10793_v1, 2 }
 0x172   :  { %v10023_v8 = vld [vmem:[#allocation8 + $0xbec] sm:$0xf0]  ;;  %3247 = vmatmul.bf16.vlgmr.msrb.gmra.mxu0 %v10762_v10 }
 0x173   :  { %v8207_v11 = vld [vmem:[#allocation8 + $0xdd0] sm:$0xf]  ;;  %v7952_v21 = vor.u32 %v10023_v8, %v7951_v6  ;;  %3272 = vmatpush.bf16.msrb.mxu2 %v6960_v14  ;;  %3291 = vmatpush.bf16.msra.mxu0 %v7696_v19  ;;  %v10820_v8 = vadd.f32 %v3053_v2, %v3041_v62  ;;  %v9667_v14 = vld [vmem:[#allocation8 + $0xd4] sm:$0xf]  ;;  %v3042_v1 = vpop.f32.mrf.mxu0 }
 0x174   :  { %v10087_v12 = vld [vmem:[#allocation8 + $0xdec] sm:$0xf0]  ;;  %3260 = vmatmul.bf16.vlgmr.msrb.gmra.mxu1 %v10764_v17  ;;  %v9643_v62 = vld [vmem:[#allocation8 + $0x14] sm:$0xf] }
 0x175   :  { %v8208_v22 = vor.u32 %v10087_v12, %v8207_v11  ;;  %v7663_v23 = vld [vmem:[#allocation8 + $0x990] sm:$0xf]  ;;  %3285 = vmatpush.bf16.msrb.mxu3 %v7216_v18  ;;  %3304 = vmatpush.bf16.msra.mxu1 %v7952_v21  ;;  %vm3604_vm1 = vcmp.ge.f32.partialorder %v10820_v8, 0.0 }
 0x176   :  { %v9951_v24 = vld [vmem:[#allocation8 + $0x9ac] sm:$0xf0]  ;;  %3273 = vmatmul.bf16.vlgmr.msrb.gmra.mxu2 %v10759_v0 }
 0x177   :  { %v7919_v25 = vld [vmem:[#allocation8 + $0xb90] sm:$0xf]  ;;  %v7664_v32 = vor.u32 %v9951_v24, %v7663_v23  ;;  %3317 = vmatpush.bf16.msra.mxu2 %v8208_v22  ;;  %v6548_v24 = vor.u32 %v9667_v14, %v6545_v15  ;;  %v9955_v15 = vld [vmem:[#allocation8 + $0x9d4] sm:$0xf] }
 0x178   :  { %v10015_v27 = vld [vmem:[#allocation8 + $0xbac] sm:$0xf0]  ;;  %3286 = vmatmul.bf16.vlgmr.msrb.gmra.mxu3 %v10767_v20 }
 0x179   :  { %v8175_v9 = vld [vmem:[#allocation8 + $0xd90] sm:$0xf]  ;;  %v7920_v33 = vor.u32 %v10015_v27, %v7919_v25  ;;  %3330 = vmatpush.bf16.msra.mxu3 %v6676_v26  ;;  %3292 = vmatpush.bf16.msra.mxu0 %v7664_v32  ;;  %v3079_v32 = vpop.f32.mrf.mxu3 }
 0x17a   :  { %v10079_v28 = vld [vmem:[#allocation8 + $0xdac] sm:$0xf0] }
 0x17b   :  { %v8176_v36 = vor.u32 %v10079_v28, %v8175_v9  ;;  %v7631_v40 = vld [vmem:[#allocation8 + $0x950] sm:$0xf]  ;;  %3305 = vmatpush.bf16.msra.mxu1 %v7920_v33  ;;  %v3066_v9 = vpop.f32.mrf.mxu2  ;;  %v9659_v28 = vld [vmem:[#allocation8 + $0x94] sm:$0xf] }
 0x17c   :  { %v9943_v41 = vld [vmem:[#allocation8 + $0x96c] sm:$0xf0]  ;;  %v3067_v30 = vadd.f32 %v3066_v9, %v621_v39  ;;  %v7697_v39 = vld [vmem:[#allocation8 + $0x9f0] sm:$0xf0] }
 0x17d   :  { %v7887_v42 = vld [vmem:[#allocation8 + $0xb50] sm:$0xf]  ;;  %v7632_v49 = vor.u32 %v9943_v41, %v7631_v40  ;;  %3318 = vmatpush.bf16.msra.mxu2 %v8176_v36  ;;  %3331 = vmatpush.bf16.msra.mxu3 %v6644_v43  ;;  %v3055_v36 = vpop.f32.mrf.mxu1  ;;  %v7409_v9 = vld [vmem:[#allocation8 + $0x7b0] sm:$0xf0] }
 0x17e   :  { %v10007_v44 = vld [vmem:[#allocation8 + $0xb6c] sm:$0xf0]  ;;  %v6865_v36 = vld [vmem:[#allocation8 + $0x370] sm:$0xf0] }
 0x17f   :  { %v8143_v45 = vld [vmem:[#allocation8 + $0xd50] sm:$0xf]  ;;  %v7888_v50 = vor.u32 %v10007_v44, %v7887_v42  ;;  %3293 = vmatpush.bf16.msra.mxu0 %v7632_v49 }
 0x180   :  { %v10071_v46 = vld [vmem:[#allocation8 + $0xd6c] sm:$0xf0] }
 0x181   :  { %v8144_v51 = vor.u32 %v10071_v46, %v8143_v45  ;;  %v7599_v52 = vld [vmem:[#allocation8 + $0x910] sm:$0xf]  ;;  %3306 = vmatpush.bf16.msra.mxu1 %v7888_v50  ;;  %3332 = vmatpush.bf16.msra.mxu3 %v6612_v55  ;;  %v10823_v45 = vadd.f32 %v3079_v32, %v3067_v30  ;;  %v6516_v46 = vor.u32 %v9659_v28, %v6513_v29  ;;  %v9651_v50 = vld [vmem:[#allocation8 + $0x54] sm:$0xf] }
 0x182   :  { %v9935_v53 = vld [vmem:[#allocation8 + $0x92c] sm:$0xf0]  ;;  %v9947_v28 = vld [vmem:[#allocation8 + $0x994] sm:$0xf] }
 0x183   :  { %v7855_v54 = vld [vmem:[#allocation8 + $0xb10] sm:$0xf]  ;;  %v7600_v63 = vor.u32 %v9935_v53, %v7599_v52  ;;  %3319 = vmatpush.bf16.msra.mxu2 %v8144_v51  ;;  %v6481_v51 = vld [vmem:[#allocation8 + $0x70] sm:$0xf0]  ;;  %v3068_v2 = vpop.f32.mrf.mxu2 }
 0x184   :  { %v9999_v56 = vld [vmem:[#allocation8 + $0xb2c] sm:$0xf0]  ;;  %v6484_v60 = vor.u32 %v9651_v50, %v6481_v51  ;;  %v7665_v29 = vld [vmem:[#allocation8 + $0x9b0] sm:$0xf0] }
 0x185   :  { %v8111_v57 = vld [vmem:[#allocation8 + $0xd10] sm:$0xf]  ;;  %v7856_v3 = vor.u32 %v9999_v56, %v7855_v54  ;;  %3294 = vmatpush.bf16.msra.mxu0 %v7600_v63  ;;  %3333 = vmatpush.bf16.msra.mxu3 %v6580_v7  ;;  %v6449_v63 = vld [vmem:[#allocation8 + $0x30] sm:$0xf0] }
 0x186   :  { %v10063_v58 = vld [vmem:[#allocation8 + $0xd2c] sm:$0xf0]  ;;  %v7185_v7 = vld [vmem:[#allocation8 + $0x5f0] sm:$0xf0] }
 0x187   :  { %v8112_v4 = vor.u32 %v10063_v58, %v8111_v57  ;;  %v7567_v5 = vld [vmem:[#allocation8 + $0x8d0] sm:$0xf]  ;;  %3307 = vmatpush.bf16.msra.mxu1 %v7856_v3  ;;  %v9763_v3 = vld [vmem:[#allocation8 + $0x3d4] sm:$0xf] }
 0x188   :  { %v9927_v35 = vld [vmem:[#allocation8 + $0x8ec] sm:$0xf0]  ;;  %v9739_v51 = vld [vmem:[#allocation8 + $0x314] sm:$0xf] }
 0x189   :  { %v7823_v6 = vld [vmem:[#allocation8 + $0xad0] sm:$0xf]  ;;  %v7568_v16 = vor.u32 %v9927_v35, %v7567_v5  ;;  %3320 = vmatpush.bf16.msra.mxu2 %v8112_v4  ;;  %3334 = vmatpush.bf16.msra.mxu3 %v6548_v24  ;;  %v6929_v4 = vld [vmem:[#allocation8 + $0x3f0] sm:$0xf0]  ;;  %v3081_v35 = vpop.f32.mrf.mxu3 }
 0x18a   :  { %v9991_v11 = vld [vmem:[#allocation8 + $0xaec] sm:$0xf0]  ;;  %v9827_v5 = vld [vmem:[#allocation8 + $0x5d4] sm:$0xf]  ;;  %v3105_v35 = vpop.f32.mrf.mxu1 }
 0x18b   :  { %v8079_v12 = vld [vmem:[#allocation8 + $0xcd0] sm:$0xf]  ;;  %v7824_v18 = vor.u32 %v9991_v11, %v7823_v6  ;;  %3295 = vmatpush.bf16.msra.mxu0 %v7568_v16  ;;  %v9891_v11 = vld [vmem:[#allocation8 + $0x7d4] sm:$0xf]  ;;  %v6452_v16 = vor.u32 %v9643_v62, %v6449_v63 }
 0x18c   :  { %v10055_v13 = vld [vmem:[#allocation8 + $0xcec] sm:$0xf0]  ;;  %v9819_v24 = vld [vmem:[#allocation8 + $0x594] sm:$0xf] }
 0x18d   :  { %v8080_v19 = vor.u32 %v10055_v13, %v8079_v12  ;;  %v7535_v21 = vld [vmem:[#allocation8 + $0x890] sm:$0xf]  ;;  %3308 = vmatpush.bf16.msra.mxu1 %v7824_v18  ;;  %3335 = vmatpush.bf16.msra.mxu3 %v6516_v46  ;;  %v7441_v12 = vld [vmem:[#allocation8 + $0x7f0] sm:$0xf0]  ;;  %v6932_v18 = vor.u32 %v9763_v3, %v6929_v4 }
 0x18e   :  { %v9919_v22 = vld [vmem:[#allocation8 + $0x8ac] sm:$0xf0]  ;;  %v9939_v46 = vld [vmem:[#allocation8 + $0x954] sm:$0xf] }
 0x18f   :  { %v7791_v23 = vld [vmem:[#allocation8 + $0xa90] sm:$0xf]  ;;  %v7536_v33 = vor.u32 %v9919_v22, %v7535_v21  ;;  %3321 = vmatpush.bf16.msra.mxu2 %v8080_v19  ;;  %v7188_v19 = vor.u32 %v9827_v5, %v7185_v7  ;;  %v7444_v21 = vor.u32 %v9891_v11, %v7441_v12  ;;  %v9755_v22 = vld [vmem:[#allocation8 + $0x394] sm:$0xf] }
 0x190   :  { %v9983_v25 = vld [vmem:[#allocation8 + $0xaac] sm:$0xf0]  ;;  %v9731_v2 = vld [vmem:[#allocation8 + $0x2d4] sm:$0xf] }
 0x191   :  { %v8047_v26 = vld [vmem:[#allocation8 + $0xc90] sm:$0xf]  ;;  %v7792_v40 = vor.u32 %v9983_v25, %v7791_v23  ;;  %3296 = vmatpush.bf16.msra.mxu0 %v7536_v33  ;;  %3336 = vmatpush.bf16.msra.mxu3 %v6484_v60  ;;  %v6897_v23 = vld [vmem:[#allocation8 + $0x3b0] sm:$0xf0]  ;;  %v7700_v25 = vor.u32 %v9955_v15, %v7697_v39 }
 0x192   :  { %v10047_v27 = vld [vmem:[#allocation8 + $0xcac] sm:$0xf0]  ;;  %v6900_v30 = vor.u32 %v9755_v22, %v6897_v23  ;;  %v9747_v33 = vld [vmem:[#allocation8 + $0x354] sm:$0xf]  ;;  %v3118_v23 = vpop.f32.mrf.mxu2 }
 0x193   :  { %v8048_v41 = vor.u32 %v10047_v27, %v8047_v26  ;;  %v7503_v42 = vld [vmem:[#allocation8 + $0x850] sm:$0xf]  ;;  %3309 = vmatpush.bf16.msra.mxu1 %v7792_v40  ;;  %v7153_v26 = vld [vmem:[#allocation8 + $0x5b0] sm:$0xf0] }
 0x194   :  { %v9911_v43 = vld [vmem:[#allocation8 + $0x86c] sm:$0xf0]  ;;  %v9883_v27 = vld [vmem:[#allocation8 + $0x794] sm:$0xf]  ;;  %v7156_v32 = vor.u32 %v9819_v24, %v7153_v26 }
 0x195   :  { %v7759_v44 = vld [vmem:[#allocation8 + $0xa50] sm:$0xf]  ;;  %v7504_v52 = vor.u32 %v9911_v43, %v7503_v42  ;;  %3322 = vmatpush.bf16.msra.mxu2 %v8048_v41  ;;  %3337 = vmatpush.bf16.msra.mxu3 %v6452_v16  ;;  %v7412_v1 = vor.u32 %v9883_v27, %v7409_v9  ;;  %v9811_v40 = vld [vmem:[#allocation8 + $0x554] sm:$0xf]  ;;  %v7668_v41 = vor.u32 %v9947_v28, %v7665_v29  ;;  %v3131_v9 = vpop.f32.mrf.mxu3 }
 0x196   :  { %v9975_v47 = vld [vmem:[#allocation8 + $0xa6c] sm:$0xf0]  ;;  %v7121_v42 = vld [vmem:[#allocation8 + $0x570] sm:$0xf0] }
 0x197   :  { %v8015_v48 = vld [vmem:[#allocation8 + $0xc50] sm:$0xf]  ;;  %v7760_v55 = vor.u32 %v9975_v47, %v7759_v44  ;;  %3297 = vmatpush.bf16.msra.mxu0 %v7504_v52  ;;  %v9875_v43 = vld [vmem:[#allocation8 + $0x754] sm:$0xf] }
 0x198   :  { %v10039_v49 = vld [vmem:[#allocation8 + $0xc6c] sm:$0xf0]  ;;  %v7377_v44 = vld [vmem:[#allocation8 + $0x770] sm:$0xf0]  ;;  %3338 = vmatmul.bf16.vlgmr.msra.gmra.mxu3 %v10762_v10 }
 0x199   :  { %v7471_v53 = vld [vmem:[#allocation8 + $0x810] sm:$0xf]  ;;  %v8016_v56 = vor.u32 %v10039_v49, %v8015_v48  ;;  %3310 = vmatpush.bf16.msra.mxu1 %v7760_v55  ;;  %3382 = vmatpush.bf16.msrb.mxu3 %v7700_v25  ;;  %v7633_v47 = vld [vmem:[#allocation8 + $0x970] sm:$0xf0]  ;;  %v6868_v48 = vor.u32 %v9747_v33, %v6865_v36  ;;  %v7124_v49 = vor.u32 %v9811_v40, %v7121_v42 }
 0x19a   :  { %v9903_v54 = vld [vmem:[#allocation8 + $0x82c] sm:$0xf0]  ;;  %v7380_v50 = vor.u32 %v9875_v43, %v7377_v44  ;;  %v6833_v52 = vld [vmem:[#allocation8 + $0x330] sm:$0xf0]  ;;  %v3107_v43 = vpop.f32.mrf.mxu1 }
 0x19b   :  { %v7727_v57 = vld [vmem:[#allocation8 + $0xa10] sm:$0xf]  ;;  %v7472_v6 = vor.u32 %v9903_v54, %v7471_v53  ;;  %3323 = vmatpush.bf16.msra.mxu2 %v8016_v56  ;;  %v9803_v53 = vld [vmem:[#allocation8 + $0x514] sm:$0xf]  ;;  %v7636_v54 = vor.u32 %v9939_v46, %v7633_v47  ;;  %v6836_v60 = vor.u32 %v9739_v51, %v6833_v52  ;;  %v9688_v43 = vld [vmem:[#allocation8 + $0x174] sm:$0xf0] }
 0x19c   :  { %v9967_v58 = vld [vmem:[#allocation8 + $0xa2c] sm:$0xf0]  ;;  %v7089_v55 = vld [vmem:[#allocation8 + $0x530] sm:$0xf0] }
 0x19d   :  { %v7983_v59 = vld [vmem:[#allocation8 + $0xc10] sm:$0xf]  ;;  %v7728_v13 = vor.u32 %v9967_v58, %v7727_v57  ;;  %3298 = vmatpush.bf16.msra.mxu0 %v7472_v6  ;;  %3383 = vmatpush.bf16.msrb.mxu3 %v7668_v41  ;;  %v9867_v56 = vld [vmem:[#allocation8 + $0x714] sm:$0xf]  ;;  %v7092_v62 = vor.u32 %v9803_v53, %v7089_v55 }
 0x19e   :  { %v10031_v61 = vld [vmem:[#allocation8 + $0xc2c] sm:$0xf0]  ;;  %v7345_v57 = vld [vmem:[#allocation8 + $0x730] sm:$0xf0] }
 0x19f   :  { %v7984_v14 = vor.u32 %v10031_v61, %v7983_v59  ;;  %3311 = vmatpush.bf16.msra.mxu1 %v7728_v13  ;;  %v9931_v58 = vld [vmem:[#allocation8 + $0x914] sm:$0xf]  ;;  %v3092_v61 = vpop.f32.mrf.mxu0  ;;  %v7348_v63 = vor.u32 %v9867_v56, %v7345_v57 }
 0x1a0   :  { %3299 = vmatmul.bf16.vlgmr.msra.gmra.mxu0 %v10773_v37  ;;  %v7601_v59 = vld [vmem:[#allocation8 + $0x930] sm:$0xf0]  ;;  %v3093_v5 = vadd.f32 %v3092_v61, %v10823_v45 }
 0x1a1   :  { %3324 = vmatpush.bf16.msra.mxu2 %v7984_v14  ;;  %3343 = vmatpush.bf16.msrb.mxu0 %v6932_v18  ;;  %v6801_v3 = vld [vmem:[#allocation8 + $0x2f0] sm:$0xf0]  ;;  %v7604_v6 = vor.u32 %v9931_v58, %v7601_v59  ;;  %v3120_v59 = vpop.f32.mrf.mxu2 }
 0x1a2   :  { %3312 = vmatmul.bf16.vlgmr.msra.gmra.mxu1 %v10775_v38  ;;  %v9795_v4 = vld [vmem:[#allocation8 + $0x4d4] sm:$0xf]  ;;  %3384 = vmatpush.bf16.msrb.mxu3 %v7636_v54  ;;  %v3106_v15 = vadd.f32 %v3105_v35, %v3093_v5  ;;  %v6804_v39 = vor.u32 %v9731_v2, %v6801_v3  ;;  %v3133_v2 = vpop.f32.mrf.mxu3  ;;  %v9744_v59 = vld [vmem:[#allocation8 + $0x334] sm:$0xf0] }
 0x1a3   :  { %3356 = vmatpush.bf16.msrb.mxu1 %v7188_v19  ;;  %v7057_v7 = vld [vmem:[#allocation8 + $0x4f0] sm:$0xf0] }
 0x1a4   :  { %3325 = vmatmul.bf16.vlgmr.msra.gmra.mxu2 %v10771_v34  ;;  %v9859_v11 = vld [vmem:[#allocation8 + $0x6d4] sm:$0xf]  ;;  %v7060_v16 = vor.u32 %v9795_v4, %v7057_v7  ;;  %v3119_v27 = vadd.f32 %v3118_v23, %v3106_v15  ;;  %v6679_v7 = vld [vmem:[#allocation8 + $0x1d8] sm:$0xf] }
 0x1a5   :  { %3369 = vmatpush.bf16.msrb.mxu2 %v7444_v21  ;;  %3344 = vmatpush.bf16.msrb.mxu0 %v6900_v30  ;;  %v7313_v12 = vld [vmem:[#allocation8 + $0x6f0] sm:$0xf0]  ;;  %v9768_v15 = vld [vmem:[#allocation8 + $0x3f4] sm:$0xf0] }
 0x1a6   :  { %v9923_v13 = vld [vmem:[#allocation8 + $0x8d4] sm:$0xf]  ;;  %v7316_v18 = vor.u32 %v9859_v11, %v7313_v12  ;;  %3385 = vmatpush.bf16.msrb.mxu3 %v7604_v6  ;;  %v9704_v11 = vld [vmem:[#allocation8 + $0x1f4] sm:$0xf0] }
 0x1a7   :  { %3357 = vmatpush.bf16.msrb.mxu1 %v7156_v32  ;;  %v7569_v14 = vld [vmem:[#allocation8 + $0x8f0] sm:$0xf0]  ;;  %v10830_v32 = vadd.f32 %v3131_v9, %v3119_v27  ;;  %v6903_v27 = vld [vmem:[#allocation8 + $0x398] sm:$0xf] }
 0x1a8   :  { %v9723_v19 = vld [vmem:[#allocation8 + $0x294] sm:$0xf]  ;;  %v7572_v45 = vor.u32 %v9923_v13, %v7569_v14  ;;  %v6935_v14 = vld [vmem:[#allocation8 + $0x3d8] sm:$0xf] }
 0x1a9   :  { %3370 = vmatpush.bf16.msrb.mxu2 %v7412_v1  ;;  %3345 = vmatpush.bf16.msrb.mxu0 %v6868_v48  ;;  %v6769_v21 = vld [vmem:[#allocation8 + $0x2b0] sm:$0xf0]  ;;  %v3094_v1 = vpop.f32.mrf.mxu0  ;;  %v9760_v9 = vld [vmem:[#allocation8 + $0x3b4] sm:$0xf0] }
 0x1aa   :  { %v9787_v22 = vld [vmem:[#allocation8 + $0x494] sm:$0xf]  ;;  %v6772_v30 = vor.u32 %v9723_v19, %v6769_v21  ;;  %3386 = vmatpush.bf16.msrb.mxu3 %v7572_v45  ;;  %v6680_v19 = vor.u32 %v9704_v11, %v6679_v7  ;;  %v6936_v45 = vor.u32 %v9768_v15, %v6935_v14  ;;  %v6807_v14 = vld [vmem:[#allocation8 + $0x2d8] sm:$0xf] }
 0x1ab   :  { %3358 = vmatpush.bf16.msrb.mxu1 %v7124_v49  ;;  %v7025_v24 = vld [vmem:[#allocation8 + $0x4b0] sm:$0xf0]  ;;  %v9736_v15 = vld [vmem:[#allocation8 + $0x2f4] sm:$0xf0] }
 0x1ac   :  { %v9851_v25 = vld [vmem:[#allocation8 + $0x694] sm:$0xf]  ;;  %v7028_v33 = vor.u32 %v9787_v22, %v7025_v24 }
 0x1ad   :  { %3371 = vmatpush.bf16.msrb.mxu2 %v7380_v50  ;;  %3346 = vmatpush.bf16.msrb.mxu0 %v6836_v60  ;;  %v7281_v26 = vld [vmem:[#allocation8 + $0x6b0] sm:$0xf0] }
 0x1ae   :  { %v9915_v28 = vld [vmem:[#allocation8 + $0x894] sm:$0xf]  ;;  %v7284_v36 = vor.u32 %v9851_v25, %v7281_v26  ;;  %v6647_v25 = vld [vmem:[#allocation8 + $0x198] sm:$0xf] }
 0x1af   :  { %3359 = vmatpush.bf16.msrb.mxu1 %v7092_v62  ;;  %v7537_v29 = vld [vmem:[#allocation8 + $0x8b0] sm:$0xf0]  ;;  %v9696_v26 = vld [vmem:[#allocation8 + $0x1b4] sm:$0xf0] }
 0x1b0   :  { %v9715_v40 = vld [vmem:[#allocation8 + $0x254] sm:$0xf]  ;;  %v7540_v44 = vor.u32 %v9915_v28, %v7537_v29 }
 0x1b1   :  { %3372 = vmatpush.bf16.msrb.mxu2 %v7348_v63  ;;  %3347 = vmatpush.bf16.msrb.mxu0 %v6804_v39  ;;  %v6737_v41 = vld [vmem:[#allocation8 + $0x270] sm:$0xf0] }
 0x1b2   :  { %v9779_v42 = vld [vmem:[#allocation8 + $0x454] sm:$0xf]  ;;  %v6740_v51 = vor.u32 %v9715_v40, %v6737_v41  ;;  %3387 = vmatpush.bf16.msrb.mxu3 %v7540_v44  ;;  %v6904_v40 = vor.u32 %v9760_v9, %v6903_v27  ;;  %v6871_v44 = vld [vmem:[#allocation8 + $0x358] sm:$0xf]  ;;  %v3183_v27 = vpop.f32.mrf.mxu3 }
 0x1b3   :  { %3360 = vmatpush.bf16.msrb.mxu1 %v7060_v16  ;;  %v6993_v46 = vld [vmem:[#allocation8 + $0x470] sm:$0xf0]  ;;  %v6775_v9 = vld [vmem:[#allocation8 + $0x298] sm:$0xf] }
 0x1b4   :  { %v9843_v47 = vld [vmem:[#allocation8 + $0x654] sm:$0xf]  ;;  %v6996_v54 = vor.u32 %v9779_v42, %v6993_v46  ;;  %v6615_v42 = vld [vmem:[#allocation8 + $0x158] sm:$0xf] }
 0x1b5   :  { %3373 = vmatpush.bf16.msrb.mxu2 %v7316_v18  ;;  %v7249_v48 = vld [vmem:[#allocation8 + $0x670] sm:$0xf0]  ;;  %3348 = vmatpush.bf16.msrb.mxu0 %v6772_v30  ;;  %v6648_v30 = vor.u32 %v9696_v26, %v6647_v25  ;;  %v9752_v46 = vld [vmem:[#allocation8 + $0x374] sm:$0xf0]  ;;  %v3170_v26 = vpop.f32.mrf.mxu2 }
 0x1b6   :  { %v9907_v49 = vld [vmem:[#allocation8 + $0x854] sm:$0xf]  ;;  %v7252_v55 = vor.u32 %v9843_v47, %v7249_v48  ;;  %v9664_v25 = vld [vmem:[#allocation8 + $0xb4] sm:$0xf0] }
 0x1b7   :  { %v7505_v50 = vld [vmem:[#allocation8 + $0x870] sm:$0xf0]  ;;  %3361 = vmatpush.bf16.msrb.mxu1 %v7028_v33 }
 0x1b8   :  { %v9707_v52 = vld [vmem:[#allocation8 + $0x214] sm:$0xf]  ;;  %v7508_v60 = vor.u32 %v9907_v49, %v7505_v50  ;;  %v6616_v49 = vor.u32 %v9688_v43, %v6615_v42 }
 0x1b9   :  { %v6705_v53 = vld [vmem:[#allocation8 + $0x230] sm:$0xf0]  ;;  %3374 = vmatpush.bf16.msrb.mxu2 %v7284_v36  ;;  %3349 = vmatpush.bf16.msrb.mxu0 %v6740_v51 }
 0x1ba   :  { %v9771_v56 = vld [vmem:[#allocation8 + $0x414] sm:$0xf]  ;;  %v6708_v35 = vor.u32 %v9707_v52, %v6705_v53  ;;  %3388 = vmatpush.bf16.msrb.mxu3 %v7508_v60  ;;  %v6872_v53 = vor.u32 %v9752_v46, %v6871_v44  ;;  %v10836_v60 = vld [vmem:[#allocation10] sm:$0xff] }
 0x1bb   :  { %v6961_v57 = vld [vmem:[#allocation8 + $0x430] sm:$0xf0]  ;;  %3362 = vmatpush.bf16.msrb.mxu1 %v6996_v54 }
 0x1bc   :  { %v9835_v58 = vld [vmem:[#allocation8 + $0x614] sm:$0xf]  ;;  %v6964_v12 = vor.u32 %v9771_v56, %v6961_v57  ;;  %v9680_v56 = vld [vmem:[#allocation8 + $0x134] sm:$0xf0]  ;;  %v3144_v57 = vpop.f32.mrf.mxu0 }
 0x1bd   :  { %v7217_v61 = vld [vmem:[#allocation8 + $0x630] sm:$0xf0]  ;;  %3375 = vmatpush.bf16.msrb.mxu2 %v7252_v55  ;;  %3350 = vmatpush.bf16.msrb.mxu0 %v6708_v35  ;;  %v6583_v55 = vld [vmem:[#allocation8 + $0x118] sm:$0xf] }
 0x1be   :  { %v9899_v62 = vld [vmem:[#allocation8 + $0x814] sm:$0xf]  ;;  %v7220_v13 = vor.u32 %v9835_v58, %v7217_v61  ;;  %v6839_v58 = vld [vmem:[#allocation8 + $0x318] sm:$0xf]  ;;  %v622_v61 = vperm.slane %v10836_v60, 3 }
 0x1bf   :  { %v7473_v63 = vld [vmem:[#allocation8 + $0x830] sm:$0xf0]  ;;  %3363 = vmatpush.bf16.msrb.mxu1 %v6964_v12  ;;  %v6840_v7 = vor.u32 %v9744_v59, %v6839_v58  ;;  %v6551_v12 = vld [vmem:[#allocation8 + $0xd8] sm:$0xf] }
 0x1c0   :  { %v10019_v3 = vld [vmem:[#allocation8 + $0xbd4] sm:$0xf]  ;;  %v7476_v39 = vor.u32 %v9899_v62, %v7473_v63  ;;  %3351 = vmatmul.bf16.vlgmr.msrb.gmra.mxu0 %v10764_v17  ;;  %v10840_v62 = vadd.f32 %v3144_v57, %v10830_v32  ;;  %v6455_v59 = vld [vmem:[#allocation8 + $0x18] sm:$0xf] }
 0x1c1   :  { %v7953_v4 = vld [vmem:[#allocation8 + $0xbf0] sm:$0xf0]  ;;  %3376 = vmatpush.bf16.msrb.mxu2 %v7220_v13  ;;  %v9672_v13 = vld [vmem:[#allocation8 + $0xf4] sm:$0xf0] }
 0x1c2   :  { %v10083_v5 = vld [vmem:[#allocation8 + $0xdd4] sm:$0xf]  ;;  %v7956_v16 = vor.u32 %v10019_v3, %v7953_v4  ;;  %3389 = vmatpush.bf16.msrb.mxu3 %v7476_v39  ;;  %3364 = vmatmul.bf16.vlgmr.msrb.gmra.mxu1 %v10759_v0  ;;  %v6584_v3 = vor.u32 %v9680_v56, %v6583_v55  ;;  %vm3605_vm2 = vcmp.ge.f32.partialorder %v10840_v62, 0.0 }
 0x1c3   :  { %v8209_v6 = vld [vmem:[#allocation8 + $0xdf0] sm:$0xf0] }
 0x1c4   :  { %v8212_v18 = vor.u32 %v10083_v5, %v8209_v6  ;;  %v10011_v21 = vld [vmem:[#allocation8 + $0xb94] sm:$0xf]  ;;  %3395 = vmatpush.bf16.msra.mxu0 %v7956_v16  ;;  %3377 = vmatmul.bf16.vlgmr.msrb.gmra.mxu2 %v10767_v20  ;;  %v3157_v6 = vpop.f32.mrf.mxu1 }
 0x1c5   :  { %v7921_v22 = vld [vmem:[#allocation8 + $0xbb0] sm:$0xf0]  ;;  %3421 = vmatpush.bf16.msra.mxu2 %v6680_v19  ;;  %3390 = vmatmul.bf16.vlgmr.msrb.gmra.mxu3 %v10773_v37  ;;  %v3158_v39 = vadd.f32 %v3157_v6, %v622_v61  ;;  %v9832_v6 = vld [vmem:[#allocation8 + $0x5f4] sm:$0xf0] }
 0x1c6   :  { %v10075_v23 = vld [vmem:[#allocation8 + $0xd94] sm:$0xf]  ;;  %v7924_v28 = vor.u32 %v10011_v21, %v7921_v22  ;;  %3408 = vmatpush.bf16.msra.mxu1 %v8212_v18  ;;  %3434 = vmatpush.bf16.msra.mxu3 %v6936_v45  ;;  %v6552_v18 = vor.u32 %v9672_v13, %v6551_v12  ;;  %v9896_v12 = vld [vmem:[#allocation8 + $0x7f4] sm:$0xf0] }
 0x1c7   :  { %v8177_v24 = vld [vmem:[#allocation8 + $0xdb0] sm:$0xf0]  ;;  %v7703_v13 = vld [vmem:[#allocation8 + $0x9d8] sm:$0xf] }
 0x1c8   :  { %v8180_v29 = vor.u32 %v10075_v23, %v8177_v24  ;;  %v10003_v1 = vld [vmem:[#allocation8 + $0xb54] sm:$0xf]  ;;  %3396 = vmatpush.bf16.msra.mxu0 %v7924_v28  ;;  %v6808_v23 = vor.u32 %v9736_v15, %v6807_v14  ;;  %v6519_v24 = vld [vmem:[#allocation8 + $0x98] sm:$0xf] }
 0x1c9   :  { %v7889_v33 = vld [vmem:[#allocation8 + $0xb70] sm:$0xf0]  ;;  %3422 = vmatpush.bf16.msra.mxu2 %v6648_v30  ;;  %v9728_v28 = vld [vmem:[#allocation8 + $0x2b4] sm:$0xf0]  ;;  %v3146_v30 = vpop.f32.mrf.mxu0 }
 0x1ca   :  { %v10067_v36 = vld [vmem:[#allocation8 + $0xd54] sm:$0xf]  ;;  %v7892_v47 = vor.u32 %v10003_v1, %v7889_v33  ;;  %3409 = vmatpush.bf16.msra.mxu1 %v8180_v29  ;;  %3435 = vmatpush.bf16.msra.mxu3 %v6904_v40  ;;  %v3171_v29 = vadd.f32 %v3170_v26, %v3158_v39  ;;  %v6776_v46 = vor.u32 %v9728_v28, %v6775_v9  ;;  %v9960_v14 = vld [vmem:[#allocation8 + $0x9f4] sm:$0xf0] }
 0x1cb   :  { %v8145_v41 = vld [vmem:[#allocation8 + $0xd70] sm:$0xf0]  ;;  %v9888_v26 = vld [vmem:[#allocation8 + $0x7b4] sm:$0xf0] }
 0x1cc   :  { %v8148_v48 = vor.u32 %v10067_v36, %v8145_v41  ;;  %v9995_v50 = vld [vmem:[#allocation8 + $0xb14] sm:$0xf]  ;;  %3397 = vmatpush.bf16.msra.mxu0 %v7892_v47  ;;  %v6520_v36 = vor.u32 %v9664_v25, %v6519_v24  ;;  %v10842_v43 = vadd.f32 %v3183_v27, %v3171_v29  ;;  %v3159_v44 = vpop.f32.mrf.mxu1  ;;  %v7415_v24 = vld [vmem:[#allocation8 + $0x798] sm:$0xf] }
 0x1cd   :  { %v7857_v51 = vld [vmem:[#allocation8 + $0xb30] sm:$0xf0]  ;;  %3423 = vmatpush.bf16.msra.mxu2 %v6616_v49  ;;  %v9656_v49 = vld [vmem:[#allocation8 + $0x74] sm:$0xf0] }
 0x1ce   :  { %v10059_v52 = vld [vmem:[#allocation8 + $0xd14] sm:$0xf]  ;;  %v7860_v63 = vor.u32 %v9995_v50, %v7857_v51  ;;  %3410 = vmatpush.bf16.msra.mxu1 %v8148_v48  ;;  %3436 = vmatpush.bf16.msra.mxu3 %v6872_v53  ;;  %v6487_v48 = vld [vmem:[#allocation8 + $0x58] sm:$0xf] }
 0x1cf   :  { %v8113_v54 = vld [vmem:[#allocation8 + $0xd30] sm:$0xf0]  ;;  %v6743_v50 = vld [vmem:[#allocation8 + $0x258] sm:$0xf]  ;;  %v6488_v56 = vor.u32 %v9656_v49, %v6487_v48 }
 0x1d0   :  { %v8116_v2 = vor.u32 %v10059_v52, %v8113_v54  ;;  %v9987_v4 = vld [vmem:[#allocation8 + $0xad4] sm:$0xf]  ;;  %3398 = vmatpush.bf16.msra.mxu0 %v7860_v63  ;;  %v9720_v51 = vld [vmem:[#allocation8 + $0x274] sm:$0xf0] }
 0x1d1   :  { %v7825_v5 = vld [vmem:[#allocation8 + $0xaf0] sm:$0xf0]  ;;  %3424 = vmatpush.bf16.msra.mxu2 %v6584_v3  ;;  %v6744_v61 = vor.u32 %v9720_v51, %v6743_v50  ;;  %v9648_v63 = vld [vmem:[#allocation8 + $0x34] sm:$0xf0] }
 0x1d2   :  { %v10051_v35 = vld [vmem:[#allocation8 + $0xcd4] sm:$0xf]  ;;  %v7828_v32 = vor.u32 %v9987_v4, %v7825_v5  ;;  %3411 = vmatpush.bf16.msra.mxu1 %v8116_v2  ;;  %3437 = vmatpush.bf16.msra.mxu3 %v6840_v7  ;;  %v6711_v2 = vld [vmem:[#allocation8 + $0x218] sm:$0xf]  ;;  %v3172_v4 = vpop.f32.mrf.mxu2  ;;  %v3185_v5 = vpop.f32.mrf.mxu3  ;;  %v6456_v39 = vor.u32 %v9648_v63, %v6455_v59 }
 0x1d3   :  { %v8081_v11 = vld [vmem:[#allocation8 + $0xcf0] sm:$0xf0]  ;;  %v9712_v3 = vld [vmem:[#allocation8 + $0x234] sm:$0xf0] }
 0x1d4   :  { %v8084_v16 = vor.u32 %v10051_v35, %v8081_v11  ;;  %v9979_v19 = vld [vmem:[#allocation8 + $0xa94] sm:$0xf]  ;;  %3399 = vmatpush.bf16.msra.mxu0 %v7828_v32  ;;  %v7191_v35 = vld [vmem:[#allocation8 + $0x5d8] sm:$0xf] }
 0x1d5   :  { %v7793_v21 = vld [vmem:[#allocation8 + $0xab0] sm:$0xf0]  ;;  %3425 = vmatpush.bf16.msra.mxu2 %v6552_v18  ;;  %v7447_v7 = vld [vmem:[#allocation8 + $0x7d8] sm:$0xf]  ;;  %v6712_v18 = vor.u32 %v9712_v3, %v6711_v2  ;;  %v3196_v3 = vpop.f32.mrf.mxu0 }
 0x1d6   :  { %v10043_v22 = vld [vmem:[#allocation8 + $0xc94] sm:$0xf]  ;;  %v7796_v1 = vor.u32 %v9979_v19, %v7793_v21  ;;  %3412 = vmatpush.bf16.msra.mxu1 %v8084_v16  ;;  %3438 = vmatpush.bf16.msra.mxu3 %v6808_v23  ;;  %v7959_v32 = vld [vmem:[#allocation8 + $0xbd8] sm:$0xf]  ;;  %v7192_v19 = vor.u32 %v9832_v6, %v7191_v35  ;;  %v7448_v21 = vor.u32 %v9896_v12, %v7447_v7  ;;  %v3209_v12 = vpop.f32.mrf.mxu1 }
 0x1d7   :  { %v8049_v45 = vld [vmem:[#allocation8 + $0xcb0] sm:$0xf0]  ;;  %v10024_v16 = vld [vmem:[#allocation8 + $0xbf4] sm:$0xf0] }
 0x1d8   :  { %v8052_v33 = vor.u32 %v10043_v22, %v8049_v45  ;;  %v9971_v40 = vld [vmem:[#allocation8 + $0xa54] sm:$0xf]  ;;  %3400 = vmatpush.bf16.msra.mxu0 %v7796_v1  ;;  %v7704_v22 = vor.u32 %v9960_v14, %v7703_v13  ;;  %v7159_v23 = vld [vmem:[#allocation8 + $0x598] sm:$0xf]  ;;  %v7960_v25 = vor.u32 %v10024_v16, %v7959_v32  ;;  %v7416_v1 = vor.u32 %v9888_v26, %v7415_v24 }
 0x1d9   :  { %v7761_v41 = vld [vmem:[#allocation8 + $0xa70] sm:$0xf0]  ;;  %3426 = vmatpush.bf16.msra.mxu2 %v6520_v36  ;;  %v9824_v45 = vld [vmem:[#allocation8 + $0x5b4] sm:$0xf0] }
 0x1da   :  { %v10035_v42 = vld [vmem:[#allocation8 + $0xc54] sm:$0xf]  ;;  %v7764_v52 = vor.u32 %v9971_v40, %v7761_v41  ;;  %3413 = vmatpush.bf16.msra.mxu1 %v8052_v33  ;;  %3439 = vmatpush.bf16.msra.mxu3 %v6776_v46  ;;  %v7671_v27 = vld [vmem:[#allocation8 + $0x998] sm:$0xf]  ;;  %v7160_v30 = vor.u32 %v9824_v45, %v7159_v23 }
 0x1db   :  { %v8017_v47 = vld [vmem:[#allocation8 + $0xc70] sm:$0xf0]  ;;  %v9952_v9 = vld [vmem:[#allocation8 + $0x9b4] sm:$0xf0] }
 0x1dc   :  { %v9963_v53 = vld [vmem:[#allocation8 + $0xa14] sm:$0xf]  ;;  %v8020_v55 = vor.u32 %v10035_v42, %v8017_v47  ;;  %3401 = vmatpush.bf16.msra.mxu0 %v7764_v52  ;;  %v7927_v28 = vld [vmem:[#allocation8 + $0xb98] sm:$0xf]  ;;  %v7672_v33 = vor.u32 %v9952_v9, %v7671_v27 }
 0x1dd   :  { %v7729_v54 = vld [vmem:[#allocation8 + $0xa30] sm:$0xf0]  ;;  %3427 = vmatpush.bf16.msra.mxu2 %v6488_v56  ;;  %v10016_v29 = vld [vmem:[#allocation8 + $0xbb4] sm:$0xf0] }
 0x1de   :  { %v10027_v57 = vld [vmem:[#allocation8 + $0xc14] sm:$0xf]  ;;  %v7732_v11 = vor.u32 %v9963_v53, %v7729_v54  ;;  %3414 = vmatpush.bf16.msra.mxu1 %v8020_v55  ;;  %3440 = vmatpush.bf16.msra.mxu3 %v6744_v61  ;;  %v7127_v36 = vld [vmem:[#allocation8 + $0x558] sm:$0xf]  ;;  %v7928_v42 = vor.u32 %v10016_v29, %v7927_v28  ;;  %v3235_v29 = vpop.f32.mrf.mxu3 }
 0x1df   :  { %v7985_v58 = vld [vmem:[#allocation8 + $0xc30] sm:$0xf0]  ;;  %v9816_v40 = vld [vmem:[#allocation8 + $0x574] sm:$0xf0] }
 0x1e0   :  { %v7988_v15 = vor.u32 %v10027_v57, %v7985_v58  ;;  %3402 = vmatpush.bf16.msra.mxu0 %v7732_v11  ;;  %v7383_v41 = vld [vmem:[#allocation8 + $0x758] sm:$0xf]  ;;  %v7128_v50 = vor.u32 %v9816_v40, %v7127_v36  ;;  %v3197_v11 = vadd.f32 %v3196_v3, %v10842_v43  ;;  %v3198_v40 = vpop.f32.mrf.mxu0 }
 0x1e1   :  { %3428 = vmatpush.bf16.msra.mxu2 %v6456_v39  ;;  %v9880_v44 = vld [vmem:[#allocation8 + $0x774] sm:$0xf0] }
 0x1e2   :  { %3415 = vmatpush.bf16.msra.mxu1 %v7988_v15  ;;  %3441 = vmatpush.bf16.msra.mxu3 %v6712_v18  ;;  %v7639_v46 = vld [vmem:[#allocation8 + $0x958] sm:$0xf]  ;;  %v7384_v51 = vor.u32 %v9880_v44, %v7383_v41  ;;  %v3210_v18 = vadd.f32 %v3209_v12, %v3197_v11 }
 0x1e3   :  { %3403 = vmatmul.bf16.vlgmr.msra.gmra.mxu0 %v10775_v38  ;;  %v9944_v47 = vld [vmem:[#allocation8 + $0x974] sm:$0xf0] }
 0x1e4   :  { %3447 = vmatpush.bf16.msrb.mxu0 %v7192_v19  ;;  %v7895_v48 = vld [vmem:[#allocation8 + $0xb58] sm:$0xf]  ;;  %3429 = vmatmul.bf16.vlgmr.msra.gmra.mxu2 %v10762_v10  ;;  %v7640_v52 = vor.u32 %v9944_v47, %v7639_v46 }
 0x1e5   :  { %3473 = vmatpush.bf16.msrb.mxu2 %v7704_v22  ;;  %3416 = vmatmul.bf16.vlgmr.msra.gmra.mxu1 %v10771_v34  ;;  %v10008_v49 = vld [vmem:[#allocation8 + $0xb74] sm:$0xf0] }
 0x1e6   :  { %3460 = vmatpush.bf16.msrb.mxu1 %v7448_v21  ;;  %3486 = vmatpush.bf16.msrb.mxu3 %v7960_v25  ;;  %v7095_v53 = vld [vmem:[#allocation8 + $0x518] sm:$0xf]  ;;  %v7896_v56 = vor.u32 %v10008_v49, %v7895_v48  ;;  %v3222_v25 = vpop.f32.mrf.mxu2  ;;  %v3211_v48 = vpop.f32.mrf.mxu1 }
 0x1e7   :  { %3442 = vmatmul.bf16.vlgmr.msra.gmra.mxu3 %v10764_v17  ;;  %v9808_v54 = vld [vmem:[#allocation8 + $0x534] sm:$0xf0]  ;;  %v3223_v28 = vadd.f32 %v3222_v25, %v3210_v18  ;;  %v6617_v48 = vld [vmem:[#allocation8 + $0x178] sm:$0xf0] }
 0x1e8   :  { %3448 = vmatpush.bf16.msrb.mxu0 %v7160_v30  ;;  %v7351_v55 = vld [vmem:[#allocation8 + $0x718] sm:$0xf]  ;;  %v7096_v2 = vor.u32 %v9808_v54, %v7095_v53 }
 0x1e9   :  { %3474 = vmatpush.bf16.msrb.mxu2 %v7672_v33  ;;  %v9872_v57 = vld [vmem:[#allocation8 + $0x734] sm:$0xf0]  ;;  %v10849_v36 = vadd.f32 %v3235_v29, %v3223_v28  ;;  %v9756_v28 = vld [vmem:[#allocation8 + $0x39c] sm:$0xf] }
 0x1ea   :  { %3461 = vmatpush.bf16.msrb.mxu1 %v7416_v1  ;;  %3487 = vmatpush.bf16.msrb.mxu3 %v7928_v42  ;;  %v7607_v58 = vld [vmem:[#allocation8 + $0x918] sm:$0xf]  ;;  %v7352_v4 = vor.u32 %v9872_v57, %v7351_v55  ;;  %v6905_v29 = vld [vmem:[#allocation8 + $0x3b8] sm:$0xf0] }
 0x1eb   :  { %v9936_v59 = vld [vmem:[#allocation8 + $0x934] sm:$0xf0]  ;;  %vm3606_vm3 = vcmp.ge.f32.partialorder %v10849_v36, 0.0 }
 0x1ec   :  { %v7863_v61 = vld [vmem:[#allocation8 + $0xb18] sm:$0xf]  ;;  %3449 = vmatpush.bf16.msrb.mxu0 %v7128_v50  ;;  %v7608_v5 = vor.u32 %v9936_v59, %v7607_v58 }
 0x1ed   :  { %v10000_v63 = vld [vmem:[#allocation8 + $0xb34] sm:$0xf0]  ;;  %3475 = vmatpush.bf16.msrb.mxu2 %v7640_v52 }
 0x1ee   :  { %3462 = vmatpush.bf16.msrb.mxu1 %v7384_v51  ;;  %v7063_v35 = vld [vmem:[#allocation8 + $0x4d8] sm:$0xf]  ;;  %3488 = vmatpush.bf16.msrb.mxu3 %v7896_v56  ;;  %v7864_v13 = vor.u32 %v10000_v63, %v7863_v61  ;;  %v3224_v3 = vpop.f32.mrf.mxu2 }
 0x1ef   :  { %v9800_v6 = vld [vmem:[#allocation8 + $0x4f4] sm:$0xf0]  ;;  %v6841_v3 = vld [vmem:[#allocation8 + $0x338] sm:$0xf0] }
 0x1f0   :  { %v7319_v7 = vld [vmem:[#allocation8 + $0x6d8] sm:$0xf]  ;;  %3450 = vmatpush.bf16.msrb.mxu0 %v7096_v2  ;;  %v7064_v19 = vor.u32 %v9800_v6, %v7063_v35 }
 0x1f1   :  { %v9864_v14 = vld [vmem:[#allocation8 + $0x6f4] sm:$0xf0]  ;;  %3476 = vmatpush.bf16.msrb.mxu2 %v7608_v5 }
 0x1f2   :  { %v7575_v15 = vld [vmem:[#allocation8 + $0x8d8] sm:$0xf]  ;;  %3463 = vmatpush.bf16.msrb.mxu1 %v7352_v4  ;;  %v7320_v21 = vor.u32 %v9864_v14, %v7319_v7  ;;  %3489 = vmatpush.bf16.msrb.mxu3 %v7864_v13  ;;  %v3237_v7 = vpop.f32.mrf.mxu3  ;;  %v9700_v13 = vld [vmem:[#allocation8 + $0x1dc] sm:$0xf] }
 0x1f3   :  { %v9928_v39 = vld [vmem:[#allocation8 + $0x8f4] sm:$0xf0]  ;;  %v3261_v7 = vpop.f32.mrf.mxu1 }
 0x1f4   :  { %v7831_v32 = vld [vmem:[#allocation8 + $0xad8] sm:$0xf]  ;;  %v7576_v22 = vor.u32 %v9928_v39, %v7575_v15  ;;  %3451 = vmatpush.bf16.msrb.mxu0 %v7064_v19  ;;  %v6681_v15 = vld [vmem:[#allocation8 + $0x1f8] sm:$0xf0] }
 0x1f5   :  { %v9992_v16 = vld [vmem:[#allocation8 + $0xaf4] sm:$0xf0]  ;;  %v9764_v39 = vld [vmem:[#allocation8 + $0x3dc] sm:$0xf] }
 0x1f6   :  { %v7031_v23 = vld [vmem:[#allocation8 + $0x498] sm:$0xf]  ;;  %v7832_v43 = vor.u32 %v9992_v16, %v7831_v32  ;;  %3464 = vmatpush.bf16.msrb.mxu1 %v7320_v21  ;;  %3477 = vmatpush.bf16.msrb.mxu2 %v7576_v22  ;;  %v6937_v32 = vld [vmem:[#allocation8 + $0x3f8] sm:$0xf0] }
 0x1f7   :  { %v9792_v45 = vld [vmem:[#allocation8 + $0x4b4] sm:$0xf0]  ;;  %v9828_v19 = vld [vmem:[#allocation8 + $0x5dc] sm:$0xf] }
 0x1f8   :  { %v7287_v24 = vld [vmem:[#allocation8 + $0x698] sm:$0xf]  ;;  %v7032_v33 = vor.u32 %v9792_v45, %v7031_v23  ;;  %3490 = vmatpush.bf16.msrb.mxu3 %v7832_v43  ;;  %v7193_v21 = vld [vmem:[#allocation8 + $0x5f8] sm:$0xf0]  ;;  %v6684_v45 = vor.u32 %v9700_v13, %v6681_v15 }
 0x1f9   :  { %v9856_v26 = vld [vmem:[#allocation8 + $0x6b4] sm:$0xf0]  ;;  %v9668_v15 = vld [vmem:[#allocation8 + $0xdc] sm:$0xf] }
 0x1fa   :  { %v7543_v27 = vld [vmem:[#allocation8 + $0x898] sm:$0xf]  ;;  %v7288_v41 = vor.u32 %v9856_v26, %v7287_v24  ;;  %3452 = vmatpush.bf16.msrb.mxu0 %v7032_v33  ;;  %v6940_v24 = vor.u32 %v9764_v39, %v6937_v32  ;;  %v9692_v26 = vld [vmem:[#allocation8 + $0x19c] sm:$0xf] }
 0x1fb   :  { %v9920_v9 = vld [vmem:[#allocation8 + $0x8b4] sm:$0xf0]  ;;  %v6553_v32 = vld [vmem:[#allocation8 + $0xf8] sm:$0xf0] }
 0x1fc   :  { %v7799_v30 = vld [vmem:[#allocation8 + $0xa98] sm:$0xf]  ;;  %v7544_v42 = vor.u32 %v9920_v9, %v7543_v27  ;;  %3465 = vmatpush.bf16.msrb.mxu1 %v7288_v41  ;;  %v7196_v27 = vor.u32 %v9828_v19, %v7193_v21  ;;  %v6649_v9 = vld [vmem:[#allocation8 + $0x1b8] sm:$0xf0]  ;;  %v6908_v41 = vor.u32 %v9756_v28, %v6905_v29 }
 0x1fd   :  { %v9984_v1 = vld [vmem:[#allocation8 + $0xab4] sm:$0xf0]  ;;  %v6652_v40 = vor.u32 %v9692_v26, %v6649_v9  ;;  %v9796_v19 = vld [vmem:[#allocation8 + $0x4dc] sm:$0xf] }
 0x1fe   :  { %v6999_v44 = vld [vmem:[#allocation8 + $0x458] sm:$0xf]  ;;  %v7800_v49 = vor.u32 %v9984_v1, %v7799_v30  ;;  %3478 = vmatpush.bf16.msrb.mxu2 %v7544_v42  ;;  %v9820_v30 = vld [vmem:[#allocation8 + $0x59c] sm:$0xf] }
 0x1ff   :  { %v9784_v46 = vld [vmem:[#allocation8 + $0x474] sm:$0xf0]  ;;  %v7161_v1 = vld [vmem:[#allocation8 + $0x5b8] sm:$0xf0] }
 0x200   :  { %v7255_v47 = vld [vmem:[#allocation8 + $0x658] sm:$0xf]  ;;  %v7000_v55 = vor.u32 %v9784_v46, %v6999_v44  ;;  %3491 = vmatpush.bf16.msrb.mxu3 %v7800_v49  ;;  %v9684_v46 = vld [vmem:[#allocation8 + $0x15c] sm:$0xf] }
 0x201   :  { %v9848_v50 = vld [vmem:[#allocation8 + $0x674] sm:$0xf0]  ;;  %v9748_v49 = vld [vmem:[#allocation8 + $0x35c] sm:$0xf] }
 0x202   :  { %v7511_v51 = vld [vmem:[#allocation8 + $0x858] sm:$0xf]  ;;  %v7256_v58 = vor.u32 %v9848_v50, %v7255_v47  ;;  %3453 = vmatpush.bf16.msrb.mxu0 %v7000_v55  ;;  %v7164_v47 = vor.u32 %v9820_v30, %v7161_v1  ;;  %v6873_v50 = vld [vmem:[#allocation8 + $0x378] sm:$0xf0]  ;;  %v6620_v55 = vor.u32 %v9684_v46, %v6617_v48 }
 0x203   :  { %v9912_v52 = vld [vmem:[#allocation8 + $0x874] sm:$0xf0]  ;;  %v7065_v21 = vld [vmem:[#allocation8 + $0x4f8] sm:$0xf0] }
 0x204   :  { %v7767_v53 = vld [vmem:[#allocation8 + $0xa58] sm:$0xf]  ;;  %v7512_v59 = vor.u32 %v9912_v52, %v7511_v51  ;;  %3466 = vmatpush.bf16.msrb.mxu1 %v7256_v58  ;;  %v9812_v51 = vld [vmem:[#allocation8 + $0x55c] sm:$0xf]  ;;  %v7068_v9 = vor.u32 %v9796_v19, %v7065_v21 }
 0x205   :  { %v9976_v54 = vld [vmem:[#allocation8 + $0xa74] sm:$0xf0]  ;;  %v7129_v52 = vld [vmem:[#allocation8 + $0x578] sm:$0xf0] }
 0x206   :  { %v6967_v56 = vld [vmem:[#allocation8 + $0x418] sm:$0xf]  ;;  %v7768_v4 = vor.u32 %v9976_v54, %v7767_v53  ;;  %3479 = vmatpush.bf16.msrb.mxu2 %v7512_v59  ;;  %v9676_v58 = vld [vmem:[#allocation8 + $0x11c] sm:$0xf]  ;;  %v623_v59 = vperm.slane %v10836_v60, 4 }
 0x207   :  { %v9776_v57 = vld [vmem:[#allocation8 + $0x434] sm:$0xf0]  ;;  %v9660_v26 = vld [vmem:[#allocation8 + $0x9c] sm:$0xf] }
 0x208   :  { %v7223_v61 = vld [vmem:[#allocation8 + $0x618] sm:$0xf]  ;;  %v6968_v14 = vor.u32 %v9776_v57, %v6967_v56  ;;  %3492 = vmatpush.bf16.msrb.mxu3 %v7768_v4  ;;  %v6876_v56 = vor.u32 %v9748_v49, %v6873_v50  ;;  %v9804_v4 = vld [vmem:[#allocation8 + $0x51c] sm:$0xf] }
 0x209   :  { %v9840_v63 = vld [vmem:[#allocation8 + $0x634] sm:$0xf0]  ;;  %v6521_v28 = vld [vmem:[#allocation8 + $0xb8] sm:$0xf0] }
 0x20a   :  { %v7479_v2 = vld [vmem:[#allocation8 + $0x818] sm:$0xf]  ;;  %v7224_v16 = vor.u32 %v9840_v63, %v7223_v61  ;;  %3454 = vmatpush.bf16.msrb.mxu0 %v6968_v14  ;;  %v7132_v61 = vor.u32 %v9812_v51, %v7129_v52  ;;  %v6585_v63 = vld [vmem:[#allocation8 + $0x138] sm:$0xf0]  ;;  %v6524_v48 = vor.u32 %v9660_v26, %v6521_v28 }
 0x20b   :  { %v9904_v5 = vld [vmem:[#allocation8 + $0x834] sm:$0xf0]  ;;  %v9724_v29 = vld [vmem:[#allocation8 + $0x29c] sm:$0xf] }
 0x20c   :  { %v7735_v35 = vld [vmem:[#allocation8 + $0xa18] sm:$0xf]  ;;  %v7480_v18 = vor.u32 %v9904_v5, %v7479_v2  ;;  %3467 = vmatpush.bf16.msrb.mxu1 %v7224_v16  ;;  %v9740_v2 = vld [vmem:[#allocation8 + $0x31c] sm:$0xf] }
 0x20d   :  { %v9968_v6 = vld [vmem:[#allocation8 + $0xa34] sm:$0xf0]  ;;  %3455 = vmatmul.bf16.vlgmr.msrb.gmra.mxu0 %v10759_v0  ;;  %v7097_v5 = vld [vmem:[#allocation8 + $0x538] sm:$0xf0] }
 0x20e   :  { %v8215_v11 = vld [vmem:[#allocation8 + $0xdd8] sm:$0xf]  ;;  %v7736_v22 = vor.u32 %v9968_v6, %v7735_v35  ;;  %3480 = vmatpush.bf16.msrb.mxu2 %v7480_v18  ;;  %v3248_v6 = vpop.f32.mrf.mxu0  ;;  %v7100_v60 = vor.u32 %v9804_v4, %v7097_v5  ;;  %v9732_v16 = vld [vmem:[#allocation8 + $0x2dc] sm:$0xf] }
 0x20f   :  { %v10088_v12 = vld [vmem:[#allocation8 + $0xdf4] sm:$0xf0]  ;;  %3468 = vmatmul.bf16.vlgmr.msrb.gmra.mxu1 %v10767_v20  ;;  %v3249_v39 = vadd.f32 %v3248_v6, %v623_v59  ;;  %v6809_v18 = vld [vmem:[#allocation8 + $0x2f8] sm:$0xf0] }
 0x210   :  { %v8216_v23 = vor.u32 %v10088_v12, %v8215_v11  ;;  %v8183_v25 = vld [vmem:[#allocation8 + $0xd98] sm:$0xf]  ;;  %3493 = vmatpush.bf16.msrb.mxu3 %v7736_v22  ;;  %3512 = vmatpush.bf16.msra.mxu1 %v6684_v45  ;;  %v6588_v11 = vor.u32 %v9676_v58, %v6585_v63  ;;  %v6844_v12 = vor.u32 %v9740_v2, %v6841_v3  ;;  %v6777_v30 = vld [vmem:[#allocation8 + $0x2b8] sm:$0xf0] }
 0x211   :  { %v10080_v43 = vld [vmem:[#allocation8 + $0xdb4] sm:$0xf0]  ;;  %3481 = vmatmul.bf16.vlgmr.msrb.gmra.mxu2 %v10773_v37  ;;  %v3262_v22 = vadd.f32 %v3261_v7, %v3249_v39  ;;  %v6556_v45 = vor.u32 %v9668_v15, %v6553_v32  ;;  %v6780_v49 = vor.u32 %v9724_v29, %v6777_v30  ;;  %v9652_v52 = vld [vmem:[#allocation8 + $0x5c] sm:$0xf] }
 0x212   :  { %3499 = vmatpush.bf16.msra.mxu0 %v8216_v23  ;;  %v8184_v33 = vor.u32 %v10080_v43, %v8183_v25  ;;  %3525 = vmatpush.bf16.msra.mxu2 %v6940_v24  ;;  %v8151_v42 = vld [vmem:[#allocation8 + $0xd58] sm:$0xf]  ;;  %v6812_v24 = vor.u32 %v9732_v16, %v6809_v18  ;;  %v7001_v58 = vld [vmem:[#allocation8 + $0x478] sm:$0xf0] }
 0x213   :  { %v10072_v44 = vld [vmem:[#allocation8 + $0xd74] sm:$0xf0]  ;;  %3494 = vmatmul.bf16.vlgmr.msrb.gmra.mxu3 %v10775_v38  ;;  %v9644_v4 = vld [vmem:[#allocation8 + $0x1c] sm:$0xf] }
 0x214   :  { %3538 = vmatpush.bf16.msra.mxu3 %v7196_v27  ;;  %v8152_v53 = vor.u32 %v10072_v44, %v8151_v42  ;;  %v8119_v54 = vld [vmem:[#allocation8 + $0xd18] sm:$0xf]  ;;  %3513 = vmatpush.bf16.msra.mxu1 %v6652_v40  ;;  %v3274_v27 = vpop.f32.mrf.mxu2  ;;  %v7033_v40 = vld [vmem:[#allocation8 + $0x4b8] sm:$0xf0] }
 0x215   :  { %v10064_v57 = vld [vmem:[#allocation8 + $0xd34] sm:$0xf0]  ;;  %v3275_v1 = vadd.f32 %v3274_v27, %v3262_v22  ;;  %v6457_v5 = vld [vmem:[#allocation8 + $0x38] sm:$0xf0] }
 0x216   :  { %3500 = vmatpush.bf16.msra.mxu0 %v8184_v33  ;;  %3526 = vmatpush.bf16.msra.mxu2 %v6908_v41  ;;  %v8120_v35 = vor.u32 %v10064_v57, %v8119_v54  ;;  %v8087_v13 = vld [vmem:[#allocation8 + $0xcd8] sm:$0xf]  ;;  %v9788_v33 = vld [vmem:[#allocation8 + $0x49c] sm:$0xf]  ;;  %v3287_v41 = vpop.f32.mrf.mxu3  ;;  %v3250_v44 = vpop.f32.mrf.mxu0  ;;  %v6460_v21 = vor.u32 %v9644_v4, %v6457_v5 }
 0x217   :  { %v10056_v14 = vld [vmem:[#allocation8 + $0xcf4] sm:$0xf0]  ;;  %v10856_v46 = vadd.f32 %v3287_v41, %v3275_v1  ;;  %v6489_v54 = vld [vmem:[#allocation8 + $0x78] sm:$0xf0]  ;;  %v3612_v44 = vmul.f32 0.2, %v10820_v8 }
 0x218   :  { %3539 = vmatpush.bf16.msra.mxu3 %v7164_v47  ;;  %3514 = vmatpush.bf16.msra.mxu1 %v6620_v55  ;;  %v8088_v23 = vor.u32 %v10056_v14, %v8087_v13  ;;  %v8055_v25 = vld [vmem:[#allocation8 + $0xc98] sm:$0xf]  ;;  %v3263_v47 = vpop.f32.mrf.mxu1  ;;  %v9716_v55 = vld [vmem:[#allocation8 + $0x25c] sm:$0xf]  ;;  %v6492_v2 = vor.u32 %v9652_v52, %v6489_v54 }
 0x219   :  { %v10048_v43 = vld [vmem:[#allocation8 + $0xcb4] sm:$0xf0]  ;;  %v9780_v57 = vld [vmem:[#allocation8 + $0x45c] sm:$0xf] }
 0x21a   :  { %3501 = vmatpush.bf16.msra.mxu0 %v8152_v53  ;;  %3527 = vmatpush.bf16.msra.mxu2 %v6876_v56  ;;  %v8056_v42 = vor.u32 %v10048_v43, %v8055_v25  ;;  %v8023_v50 = vld [vmem:[#allocation8 + $0xc58] sm:$0xf]  ;;  %v7036_v53 = vor.u32 %v9788_v33, %v7033_v40  ;;  %v6745_v56 = vld [vmem:[#allocation8 + $0x278] sm:$0xf0]  ;;  %v7004_v7 = vor.u32 %v9780_v57, %v7001_v58 }
 0x21b   :  { %v10040_v51 = vld [vmem:[#allocation8 + $0xc74] sm:$0xf0]  ;;  %v6748_v3 = vor.u32 %v9716_v55, %v6745_v56  ;;  %v6969_v13 = vld [vmem:[#allocation8 + $0x438] sm:$0xf0] }
 0x21c   :  { %3540 = vmatpush.bf16.msra.mxu3 %v7132_v61  ;;  %3515 = vmatpush.bf16.msra.mxu1 %v6588_v11  ;;  %v8024_v59 = vor.u32 %v10040_v51, %v8023_v50  ;;  %v7991_v61 = vld [vmem:[#allocation8 + $0xc18] sm:$0xf]  ;;  %v3276_v6 = vpop.f32.mrf.mxu2  ;;  %v6713_v11 = vld [vmem:[#allocation8 + $0x238] sm:$0xf0] }
 0x21d   :  { %v10032_v63 = vld [vmem:[#allocation8 + $0xc34] sm:$0xf0]  ;;  %v9892_v14 = vld [vmem:[#allocation8 + $0x7dc] sm:$0xf] }
 0x21e   :  { %3502 = vmatpush.bf16.msra.mxu0 %v8120_v35  ;;  %3528 = vmatpush.bf16.msra.mxu2 %v6844_v12  ;;  %v9708_v35 = vld [vmem:[#allocation8 + $0x21c] sm:$0xf]  ;;  %v7992_v32 = vor.u32 %v10032_v63, %v7991_v61  ;;  %v3613_v63 = vmul.f32 0.2, %v10840_v62 }
 0x21f   :  { %v9772_v12 = vld [vmem:[#allocation8 + $0x41c] sm:$0xf]  ;;  %v6716_v22 = vor.u32 %v9708_v35, %v6713_v11 }
 0x220   :  { %3541 = vmatpush.bf16.msra.mxu3 %v7100_v60  ;;  %3516 = vmatpush.bf16.msra.mxu1 %v6556_v45  ;;  %v7449_v15 = vld [vmem:[#allocation8 + $0x7f8] sm:$0xf0]  ;;  %v3289_v60 = vpop.f32.mrf.mxu3 }
 0x221   :  { %v9956_v39 = vld [vmem:[#allocation8 + $0x9dc] sm:$0xf]  ;;  %v7452_v25 = vor.u32 %v9892_v14, %v7449_v15  ;;  %v3620_v60 = vsel %vm3604_vm1, %v10820_v8, %v3612_v44 }
 0x222   :  { %3503 = vmatpush.bf16.msra.mxu0 %v8088_v23  ;;  %3529 = vmatpush.bf16.msra.mxu2 %v6812_v24  ;;  %v7705_v16 = vld [vmem:[#allocation8 + $0x9f8] sm:$0xf0]  ;;  %v6972_v24 = vor.u32 %v9772_v12, %v6969_v13 }
 0x223   :  { %v10020_v18 = vld [vmem:[#allocation8 + $0xbdc] sm:$0xf]  ;;  %v7708_v43 = vor.u32 %v9956_v39, %v7705_v16 }
 0x224   :  { %3542 = vmatpush.bf16.msra.mxu3 %v7068_v9  ;;  %3517 = vmatpush.bf16.msra.mxu1 %v6524_v48  ;;  %v7961_v19 = vld [vmem:[#allocation8 + $0xbf8] sm:$0xf0]  ;;  %v3627_v48 = vlaneseq }
 0x225   :  { %v10084_v23 = vld [vmem:[#allocation8 + $0xddc] sm:$0xf]  ;;  %v7964_v26 = vor.u32 %v10020_v18, %v7961_v19  ;;  %v3300_v18 = vpop.f32.mrf.mxu0  ;;  %v3313_v19 = vpop.f32.mrf.mxu1 }
 0x226   :  { %3504 = vmatpush.bf16.msra.mxu0 %v8056_v42  ;;  %3530 = vmatpush.bf16.msra.mxu2 %v6780_v49  ;;  %v8217_v45 = vld [vmem:[#allocation8 + $0xdf8] sm:$0xf0]  ;;  %v3611_v42 = vmul.f32 0.2, %v10803_v31  ;;  %v3628_v61 = vshrl.u32 %v3627_v48, 7  ;;  %v10868_v4 = vand.u32 127, %v3627_v48 }
 0x227   :  { %v9884_v27 = vld [vmem:[#allocation8 + $0x79c] sm:$0xf]  ;;  %v8220_v29 = vor.u32 %v10084_v23, %v8217_v45 }
 0x228   :  { %3543 = vmatpush.bf16.msra.mxu3 %v7036_v53  ;;  %3518 = vmatpush.bf16.msra.mxu1 %v6492_v2  ;;  %v7417_v9 = vld [vmem:[#allocation8 + $0x7b8] sm:$0xf0]  ;;  %v3619_v14 = vsel %vm3603_vm0, %v10803_v31, %v3611_v42  ;;  %v10873_v15 = vmul.u32 2654435761, %v3628_v61  ;;  %v3641_v39 = vmul.u32 2246822519, %v10868_v4 }
 0x229   :  { %v9948_v28 = vld [vmem:[#allocation8 + $0x99c] sm:$0xf]  ;;  %v7420_v47 = vor.u32 %v9884_v27, %v7417_v9  ;;  %v3633_v31 = vadd.s32 128, %v10868_v4  ;;  %v10890_v9 = vmul.f32 1.4285715, %v3619_v14 }
 0x22a   :  { %3505 = vmatpush.bf16.msra.mxu0 %v8024_v59  ;;  %3531 = vmatpush.bf16.msra.mxu2 %v6748_v3  ;;  %v7673_v30 = vld [vmem:[#allocation8 + $0x9b8] sm:$0xf0]  ;;  %v10888_v27 = vadd.s32 %v3641_v39, %v10873_v15 }
 0x22b   :  { %v10012_v1 = vld [vmem:[#allocation8 + $0xb9c] sm:$0xf]  ;;  %v7676_v49 = vor.u32 %v9948_v28, %v7673_v30 }
 0x22c   :  { %3544 = vmatpush.bf16.msra.mxu3 %v7004_v7  ;;  %v7929_v33 = vld [vmem:[#allocation8 + $0xbb8] sm:$0xf0]  ;;  %3519 = vmatpush.bf16.msra.mxu1 %v6460_v21 }
 0x22d   :  { %v10076_v40 = vld [vmem:[#allocation8 + $0xd9c] sm:$0xf]  ;;  %v7932_v50 = vor.u32 %v10012_v1, %v7929_v33  ;;  %v10892_v1 = vstv %s3657_s12  ;;  %v10894_v33 = vmul.f32 1.4285715, %v3620_v60 }
 0x22e   :  { %3506 = vmatpush.bf16.msra.mxu0 %v7992_v32  ;;  %3532 = vmatpush.bf16.msra.mxu2 %v6716_v22  ;;  %v8185_v41 = vld [vmem:[#allocation8 + $0xdb8] sm:$0xf0]  ;;  %v3621_v32 = vsel %vm3605_vm2, %v10840_v62, %v3613_v63  ;;  %v10908_v63 = vpop.f32.mrf.mxu3 }
 0x22f   :  { %v9876_v51 = vld [vmem:[#allocation8 + $0x75c] sm:$0xf]  ;;  %v8188_v54 = vor.u32 %v10076_v40, %v8185_v41  ;;  %3520 = vmatmul.bf16.vlgmr.msra.gmra.mxu1 %v10762_v10  ;;  %v10896_v40 = vmul.f32 1.4285715, %v3621_v32  ;;  %v3642_v41 = vmul.u32 2246822519, %v3633_v31 }
 0x230   :  { %3545 = vmatpush.bf16.msra.mxu3 %v6972_v24  ;;  %3564 = vmatpush.bf16.msrb.mxu1 %v7708_v43  ;;  %v7385_v52 = vld [vmem:[#allocation8 + $0x778] sm:$0xf0]  ;;  %v3301_v24 = vadd.f32 %v3300_v18, %v10856_v46 }
 0x231   :  { %v9940_v53 = vld [vmem:[#allocation8 + $0x95c] sm:$0xf]  ;;  %3507 = vmatmul.bf16.vlgmr.msra.gmra.mxu0 %v10771_v34  ;;  %3533 = vmatmul.bf16.vlgmr.msra.gmra.mxu2 %v10764_v17  ;;  %v7388_v2 = vor.u32 %v9876_v51, %v7385_v52 }
 0x232   :  { %3551 = vmatpush.bf16.msrb.mxu0 %v7452_v25  ;;  %3577 = vmatpush.bf16.msrb.mxu2 %v7964_v26  ;;  %v7641_v55 = vld [vmem:[#allocation8 + $0x978] sm:$0xf0]  ;;  %v3314_v30 = vadd.f32 %v3313_v19, %v3301_v24  ;;  %v3634_v19 = vadd.s32 256, %v10868_v4 }
 0x233   :  { %v10004_v56 = vld [vmem:[#allocation8 + $0xb5c] sm:$0xf]  ;;  %3546 = vmatmul.bf16.vlgmr.msra.gmra.mxu3 %v10759_v0  ;;  %v7644_v5 = vor.u32 %v9940_v53, %v7641_v55 }
 0x234   :  { %3590 = vmatpush.bf16.msrb.mxu3 %v8220_v29  ;;  %v7897_v57 = vld [vmem:[#allocation8 + $0xb78] sm:$0xf0]  ;;  %3565 = vmatpush.bf16.msrb.mxu1 %v7676_v49 }
 0x235   :  { %v10068_v58 = vld [vmem:[#allocation8 + $0xd5c] sm:$0xf]  ;;  %v7900_v17 = vor.u32 %v10004_v56, %v7897_v57  ;;  %v3659_v56 = vxor.u32 %v10892_v1, %v10888_v27  ;;  %v10903_v57 = vadd.s32 %v3642_v41, %v10873_v15  ;;  %v8471_v41 = vld [vmem:[#allocation11 + $0x1e0] sm:$0xf] }
 0x236   :  { %v8153_v59 = vld [vmem:[#allocation8 + $0xd78] sm:$0xf0]  ;;  %3552 = vmatpush.bf16.msrb.mxu0 %v7420_v47  ;;  %3578 = vmatpush.bf16.msrb.mxu2 %v7932_v50  ;;  %v3326_v50 = vpop.f32.mrf.mxu2 }
 0x237   :  { %v9868_v3 = vld [vmem:[#allocation8 + $0x71c] sm:$0xf]  ;;  %v8156_v0 = vor.u32 %v10068_v58, %v8153_v59  ;;  %v10898_v55 = vadd.f32 %v3326_v50, %v3314_v30  ;;  %v10906_v58 = vmul.f32 0.2, %v10849_v36  ;;  %v3667_v32 = vshrl.u32 %v3659_v56, 16 }
 0x238   :  { %v7353_v35 = vld [vmem:[#allocation8 + $0x738] sm:$0xf0]  ;;  %3591 = vmatpush.bf16.msrb.mxu3 %v8188_v54  ;;  %3566 = vmatpush.bf16.msrb.mxu1 %v7644_v5  ;;  %v10119_v30 = vld [vmem:[#allocation11 + $0xec] sm:$0xf0]  ;;  %v8599_v50 = vld [vmem:[#allocation11 + $0x2e0] sm:$0xf] }
 0x239   :  { %v9932_v6 = vld [vmem:[#allocation8 + $0x91c] sm:$0xf]  ;;  %v7356_v16 = vor.u32 %v9868_v3, %v7353_v35  ;;  %v3302_v35 = vpop.f32.mrf.mxu0  ;;  %vm3607_vm12 = vcmp.ge.f32.partialorder %v10898_v55, 0.0 }
 0x23a   :  { %v7609_v7 = vld [vmem:[#allocation8 + $0x938] sm:$0xf0]  ;;  %3553 = vmatpush.bf16.msrb.mxu0 %v7388_v2  ;;  %3579 = vmatpush.bf16.msrb.mxu2 %v7900_v17  ;;  %v8455_v35 = vld [vmem:[#allocation11 + $0x1c0] sm:$0xf] }
 0x23b   :  { %v9996_v11 = vld [vmem:[#allocation8 + $0xb1c] sm:$0xf]  ;;  %v7612_v21 = vor.u32 %v9932_v6, %v7609_v7  ;;  %v3315_v6 = vpop.f32.mrf.mxu1  ;;  %v3660_v7 = vxor.u32 %v10892_v1, %v10903_v57 }
 0x23c   :  { %v7865_v12 = vld [vmem:[#allocation8 + $0xb38] sm:$0xf0]  ;;  %3592 = vmatpush.bf16.msrb.mxu3 %v8156_v0 }
 0x23d   :  { %v10060_v13 = vld [vmem:[#allocation8 + $0xd1c] sm:$0xf]  ;;  %v7868_v22 = vor.u32 %v9996_v11, %v7865_v12  ;;  %3567 = vmatpush.bf16.msrb.mxu1 %v7612_v21 }
 0x23e   :  { %v8121_v10 = vld [vmem:[#allocation8 + $0xd38] sm:$0xf0]  ;;  %3554 = vmatpush.bf16.msrb.mxu0 %v7356_v16 }
 0x23f   :  { %v9860_v23 = vld [vmem:[#allocation8 + $0x6dc] sm:$0xf]  ;;  %v8124_v62 = vor.u32 %v10060_v13, %v8121_v10  ;;  %3580 = vmatpush.bf16.msrb.mxu2 %v7868_v22 }
 0x240   :  { %v7321_v8 = vld [vmem:[#allocation8 + $0x6f8] sm:$0xf0] }
 0x241   :  { %v9924_v45 = vld [vmem:[#allocation8 + $0x8dc] sm:$0xf]  ;;  %v7324_v46 = vor.u32 %v9860_v23, %v7321_v8  ;;  %3593 = vmatpush.bf16.msrb.mxu3 %v8124_v62  ;;  %v3668_v23 = vshrl.u32 %v3660_v7, 16 }
 0x242   :  { %v7577_v25 = vld [vmem:[#allocation8 + $0x8f8] sm:$0xf0] }
 0x243   :  { %v9988_v43 = vld [vmem:[#allocation8 + $0xadc] sm:$0xf]  ;;  %v7580_v42 = vor.u32 %v9924_v45, %v7577_v25  ;;  %3555 = vmatpush.bf16.msrb.mxu0 %v7324_v46  ;;  %v10913_v46 = vxor.u32 %v3667_v32, %v3659_v56  ;;  %v10211_v32 = vld [vmem:[#allocation11 + $0x3cc] sm:$0xf0] }
 0x244   :  { %v7833_v26 = vld [vmem:[#allocation8 + $0xaf8] sm:$0xf0] }
 0x245   :  { %v10052_v28 = vld [vmem:[#allocation8 + $0xcdc] sm:$0xf]  ;;  %v7836_v44 = vor.u32 %v9988_v43, %v7833_v26  ;;  %3568 = vmatpush.bf16.msrb.mxu1 %v7580_v42  ;;  %v3328_v43 = vpop.f32.mrf.mxu2  ;;  %v10151_v42 = vld [vmem:[#allocation11 + $0x1ec] sm:$0xf0]  ;;  %v3683_v6 = vmul.u32 2146121005, %v10913_v46 }
 0x246   :  { %v8089_v29 = vld [vmem:[#allocation8 + $0xcf8] sm:$0xf0]  ;;  %v10207_v46 = vld [vmem:[#allocation11 + $0x3ac] sm:$0xf0] }
 0x247   :  { %v9852_v47 = vld [vmem:[#allocation8 + $0x69c] sm:$0xf]  ;;  %v8092_v51 = vor.u32 %v10052_v28, %v8089_v29  ;;  %3581 = vmatpush.bf16.msrb.mxu2 %v7836_v44  ;;  %v8343_v29 = vld [vmem:[#allocation11 + $0xe0] sm:$0xf]  ;;  %v3341_v44 = vpop.f32.mrf.mxu3 }
 0x248   :  { %v7289_v48 = vld [vmem:[#allocation8 + $0x6b8] sm:$0xf0] }
 0x249   :  { %v9916_v49 = vld [vmem:[#allocation8 + $0x89c] sm:$0xf]  ;;  %v7292_v2 = vor.u32 %v9852_v47, %v7289_v48  ;;  %3594 = vmatpush.bf16.msrb.mxu3 %v8092_v51  ;;  %v10915_v47 = vxor.u32 %v3668_v23, %v3660_v7  ;;  %v3643_v48 = vmul.u32 2246822519, %v3634_v19  ;;  %v10183_v51 = vld [vmem:[#allocation11 + $0x2ec] sm:$0xf0]  ;;  %v8472_v7 = vor.u32 %v10151_v42, %v8471_v41 }
 0x24a   :  { %v7545_v52 = vld [vmem:[#allocation8 + $0x8b8] sm:$0xf0]  ;;  %v8439_v23 = vld [vmem:[#allocation11 + $0x1a0] sm:$0xf] }
 0x24b   :  { %v9980_v53 = vld [vmem:[#allocation8 + $0xa9c] sm:$0xf]  ;;  %v7548_v0 = vor.u32 %v9916_v49, %v7545_v52  ;;  %3556 = vmatpush.bf16.msrb.mxu0 %v7292_v2  ;;  %v8727_v52 = vld [vmem:[#allocation11 + $0x3e0] sm:$0xf]  ;;  %v10918_v56 = vadd.s32 %v3643_v48, %v10873_v15  ;;  %v3635_v2 = vadd.s32 384, %v10868_v4 }
 0x24c   :  { %v7801_v54 = vld [vmem:[#allocation8 + $0xab8] sm:$0xf0]  ;;  %v8295_v41 = vld [vmem:[#allocation11 + $0x80] sm:$0xf] }
 0x24d   :  { %v10044_v59 = vld [vmem:[#allocation8 + $0xc9c] sm:$0xf]  ;;  %v7804_v11 = vor.u32 %v9980_v53, %v7801_v54  ;;  %3569 = vmatpush.bf16.msrb.mxu1 %v7548_v0  ;;  %v8600_v0 = vor.u32 %v10183_v51, %v8599_v50  ;;  %v3644_v19 = vmul.u32 2246822519, %v3635_v2  ;;  %v8423_v50 = vld [vmem:[#allocation11 + $0x180] sm:$0xf] }
 0x24e   :  { %v8057_v61 = vld [vmem:[#allocation8 + $0xcb8] sm:$0xf0]  ;;  %v10139_v51 = vld [vmem:[#allocation11 + $0x18c] sm:$0xf0] }
 0x24f   :  { %v9844_v3 = vld [vmem:[#allocation8 + $0x65c] sm:$0xf]  ;;  %v8060_v10 = vor.u32 %v10044_v59, %v8057_v61  ;;  %3582 = vmatpush.bf16.msrb.mxu2 %v7804_v11  ;;  %v10215_v59 = vld [vmem:[#allocation11 + $0x3ec] sm:$0xf0]  ;;  %v8327_v61 = vld [vmem:[#allocation11 + $0xc0] sm:$0xf] }
 0x250   :  { %v7257_v5 = vld [vmem:[#allocation8 + $0x678] sm:$0xf0]  ;;  %v10147_v11 = vld [vmem:[#allocation11 + $0x1cc] sm:$0xf0] }
 0x251   :  { %v9908_v17 = vld [vmem:[#allocation8 + $0x85c] sm:$0xf]  ;;  %v7260_v31 = vor.u32 %v9844_v3, %v7257_v5  ;;  %3595 = vmatpush.bf16.msrb.mxu3 %v8060_v10  ;;  %v8344_v5 = vor.u32 %v10119_v30, %v8343_v29  ;;  %v8728_v10 = vor.u32 %v10215_v59, %v8727_v52  ;;  %v10175_v29 = vld [vmem:[#allocation11 + $0x2ac] sm:$0xf0]  ;;  %v8695_v30 = vld [vmem:[#allocation11 + $0x3a0] sm:$0xf] }
 0x252   :  { %v7513_v12 = vld [vmem:[#allocation8 + $0x878] sm:$0xf0]  ;;  %v8696_v2 = vor.u32 %v10207_v46, %v8695_v30 }
 0x253   :  { %v9972_v13 = vld [vmem:[#allocation8 + $0xa5c] sm:$0xf]  ;;  %v7516_v8 = vor.u32 %v9908_v17, %v7513_v12  ;;  %3557 = vmatpush.bf16.msrb.mxu0 %v7260_v31  ;;  %v10115_v17 = vld [vmem:[#allocation11 + $0xcc] sm:$0xf0]  ;;  %v8583_v12 = vld [vmem:[#allocation11 + $0x2c0] sm:$0xf] }
 0x254   :  { %v7769_v14 = vld [vmem:[#allocation8 + $0xa78] sm:$0xf0]  ;;  %v8328_v31 = vor.u32 %v10115_v17, %v8327_v61  ;;  %v8279_v17 = vld [vmem:[#allocation11 + $0x60] sm:$0xf] }
 0x255   :  { %v10036_v39 = vld [vmem:[#allocation8 + $0xc5c] sm:$0xf]  ;;  %v7772_v45 = vor.u32 %v9972_v13, %v7769_v14  ;;  %3570 = vmatpush.bf16.msrb.mxu1 %v7516_v8  ;;  %v3684_v13 = vmul.u32 2146121005, %v10915_v47  ;;  %v3661_v14 = vxor.u32 %v10892_v1, %v10918_v56  ;;  %v3691_v8 = vshrl.u32 %v3683_v6, 15 }
 0x256   :  { %v8025_v60 = vld [vmem:[#allocation8 + $0xc78] sm:$0xf0]  ;;  %v3636_v47 = vadd.s32 512, %v10868_v4 }
 0x257   :  { %v9836_v16 = vld [vmem:[#allocation8 + $0x61c] sm:$0xf]  ;;  %v8028_v26 = vor.u32 %v10036_v39, %v8025_v60  ;;  %3583 = vmatpush.bf16.msrb.mxu2 %v7772_v45  ;;  %v10179_v39 = vld [vmem:[#allocation11 + $0x2cc] sm:$0xf0]  ;;  %v8711_v60 = vld [vmem:[#allocation11 + $0x3c0] sm:$0xf]  ;;  %v10935_v52 = vxor.u32 %v3691_v8, %v3683_v6 }
 0x258   :  { %v7225_v18 = vld [vmem:[#allocation8 + $0x638] sm:$0xf0]  ;;  %v8584_v45 = vor.u32 %v10179_v39, %v8583_v12  ;;  %v8407_v12 = vld [vmem:[#allocation11 + $0x160] sm:$0xf]  ;;  %v8424_v39 = vor.u32 %v10139_v51, %v8423_v50  ;;  %v10163_v51 = vld [vmem:[#allocation11 + $0x24c] sm:$0xf0] }
 0x259   :  { %v9900_v21 = vld [vmem:[#allocation8 + $0x81c] sm:$0xf]  ;;  %v7228_v49 = vor.u32 %v9836_v16, %v7225_v18  ;;  %3596 = vmatpush.bf16.msrb.mxu3 %v8028_v26  ;;  %v8311_v16 = vld [vmem:[#allocation11 + $0xa0] sm:$0xf]  ;;  %v3669_v18 = vshrl.u32 %v3661_v14, 16  ;;  %v10926_v26 = vadd.s32 %v3644_v19, %v10873_v15 }
 0x25a   :  { %v7481_v22 = vld [vmem:[#allocation8 + $0x838] sm:$0xf0]  ;;  %v8663_v8 = vld [vmem:[#allocation11 + $0x360] sm:$0xf] }
 0x25b   :  { %v9964_v24 = vld [vmem:[#allocation8 + $0xa1c] sm:$0xf]  ;;  %v7484_v53 = vor.u32 %v9900_v21, %v7481_v22  ;;  %3558 = vmatpush.bf16.msrb.mxu0 %v7228_v49  ;;  %v8456_v21 = vor.u32 %v10147_v11, %v8455_v35  ;;  %v10111_v22 = vld [vmem:[#allocation11 + $0xac] sm:$0xf0]  ;;  %v3677_v43 = vxor.u32 %v3669_v18, %v3661_v14  ;;  %v3662_v44 = vxor.u32 %v10892_v1, %v10926_v26  ;;  %v8519_v50 = vld [vmem:[#allocation11 + $0x240] sm:$0xf] }
 0x25c   :  { %v7737_v62 = vld [vmem:[#allocation8 + $0xa38] sm:$0xf0]  ;;  %v8312_v48 = vor.u32 %v10111_v22, %v8311_v16  ;;  %v10107_v49 = vld [vmem:[#allocation11 + $0x8c] sm:$0xf0]  ;;  %v10945_v16 = vpop.f32.mrf.mxu1 }
 0x25d   :  { %v10028_v25 = vld [vmem:[#allocation8 + $0xc1c] sm:$0xf]  ;;  %v7740_v54 = vor.u32 %v9964_v24, %v7737_v62  ;;  %3571 = vmatpush.bf16.msrb.mxu1 %v7484_v53  ;;  %v10143_v24 = vld [vmem:[#allocation11 + $0x1ac] sm:$0xf0]  ;;  %v8567_v62 = vld [vmem:[#allocation11 + $0x2a0] sm:$0xf]  ;;  %v8296_v11 = vor.u32 %v10107_v49, %v8295_v41 }
 0x25e   :  { %v7993_v28 = vld [vmem:[#allocation8 + $0xc38] sm:$0xf0]  ;;  %3559 = vmatmul.bf16.vlgmr.msrb.gmra.mxu0 %v10767_v20  ;;  %v3685_v42 = vmul.u32 2146121005, %v3677_v43  ;;  %v8440_v20 = vor.u32 %v10143_v24, %v8439_v23  ;;  %v10171_v53 = vld [vmem:[#allocation11 + $0x28c] sm:$0xf0] }
 0x25f   :  { %v7996_v3 = vor.u32 %v10028_v25, %v7993_v28  ;;  %3584 = vmatpush.bf16.msrb.mxu2 %v7740_v54  ;;  %5325 = vmatpush.bf16.msra.mxu0 %v8344_v5  ;;  %v3692_v25 = vshrl.u32 %v3684_v13, 15  ;;  %v8712_v28 = vor.u32 %v10211_v32, %v8711_v60  ;;  %v3670_v61 = vshrl.u32 %v3662_v44, 16  ;;  %v10103_v35 = vld [vmem:[#allocation11 + $0x6c] sm:$0xf0]  ;;  %v8535_v32 = vld [vmem:[#allocation11 + $0x260] sm:$0xf] }
 0x260   :  { %3572 = vmatmul.bf16.vlgmr.msrb.gmra.mxu1 %v10773_v37  ;;  %v8568_v37 = vor.u32 %v10175_v29, %v8567_v62  ;;  %v3693_v59 = vshrl.u32 %v3685_v42, 15  ;;  %v3637_v5 = vadd.s32 640, %v10868_v4  ;;  %v10135_v14 = vld [vmem:[#allocation11 + $0x16c] sm:$0xf0]  ;;  %v8263_v43 = vld [vmem:[#allocation11 + $0x40] sm:$0xf] }
 0x261   :  { %3597 = vmatpush.bf16.msrb.mxu3 %v7996_v3  ;;  %5338 = vmatpush.bf16.msra.mxu1 %v8472_v7  ;;  %v10937_v54 = vxor.u32 %v3692_v25, %v3684_v13  ;;  %v10203_v3 = vld [vmem:[#allocation11 + $0x38c] sm:$0xf0]  ;;  %v3678_v6 = vxor.u32 %v3670_v61, %v3662_v44  ;;  %v10942_v13 = vpop.f32.mrf.mxu0  ;;  %v8280_v25 = vor.u32 %v10103_v35, %v8279_v17 }
 0x262   :  { %3585 = vmatmul.bf16.vlgmr.msrb.gmra.mxu2 %v10775_v38  ;;  %v8551_v38 = vld [vmem:[#allocation11 + $0x280] sm:$0xf]  ;;  %v10940_v7 = vxor.u32 %v3693_v59, %v3685_v42  ;;  %v3646_v23 = vmul.u32 2246822519, %v3637_v5  ;;  %v8408_v46 = vor.u32 %v10135_v14, %v8407_v12  ;;  %v10131_v44 = vld [vmem:[#allocation11 + $0x14c] sm:$0xf0] }
 0x263   :  { %5351 = vmatpush.bf16.msra.mxu2 %v8600_v0  ;;  %5326 = vmatpush.bf16.msra.mxu0 %v8328_v31  ;;  %v3645_v0 = vmul.u32 2246822519, %v3636_v47  ;;  %v8552_v60 = vor.u32 %v10171_v53, %v8551_v38  ;;  %v3708_v18 = vmul.u32 2221713035, %v10937_v54  ;;  %v3686_v19 = vmul.u32 2146121005, %v3678_v6  ;;  %v10951_v47 = vpop.f32.mrf.mxu2 }
 0x264   :  { %3598 = vmatmul.bf16.vlgmr.msrb.gmra.mxu3 %v10771_v34  ;;  %v8679_v34 = vld [vmem:[#allocation11 + $0x380] sm:$0xf]  ;;  %v3709_v22 = vmul.u32 2221713035, %v10940_v7  ;;  %v3654_v30 = vadd.s32 %v3646_v23, %v10873_v15  ;;  %v10195_v53 = vld [vmem:[#allocation11 + $0x34c] sm:$0xf0]  ;;  %v8520_v6 = vor.u32 %v10163_v51, %v8519_v50 }
 0x265   :  { %5364 = vmatpush.bf16.msra.mxu3 %v8728_v10  ;;  %5339 = vmatpush.bf16.msra.mxu1 %v8456_v21  ;;  %v3707_v10 = vmul.u32 2221713035, %v10935_v52  ;;  %v8680_v31 = vor.u32 %v10203_v3, %v8679_v34  ;;  %v10167_v21 = vld [vmem:[#allocation11 + $0x26c] sm:$0xf0]  ;;  %v3694_v24 = vshrl.u32 %v3686_v19, 15  ;;  %v3653_v62 = vadd.s32 %v3645_v0, %v10873_v15  ;;  %v10954_v52 = vpop.f32.mrf.mxu3  ;;  %v10958_v23 = vld [vmem:[#allocation10] sm:$0xff] }
 0x266   :  { %v8536_v41 = vor.u32 %v10167_v21, %v8535_v32  ;;  %v8391_v42 = vld [vmem:[#allocation11 + $0x140] sm:$0xf]  ;;  %v10095_v34 = vld [vmem:[#allocation11 + $0x2c] sm:$0xf0]  ;;  %v3664_v35 = vxor.u32 %v10892_v1, %v3654_v30 }
 0x267   :  { %5352 = vmatpush.bf16.msra.mxu2 %v8584_v45  ;;  %5327 = vmatpush.bf16.msra.mxu0 %v8312_v48  ;;  %v10199_v45 = vld [vmem:[#allocation11 + $0x36c] sm:$0xf0]  ;;  %v3715_v29 = vshrl.u32 %v3707_v10, 16  ;;  %v3716_v48 = vshrl.u32 %v3708_v18, 16  ;;  %v8647_v38 = vld [vmem:[#allocation11 + $0x340] sm:$0xf]  ;;  %v3663_v59 = vxor.u32 %v10892_v1, %v3653_v62  ;;  %v8392_v7 = vor.u32 %v10131_v44, %v8391_v42 }
 0x268   :  { %v8664_v49 = vor.u32 %v10199_v45, %v8663_v8  ;;  %v8375_v3 = vld [vmem:[#allocation11 + $0x120] sm:$0xf]  ;;  %v10127_v0 = vld [vmem:[#allocation11 + $0x12c] sm:$0xf0] }
 0x269   :  { %5365 = vmatpush.bf16.msra.mxu3 %v8712_v28  ;;  %5340 = vmatpush.bf16.msra.mxu1 %v8440_v20  ;;  %v10099_v28 = vld [vmem:[#allocation11 + $0x4c] sm:$0xf0]  ;;  %v3702_v20 = vxor.u32 %v3694_v24, %v3686_v19  ;;  %v3723_v5 = vxor.u32 %v3715_v29, %v3707_v10  ;;  %v3354_v17 = vpop.f32.mrf.mxu0  ;;  %v3724_v12 = vxor.u32 %v3716_v48, %v3708_v18  ;;  %v8631_v19 = vld [vmem:[#allocation11 + $0x320] sm:$0xf]  ;;  %v624_v10 = vperm.slane %v10958_v23, 5 }
 0x26a   :  { %v8264_v61 = vor.u32 %v10099_v28, %v8263_v43  ;;  %v10159_v32 = vld [vmem:[#allocation11 + $0x22c] sm:$0xf0]  ;;  %v8231_v8 = vld [vmem:[#allocation11] sm:$0xf]  ;;  %v3671_v62 = vshrl.u32 %v3663_v59, 16  ;;  %v3672_v29 = vshrl.u32 %v3664_v35, 16  ;;  %v8376_v30 = vor.u32 %v10127_v0, %v8375_v3 }
 0x26b   :  { %5353 = vmatpush.bf16.msra.mxu2 %v8568_v37  ;;  %5328 = vmatpush.bf16.msra.mxu0 %v8296_v11  ;;  %v3717_v37 = vshrl.u32 %v3709_v22, 16  ;;  %v3710_v54 = vmul.u32 2221713035, %v3702_v20  ;;  %v8503_v11 = vld [vmem:[#allocation11 + $0x220] sm:$0xf]  ;;  %v8221_v28 = vxor.u32 2147483648, %v3723_v5  ;;  %v3380_v44 = vpop.f32.mrf.mxu2  ;;  %v3622_v48 = vsel %vm3606_vm3, %v10849_v36, %v10906_v58 }
 0x26c   :  { %v10091_v45 = vld [vmem:[#allocation11 + $0xc] sm:$0xf0]  ;;  %v8359_v43 = vld [vmem:[#allocation11 + $0x100] sm:$0xf]  ;;  %v8222_v42 = vxor.u32 2147483648, %v3724_v12  ;;  %v10972_v36 = vxor.u32 %v3672_v29, %v3664_v35 }
 0x26d   :  { %5366 = vmatpush.bf16.msra.mxu3 %v8696_v2  ;;  %5341 = vmatpush.bf16.msra.mxu1 %v8424_v39  ;;  %v8247_v2 = vld [vmem:[#allocation11 + $0x20] sm:$0xf]  ;;  %v3718_v14 = vshrl.u32 %v3710_v54, 16  ;;  %v3367_v39 = vpop.f32.mrf.mxu1  ;;  %v3725_v21 = vxor.u32 %v3717_v37, %v3709_v22  ;;  %v10123_v18 = vld [vmem:[#allocation11 + $0x10c] sm:$0xf0]  ;;  %v3393_v37 = vpop.f32.mrf.mxu3 }
 0x26e   :  { %v10155_v22 = vld [vmem:[#allocation11 + $0x20c] sm:$0xf0]  ;;  %v8983_v3 = vld [vmem:[#allocation11 + $0x5e0] sm:$0xf]  ;;  %vm10968_vm4 = vcmp.ge.s32.totalorder %v8221_v28, 3435973836 }
 0x26f   :  { %5354 = vmatpush.bf16.msra.mxu2 %v8552_v60  ;;  %5329 = vmatpush.bf16.msra.mxu0 %v8280_v25  ;;  %v8648_v60 = vor.u32 %v10195_v53, %v8647_v38  ;;  %v3726_v24 = vxor.u32 %v3718_v14, %v3710_v54  ;;  %v8248_v25 = vor.u32 %v10095_v34, %v8247_v2  ;;  %v10187_v50 = vld [vmem:[#allocation11 + $0x30c] sm:$0xf0]  ;;  %v8223_v51 = vxor.u32 2147483648, %v3725_v21  ;;  %v8855_v53 = vld [vmem:[#allocation11 + $0x4e0] sm:$0xf]  ;;  %vm10982_vm7 = vmpackc.low %vm10968_vm4, %vm10968_vm4 }
 0x270   :  { %v3340_v38 = vadd.f32 %v10908_v63, %v624_v10  ;;  %v10247_v54 = vld [vmem:[#allocation11 + $0x4ec] sm:$0xf0]  ;;  %v10966_v2 = vxor.u32 %v3671_v62, %v3663_v59  ;;  %v8232_v34 = vor.u32 %v10091_v45, %v8231_v8  ;;  %v3758_v58 = vmul.f32 1.4285715, %v3622_v48  ;;  %v9111_v12 = vld [vmem:[#allocation11 + $0x6e0] sm:$0xf] }
 0x271   :  { %5367 = vmatpush.bf16.msra.mxu3 %v8680_v31  ;;  %5342 = vmatpush.bf16.msra.mxu1 %v8408_v46  ;;  %v10191_v31 = vld [vmem:[#allocation11 + $0x32c] sm:$0xf0]  ;;  %v8504_v46 = vor.u32 %v10159_v32, %v8503_v11  ;;  %vm3736_vm5 = vcmp.ge.s32.totalorder %v8222_v42, 3435973836  ;;  %v8856_v0 = vor.u32 %v10247_v54, %v8855_v53  ;;  %vm10974_vm6 = vcmp.ge.s32.totalorder %v8223_v51, 3435973836 }
 0x272   :  { %v8632_v20 = vor.u32 %v10191_v31, %v8631_v19  ;;  %v10279_v5 = vld [vmem:[#allocation11 + $0x5ec] sm:$0xf0]  ;;  %v3353_v39 = vadd.f32 %v10942_v13, %v3340_v38  ;;  %v3687_v31 = vmul.u32 2146121005, %v10966_v2  ;;  %vm10991_vm9 = vmpackc.low %vm3736_vm5, %vm3736_vm5  ;;  %v8967_v13 = vld [vmem:[#allocation11 + $0x5c0] sm:$0xf]  ;;  %v10998_v45 = vpack.c.bf16 %v10890_v9, %v10890_v9 }
 0x273   :  { %5355 = vmatpush.bf16.msra.mxu2 %v8536_v41  ;;  %5330 = vmatpush.bf16.msra.mxu0 %v8264_v61  ;;  %v8487_v41 = vld [vmem:[#allocation11 + $0x200] sm:$0xf]  ;;  %v8224_v61 = vxor.u32 2147483648, %v3726_v24  ;;  %v10311_v14 = vld [vmem:[#allocation11 + $0x6ec] sm:$0xf0]  ;;  %v8984_v35 = vor.u32 %v10279_v5, %v8983_v3  ;;  %vm11003_vm10 = vmpackc.low %vm10974_vm6, %vm10974_vm6  ;;  %v3404_v3 = vpop.f32.mrf.mxu0 }
 0x274   :  { %v8488_v63 = vor.u32 %v10155_v22, %v8487_v41  ;;  %v10243_v19 = vld [vmem:[#allocation11 + $0x4cc] sm:$0xf0]  ;;  %v3688_v8 = vmul.u32 2146121005, %v10972_v36  ;;  %v9112_v62 = vor.u32 %v10311_v14, %v9111_v12  ;;  %v9095_v28 = vld [vmem:[#allocation11 + $0x6c0] sm:$0xf] }
 0x275   :  { %5368 = vmatpush.bf16.msra.mxu3 %v8664_v49  ;;  %5343 = vmatpush.bf16.msra.mxu1 %v8392_v7  ;;  %v8615_v49 = vld [vmem:[#allocation11 + $0x300] sm:$0xf]  ;;  %v8360_v7 = vor.u32 %v10123_v18, %v8359_v43  ;;  %vm10986_vm8 = vcmp.ge.s32.totalorder %v8224_v61, 3435973836  ;;  %v10275_v10 = vld [vmem:[#allocation11 + $0x5cc] sm:$0xf0]  ;;  %v11013_v43 = vpack.c.bf16 %v10896_v40, %v10896_v40  ;;  %v3417_v36 = vpop.f32.mrf.mxu1 }
 0x276   :  { %v8616_v59 = vor.u32 %v10187_v50, %v8615_v49  ;;  %vm11018_vm11 = vmpackc.low %vm10986_vm8, %vm10986_vm8  ;;  %v10307_v29 = vld [vmem:[#allocation11 + $0x6cc] sm:$0xf0]  ;;  %v8968_v40 = vor.u32 %v10275_v10, %v8967_v13  ;;  %v3695_v22 = vshrl.u32 %v3687_v31, 15  ;;  %v8951_v42 = vld [vmem:[#allocation11 + $0x5a0] sm:$0xf] }
 0x277   :  { %5356 = vmatpush.bf16.msra.mxu2 %v8520_v6  ;;  %5331 = vmatpush.bf16.msra.mxu0 %v8248_v25  ;;  %v8839_v6 = vld [vmem:[#allocation11 + $0x4c0] sm:$0xf]  ;;  %v11009_v25 = vpack.c.bf16 %v10894_v33, %v10894_v33  ;;  %v3366_v33 = vadd.f32 %v10945_v16, %v3353_v39  ;;  %v10239_v41 = vld [vmem:[#allocation11 + $0x4ac] sm:$0xf0]  ;;  %v3696_v16 = vshrl.u32 %v3688_v8, 15  ;;  %v9096_v48 = vor.u32 %v10307_v29, %v9095_v28 }
 0x278   :  { %v8840_v18 = vor.u32 %v10243_v19, %v8839_v6  ;;  %v10271_v44 = vld [vmem:[#allocation11 + $0x5ac] sm:$0xf0]  ;;  %v9079_v49 = vld [vmem:[#allocation11 + $0x6a0] sm:$0xf]  ;;  %v3703_v54 = vxor.u32 %v3695_v22, %v3687_v31  ;;  %v3615_v39 = vmul.f32 0.2, %v10898_v55  ;;  %v11044_v22 = vpop.f32.mrf.mxu3 }
 0x279   :  { %5369 = vmatpush.bf16.msra.mxu3 %v8648_v60  ;;  %5344 = vmatpush.bf16.msra.mxu1 %v8376_v30  ;;  %v11022_v30 = vpack.c.bf16 %v3758_v58, %v3758_v58  ;;  %v10303_v50 = vld [vmem:[#allocation11 + $0x6ac] sm:$0xf0]  ;;  %v3379_v51 = vadd.f32 %v10951_v47, %v3366_v33  ;;  %v8952_v37 = vor.u32 %v10271_v44, %v8951_v42  ;;  %v8807_v38 = vld [vmem:[#allocation11 + $0x480] sm:$0xf]  ;;  %v11041_v33 = vpop.f32.mrf.mxu2  ;;  %v10234_v60 = vld [vmem:[#allocation11 + $0x48c] sm:$0xf] }
 0x27a   :  { %v10235_v53 = vld [vmem:[#allocation11 + $0x48c] sm:$0xf0]  ;;  %v8935_v61 = vld [vmem:[#allocation11 + $0x580] sm:$0xf]  ;;  %v9080_v5 = vor.u32 %v10303_v50, %v9079_v49  ;;  %v10266_v21 = vld [vmem:[#allocation11 + $0x58c] sm:$0xf] }
 0x27b   :  { %5357 = vmatpush.bf16.msra.mxu2 %v8504_v46  ;;  %5332 = vmatpush.bf16.msra.mxu0 %v8232_v34  ;;  %v8823_v46 = vld [vmem:[#allocation11 + $0x4a0] sm:$0xf]  ;;  %v10267_v2 = vld [vmem:[#allocation11 + $0x58c] sm:$0xf0]  ;;  %v3704_v34 = vxor.u32 %v3696_v16, %v3688_v8  ;;  %v8808_v17 = vor.u32 %v10235_v53, %v8807_v38  ;;  %v3406_v42 = vpop.f32.mrf.mxu0 }
 0x27c   :  { %v9063_v58 = vld [vmem:[#allocation11 + $0x680] sm:$0xf]  ;;  %v8936_v47 = vor.u32 %v10267_v2, %v8935_v61  ;;  %v10263_v12 = vld [vmem:[#allocation11 + $0x56c] sm:$0xf0] }
 0x27d   :  { %5370 = vmatpush.bf16.msra.mxu3 %v8632_v20  ;;  %5345 = vmatpush.bf16.msra.mxu1 %v8360_v7  ;;  %v8824_v20 = vor.u32 %v10239_v41, %v8823_v46  ;;  %v10299_v7 = vld [vmem:[#allocation11 + $0x68c] sm:$0xf0]  ;;  %v8791_v6 = vld [vmem:[#allocation11 + $0x460] sm:$0xf]  ;;  %v3712_v14 = vmul.u32 2221713035, %v3704_v34 }
 0x27e   :  { %9255 = vmatmul.msk.bf16.vlgmr.msra.gmra.mxu0 %vm10982_vm7, %v10998_v45  ;;  %v8919_v11 = vld [vmem:[#allocation11 + $0x560] sm:$0xf]  ;;  %v9064_v32 = vor.u32 %v10299_v7, %v9063_v58  ;;  %v10295_v13 = vld [vmem:[#allocation11 + $0x66c] sm:$0xf0]  ;;  %v3638_v7 = vadd.s32 768, %v10868_v4 }
 0x27f   :  { %5358 = vmatpush.bf16.msra.mxu2 %v8488_v63  ;;  %5377 = vmatpush.bf16.msrb.mxu0 %v8856_v0  ;;  %v3392_v63 = vadd.f32 %v10954_v52, %v3379_v51  ;;  %v3711_v0 = vmul.u32 2221713035, %v3703_v54  ;;  %v9047_v31 = vld [vmem:[#allocation11 + $0x660] sm:$0xf]  ;;  %v8920_v52 = vor.u32 %v10263_v12, %v8919_v11  ;;  %v10227_v8 = vld [vmem:[#allocation11 + $0x44c] sm:$0xf0] }
 0x280   :  { %9258 = vmatmul.msk.bf16.vlgmr.msra.gmra.mxu1 %vm10991_vm9, %v11009_v25  ;;  %v8775_v10 = vld [vmem:[#allocation11 + $0x440] sm:$0xf]  ;;  %v10259_v28 = vld [vmem:[#allocation11 + $0x54c] sm:$0xf0]  ;;  %v3720_v29 = vshrl.u32 %v3712_v14, 16  ;;  %v9048_v41 = vor.u32 %v10295_v13, %v9047_v31 }
 0x281   :  { %5371 = vmatpush.bf16.msra.mxu3 %v8616_v59  ;;  %5390 = vmatpush.bf16.msrb.mxu1 %v8984_v35  ;;  %v10231_v59 = vld [vmem:[#allocation11 + $0x46c] sm:$0xf0]  ;;  %v3405_v35 = vadd.f32 %v3404_v3, %v3392_v63  ;;  %v8776_v44 = vor.u32 %v10227_v8, %v8775_v10  ;;  %v9031_v16 = vld [vmem:[#allocation11 + $0x640] sm:$0xf]  ;;  %v10149_v11 = vld [vmem:[#allocation11 + $0x1e4] sm:$0xf] }
 0x282   :  { %9261 = vmatmul.msk.bf16.vlgmr.msra.gmra.mxu2 %vm11003_vm10, %v11013_v43  ;;  %v8792_v19 = vor.u32 %v10231_v59, %v8791_v6  ;;  %v8759_v50 = vld [vmem:[#allocation11 + $0x420] sm:$0xf]  ;;  %v10223_v51 = vld [vmem:[#allocation11 + $0x42c] sm:$0xf0]  ;;  %v10117_v6 = vld [vmem:[#allocation11 + $0xe4] sm:$0xf] }
 0x283   :  { %5403 = vmatpush.bf16.msrb.mxu2 %v9112_v62  ;;  %5378 = vmatpush.bf16.msrb.mxu0 %v8840_v18  ;;  %v3719_v62 = vshrl.u32 %v3711_v0, 16  ;;  %v8903_v18 = vld [vmem:[#allocation11 + $0x540] sm:$0xf]  ;;  %v3418_v46 = vadd.f32 %v3417_v36, %v3405_v35  ;;  %v10255_v54 = vld [vmem:[#allocation11 + $0x52c] sm:$0xf0] }
 0x284   :  { %9264 = vmatmul.msk.bf16.vlgmr.msra.gmra.mxu3 %vm11018_vm11, %v11022_v30  ;;  %v8904_v49 = vor.u32 %v10259_v28, %v8903_v18  ;;  %v8887_v53 = vld [vmem:[#allocation11 + $0x520] sm:$0xf]  ;;  %v10219_v34 = vld [vmem:[#allocation11 + $0x40c] sm:$0xf0]  ;;  %v8473_v35 = vld [vmem:[#allocation11 + $0x1f0] sm:$0xf0] }
 0x285   :  { %5391 = vmatpush.bf16.msrb.mxu1 %v8968_v40  ;;  %v3623_v40 = vsel %vm3607_vm12, %v10898_v55, %v3615_v39  ;;  %v3728_v55 = vxor.u32 %v3720_v29, %v3712_v14  ;;  %v3616_v61 = vmul.f32 0.2, %v3418_v46  ;;  %v8743_v2 = vld [vmem:[#allocation11 + $0x400] sm:$0xf]  ;;  %vm3608_vm13 = vcmp.ge.f32.partialorder %v3418_v46, 0.0  ;;  %v3432_v14 = vpop.f32.mrf.mxu2 }
 0x286   :  { %v3759_v38 = vmul.f32 1.4285715, %v3623_v40  ;;  %v9015_v36 = vld [vmem:[#allocation11 + $0x620] sm:$0xf]  ;;  %v10287_v58 = vld [vmem:[#allocation11 + $0x62c] sm:$0xf0]  ;;  %v8888_v63 = vor.u32 %v10255_v54, %v8887_v53 }
 0x287   :  { %5404 = vmatpush.bf16.msrb.mxu2 %v9096_v48  ;;  %5379 = vmatpush.bf16.msrb.mxu0 %v8824_v20  ;;  %v10291_v48 = vld [vmem:[#allocation11 + $0x64c] sm:$0xf0]  ;;  %v3419_v20 = vpop.f32.mrf.mxu1  ;;  %v8226_v12 = vxor.u32 2147483648, %v3728_v55  ;;  %v3624_v39 = vsel %vm3608_vm13, %v3418_v46, %v3616_v61  ;;  %v8999_v31 = vld [vmem:[#allocation11 + $0x600] sm:$0xf] }
 0x288   :  { %v9032_v3 = vor.u32 %v10291_v48, %v9031_v16  ;;  %v3647_v13 = vmul.u32 2246822519, %v3638_v7  ;;  %v10113_v10 = vld [vmem:[#allocation11 + $0xc4] sm:$0xf]  ;;  %v10283_v8 = vld [vmem:[#allocation11 + $0x60c] sm:$0xf0]  ;;  %v11057_v61 = vpack.c.bf16 %v3759_v38, %v3759_v38 }
 0x289   :  { %5392 = vmatpush.bf16.msrb.mxu1 %v8952_v37  ;;  %v3727_v37 = vxor.u32 %v3719_v62, %v3711_v0  ;;  %v8345_v0 = vld [vmem:[#allocation11 + $0xf0] sm:$0xf0]  ;;  %v9239_v62 = vld [vmem:[#allocation11 + $0x7e0] sm:$0xf]  ;;  %v10343_v18 = vld [vmem:[#allocation11 + $0x7ec] sm:$0xf0] }
 0x28a   :  { %v8348_v29 = vor.u32 %v10117_v6, %v8345_v0  ;;  %v10181_v40 = vld [vmem:[#allocation11 + $0x2e4] sm:$0xf]  ;;  %v9240_v42 = vor.u32 %v10343_v18, %v9239_v62  ;;  %v3760_v46 = vmul.f32 1.4285715, %v3624_v39  ;;  %vm11048_vm15 = vcmp.ge.s32.totalorder %v8226_v12, 3435973836  ;;  %v11075_v16 = vpop.f32.mrf.mxu0 }
 0x28b   :  { %5405 = vmatpush.bf16.msrb.mxu2 %v9080_v5  ;;  %5380 = vmatpush.bf16.msrb.mxu0 %v8808_v17  ;;  %v8760_v5 = vor.u32 %v10223_v51, %v8759_v50  ;;  %v8871_v17 = vld [vmem:[#allocation11 + $0x500] sm:$0xf]  ;;  %v8225_v59 = vxor.u32 2147483648, %v3727_v37  ;;  %v8329_v48 = vld [vmem:[#allocation11 + $0xd0] sm:$0xf0]  ;;  %v9000_v50 = vor.u32 %v10283_v8, %v8999_v31  ;;  %v3655_v51 = vadd.s32 %v3647_v13, %v10873_v15  ;;  %vm11062_vm1 = vmpackc.low %vm11048_vm15, %vm11048_vm15 }
 0x28c   :  { %v10145_v20 = vld [vmem:[#allocation11 + $0x1c4] sm:$0xf]  ;;  %5416 = vmatpush.bf16.msrb.mxu3 %v9240_v42  ;;  %v9223_v54 = vld [vmem:[#allocation11 + $0x7c0] sm:$0xf]  ;;  %v10339_v55 = vld [vmem:[#allocation11 + $0x7cc] sm:$0xf0] }
 0x28d   :  { %5393 = vmatpush.bf16.msrb.mxu1 %v8936_v47  ;;  %v10251_v47 = vld [vmem:[#allocation11 + $0x50c] sm:$0xf0]  ;;  %vm3745_vm14 = vcmp.ge.s32.totalorder %v8225_v59, 3435973836  ;;  %v10109_v7 = vld [vmem:[#allocation11 + $0xa4] sm:$0xf]  ;;  %v3665_v0 = vxor.u32 %v10892_v1, %v3655_v51 }
 0x28e   :  { %v8872_v28 = vor.u32 %v10251_v47, %v8871_v17  ;;  %vm11053_vm0 = vmpackc.low %vm3745_vm14, %vm3745_vm14  ;;  %v9224_v17 = vor.u32 %v10339_v55, %v9223_v54  ;;  %v8313_v38 = vld [vmem:[#allocation11 + $0xb0] sm:$0xf0]  ;;  %v9207_v6 = vld [vmem:[#allocation11 + $0x7a0] sm:$0xf]  ;;  %v625_v51 = vperm.slane %v10958_v23, 6 }
 0x28f   :  { %5406 = vmatpush.bf16.msrb.mxu2 %v9064_v32  ;;  %5381 = vmatpush.bf16.msrb.mxu0 %v8792_v19  ;;  %v9016_v32 = vor.u32 %v10287_v58, %v9015_v36  ;;  %v3445_v19 = vpop.f32.mrf.mxu3  ;;  %v11066_v36 = vpack.c.bf16 %v3760_v46, %v3760_v46  ;;  %v8441_v47 = vld [vmem:[#allocation11 + $0x1b0] sm:$0xf0]  ;;  %v10335_v59 = vld [vmem:[#allocation11 + $0x7ac] sm:$0xf0]  ;;  %v8316_v12 = vor.u32 %v10109_v7, %v8313_v38  ;;  %v10173_v14 = vld [vmem:[#allocation11 + $0x2a4] sm:$0xf] }
 0x290   :  { %v8569_v39 = vld [vmem:[#allocation11 + $0x2b0] sm:$0xf0]  ;;  %5417 = vmatpush.bf16.msrb.mxu3 %v9224_v17  ;;  %v10105_v19 = vld [vmem:[#allocation11 + $0x84] sm:$0xf]  ;;  %v9191_v62 = vld [vmem:[#allocation11 + $0x780] sm:$0xf] }
 0x291   :  { %5394 = vmatpush.bf16.msrb.mxu1 %v8920_v52  ;;  %v8744_v52 = vor.u32 %v10219_v34, %v8743_v2  ;;  %v8332_v34 = vor.u32 %v10113_v10, %v8329_v48  ;;  %v8297_v31 = vld [vmem:[#allocation11 + $0x90] sm:$0xf0]  ;;  %v10137_v13 = vld [vmem:[#allocation11 + $0x184] sm:$0xf]  ;;  %v3673_v10 = vshrl.u32 %v3665_v0, 16  ;;  %v8572_v8 = vor.u32 %v10173_v14, %v8569_v39 }
 0x292   :  { %v10331_v18 = vld [vmem:[#allocation11 + $0x78c] sm:$0xf0]  ;;  %v10101_v46 = vld [vmem:[#allocation11 + $0x64] sm:$0xf]  ;;  %v9175_v54 = vld [vmem:[#allocation11 + $0x760] sm:$0xf] }
 0x293   :  { %5407 = vmatpush.bf16.msrb.mxu2 %v9048_v41  ;;  %5382 = vmatpush.bf16.msrb.mxu0 %v8776_v44  ;;  %v8601_v41 = vld [vmem:[#allocation11 + $0x2f0] sm:$0xf0]  ;;  %v8476_v44 = vor.u32 %v10149_v11, %v8473_v35  ;;  %v9208_v35 = vor.u32 %v10335_v59, %v9207_v6  ;;  %v10133_v48 = vld [vmem:[#allocation11 + $0x164] sm:$0xf]  ;;  %v10327_v55 = vld [vmem:[#allocation11 + $0x76c] sm:$0xf0] }
 0x294   :  { %v8604_v53 = vor.u32 %v10181_v40, %v8601_v41  ;;  %v8553_v40 = vld [vmem:[#allocation11 + $0x290] sm:$0xf0]  ;;  %v9192_v41 = vor.u32 %v10331_v18, %v9191_v62  ;;  %v11080_v6 = vpop.f32.mrf.mxu2  ;;  %v9159_v59 = vld [vmem:[#allocation11 + $0x740] sm:$0xf]  ;;  %v3458_v18 = vpop.f32.mrf.mxu0  ;;  %v9389_v9 = vld [vmem:[#allocation14 + $0x48] sm:$0xf0] }
 0x295   :  { %5395 = vmatpush.bf16.msrb.mxu1 %v8904_v49  ;;  %v8457_v49 = vld [vmem:[#allocation11 + $0x1d0] sm:$0xf0]  ;;  %5418 = vmatpush.bf16.msrb.mxu3 %v9208_v35  ;;  %v10093_v35 = vld [vmem:[#allocation11 + $0x24] sm:$0xf] }
 0x296   :  { %v8460_v58 = vor.u32 %v10145_v20, %v8457_v49  ;;  %v8409_v20 = vld [vmem:[#allocation11 + $0x170] sm:$0xf0]  ;;  %v11077_v49 = vpop.f32.mrf.mxu1  ;;  %v10273_v18 = vld [vmem:[#allocation11 + $0x5c4] sm:$0xf] }
 0x297   :  { %5408 = vmatpush.bf16.msrb.mxu2 %v9032_v3  ;;  %5383 = vmatpush.bf16.msrb.mxu0 %v8760_v5  ;;  %v10177_v3 = vld [vmem:[#allocation11 + $0x2c4] sm:$0xf]  ;;  %v8585_v5 = vld [vmem:[#allocation11 + $0x2d0] sm:$0xf0]  ;;  %v8412_v7 = vor.u32 %v10133_v48, %v8409_v20 }
 0x298   :  { %v8588_v11 = vor.u32 %v10177_v3, %v8585_v5  ;;  %v10097_v3 = vld [vmem:[#allocation11 + $0x44] sm:$0xf]  ;;  %v8537_v17 = vld [vmem:[#allocation11 + $0x270] sm:$0xf0] }
 0x299   :  { %5396 = vmatpush.bf16.msrb.mxu1 %v8888_v63  ;;  %v10141_v63 = vld [vmem:[#allocation11 + $0x1a4] sm:$0xf]  ;;  %5419 = vmatpush.bf16.msrb.mxu3 %v9192_v41  ;;  %v8265_v38 = vld [vmem:[#allocation11 + $0x50] sm:$0xf0]  ;;  %v10319_v41 = vld [vmem:[#allocation11 + $0x72c] sm:$0xf0] }
 0x29a   :  { %v10165_v5 = vld [vmem:[#allocation11 + $0x264] sm:$0xf]  ;;  %v8268_v39 = vor.u32 %v10097_v3, %v8265_v38  ;;  %v8377_v62 = vld [vmem:[#allocation11 + $0x130] sm:$0xf0] }
 0x29b   :  { %5409 = vmatpush.bf16.msrb.mxu2 %v9016_v32  ;;  %5384 = vmatpush.bf16.msrb.mxu0 %v8744_v52  ;;  %v8444_v32 = vor.u32 %v10141_v63, %v8441_v47  ;;  %v8425_v52 = vld [vmem:[#allocation11 + $0x190] sm:$0xf0]  ;;  %v10129_v63 = vld [vmem:[#allocation11 + $0x144] sm:$0xf]  ;;  %v8540_v14 = vor.u32 %v10165_v5, %v8537_v17 }
 0x29c   :  { %v8428_v42 = vor.u32 %v10137_v13, %v8425_v52  ;;  %v8393_v47 = vld [vmem:[#allocation11 + $0x150] sm:$0xf0]  ;;  %v3431_v13 = vadd.f32 %v11041_v33, %v625_v51  ;;  %v10157_v20 = vld [vmem:[#allocation11 + $0x224] sm:$0xf]  ;;  %v3484_v5 = vpop.f32.mrf.mxu2 }
 0x29d   :  { %5397 = vmatpush.bf16.msrb.mxu1 %v8872_v28  ;;  %v8300_v28 = vor.u32 %v10105_v19, %v8297_v31  ;;  %v8521_v19 = vld [vmem:[#allocation11 + $0x250] sm:$0xf0]  ;;  %v8396_v52 = vor.u32 %v10129_v63, %v8393_v47  ;;  %v10277_v38 = vld [vmem:[#allocation11 + $0x5e4] sm:$0xf] }
 0x29e   :  { %9267 = vmatmul.msk.bf16.vlgmr.msrb.gmra.mxu0 %vm11053_vm0, %v11057_v61  ;;  %v8233_v48 = vld [vmem:[#allocation11 + $0x10] sm:$0xf0]  ;;  %v3444_v51 = vadd.f32 %v11044_v22, %v3431_v13 }
 0x29f   :  { %5429 = vmatpush.bf16.msra.mxu0 %v8348_v29  ;;  %5410 = vmatpush.bf16.msrb.mxu2 %v9000_v50  ;;  %v10169_v29 = vld [vmem:[#allocation11 + $0x284] sm:$0xf]  ;;  %v3681_v50 = vxor.u32 %v3673_v10, %v3665_v0  ;;  %v10323_v0 = vld [vmem:[#allocation11 + $0x74c] sm:$0xf0]  ;;  %v8249_v10 = vld [vmem:[#allocation11 + $0x30] sm:$0xf0] }
 0x2a0   :  { %9270 = vmatmul.msk.bf16.vlgmr.msrb.gmra.mxu1 %vm11062_vm1, %v11066_v36  ;;  %v9160_v31 = vor.u32 %v10323_v0, %v9159_v59  ;;  %v8857_v3 = vld [vmem:[#allocation11 + $0x4f0] sm:$0xf0] }
 0x2a1   :  { %5442 = vmatpush.bf16.msra.mxu1 %v8476_v44  ;;  %v8281_v44 = vld [vmem:[#allocation11 + $0x70] sm:$0xf0] }
 0x2a2   :  { %v8985_v63 = vld [vmem:[#allocation11 + $0x5f0] sm:$0xf0] }
 0x2a3   :  { %5455 = vmatpush.bf16.msra.mxu2 %v8604_v53  ;;  %5430 = vmatpush.bf16.msra.mxu0 %v8332_v34  ;;  %v8556_v53 = vor.u32 %v10169_v29, %v8553_v40  ;;  %v8284_v34 = vor.u32 %v10101_v46, %v8281_v44  ;;  %v9143_v40 = vld [vmem:[#allocation11 + $0x720] sm:$0xf]  ;;  %v8252_v44 = vor.u32 %v10093_v35, %v8249_v10  ;;  %v10213_v35 = vld [vmem:[#allocation11 + $0x3e4] sm:$0xf]  ;;  %v8841_v10 = vld [vmem:[#allocation11 + $0x4d0] sm:$0xf0] }
 0x2a4   :  { %v9144_v33 = vor.u32 %v10319_v41, %v9143_v40  ;;  %v8988_v13 = vor.u32 %v10277_v38, %v8985_v63  ;;  %v10209_v40 = vld [vmem:[#allocation11 + $0x3c4] sm:$0xf]  ;;  %v8713_v41 = vld [vmem:[#allocation11 + $0x3d0] sm:$0xf0] }
 0x2a5   :  { %5443 = vmatpush.bf16.msra.mxu1 %v8460_v58  ;;  %v9176_v58 = vor.u32 %v10327_v55, %v9175_v54  ;;  %v10121_v54 = vld [vmem:[#allocation11 + $0x104] sm:$0xf]  ;;  %v8361_v55 = vld [vmem:[#allocation11 + $0x110] sm:$0xf0] }
 0x2a6   :  { %v8809_v5 = vld [vmem:[#allocation11 + $0x490] sm:$0xf0]  ;;  %v10265_v38 = vld [vmem:[#allocation11 + $0x584] sm:$0xf] }
 0x2a7   :  { %5456 = vmatpush.bf16.msra.mxu2 %v8588_v11  ;;  %5431 = vmatpush.bf16.msra.mxu0 %v8316_v12  ;;  %v3689_v11 = vmul.u32 2146121005, %v3681_v50  ;;  %v11082_v12 = vpop.f32.mrf.mxu3  ;;  %v8505_v50 = vld [vmem:[#allocation11 + $0x230] sm:$0xf0] }
 0x2a8   :  { %5420 = vmatpush.bf16.msrb.mxu3 %v9176_v58  ;;  %v9127_v58 = vld [vmem:[#allocation11 + $0x700] sm:$0xf]  ;;  %v8508_v59 = vor.u32 %v10157_v20, %v8505_v50  ;;  %v8716_v50 = vor.u32 %v10209_v40, %v8713_v41  ;;  %v8937_v63 = vld [vmem:[#allocation11 + $0x590] sm:$0xf0]  ;;  %v10309_v41 = vld [vmem:[#allocation11 + $0x6e4] sm:$0xf] }
 0x2a9   :  { %5444 = vmatpush.bf16.msra.mxu1 %v8444_v32  ;;  %v10161_v32 = vld [vmem:[#allocation11 + $0x244] sm:$0xf]  ;;  %v3697_v29 = vshrl.u32 %v3689_v11, 15 }
 0x2aa   :  { %v8524_v46 = vor.u32 %v10161_v32, %v8521_v19  ;;  %v3457_v32 = vadd.f32 %v11075_v16, %v3444_v51  ;;  %v8364_v19 = vor.u32 %v10121_v54, %v8361_v55  ;;  %v10269_v51 = vld [vmem:[#allocation11 + $0x5a4] sm:$0xf]  ;;  %v8697_v54 = vld [vmem:[#allocation11 + $0x3b0] sm:$0xf0] }
 0x2ab   :  { %5457 = vmatpush.bf16.msra.mxu2 %v8572_v8  ;;  %5432 = vmatpush.bf16.msra.mxu0 %v8300_v28  ;;  %v10125_v8 = vld [vmem:[#allocation11 + $0x124] sm:$0xf]  ;;  %v3471_v28 = vpop.f32.mrf.mxu1  ;;  %v3705_v17 = vxor.u32 %v3697_v29, %v3689_v11  ;;  %v8729_v11 = vld [vmem:[#allocation11 + $0x3f0] sm:$0xf0] }
 0x2ac   :  { %5421 = vmatpush.bf16.msrb.mxu3 %v9160_v31  ;;  %v8969_v28 = vld [vmem:[#allocation11 + $0x5d0] sm:$0xf0] }
 0x2ad   :  { %5445 = vmatpush.bf16.msra.mxu1 %v8428_v42  ;;  %v10089_v42 = vld [vmem:[#allocation11 + $0x4] sm:$0xf] }
 0x2ae   :  { %v8236_v0 = vor.u32 %v10089_v42, %v8233_v48  ;;  %v3470_v42 = vadd.f32 %v11077_v49, %v3457_v32  ;;  %v8825_v48 = vld [vmem:[#allocation11 + $0x4b0] sm:$0xf0]  ;;  %v10205_v49 = vld [vmem:[#allocation11 + $0x3a4] sm:$0xf] }
 0x2af   :  { %5458 = vmatpush.bf16.msra.mxu2 %v8556_v53  ;;  %5433 = vmatpush.bf16.msra.mxu0 %v8284_v34  ;;  %v8380_v53 = vor.u32 %v10125_v8, %v8377_v62  ;;  %v10245_v34 = vld [vmem:[#allocation11 + $0x4e4] sm:$0xf]  ;;  %v3497_v47 = vpop.f32.mrf.mxu3  ;;  %v3713_v8 = vmul.u32 2221713035, %v3705_v17  ;;  %v8732_v62 = vor.u32 %v10213_v35, %v8729_v11  ;;  %v8940_v35 = vor.u32 %v10265_v38, %v8937_v63  ;;  %v8793_v32 = vld [vmem:[#allocation11 + $0x470] sm:$0xf0] }
 0x2b0   :  { %5422 = vmatpush.bf16.msrb.mxu3 %v9144_v33  ;;  %v8860_v31 = vor.u32 %v10245_v34, %v8857_v3  ;;  %v3639_v33 = vadd.s32 896, %v10868_v4  ;;  %v3483_v55 = vadd.f32 %v11080_v6, %v3470_v42  ;;  %v10233_v4 = vld [vmem:[#allocation11 + $0x484] sm:$0xf]  ;;  %v9113_v42 = vld [vmem:[#allocation11 + $0x6f0] sm:$0xf0] }
 0x2b1   :  { %5446 = vmatpush.bf16.msra.mxu1 %v8412_v7  ;;  %v10315_v7 = vld [vmem:[#allocation11 + $0x70c] sm:$0xf0]  ;;  %v3721_v20 = vshrl.u32 %v3713_v8, 16  ;;  %v10201_v47 = vld [vmem:[#allocation11 + $0x384] sm:$0xf] }
 0x2b2   :  { %v9128_v22 = vor.u32 %v10315_v7, %v9127_v58  ;;  %v8700_v58 = vor.u32 %v10205_v49, %v8697_v54  ;;  %v3648_v7 = vmul.u32 2246822519, %v3639_v33  ;;  %v8649_v33 = vld [vmem:[#allocation11 + $0x350] sm:$0xf0]  ;;  %v10253_v63 = vld [vmem:[#allocation11 + $0x524] sm:$0xf] }
 0x2b3   :  { %5459 = vmatpush.bf16.msra.mxu2 %v8540_v14  ;;  %5434 = vmatpush.bf16.msra.mxu0 %v8268_v39  ;;  %v10153_v14 = vld [vmem:[#allocation11 + $0x204] sm:$0xf]  ;;  %v8489_v39 = vld [vmem:[#allocation11 + $0x210] sm:$0xf0]  ;;  %v3729_v17 = vxor.u32 %v3721_v20, %v3713_v8 }
 0x2b4   :  { %v8492_v29 = vor.u32 %v10153_v14, %v8489_v39  ;;  %5423 = vmatpush.bf16.msrb.mxu3 %v9128_v22  ;;  %v8812_v14 = vor.u32 %v10233_v4, %v8809_v5  ;;  %v10229_v39 = vld [vmem:[#allocation11 + $0x464] sm:$0xf]  ;;  %v3656_v6 = vadd.s32 %v3648_v7, %v10873_v15  ;;  %v3508_v22 = vpop.f32.mrf.mxu0  ;;  %v8665_v8 = vld [vmem:[#allocation11 + $0x370] sm:$0xf0]  ;;  %v11105_v49 = vpop.f32.mrf.mxu2 }
 0x2b5   :  { %5447 = vmatpush.bf16.msra.mxu1 %v8396_v52  ;;  %v10241_v52 = vld [vmem:[#allocation11 + $0x4c4] sm:$0xf]  ;;  %v8777_v15 = vld [vmem:[#allocation11 + $0x450] sm:$0xf0] }
 0x2b6   :  { %v8844_v16 = vor.u32 %v10241_v52, %v8841_v10  ;;  %v8921_v52 = vld [vmem:[#allocation11 + $0x570] sm:$0xf0]  ;;  %v10197_v10 = vld [vmem:[#allocation11 + $0x364] sm:$0xf] }
 0x2b7   :  { %5460 = vmatpush.bf16.msra.mxu2 %v8524_v46  ;;  %5435 = vmatpush.bf16.msra.mxu0 %v8252_v44  ;;  %v8972_v46 = vor.u32 %v10273_v18, %v8969_v28  ;;  %v10237_v44 = vld [vmem:[#allocation11 + $0x4a4] sm:$0xf]  ;;  %v8796_v28 = vor.u32 %v10229_v39, %v8793_v32  ;;  %v11107_v54 = vpop.f32.mrf.mxu3  ;;  %v8761_v5 = vld [vmem:[#allocation11 + $0x430] sm:$0xf0] }
 0x2b8   :  { %5468 = vmatpush.bf16.msra.mxu3 %v8732_v62  ;;  %v8828_v34 = vor.u32 %v10237_v44, %v8825_v48  ;;  %v11098_v62 = vpop.f32.mrf.mxu1  ;;  %v10257_v44 = vld [vmem:[#allocation11 + $0x544] sm:$0xf]  ;;  %v8905_v48 = vld [vmem:[#allocation11 + $0x550] sm:$0xf0] }
 0x2b9   :  { %5448 = vmatpush.bf16.msra.mxu1 %v8380_v53  ;;  %v8953_v53 = vld [vmem:[#allocation11 + $0x5b0] sm:$0xf0]  ;;  %v8908_v4 = vor.u32 %v10257_v44, %v8905_v48  ;;  %v10249_v32 = vld [vmem:[#allocation11 + $0x504] sm:$0xf] }
 0x2ba   :  { %v8956_v3 = vor.u32 %v10269_v51, %v8953_v53  ;;  %v10366_v53 = vld [vmem:[#allocation14 + $0xa4] sm:$0xf0] }
 0x2bb   :  { %5461 = vmatpush.bf16.msra.mxu2 %v8508_v59  ;;  %5436 = vmatpush.bf16.msra.mxu0 %v8236_v0  ;;  %v8681_v59 = vld [vmem:[#allocation11 + $0x390] sm:$0xf0]  ;;  %v3496_v0 = vadd.f32 %v11082_v12, %v3483_v55  ;;  %v10225_v12 = vld [vmem:[#allocation11 + $0x444] sm:$0xf] }
 0x2bc   :  { %5469 = vmatpush.bf16.msra.mxu3 %v8716_v50  ;;  %v8684_v11 = vor.u32 %v10201_v47, %v8681_v59  ;;  %v10193_v50 = vld [vmem:[#allocation11 + $0x344] sm:$0xf]  ;;  %v8780_v51 = vor.u32 %v10225_v12, %v8777_v15  ;;  %v3510_v7 = vpop.f32.mrf.mxu0  ;;  %v8889_v47 = vld [vmem:[#allocation11 + $0x530] sm:$0xf0]  ;;  %v10120_v12 = vld [vmem:[#allocation11 + $0xf4] sm:$0xf0] }
 0x2bd   :  { %5449 = vmatpush.bf16.msra.mxu1 %v8364_v19  ;;  %v10261_v19 = vld [vmem:[#allocation11 + $0x564] sm:$0xf]  ;;  %v8652_v38 = vor.u32 %v10193_v50, %v8649_v33  ;;  %v9065_v50 = vld [vmem:[#allocation11 + $0x690] sm:$0xf0] }
 0x2be   :  { %9279 = vmatmul.msk.bf16.vlgmr.msra.gmra.mxu0 %vm10982_vm7, %v10998_v45  ;;  %v8924_v40 = vor.u32 %v10261_v19, %v8921_v52  ;;  %v10221_v55 = vld [vmem:[#allocation11 + $0x424] sm:$0xf]  ;;  %v9081_v52 = vld [vmem:[#allocation11 + $0x6b0] sm:$0xf0] }
 0x2bf   :  { %5481 = vmatpush.bf16.msrb.mxu0 %v8860_v31  ;;  %5462 = vmatpush.bf16.msra.mxu2 %v8492_v29  ;;  %v8227_v31 = vxor.u32 2147483648, %v3729_v17  ;;  %v3666_v29 = vxor.u32 %v10892_v1, %v3656_v6  ;;  %v9116_v1 = vor.u32 %v10309_v41, %v9113_v42  ;;  %v10305_v17 = vld [vmem:[#allocation11 + $0x6c4] sm:$0xf]  ;;  %v8764_v39 = vor.u32 %v10221_v55, %v8761_v5  ;;  %v10148_v5 = vld [vmem:[#allocation11 + $0x1d4] sm:$0xf0] }
 0x2c0   :  { %9282 = vmatmul.msk.bf16.vlgmr.msra.gmra.mxu1 %vm10991_vm9, %v11009_v25  ;;  %5470 = vmatpush.bf16.msra.mxu3 %v8700_v58  ;;  %v9097_v58 = vld [vmem:[#allocation11 + $0x6d0] sm:$0xf0]  ;;  %v3523_v59 = vpop.f32.mrf.mxu1  ;;  %v10185_v15 = vld [vmem:[#allocation11 + $0x304] sm:$0xf] }
 0x2c1   :  { %5494 = vmatpush.bf16.msrb.mxu1 %v8988_v13  ;;  %v3509_v13 = vadd.f32 %v3508_v22, %v3496_v0  ;;  %vm3751_vm3 = vcmp.ge.s32.totalorder %v8227_v31, 3435973836  ;;  %v10189_v0 = vld [vmem:[#allocation11 + $0x324] sm:$0xf]  ;;  %v9100_v6 = vor.u32 %v10305_v17, %v9097_v58  ;;  %v8892_v31 = vor.u32 %v10253_v63, %v8889_v47  ;;  %v9049_v63 = vld [vmem:[#allocation11 + $0x670] sm:$0xf0] }
 0x2c2   :  { %vm11101_vm4 = vmpackc.low %vm3751_vm3, %vm3751_vm3  ;;  %v10217_v22 = vld [vmem:[#allocation11 + $0x404] sm:$0xf]  ;;  %v8319_v59 = vld [vmem:[#allocation11 + $0xa8] sm:$0xf] }
 0x2c3   :  { %5482 = vmatpush.bf16.msrb.mxu0 %v8844_v16  ;;  %vm3609_vm2 = vcmp.ge.f32.partialorder %v3509_v13, 0.0  ;;  %v3617_v18 = vmul.f32 0.2, %v3509_v13  ;;  %v8668_v16 = vor.u32 %v10197_v10, %v8665_v8  ;;  %v8351_v8 = vld [vmem:[#allocation11 + $0xe8] sm:$0xf] }
 0x2c4   :  { %5471 = vmatpush.bf16.msra.mxu3 %v8684_v11  ;;  %v8873_v11 = vld [vmem:[#allocation11 + $0x510] sm:$0xf0]  ;;  %v8352_v48 = vor.u32 %v10120_v12, %v8351_v8 }
 0x2c5   :  { %5495 = vmatpush.bf16.msrb.mxu1 %v8972_v46  ;;  %v3625_v46 = vsel %vm3609_vm2, %v3509_v13, %v3617_v18  ;;  %v10301_v13 = vld [vmem:[#allocation11 + $0x6a4] sm:$0xf]  ;;  %v8479_v18 = vld [vmem:[#allocation11 + $0x1e8] sm:$0xf]  ;;  %v8876_v44 = vor.u32 %v10249_v32, %v8873_v11  ;;  %v10108_v11 = vld [vmem:[#allocation11 + $0x94] sm:$0xf0] }
 0x2c6   :  { %v3761_v20 = vmul.f32 1.4285715, %v3625_v46  ;;  %v9084_v42 = vor.u32 %v10301_v13, %v9081_v52  ;;  %v3549_v46 = vpop.f32.mrf.mxu3  ;;  %v10289_v32 = vld [vmem:[#allocation11 + $0x644] sm:$0xf]  ;;  %v8431_v52 = vld [vmem:[#allocation11 + $0x188] sm:$0xf] }
 0x2c7   :  { %5483 = vmatpush.bf16.msrb.mxu0 %v8828_v34  ;;  %v3674_v34 = vshrl.u32 %v3666_v29, 16  ;;  %v8415_v46 = vld [vmem:[#allocation11 + $0x168] sm:$0xf] }
 0x2c8   :  { %5472 = vmatpush.bf16.msra.mxu3 %v8668_v16  ;;  %v3536_v16 = vpop.f32.mrf.mxu2 }
 0x2c9   :  { %5496 = vmatpush.bf16.msrb.mxu1 %v8956_v3  ;;  %v11109_v3 = vpack.c.bf16 %v3761_v20, %v3761_v20  ;;  %v3682_v19 = vxor.u32 %v3674_v34, %v3666_v29  ;;  %v10297_v20 = vld [vmem:[#allocation11 + $0x684] sm:$0xf]  ;;  %v626_v34 = vperm.slane %v10958_v23, 7  ;;  %v8447_v23 = vld [vmem:[#allocation11 + $0x1a8] sm:$0xf] }
 0x2ca   :  { %v9068_v17 = vor.u32 %v10297_v20, %v9065_v50 }
 0x2cb   :  { %5484 = vmatpush.bf16.msrb.mxu0 %v8812_v14  ;;  %9273 = vmatmul.msk.bf16.vlgmr.msrb.gmra.mxu2 %vm11101_vm4, %v11109_v3  ;;  %v8633_v14 = vld [vmem:[#allocation11 + $0x330] sm:$0xf0]  ;;  %v3690_v29 = vmul.u32 2146121005, %v3682_v19 }
 0x2cc   :  { %5507 = vmatpush.bf16.msrb.mxu2 %v9116_v1  ;;  %5473 = vmatpush.bf16.msra.mxu3 %v8652_v38  ;;  %v8636_v10 = vor.u32 %v10189_v0, %v8633_v14  ;;  %v10116_v1 = vld [vmem:[#allocation11 + $0xd4] sm:$0xf0]  ;;  %v10293_v38 = vld [vmem:[#allocation11 + $0x664] sm:$0xf]  ;;  %v3522_v14 = vadd.f32 %v11098_v62, %v626_v34  ;;  %v9033_v19 = vld [vmem:[#allocation11 + $0x650] sm:$0xf0] }
 0x2cd   :  { %5497 = vmatpush.bf16.msrb.mxu1 %v8940_v35  ;;  %v8745_v35 = vld [vmem:[#allocation11 + $0x410] sm:$0xf0]  ;;  %v3698_v58 = vshrl.u32 %v3690_v29, 15  ;;  %v10112_v0 = vld [vmem:[#allocation11 + $0xb4] sm:$0xf0]  ;;  %v9036_v8 = vor.u32 %v10289_v32, %v9033_v19 }
 0x2ce   :  { %v8748_v41 = vor.u32 %v10217_v22, %v8745_v35  ;;  %v8320_v35 = vor.u32 %v10112_v0, %v8319_v59  ;;  %v8303_v62 = vld [vmem:[#allocation11 + $0x88] sm:$0xf]  ;;  %v3535_v13 = vadd.f32 %v11105_v49, %v3522_v14 }
 0x2cf   :  { %5485 = vmatpush.bf16.msrb.mxu0 %v8796_v28  ;;  %v10152_v28 = vld [vmem:[#allocation11 + $0x1f4] sm:$0xf0]  ;;  %v3706_v22 = vxor.u32 %v3698_v58, %v3690_v29  ;;  %v8399_v58 = vld [vmem:[#allocation11 + $0x148] sm:$0xf] }
 0x2d0   :  { %5508 = vmatpush.bf16.msrb.mxu2 %v9100_v6  ;;  %5474 = vmatpush.bf16.msra.mxu3 %v8636_v10  ;;  %v8480_v33 = vor.u32 %v10152_v28, %v8479_v18  ;;  %v9052_v6 = vor.u32 %v10293_v38, %v9049_v63  ;;  %v10140_v10 = vld [vmem:[#allocation11 + $0x194] sm:$0xf0]  ;;  %v8304_v18 = vor.u32 %v10108_v11, %v8303_v62  ;;  %v10285_v28 = vld [vmem:[#allocation11 + $0x624] sm:$0xf]  ;;  %v8255_v0 = vld [vmem:[#allocation11 + $0x28] sm:$0xf] }
 0x2d1   :  { %5498 = vmatpush.bf16.msrb.mxu1 %v8924_v40  ;;  %v8617_v40 = vld [vmem:[#allocation11 + $0x310] sm:$0xf0]  ;;  %v3714_v12 = vmul.u32 2221713035, %v3706_v22  ;;  %v3548_v16 = vadd.f32 %v11107_v54, %v3535_v13  ;;  %v10136_v29 = vld [vmem:[#allocation11 + $0x174] sm:$0xf0] }
 0x2d2   :  { %v8620_v55 = vor.u32 %v10185_v15, %v8617_v40  ;;  %v9017_v15 = vld [vmem:[#allocation11 + $0x630] sm:$0xf0]  ;;  %v8432_v40 = vor.u32 %v10140_v10, %v8431_v52  ;;  %v8416_v34 = vor.u32 %v10136_v29, %v8415_v46  ;;  %v10132_v54 = vld [vmem:[#allocation11 + $0x154] sm:$0xf0]  ;;  %v8239_v13 = vld [vmem:[#allocation11 + $0x8] sm:$0xf] }
 0x2d3   :  { %5486 = vmatpush.bf16.msrb.mxu0 %v8780_v51  ;;  %v8335_v51 = vld [vmem:[#allocation11 + $0xc8] sm:$0xf]  ;;  %v3722_v20 = vshrl.u32 %v3714_v12, 16  ;;  %v10180_v22 = vld [vmem:[#allocation11 + $0x2d4] sm:$0xf0] }
 0x2d4   :  { %5509 = vmatpush.bf16.msrb.mxu2 %v9084_v42  ;;  %v8336_v7 = vor.u32 %v10116_v1, %v8335_v51  ;;  %5475 = vmatpush.bf16.msra.mxu3 %v8620_v55  ;;  %v10104_v42 = vld [vmem:[#allocation11 + $0x74] sm:$0xf0]  ;;  %v10281_v51 = vld [vmem:[#allocation11 + $0x604] sm:$0xf]  ;;  %v9001_v1 = vld [vmem:[#allocation11 + $0x610] sm:$0xf0] }
 0x2d5   :  { %5499 = vmatpush.bf16.msrb.mxu1 %v8908_v4  ;;  %v8463_v4 = vld [vmem:[#allocation11 + $0x1c8] sm:$0xf]  ;;  %v3730_v38 = vxor.u32 %v3722_v20, %v3714_v12  ;;  %v10128_v62 = vld [vmem:[#allocation11 + $0x134] sm:$0xf0]  ;;  %v9241_v46 = vld [vmem:[#allocation11 + $0x7f0] sm:$0xf0] }
 0x2d6   :  { %v8464_v47 = vor.u32 %v10148_v5, %v8463_v4  ;;  %v8271_v55 = vld [vmem:[#allocation11 + $0x48] sm:$0xf]  ;;  %v10100_v4 = vld [vmem:[#allocation11 + $0x54] sm:$0xf0] }
 0x2d7   :  { %5487 = vmatpush.bf16.msrb.mxu0 %v8764_v39  ;;  %v10144_v39 = vld [vmem:[#allocation11 + $0x1b4] sm:$0xf0]  ;;  %v8607_v5 = vld [vmem:[#allocation11 + $0x2e8] sm:$0xf]  ;;  %v8228_v52 = vxor.u32 2147483648, %v3730_v38 }
 0x2d8   :  { %5510 = vmatpush.bf16.msrb.mxu2 %v9068_v17  ;;  %v10184_v17 = vld [vmem:[#allocation11 + $0x2f4] sm:$0xf0]  ;;  %v8815_v29 = vld [vmem:[#allocation11 + $0x488] sm:$0xf] }
 0x2d9   :  { %5500 = vmatpush.bf16.msrb.mxu1 %v8892_v31  ;;  %v8448_v31 = vor.u32 %v10144_v39, %v8447_v23  ;;  %v8608_v59 = vor.u32 %v10184_v17, %v8607_v5  ;;  %v8400_v23 = vor.u32 %v10132_v54, %v8399_v58  ;;  %v10096_v39 = vld [vmem:[#allocation11 + $0x34] sm:$0xf0]  ;;  %vm11130_vm6 = vcmp.ge.s32.totalorder %v8228_v52, 3435973836  ;;  %v8559_v5 = vld [vmem:[#allocation11 + $0x288] sm:$0xf] }
 0x2da   :  { %v10172_v17 = vld [vmem:[#allocation11 + $0x294] sm:$0xf0]  ;;  %vm11137_vm8 = vmpackc.low %vm11130_vm6, %vm11130_vm6  ;;  %v8831_v52 = vld [vmem:[#allocation11 + $0x4a8] sm:$0xf] }
 0x2db   :  { %5488 = vmatpush.bf16.msrb.mxu0 %v8748_v41  ;;  %9285 = vmatmul.msk.bf16.vlgmr.msra.gmra.mxu2 %vm11003_vm10, %v11013_v43  ;;  %v8287_v41 = vld [vmem:[#allocation11 + $0x68] sm:$0xf]  ;;  %v3560_v49 = vpop.f32.mrf.mxu0 }
 0x2dc   :  { %5511 = vmatpush.bf16.msrb.mxu2 %v9052_v6  ;;  %v3561_v50 = vadd.f32 %v3560_v49, %v3548_v16  ;;  %v8591_v6 = vld [vmem:[#allocation11 + $0x2c8] sm:$0xf]  ;;  %v10176_v16 = vld [vmem:[#allocation11 + $0x2b4] sm:$0xf0] }
 0x2dd   :  { %5501 = vmatpush.bf16.msrb.mxu1 %v8876_v44  ;;  %v3573_v44 = vpop.f32.mrf.mxu1  ;;  %v8592_v12 = vor.u32 %v10180_v22, %v8591_v6  ;;  %v8975_v6 = vld [vmem:[#allocation11 + $0x5c8] sm:$0xf]  ;;  %v10276_v22 = vld [vmem:[#allocation11 + $0x5d4] sm:$0xf0] }
 0x2de   :  { %9291 = vmatmul.msk.bf16.vlgmr.msrb.gmra.mxu0 %vm11053_vm0, %v11057_v61  ;;  %v3574_v63 = vadd.f32 %v3573_v44, %v3561_v50  ;;  %v8863_v44 = vld [vmem:[#allocation11 + $0x4e8] sm:$0xf] }
 0x2df   :  { %5533 = vmatpush.bf16.msra.mxu0 %v8352_v48  ;;  %v9020_v48 = vor.u32 %v10285_v28, %v9017_v15  ;;  %v8367_v28 = vld [vmem:[#allocation11 + $0x108] sm:$0xf]  ;;  %v10124_v15 = vld [vmem:[#allocation11 + $0x114] sm:$0xf0] }
 0x2e0   :  { %9294 = vmatmul.msk.bf16.vlgmr.msrb.gmra.mxu1 %vm11062_vm1, %v11066_v36  ;;  %5512 = vmatpush.bf16.msrb.mxu2 %v9036_v8  ;;  %v8256_v8 = vor.u32 %v10096_v39, %v8255_v0  ;;  %v9225_v0 = vld [vmem:[#allocation11 + $0x7d0] sm:$0xf0]  ;;  %v8560_v39 = vor.u32 %v10172_v17, %v8559_v5 }
 0x2e1   :  { %5546 = vmatpush.bf16.msra.mxu1 %v8480_v33  ;;  %v8288_v33 = vor.u32 %v10104_v42, %v8287_v41  ;;  %v10341_v41 = vld [vmem:[#allocation11 + $0x7e4] sm:$0xf]  ;;  %v8575_v42 = vld [vmem:[#allocation11 + $0x2a8] sm:$0xf] }
 0x2e3   :  { %5534 = vmatpush.bf16.msra.mxu0 %v8336_v7  ;;  %v9004_v7 = vor.u32 %v10281_v51, %v9001_v1  ;;  %v3562_v19 = vpop.f32.mrf.mxu0  ;;  %v8991_v51 = vld [vmem:[#allocation11 + $0x5e8] sm:$0xf]  ;;  %v10280_v1 = vld [vmem:[#allocation11 + $0x5f4] sm:$0xf0] }
 0x2e4   :  { %5513 = vmatpush.bf16.msrb.mxu2 %v9020_v48  ;;  %v10248_v48 = vld [vmem:[#allocation11 + $0x4f4] sm:$0xf0] }
 0x2e5   :  { %5547 = vmatpush.bf16.msra.mxu1 %v8464_v47  ;;  %v8272_v47 = vor.u32 %v10100_v4, %v8271_v55  ;;  %v3586_v14 = vpop.f32.mrf.mxu2  ;;  %v3575_v11 = vpop.f32.mrf.mxu1  ;;  %v8368_v4 = vor.u32 %v10124_v15, %v8367_v28  ;;  %v8864_v38 = vor.u32 %v10248_v48, %v8863_v44  ;;  %v11152_v28 = vld [vmem:[#allocation13] sm:$0xf]  ;;  %v8527_v15 = vld [vmem:[#allocation11 + $0x248] sm:$0xf]  ;;  %v10236_v44 = vld [vmem:[#allocation11 + $0x494] sm:$0xf0] }
 0x2e6   :  { %v8976_v11 = vor.u32 %v10276_v22, %v8975_v6  ;;  %v4037_v48 = vperm.slane %v11152_v28, 0  ;;  %v10156_v6 = vld [vmem:[#allocation11 + $0x214] sm:$0xf0] }
 0x2e7   :  { %5535 = vmatpush.bf16.msra.mxu0 %v8320_v35  ;;  %v3587_v35 = vadd.f32 %v3586_v14, %v3574_v63  ;;  %v3599_v32 = vpop.f32.mrf.mxu3  ;;  %v10337_v63 = vld [vmem:[#allocation11 + $0x7c4] sm:$0xf]  ;;  %v8847_v14 = vld [vmem:[#allocation11 + $0x4c8] sm:$0xf] }
 0x2e8   :  { %5514 = vmatpush.bf16.msrb.mxu2 %v9004_v7  ;;  %v9244_v7 = vor.u32 %v10341_v41, %v9241_v46  ;;  %v9228_v19 = vor.u32 %v10337_v63, %v9225_v0  ;;  %v9193_v46 = vld [vmem:[#allocation11 + $0x790] sm:$0xf0] }
 0x2e9   :  { %5548 = vmatpush.bf16.msra.mxu1 %v8448_v31  ;;  %v8383_v31 = vld [vmem:[#allocation11 + $0x128] sm:$0xf]  ;;  %v3600_v10 = vadd.f32 %v3599_v32, %v3587_v35  ;;  %v10168_v32 = vld [vmem:[#allocation11 + $0x274] sm:$0xf0] }
 0x2ea   :  { %v8543_v35 = vld [vmem:[#allocation11 + $0x268] sm:$0xf] }
 0x2eb   :  { %5536 = vmatpush.bf16.msra.mxu0 %v8304_v18  ;;  %v10092_v18 = vld [vmem:[#allocation11 + $0x14] sm:$0xf0]  ;;  %vm3610_vm5 = vcmp.ge.f32.partialorder %v3600_v10, 0.0  ;;  %v3618_v49 = vmul.f32 0.2, %v3600_v10  ;;  %9297 = vmatmul.msk.bf16.vlgmr.msrb.gmra.mxu2 %vm11101_vm4, %v11109_v3 }
 0x2ec   :  { %5559 = vmatpush.bf16.msra.mxu2 %v8608_v59  ;;  %v8240_v50 = vor.u32 %v10092_v18, %v8239_v13  ;;  %v8992_v59 = vor.u32 %v10280_v1, %v8991_v51  ;;  %v9209_v13 = vld [vmem:[#allocation11 + $0x7b0] sm:$0xf0]  ;;  %v10272_v18 = vld [vmem:[#allocation11 + $0x5b4] sm:$0xf0]  ;;  %v8511_v51 = vld [vmem:[#allocation11 + $0x228] sm:$0xf] }
 0x2ed   :  { %5549 = vmatpush.bf16.msra.mxu1 %v8432_v40  ;;  %v8384_v40 = vor.u32 %v10128_v62, %v8383_v31  ;;  %v3626_v20 = vsel %vm3610_vm5, %v3600_v10, %v3618_v49  ;;  %v10333_v62 = vld [vmem:[#allocation11 + $0x7a4] sm:$0xf]  ;;  %v10240_v10 = vld [vmem:[#allocation11 + $0x4b4] sm:$0xf0] }
 0x2ee   :  { %v3762_v55 = vmul.f32 1.4285715, %v3626_v20  ;;  %v9212_v41 = vor.u32 %v10333_v62, %v9209_v13  ;;  %v10160_v1 = vld [vmem:[#allocation11 + $0x234] sm:$0xf0]  ;;  %v9161_v13 = vld [vmem:[#allocation11 + $0x750] sm:$0xf0] }
 0x2ef   :  { %5537 = vmatpush.bf16.msra.mxu0 %v8288_v33  ;;  %v8576_v33 = vor.u32 %v10176_v16, %v8575_v42  ;;  %v3601_v58 = vpop.f32.mrf.mxu3  ;;  %v8832_v42 = vor.u32 %v10240_v10, %v8831_v52  ;;  %v10329_v16 = vld [vmem:[#allocation11 + $0x784] sm:$0xf]  ;;  %v8512_v0 = vor.u32 %v10160_v1, %v8511_v51  ;;  %v10312_v62 = vld [vmem:[#allocation11 + $0x6f4] sm:$0xf0]  ;;  %v8783_v52 = vld [vmem:[#allocation11 + $0x448] sm:$0xf] }
 0x2f0   :  { %5560 = vmatpush.bf16.msra.mxu2 %v8592_v12  ;;  %v8959_v12 = vld [vmem:[#allocation11 + $0x5a8] sm:$0xf]  ;;  %v9177_v58 = vld [vmem:[#allocation11 + $0x770] sm:$0xf0]  ;;  %v10228_v10 = vld [vmem:[#allocation11 + $0x454] sm:$0xf0] }
 0x2f1   :  { %5550 = vmatpush.bf16.msra.mxu1 %v8416_v34  ;;  %v3588_v34 = vpop.f32.mrf.mxu2  ;;  %v8960_v49 = vor.u32 %v10272_v18, %v8959_v12  ;;  %v8911_v12 = vld [vmem:[#allocation11 + $0x548] sm:$0xf]  ;;  %v10260_v18 = vld [vmem:[#allocation11 + $0x554] sm:$0xf0] }
 0x2f2   :  { %v8816_v34 = vor.u32 %v10236_v44, %v8815_v29  ;;  %v10224_v51 = vld [vmem:[#allocation11 + $0x434] sm:$0xf0] }
 0x2f3   :  { %5538 = vmatpush.bf16.msra.mxu0 %v8272_v47  ;;  %v11141_v47 = vpack.c.bf16 %v3762_v55, %v3762_v55  ;;  %v9196_v55 = vor.u32 %v10329_v16, %v9193_v46  ;;  %v10317_v16 = vld [vmem:[#allocation11 + $0x724] sm:$0xf]  ;;  %v10308_v46 = vld [vmem:[#allocation11 + $0x6d4] sm:$0xf0] }
 0x2f4   :  { %5561 = vmatpush.bf16.msra.mxu2 %v8576_v33  ;;  %v10268_v33 = vld [vmem:[#allocation11 + $0x594] sm:$0xf0] }
 0x2f5   :  { %5551 = vmatpush.bf16.msra.mxu1 %v8400_v23  ;;  %v10244_v23 = vld [vmem:[#allocation11 + $0x4d4] sm:$0xf0]  ;;  %9276 = vmatmul.msk.bf16.vlgmr.msrb.gmra.mxu3 %vm11137_vm8, %v11141_v47 }
 0x2f6   :  { %5520 = vmatpush.bf16.msrb.mxu3 %v9244_v7  ;;  %v8848_v31 = vor.u32 %v10244_v23, %v8847_v14  ;;  %v8799_v7 = vld [vmem:[#allocation11 + $0x468] sm:$0xf]  ;;  %v10264_v23 = vld [vmem:[#allocation11 + $0x574] sm:$0xf0] }
 0x2f7   :  { %5539 = vmatpush.bf16.msra.mxu0 %v8256_v8  ;;  %v8544_v8 = vor.u32 %v10168_v32, %v8543_v35  ;;  %v8927_v14 = vld [vmem:[#allocation11 + $0x568] sm:$0xf] }
 0x2f8   :  { %5562 = vmatpush.bf16.msra.mxu2 %v8560_v39  ;;  %v8495_v39 = vld [vmem:[#allocation11 + $0x208] sm:$0xf] }
 0x2f9   :  { %5552 = vmatpush.bf16.msra.mxu1 %v8384_v40  ;;  %v10164_v40 = vld [vmem:[#allocation11 + $0x254] sm:$0xf0] }
 0x2fa   :  { %5521 = vmatpush.bf16.msrb.mxu3 %v9228_v19  ;;  %v8528_v20 = vor.u32 %v10164_v40, %v8527_v15  ;;  %v10321_v19 = vld [vmem:[#allocation11 + $0x744] sm:$0xf] }
 0x2fb   :  { %5540 = vmatpush.bf16.msra.mxu0 %v8240_v50  ;;  %v8943_v50 = vld [vmem:[#allocation11 + $0x588] sm:$0xf]  ;;  %v5334_v5 = vpop.f32.mrf.mxu0 }
 0x2fc   :  { %5563 = vmatpush.bf16.msra.mxu2 %v8544_v8  ;;  %v8944_v17 = vor.u32 %v10268_v33, %v8943_v50  ;;  %v5335_v63 = vadd.f32 %v5334_v5, %v4037_v48  ;;  %v8496_v8 = vor.u32 %v10156_v6, %v8495_v39  ;;  %v9145_v50 = vld [vmem:[#allocation11 + $0x730] sm:$0xf0]  ;;  %v8767_v33 = vld [vmem:[#allocation11 + $0x428] sm:$0xf]  ;;  %v10252_v6 = vld [vmem:[#allocation11 + $0x514] sm:$0xf0] }
 0x2fd   :  { %5553 = vmatpush.bf16.msra.mxu1 %v8368_v4  ;;  %v10325_v4 = vld [vmem:[#allocation11 + $0x764] sm:$0xf]  ;;  %v8879_v39 = vld [vmem:[#allocation11 + $0x508] sm:$0xf] }
 0x2fe   :  { %9303 = vmatmul.msk.bf16.vlgmr.msra.gmra.mxu0 %vm10982_vm7, %v10998_v45  ;;  %5522 = vmatpush.bf16.msrb.mxu3 %v9212_v41  ;;  %v9180_v35 = vor.u32 %v10325_v4, %v9177_v58  ;;  %v9164_v41 = vor.u32 %v10321_v19, %v9161_v13  ;;  %v9129_v58 = vld [vmem:[#allocation11 + $0x710] sm:$0xf0] }
 0x2ff   :  { %5585 = vmatpush.bf16.msrb.mxu0 %v8864_v38  ;;  %v10232_v38 = vld [vmem:[#allocation11 + $0x474] sm:$0xf0] }
 0x300   :  { %9306 = vmatmul.msk.bf16.vlgmr.msra.gmra.mxu1 %vm10991_vm9, %v11009_v25  ;;  %5564 = vmatpush.bf16.msra.mxu2 %v8528_v20  ;;  %v8800_v32 = vor.u32 %v10232_v38, %v8799_v7  ;;  %v8912_v20 = vor.u32 %v10260_v18, %v8911_v12  ;;  %v9148_v7 = vor.u32 %v10317_v16, %v9145_v50  ;;  %v8719_v16 = vld [vmem:[#allocation11 + $0x3c8] sm:$0xf] }
 0x301   :  { %5598 = vmatpush.bf16.msrb.mxu1 %v8992_v59  ;;  %v5347_v59 = vpop.f32.mrf.mxu1  ;;  %v8768_v38 = vor.u32 %v10224_v51, %v8767_v33  ;;  %v8880_v12 = vor.u32 %v10252_v6, %v8879_v39  ;;  %v9055_v33 = vld [vmem:[#allocation11 + $0x668] sm:$0xf]  ;;  %v10296_v51 = vld [vmem:[#allocation11 + $0x674] sm:$0xf0] }
 0x302   :  { %v5348_v22 = vadd.f32 %v5347_v59, %v5335_v63  ;;  %5523 = vmatpush.bf16.msrb.mxu3 %v9196_v55  ;;  %v8895_v55 = vld [vmem:[#allocation11 + $0x528] sm:$0xf] }
 0x303   :  { %5586 = vmatpush.bf16.msrb.mxu0 %v8848_v31  ;;  %v9119_v31 = vld [vmem:[#allocation11 + $0x6e8] sm:$0xf]  ;;  %v5336_v48 = vpop.f32.mrf.mxu0 }
 0x304   :  { %5565 = vmatpush.bf16.msra.mxu2 %v8512_v0  ;;  %v9120_v15 = vor.u32 %v10312_v62, %v9119_v31  ;;  %v8751_v63 = vld [vmem:[#allocation11 + $0x408] sm:$0xf]  ;;  %v10304_v0 = vld [vmem:[#allocation11 + $0x6b4] sm:$0xf0]  ;;  %v8353_v31 = vld [vmem:[#allocation11 + $0xf8] sm:$0xf0] }
 0x305   :  { %5599 = vmatpush.bf16.msrb.mxu1 %v8976_v11  ;;  %v8928_v11 = vor.u32 %v10264_v23, %v8927_v14  ;;  %9288 = vmatmul.msk.bf16.vlgmr.msra.gmra.mxu3 %vm11018_vm11, %v11022_v30  ;;  %v5360_v40 = vpop.f32.mrf.mxu2  ;;  %v9087_v59 = vld [vmem:[#allocation11 + $0x6a8] sm:$0xf]  ;;  %v10220_v23 = vld [vmem:[#allocation11 + $0x414] sm:$0xf0]  ;;  %v10150_v62 = vld [vmem:[#allocation11 + $0x1ec] sm:$0xf] }
 0x306   :  { %5524 = vmatpush.bf16.msrb.mxu3 %v9180_v35  ;;  %v5361_v29 = vadd.f32 %v5360_v40, %v5348_v22  ;;  %v8735_v22 = vld [vmem:[#allocation11 + $0x3e8] sm:$0xf]  ;;  %v10216_v35 = vld [vmem:[#allocation11 + $0x3f4] sm:$0xf0]  ;;  %v9088_v19 = vor.u32 %v10304_v0, %v9087_v59  ;;  %v8465_v48 = vld [vmem:[#allocation11 + $0x1d8] sm:$0xf0] }
 0x307   :  { %5587 = vmatpush.bf16.msrb.mxu0 %v8832_v42  ;;  %v8784_v42 = vor.u32 %v10228_v10, %v8783_v52  ;;  %v5373_v44 = vpop.f32.mrf.mxu3  ;;  %v8752_v10 = vor.u32 %v10220_v23, %v8751_v63  ;;  %v8736_v18 = vor.u32 %v10216_v35, %v8735_v22  ;;  %v10300_v40 = vld [vmem:[#allocation11 + $0x694] sm:$0xf0]  ;;  %v9056_v63 = vor.u32 %v10296_v51, %v9055_v33  ;;  %v9039_v0 = vld [vmem:[#allocation11 + $0x648] sm:$0xf]  ;;  %v10106_v35 = vld [vmem:[#allocation11 + $0x8c] sm:$0xf] }
 0x308   :  { %5566 = vmatpush.bf16.msra.mxu2 %v8496_v8  ;;  %v11158_v4 = vadd.f32 %v5373_v44, %v5361_v29  ;;  %v8337_v29 = vld [vmem:[#allocation11 + $0xd8] sm:$0xf0]  ;;  %v10146_v44 = vld [vmem:[#allocation11 + $0x1cc] sm:$0xf]  ;;  %v8687_v6 = vld [vmem:[#allocation11 + $0x388] sm:$0xf] }
 0x309   :  { %5600 = vmatpush.bf16.msrb.mxu1 %v8960_v49  ;;  %v9103_v49 = vld [vmem:[#allocation11 + $0x6c8] sm:$0xf]  ;;  %v5349_v1 = vpop.f32.mrf.mxu1  ;;  %v10204_v22 = vld [vmem:[#allocation11 + $0x394] sm:$0xf0] }
 0x30a   :  { %v9104_v5 = vor.u32 %v10308_v46, %v9103_v49  ;;  %5525 = vmatpush.bf16.msrb.mxu3 %v9164_v41  ;;  %v10212_v49 = vld [vmem:[#allocation11 + $0x3d4] sm:$0xf0]  ;;  %v10114_v46 = vld [vmem:[#allocation11 + $0xcc] sm:$0xf] }
 0x30b   :  { %5588 = vmatpush.bf16.msrb.mxu0 %v8816_v34  ;;  %v10256_v34 = vld [vmem:[#allocation11 + $0x534] sm:$0xf0]  ;;  %9309 = vmatmul.msk.bf16.vlgmr.msra.gmra.mxu2 %vm11003_vm10, %v11013_v43  ;;  %v8720_v50 = vor.u32 %v10212_v49, %v8719_v16  ;;  %v8340_v1 = vor.u32 %v10114_v46, %v8337_v29  ;;  %v8417_v16 = vld [vmem:[#allocation11 + $0x178] sm:$0xf0] }
 0x30c   :  { %5611 = vmatpush.bf16.msrb.mxu2 %v9120_v15  ;;  %v8896_v14 = vor.u32 %v10256_v34, %v8895_v55  ;;  %v9071_v15 = vld [vmem:[#allocation11 + $0x688] sm:$0xf]  ;;  %v8468_v55 = vor.u32 %v10146_v44, %v8465_v48  ;;  %v10284_v33 = vld [vmem:[#allocation11 + $0x614] sm:$0xf0] }
 0x30d   :  { %5601 = vmatpush.bf16.msrb.mxu1 %v8944_v17  ;;  %v10313_v17 = vld [vmem:[#allocation11 + $0x704] sm:$0xf]  ;;  %v5362_v13 = vpop.f32.mrf.mxu2  ;;  %v8703_v34 = vld [vmem:[#allocation11 + $0x3a8] sm:$0xf] }
 0x30e   :  { %5526 = vmatpush.bf16.msrb.mxu3 %v9148_v7  ;;  %v9132_v52 = vor.u32 %v10313_v17, %v9129_v58  ;;  %v10110_v17 = vld [vmem:[#allocation11 + $0xac] sm:$0xf]  ;;  %v8321_v58 = vld [vmem:[#allocation11 + $0xb8] sm:$0xf0]  ;;  %v9023_v13 = vld [vmem:[#allocation11 + $0x628] sm:$0xf] }
 0x30f   :  { %5589 = vmatpush.bf16.msrb.mxu0 %v8800_v32  ;;  %v10118_v32 = vld [vmem:[#allocation11 + $0xec] sm:$0xf]  ;;  %v5375_v8 = vpop.f32.mrf.mxu3  ;;  %v8324_v23 = vor.u32 %v10110_v17, %v8321_v58  ;;  %v8655_v44 = vld [vmem:[#allocation11 + $0x348] sm:$0xf]  ;;  %v8609_v17 = vld [vmem:[#allocation11 + $0x2f8] sm:$0xf0] }
 0x310   :  { %5612 = vmatpush.bf16.msrb.mxu2 %v9104_v5  ;;  %v8356_v41 = vor.u32 %v10118_v32, %v8353_v31  ;;  %v10208_v5 = vld [vmem:[#allocation11 + $0x3b4] sm:$0xf0]  ;;  %v10142_v7 = vld [vmem:[#allocation11 + $0x1ac] sm:$0xf]  ;;  %v8305_v32 = vld [vmem:[#allocation11 + $0x98] sm:$0xf0] }
 0x311   :  { %5602 = vmatpush.bf16.msrb.mxu1 %v8928_v11  ;;  %v8481_v11 = vld [vmem:[#allocation11 + $0x1f8] sm:$0xf0]  ;;  %v8704_v59 = vor.u32 %v10208_v5, %v8703_v34  ;;  %v10098_v34 = vld [vmem:[#allocation11 + $0x4c] sm:$0xf] }
 0x312   :  { %5527 = vmatpush.bf16.msrb.mxu3 %v9132_v52  ;;  %v8433_v31 = vld [vmem:[#allocation11 + $0x198] sm:$0xf0]  ;;  %v10288_v52 = vld [vmem:[#allocation11 + $0x634] sm:$0xf0]  ;;  %v10182_v5 = vld [vmem:[#allocation11 + $0x2ec] sm:$0xf] }
 0x313   :  { %5590 = vmatpush.bf16.msrb.mxu0 %v8784_v42  ;;  %v8484_v42 = vor.u32 %v10150_v62, %v8481_v11  ;;  %v8688_v11 = vor.u32 %v10204_v22, %v8687_v6  ;;  %v9024_v29 = vor.u32 %v10288_v52, %v9023_v13  ;;  %v8273_v58 = vld [vmem:[#allocation11 + $0x58] sm:$0xf0]  ;;  %v10094_v6 = vld [vmem:[#allocation11 + $0x2c] sm:$0xf] }
 0x314   :  { %5613 = vmatpush.bf16.msrb.mxu2 %v9088_v19  ;;  %v10138_v19 = vld [vmem:[#allocation11 + $0x18c] sm:$0xf] }
 0x315   :  { %5603 = vmatpush.bf16.msrb.mxu1 %v8912_v20  ;;  %v9072_v20 = vor.u32 %v10300_v40, %v9071_v15  ;;  %9300 = vmatmul.msk.bf16.vlgmr.msrb.gmra.mxu3 %vm11137_vm8, %v11141_v47  ;;  %v8436_v8 = vor.u32 %v10138_v19, %v8433_v31  ;;  %v10102_v15 = vld [vmem:[#allocation11 + $0x6c] sm:$0xf]  ;;  %v8257_v19 = vld [vmem:[#allocation11 + $0x38] sm:$0xf0] }
 0x316   :  { %5572 = vmatpush.bf16.msra.mxu3 %v8736_v18  ;;  %v10200_v18 = vld [vmem:[#allocation11 + $0x374] sm:$0xf0]  ;;  %v10178_v22 = vld [vmem:[#allocation11 + $0x2cc] sm:$0xf] }
 0x317   :  { %5591 = vmatpush.bf16.msrb.mxu0 %v8768_v38  ;;  %v8449_v38 = vld [vmem:[#allocation11 + $0x1b8] sm:$0xf0]  ;;  %v10126_v31 = vld [vmem:[#allocation11 + $0x12c] sm:$0xf] }
 0x318   :  { %5614 = vmatpush.bf16.msrb.mxu2 %v9072_v20  ;;  %v8452_v39 = vor.u32 %v10142_v7, %v8449_v38  ;;  %v10196_v20 = vld [vmem:[#allocation11 + $0x354] sm:$0xf0]  ;;  %v8401_v7 = vld [vmem:[#allocation11 + $0x158] sm:$0xf0] }
 0x319   :  { %5604 = vmatpush.bf16.msrb.mxu1 %v8896_v14  ;;  %v10292_v14 = vld [vmem:[#allocation11 + $0x654] sm:$0xf0] }
 0x31a   :  { %5573 = vmatpush.bf16.msra.mxu3 %v8720_v50  ;;  %v9040_v62 = vor.u32 %v10292_v14, %v9039_v0  ;;  %v9007_v50 = vld [vmem:[#allocation11 + $0x608] sm:$0xf]  ;;  %v10192_v14 = vld [vmem:[#allocation11 + $0x334] sm:$0xf0] }
 0x31b   :  { %5592 = vmatpush.bf16.msrb.mxu0 %v8752_v10  ;;  %v8308_v10 = vor.u32 %v10106_v35, %v8305_v32  ;;  %v5386_v40 = vpop.f32.mrf.mxu0  ;;  %v9008_v38 = vor.u32 %v10284_v33, %v9007_v50  ;;  %v8639_v0 = vld [vmem:[#allocation11 + $0x328] sm:$0xf]  ;;  %v8593_v35 = vld [vmem:[#allocation11 + $0x2d8] sm:$0xf0]  ;;  %v10278_v33 = vld [vmem:[#allocation11 + $0x5ec] sm:$0xf] }
 0x31c   :  { %5615 = vmatpush.bf16.msrb.mxu2 %v9056_v63  ;;  %v5387_v49 = vadd.f32 %v5386_v40, %v11158_v4  ;;  %v10130_v4 = vld [vmem:[#allocation11 + $0x14c] sm:$0xf]  ;;  %v8656_v63 = vor.u32 %v10196_v20, %v8655_v44  ;;  %v8640_v13 = vor.u32 %v10192_v14, %v8639_v0  ;;  %v8596_v52 = vor.u32 %v10178_v22, %v8593_v35  ;;  %v8241_v40 = vld [vmem:[#allocation11 + $0x18] sm:$0xf0]  ;;  %v9215_v35 = vld [vmem:[#allocation11 + $0x7a8] sm:$0xf] }
 0x31d   :  { %5605 = vmatpush.bf16.msrb.mxu1 %v8880_v12  ;;  %v8671_v12 = vld [vmem:[#allocation11 + $0x368] sm:$0xf]  ;;  %v5399_v46 = vpop.f32.mrf.mxu1  ;;  %v10246_v44 = vld [vmem:[#allocation11 + $0x4ec] sm:$0xf]  ;;  %v8849_v0 = vld [vmem:[#allocation11 + $0x4d8] sm:$0xf0] }
 0x31e   :  { %9315 = vmatmul.msk.bf16.vlgmr.msrb.gmra.mxu0 %vm11053_vm0, %v11057_v61  ;;  %5574 = vmatpush.bf16.msra.mxu3 %v8704_v59  ;;  %v8672_v48 = vor.u32 %v10200_v18, %v8671_v12  ;;  %v11173_v51 = vadd.f32 %v5399_v46, %v5387_v49  ;;  %v8612_v59 = vor.u32 %v10182_v5, %v8609_v17  ;;  %v10090_v12 = vld [vmem:[#allocation11 + $0xc] sm:$0xf]  ;;  %v8369_v49 = vld [vmem:[#allocation11 + $0x118] sm:$0xf0]  ;;  %v9247_v46 = vld [vmem:[#allocation11 + $0x7e8] sm:$0xf] }
 0x31f   :  { %5637 = vmatpush.bf16.msra.mxu0 %v8356_v41  ;;  %v8289_v41 = vld [vmem:[#allocation11 + $0x78] sm:$0xf0]  ;;  %v8260_v18 = vor.u32 %v10094_v6, %v8257_v19  ;;  %v10274_v14 = vld [vmem:[#allocation11 + $0x5cc] sm:$0xf] }
 0x320   :  { %9318 = vmatmul.msk.bf16.vlgmr.msrb.gmra.mxu1 %vm11062_vm1, %v11066_v36  ;;  %5616 = vmatpush.bf16.msrb.mxu2 %v9040_v62  ;;  %v8385_v62 = vld [vmem:[#allocation11 + $0x138] sm:$0xf0] }
 0x321   :  { %5650 = vmatpush.bf16.msra.mxu1 %v8484_v42  ;;  %v10134_v42 = vld [vmem:[#allocation11 + $0x16c] sm:$0xf]  ;;  %v8545_v19 = vld [vmem:[#allocation11 + $0x278] sm:$0xf0] }
 0x322   :  { %5575 = vmatpush.bf16.msra.mxu3 %v8688_v11 }
 0x323   :  { %5638 = vmatpush.bf16.msra.mxu0 %v8340_v1  ;;  %v8292_v1 = vor.u32 %v10102_v15, %v8289_v41  ;;  %v5388_v32 = vpop.f32.mrf.mxu0  ;;  %v8388_v15 = vor.u32 %v10126_v31, %v8385_v62  ;;  %v10174_v41 = vld [vmem:[#allocation11 + $0x2ac] sm:$0xf]  ;;  %v10336_v62 = vld [vmem:[#allocation11 + $0x7b4] sm:$0xf0] }
 0x324   :  { %5617 = vmatpush.bf16.msrb.mxu2 %v9024_v29  ;;  %v10344_v29 = vld [vmem:[#allocation11 + $0x7f4] sm:$0xf0]  ;;  %v10166_v32 = vld [vmem:[#allocation11 + $0x26c] sm:$0xf] }
 0x325   :  { %5651 = vmatpush.bf16.msra.mxu1 %v8468_v55  ;;  %v8420_v55 = vor.u32 %v10134_v42, %v8417_v16  ;;  %v5401_v11 = vpop.f32.mrf.mxu1  ;;  %v8577_v42 = vld [vmem:[#allocation11 + $0x2b8] sm:$0xf0]  ;;  %v10122_v16 = vld [vmem:[#allocation11 + $0x10c] sm:$0xf]  ;;  %v9248_v5 = vor.u32 %v10344_v29, %v9247_v46 }
 0x326   :  { %5576 = vmatpush.bf16.msra.mxu3 %v8672_v48  ;;  %v8865_v48 = vld [vmem:[#allocation11 + $0x4f8] sm:$0xf0]  ;;  %v8580_v50 = vor.u32 %v10174_v41, %v8577_v42  ;;  %v10238_v11 = vld [vmem:[#allocation11 + $0x4ac] sm:$0xf] }
 0x327   :  { %5639 = vmatpush.bf16.msra.mxu0 %v8324_v23  ;;  %v8276_v23 = vor.u32 %v10098_v34, %v8273_v58  ;;  %v8372_v34 = vor.u32 %v10122_v16, %v8369_v49  ;;  %v8868_v17 = vor.u32 %v10246_v44, %v8865_v48  ;;  %v9231_v58 = vld [vmem:[#allocation11 + $0x7c8] sm:$0xf]  ;;  %v8529_v41 = vld [vmem:[#allocation11 + $0x258] sm:$0xf0]  ;;  %v10332_v16 = vld [vmem:[#allocation11 + $0x794] sm:$0xf0] }
 0x328   :  { %5618 = vmatpush.bf16.msrb.mxu2 %v9008_v38  ;;  %v4038_v49 = vperm.slane %v11152_v28, 1  ;;  %v9183_v48 = vld [vmem:[#allocation11 + $0x768] sm:$0xf]  ;;  %v10262_v28 = vld [vmem:[#allocation11 + $0x56c] sm:$0xf] }
 0x329   :  { %5652 = vmatpush.bf16.msra.mxu1 %v8452_v39  ;;  %v8404_v39 = vor.u32 %v10130_v4, %v8401_v7  ;;  %v10170_v4 = vld [vmem:[#allocation11 + $0x28c] sm:$0xf]  ;;  %v8561_v7 = vld [vmem:[#allocation11 + $0x298] sm:$0xf0] }
 0x32a   :  { %5577 = vmatpush.bf16.msra.mxu3 %v8656_v63  ;;  %v10340_v63 = vld [vmem:[#allocation11 + $0x7d4] sm:$0xf0] }
 0x32b   :  { %5640 = vmatpush.bf16.msra.mxu0 %v8308_v10  ;;  %v8623_v10 = vld [vmem:[#allocation11 + $0x308] sm:$0xf]  ;;  %9321 = vmatmul.msk.bf16.vlgmr.msrb.gmra.mxu2 %vm11101_vm4, %v11109_v3  ;;  %v9232_v6 = vor.u32 %v10340_v63, %v9231_v58 }
 0x32c   :  { %5663 = vmatpush.bf16.msra.mxu2 %v8612_v59  ;;  %v10242_v59 = vld [vmem:[#allocation11 + $0x4cc] sm:$0xf] }
 0x32d   :  { %5653 = vmatpush.bf16.msra.mxu1 %v8436_v8  ;;  %v10188_v8 = vld [vmem:[#allocation11 + $0x314] sm:$0xf0]  ;;  %v8852_v22 = vor.u32 %v10242_v59, %v8849_v0 }
 0x32e   :  { %5578 = vmatpush.bf16.msra.mxu3 %v8640_v13  ;;  %v8624_v20 = vor.u32 %v10188_v8, %v8623_v10  ;;  %v8833_v13 = vld [vmem:[#allocation11 + $0x4b8] sm:$0xf0]  ;;  %v8548_v8 = vor.u32 %v10166_v32, %v8545_v19  ;;  %v10258_v32 = vld [vmem:[#allocation11 + $0x54c] sm:$0xf] }
 0x32f   :  { %5641 = vmatpush.bf16.msra.mxu0 %v8292_v1  ;;  %v8993_v1 = vld [vmem:[#allocation11 + $0x5f8] sm:$0xf0] }
 0x330   :  { %5664 = vmatpush.bf16.msra.mxu2 %v8596_v52  ;;  %v8996_v38 = vor.u32 %v10278_v33, %v8993_v1  ;;  %v10270_v52 = vld [vmem:[#allocation11 + $0x5ac] sm:$0xf]  ;;  %v8961_v10 = vld [vmem:[#allocation11 + $0x5b8] sm:$0xf0] }
 0x331   :  { %5654 = vmatpush.bf16.msra.mxu1 %v8420_v55  ;;  %v8244_v55 = vor.u32 %v10090_v12, %v8241_v40  ;;  %v9216_v12 = vor.u32 %v10336_v62, %v9215_v35  ;;  %v10162_v40 = vld [vmem:[#allocation11 + $0x24c] sm:$0xf]  ;;  %v8964_v42 = vor.u32 %v10270_v52, %v8961_v10  ;;  %v8785_v35 = vld [vmem:[#allocation11 + $0x458] sm:$0xf0]  ;;  %v9151_v10 = vld [vmem:[#allocation11 + $0x728] sm:$0xf] }
 0x332   :  { %5579 = vmatpush.bf16.msra.mxu3 %v8624_v20  ;;  %v8532_v46 = vor.u32 %v10162_v40, %v8529_v41  ;;  %v10158_v20 = vld [vmem:[#allocation11 + $0x22c] sm:$0xf]  ;;  %v8913_v19 = vld [vmem:[#allocation11 + $0x558] sm:$0xf0] }
 0x333   :  { %5642 = vmatpush.bf16.msra.mxu0 %v8276_v23  ;;  %v8977_v23 = vld [vmem:[#allocation11 + $0x5d8] sm:$0xf0]  ;;  %v10222_v40 = vld [vmem:[#allocation11 + $0x42c] sm:$0xf] }
 0x334   :  { %5665 = vmatpush.bf16.msra.mxu2 %v8580_v50  ;;  %v8980_v31 = vor.u32 %v10274_v14, %v8977_v23  ;;  %v8513_v50 = vld [vmem:[#allocation11 + $0x238] sm:$0xf0]  ;;  %v10324_v14 = vld [vmem:[#allocation11 + $0x754] sm:$0xf0]  ;;  %v10154_v23 = vld [vmem:[#allocation11 + $0x20c] sm:$0xf] }
 0x335   :  { %5655 = vmatpush.bf16.msra.mxu1 %v8404_v39  ;;  %v8564_v39 = vor.u32 %v10170_v4, %v8561_v7  ;;  %9312 = vmatmul.msk.bf16.vlgmr.msra.gmra.mxu3 %vm11018_vm11, %v11022_v30  ;;  %v8929_v4 = vld [vmem:[#allocation11 + $0x578] sm:$0xf0]  ;;  %v8516_v7 = vor.u32 %v10158_v20, %v8513_v50 }
 0x336   :  { %5624 = vmatpush.bf16.msrb.mxu3 %v9248_v5  ;;  %v8801_v5 = vld [vmem:[#allocation11 + $0x478] sm:$0xf0] }
 0x337   :  { %5643 = vmatpush.bf16.msra.mxu0 %v8260_v18  ;;  %v8836_v18 = vor.u32 %v10238_v11, %v8833_v13  ;;  %v9121_v62 = vld [vmem:[#allocation11 + $0x6f8] sm:$0xf0] }
 0x338   :  { %5666 = vmatpush.bf16.msra.mxu2 %v8564_v39  ;;  %v8497_v39 = vld [vmem:[#allocation11 + $0x218] sm:$0xf0] }
 0x339   :  { %5656 = vmatpush.bf16.msra.mxu1 %v8388_v15  ;;  %v9199_v15 = vld [vmem:[#allocation11 + $0x788] sm:$0xf]  ;;  %v8500_v11 = vor.u32 %v10154_v23, %v8497_v39  ;;  %v8769_v41 = vld [vmem:[#allocation11 + $0x438] sm:$0xf0]  ;;  %v10298_v39 = vld [vmem:[#allocation11 + $0x68c] sm:$0xf] }
 0x33a   :  { %5625 = vmatpush.bf16.msrb.mxu3 %v9232_v6  ;;  %v9200_v29 = vor.u32 %v10332_v16, %v9199_v15  ;;  %v8932_v6 = vor.u32 %v10262_v28, %v8929_v4  ;;  %v8753_v50 = vld [vmem:[#allocation11 + $0x418] sm:$0xf0] }
 0x33b   :  { %5644 = vmatpush.bf16.msra.mxu0 %v8244_v55  ;;  %v5438_v33 = vpop.f32.mrf.mxu0  ;;  %v10328_v55 = vld [vmem:[#allocation11 + $0x774] sm:$0xf0]  ;;  %v10360_v28 = vld [vmem:[#allocation14 + $0x74] sm:$0xf0] }
 0x33c   :  { %5667 = vmatpush.bf16.msra.mxu2 %v8548_v8  ;;  %v9184_v59 = vor.u32 %v10328_v55, %v9183_v48  ;;  %v10320_v8 = vld [vmem:[#allocation11 + $0x734] sm:$0xf0]  ;;  %v10214_v55 = vld [vmem:[#allocation11 + $0x3ec] sm:$0xf]  ;;  %v8721_v23 = vld [vmem:[#allocation11 + $0x3d8] sm:$0xf0] }
 0x33d   :  { %5657 = vmatpush.bf16.msra.mxu1 %v8372_v34  ;;  %v10230_v34 = vld [vmem:[#allocation11 + $0x46c] sm:$0xf]  ;;  %v5451_v58 = vpop.f32.mrf.mxu1 }
 0x33e   :  { %9327 = vmatmul.msk.bf16.vlgmr.msra.gmra.mxu0 %vm10982_vm7, %v10998_v45  ;;  %v8817_v45 = vld [vmem:[#allocation11 + $0x498] sm:$0xf0]  ;;  %5626 = vmatpush.bf16.msrb.mxu3 %v9216_v12  ;;  %v8804_v0 = vor.u32 %v10230_v34, %v8801_v5  ;;  %v10302_v5 = vld [vmem:[#allocation11 + $0x6ac] sm:$0xf] }
 0x33f   :  { %5689 = vmatpush.bf16.msrb.mxu0 %v8868_v17  ;;  %v8820_v44 = vor.u32 %v10234_v60, %v8817_v45  ;;  %v5439_v17 = vadd.f32 %v5438_v33, %v4038_v49  ;;  %v8897_v60 = vld [vmem:[#allocation11 + $0x538] sm:$0xf0]  ;;  %v10306_v45 = vld [vmem:[#allocation11 + $0x6cc] sm:$0xf] }
 0x340   :  { %9330 = vmatmul.msk.bf16.vlgmr.msra.gmra.mxu1 %vm10991_vm9, %v11009_v25  ;;  %v8945_v25 = vld [vmem:[#allocation11 + $0x598] sm:$0xf0]  ;;  %5668 = vmatpush.bf16.msra.mxu2 %v8532_v46  ;;  %v9135_v46 = vld [vmem:[#allocation11 + $0x708] sm:$0xf]  ;;  %v10250_v33 = vld [vmem:[#allocation11 + $0x50c] sm:$0xf] }
 0x341   :  { %5702 = vmatpush.bf16.msrb.mxu1 %v8996_v38  ;;  %v8948_v1 = vor.u32 %v10266_v21, %v8945_v25  ;;  %v9167_v38 = vld [vmem:[#allocation11 + $0x748] sm:$0xf]  ;;  %v11188_v63 = vadd.f32 %v5451_v58, %v5439_v17  ;;  %v9105_v49 = vld [vmem:[#allocation11 + $0x6d8] sm:$0xf0]  ;;  %v9152_v21 = vor.u32 %v10320_v8, %v9151_v10  ;;  %v8772_v25 = vor.u32 %v10222_v40, %v8769_v41  ;;  %v9411_v58 = vld [vmem:[#allocation14 + $0x70] sm:$0xf] }
 0x342   :  { %5627 = vmatpush.bf16.msrb.mxu3 %v9200_v29  ;;  %v9168_v13 = vor.u32 %v10324_v14, %v9167_v38  ;;  %v10316_v29 = vld [vmem:[#allocation11 + $0x714] sm:$0xf0]  ;;  %v9108_v20 = vor.u32 %v10306_v45, %v9105_v49  ;;  %v8737_v34 = vld [vmem:[#allocation11 + $0x3f8] sm:$0xf0]  ;;  %v10210_v14 = vld [vmem:[#allocation11 + $0x3cc] sm:$0xf]  ;;  %v9412_v24 = vor.u32 %v10360_v28, %v9411_v58 }
 0x343   :  { %5690 = vmatpush.bf16.msrb.mxu0 %v8852_v22  ;;  %v10226_v22 = vld [vmem:[#allocation11 + $0x44c] sm:$0xf]  ;;  %v5440_v12 = vpop.f32.mrf.mxu0  ;;  %v9089_v17 = vld [vmem:[#allocation11 + $0x6b8] sm:$0xf0]  ;;  %v9136_v4 = vor.u32 %v10316_v29, %v9135_v46  ;;  %v9475_v49 = vld [vmem:[#allocation14 + $0xf0] sm:$0xf] }
 0x344   :  { %5669 = vmatpush.bf16.msra.mxu2 %v8516_v7  ;;  %v8788_v52 = vor.u32 %v10226_v22, %v8785_v35  ;;  %v10358_v22 = vld [vmem:[#allocation14 + $0x64] sm:$0xf0]  ;;  %v8724_v35 = vor.u32 %v10210_v14, %v8721_v23  ;;  %v10356_v10 = vld [vmem:[#allocation14 + $0x54] sm:$0xf0]  ;;  %v11207_v12 = vstv %s5753_s14  ;;  %v9467_v58 = vld [vmem:[#allocation14 + $0xe0] sm:$0xf] }
 0x345   :  { %5703 = vmatpush.bf16.msrb.mxu1 %v8980_v31  ;;  %v10310_v31 = vld [vmem:[#allocation11 + $0x6ec] sm:$0xf]  ;;  %v5453_v16 = vpop.f32.mrf.mxu1  ;;  %v8689_v41 = vld [vmem:[#allocation11 + $0x398] sm:$0xf0]  ;;  %v5755_v2 = vxor.u32 %v11207_v12, %v10888_v27 }
 0x346   :  { %5628 = vmatpush.bf16.msrb.mxu3 %v9184_v59  ;;  %v9124_v15 = vor.u32 %v10310_v31, %v9121_v62  ;;  %v8740_v59 = vor.u32 %v10214_v55, %v8737_v34  ;;  %v8705_v31 = vld [vmem:[#allocation11 + $0x3b8] sm:$0xf0]  ;;  %v10294_v62 = vld [vmem:[#allocation11 + $0x66c] sm:$0xf]  ;;  %v9387_v16 = vld [vmem:[#allocation14 + $0x40] sm:$0xf] }
 0x347   :  { %5691 = vmatpush.bf16.msrb.mxu0 %v8836_v18  ;;  %v8916_v18 = vor.u32 %v10258_v32, %v8913_v19  ;;  %v10206_v19 = vld [vmem:[#allocation11 + $0x3ac] sm:$0xf]  ;;  %v8673_v29 = vld [vmem:[#allocation11 + $0x378] sm:$0xf0]  ;;  %v5759_v34 = vshrl.u32 %v5755_v2, 16 }
 0x348   :  { %5670 = vmatpush.bf16.msra.mxu2 %v8500_v11  ;;  %v10202_v40 = vld [vmem:[#allocation11 + $0x38c] sm:$0xf]  ;;  %v10352_v55 = vld [vmem:[#allocation14 + $0x34] sm:$0xf0] }
 0x349   :  { %5704 = vmatpush.bf16.msrb.mxu1 %v8964_v42  ;;  %v10254_v42 = vld [vmem:[#allocation11 + $0x52c] sm:$0xf]  ;;  %v9009_v23 = vld [vmem:[#allocation11 + $0x618] sm:$0xf0] }
 0x34a   :  { %5629 = vmatpush.bf16.msrb.mxu3 %v9168_v13  ;;  %v8900_v48 = vor.u32 %v10254_v42, %v8897_v60  ;;  %v9057_v13 = vld [vmem:[#allocation11 + $0x678] sm:$0xf0]  ;;  %v10290_v42 = vld [vmem:[#allocation11 + $0x64c] sm:$0xf] }
 0x34b   :  { %5692 = vmatpush.bf16.msrb.mxu0 %v8820_v44  ;;  %v10218_v44 = vld [vmem:[#allocation11 + $0x40c] sm:$0xf]  ;;  %9333 = vmatmul.msk.bf16.vlgmr.msra.gmra.mxu2 %vm11003_vm10, %v11013_v43  ;;  %v9073_v43 = vld [vmem:[#allocation11 + $0x698] sm:$0xf0] }
 0x34c   :  { %5715 = vmatpush.bf16.msrb.mxu2 %v9124_v15  ;;  %v8756_v7 = vor.u32 %v10218_v44, %v8753_v50  ;;  %v9076_v32 = vor.u32 %v10298_v39, %v9073_v43  ;;  %v9060_v15 = vor.u32 %v10294_v62, %v9057_v13  ;;  %v10354_v60 = vld [vmem:[#allocation14 + $0x44] sm:$0xf0]  ;;  %v9371_v39 = vld [vmem:[#allocation14 + $0x20] sm:$0xf]  ;;  %v5763_v43 = vxor.u32 %v5759_v34, %v5755_v2  ;;  %v8641_v62 = vld [vmem:[#allocation11 + $0x338] sm:$0xf0] }
 0x34d   :  { %5705 = vmatpush.bf16.msrb.mxu1 %v8948_v1  ;;  %v8881_v1 = vld [vmem:[#allocation11 + $0x518] sm:$0xf0]  ;;  %v10198_v45 = vld [vmem:[#allocation11 + $0x36c] sm:$0xf] }
 0x34e   :  { %5630 = vmatpush.bf16.msrb.mxu3 %v9152_v21  ;;  %v8884_v38 = vor.u32 %v10250_v33, %v8881_v1  ;;  %v11205_v8 = vpop.f32.mrf.mxu2  ;;  %v10376_v21 = vld [vmem:[#allocation14 + $0xf4] sm:$0xf0]  ;;  %v10286_v44 = vld [vmem:[#allocation11 + $0x62c] sm:$0xf]  ;;  %v9379_v1 = vld [vmem:[#allocation14 + $0x30] sm:$0xf] }
 0x34f   :  { %5693 = vmatpush.bf16.msrb.mxu0 %v8804_v0  ;;  %v9092_v0 = vor.u32 %v10302_v5, %v9089_v17  ;;  %v9476_v50 = vor.u32 %v10376_v21, %v9475_v49  ;;  %v8676_v17 = vor.u32 %v10198_v45, %v8673_v29  ;;  %v10374_v28 = vld [vmem:[#allocation14 + $0xe4] sm:$0xf0]  ;;  %v9249_v2 = vld [vmem:[#allocation11 + $0x7f8] sm:$0xf0]  ;;  %v9355_v49 = vld [vmem:[#allocation14] sm:$0xf] }
 0x350   :  { %5716 = vmatpush.bf16.msrb.mxu2 %v9108_v20  ;;  %v9388_v20 = vor.u32 %v10354_v60, %v9387_v16  ;;  %v9468_v14 = vor.u32 %v10374_v28, %v9467_v58  ;;  %v8625_v16 = vld [vmem:[#allocation11 + $0x318] sm:$0xf0]  ;;  %v10342_v60 = vld [vmem:[#allocation11 + $0x7ec] sm:$0xf]  ;;  %v10359_v29 = vld [vmem:[#allocation14 + $0x74] sm:$0xf] }
 0x351   :  { %5706 = vmatpush.bf16.msrb.mxu1 %v8932_v6  ;;  %v9403_v6 = vld [vmem:[#allocation14 + $0x60] sm:$0xf]  ;;  %v10346_v21 = vld [vmem:[#allocation14 + $0x4] sm:$0xf0] }
 0x352   :  { %5631 = vmatpush.bf16.msrb.mxu3 %v9136_v4  ;;  %v9404_v11 = vor.u32 %v10358_v22, %v9403_v6  ;;  %v9459_v22 = vld [vmem:[#allocation14 + $0xd0] sm:$0xf] }
 0x353   :  { %5694 = vmatpush.bf16.msrb.mxu0 %v8788_v52  ;;  %v9395_v52 = vld [vmem:[#allocation14 + $0x50] sm:$0xf] }
 0x354   :  { %5717 = vmatpush.bf16.msrb.mxu2 %v9092_v0  ;;  %v9396_v37 = vor.u32 %v10356_v10, %v9395_v52  ;;  %v9380_v0 = vor.u32 %v10352_v55, %v9379_v1  ;;  %v9363_v10 = vld [vmem:[#allocation14 + $0x10] sm:$0xf]  ;;  %v9252_v1 = vor.u32 %v10342_v60, %v9249_v2  ;;  %v9356_v55 = vor.u32 %v10346_v21, %v9355_v49  ;;  %v10326_v2 = vld [vmem:[#allocation11 + $0x76c] sm:$0xf] }
 0x355   :  { %5707 = vmatpush.bf16.msrb.mxu1 %v8916_v18  ;;  %9324 = vmatmul.msk.bf16.vlgmr.msrb.gmra.mxu3 %vm11137_vm8, %v11141_v47  ;;  %v8708_v18 = vor.u32 %v10206_v19, %v8705_v31  ;;  %v10190_v31 = vld [vmem:[#allocation11 + $0x32c] sm:$0xf] }
 0x356   :  { %5676 = vmatpush.bf16.msra.mxu3 %v8740_v59  ;;  %v5414_v5 = vpop.f32.mrf.mxu2  ;;  %v10282_v59 = vld [vmem:[#allocation11 + $0x60c] sm:$0xf] }
 0x357   :  { %5695 = vmatpush.bf16.msrb.mxu0 %v8772_v25  ;;  %v9012_v19 = vor.u32 %v10282_v59, %v9009_v23  ;;  %v10338_v5 = vld [vmem:[#allocation11 + $0x7cc] sm:$0xf]  ;;  %v9435_v59 = vld [vmem:[#allocation14 + $0xa0] sm:$0xf]  ;;  %v9427_v23 = vld [vmem:[#allocation14 + $0x90] sm:$0xf] }
 0x358   :  { %5718 = vmatpush.bf16.msrb.mxu2 %v9076_v32 }
 0x359   :  { %5708 = vmatpush.bf16.msrb.mxu1 %v8900_v48  ;;  %v9025_v48 = vld [vmem:[#allocation11 + $0x638] sm:$0xf0] }
 0x35a   :  { %5677 = vmatpush.bf16.msra.mxu3 %v8724_v35  ;;  %v9028_v4 = vor.u32 %v10286_v44, %v9025_v48  ;;  %v10372_v35 = vld [vmem:[#allocation14 + $0xd4] sm:$0xf0]  ;;  %v9413_v44 = vld [vmem:[#allocation14 + $0x78] sm:$0xf0] }
 0x35b   :  { %5696 = vmatpush.bf16.msrb.mxu0 %v8756_v7  ;;  %v11211_v25 = vpop.f32.mrf.mxu0  ;;  %v10194_v7 = vld [vmem:[#allocation11 + $0x34c] sm:$0xf]  ;;  %v9460_v13 = vor.u32 %v10372_v35, %v9459_v22  ;;  %v9416_v58 = vor.u32 %v10359_v29, %v9413_v44  ;;  %v10355_v22 = vld [vmem:[#allocation14 + $0x54] sm:$0xf]  ;;  %v9397_v35 = vld [vmem:[#allocation14 + $0x58] sm:$0xf0] }
 0x35c   :  { %5719 = vmatpush.bf16.msrb.mxu2 %v9060_v15  ;;  %v5767_v15 = vmul.u32 2146121005, %v5763_v43 }
 0x35d   :  { %5709 = vmatpush.bf16.msrb.mxu1 %v8884_v38  ;;  %v11213_v33 = vpop.f32.mrf.mxu1  ;;  %v8657_v38 = vld [vmem:[#allocation11 + $0x358] sm:$0xf0] }
 0x35e   :  { %9339 = vmatmul.msk.bf16.vlgmr.msrb.gmra.mxu0 %vm11053_vm0, %v11057_v61  ;;  %v9041_v61 = vld [vmem:[#allocation11 + $0x658] sm:$0xf0]  ;;  %5678 = vmatpush.bf16.msra.mxu3 %v8708_v18  ;;  %v8660_v6 = vor.u32 %v10194_v7, %v8657_v38  ;;  %v10357_v7 = vld [vmem:[#allocation14 + $0x64] sm:$0xf]  ;;  %v9405_v38 = vld [vmem:[#allocation14 + $0x68] sm:$0xf0] }
 0x35f   :  { %6205 = vmatpush.bf16.msra.mxu0 %v9412_v24  ;;  %v9044_v46 = vor.u32 %v10290_v42, %v9041_v61  ;;  %v10350_v24 = vld [vmem:[#allocation14 + $0x24] sm:$0xf0]  ;;  %v10348_v18 = vld [vmem:[#allocation14 + $0x14] sm:$0xf0] }
 0x360   :  { %9342 = vmatmul.msk.bf16.vlgmr.msrb.gmra.mxu1 %vm11062_vm1, %v11066_v36  ;;  %v8692_v36 = vor.u32 %v10202_v40, %v8689_v41  ;;  %v11215_v40 = vpop.f32.mrf.mxu2  ;;  %v8644_v41 = vor.u32 %v10190_v31, %v8641_v62  ;;  %v10186_v42 = vld [vmem:[#allocation11 + $0x30c] sm:$0xf]  ;;  %v9201_v62 = vld [vmem:[#allocation11 + $0x798] sm:$0xf0] }
 0x361   :  { %6218 = vmatpush.bf16.msra.mxu1 %v9476_v50  ;;  %5720 = vmatpush.bf16.msrb.mxu2 %v9044_v46  ;;  %v10370_v61 = vld [vmem:[#allocation14 + $0xc4] sm:$0xf0]  ;;  %v5771_v46 = vshrl.u32 %v5767_v15, 15  ;;  %v8628_v48 = vor.u32 %v10186_v42, %v8625_v16  ;;  %v10368_v50 = vld [vmem:[#allocation14 + $0xb4] sm:$0xf0] }
 0x362   :  { %5679 = vmatpush.bf16.msra.mxu3 %v8692_v36  ;;  %v9364_v36 = vor.u32 %v10348_v18, %v9363_v10  ;;  %v10330_v31 = vld [vmem:[#allocation11 + $0x78c] sm:$0xf]  ;;  %v11225_v10 = vld [vmem:[#allocation13] sm:$0xf] }
 0x363   :  { %6206 = vmatpush.bf16.msra.mxu0 %v9404_v11  ;;  %v5492_v32 = vpop.f32.mrf.mxu0  ;;  %v9372_v11 = vor.u32 %v10350_v24, %v9371_v39  ;;  %v5775_v28 = vxor.u32 %v5771_v46, %v5767_v15  ;;  %v9217_v39 = vld [vmem:[#allocation11 + $0x7b8] sm:$0xf0]  ;;  %v9408_v24 = vor.u32 %v10357_v7, %v9405_v38  ;;  %v4039_v18 = vperm.slane %v11225_v10, 2  ;;  %v10353_v15 = vld [vmem:[#allocation14 + $0x44] sm:$0xf] }
 0x364   :  { %v9204_v42 = vor.u32 %v10330_v31, %v9201_v62  ;;  %v9477_v16 = vld [vmem:[#allocation14 + $0xf8] sm:$0xf0]  ;;  %v5756_v46 = vxor.u32 %v11207_v12, %v10903_v57  ;;  %v10347_v62 = vld [vmem:[#allocation14 + $0x14] sm:$0xf] }
 0x365   :  { %6219 = vmatpush.bf16.msra.mxu1 %v9468_v14  ;;  %5721 = vmatpush.bf16.msrb.mxu2 %v9028_v4  ;;  %v5505_v52 = vpop.f32.mrf.mxu1  ;;  %v9436_v14 = vor.u32 %v10366_v53, %v9435_v59  ;;  %v5779_v43 = vmul.u32 2221713035, %v5775_v28  ;;  %v10322_v28 = vld [vmem:[#allocation11 + $0x74c] sm:$0xf] }
 0x366   :  { %5680 = vmatpush.bf16.msra.mxu3 %v8676_v17  ;;  %v9233_v17 = vld [vmem:[#allocation11 + $0x7d8] sm:$0xf0]  ;;  %v5760_v59 = vshrl.u32 %v5756_v46, 16 }
 0x367   :  { %6207 = vmatpush.bf16.msra.mxu0 %v9396_v37  ;;  %v9451_v37 = vld [vmem:[#allocation14 + $0xc0] sm:$0xf] }
 0x368   :  { %v9452_v45 = vor.u32 %v10370_v61, %v9451_v37  ;;  %v5466_v4 = vpop.f32.mrf.mxu2  ;;  %v10375_v61 = vld [vmem:[#allocation14 + $0xf4] sm:$0xf] }
 0x369   :  { %6220 = vmatpush.bf16.msra.mxu1 %v9460_v13  ;;  %5722 = vmatpush.bf16.msrb.mxu2 %v9012_v19  ;;  %v5783_v13 = vshrl.u32 %v5779_v43, 16  ;;  %v9480_v21 = vor.u32 %v10375_v61, %v9477_v16  ;;  %v9169_v4 = vld [vmem:[#allocation11 + $0x758] sm:$0xf0] }
 0x36a   :  { %5681 = vmatpush.bf16.msra.mxu3 %v8660_v6  ;;  %v10364_v6 = vld [vmem:[#allocation14 + $0x94] sm:$0xf0] }
 0x36b   :  { %6208 = vmatpush.bf16.msra.mxu0 %v9388_v20  ;;  %v9443_v20 = vld [vmem:[#allocation14 + $0xb0] sm:$0xf]  ;;  %v9428_v32 = vor.u32 %v10364_v6, %v9427_v23  ;;  %v5787_v49 = vxor.u32 %v5783_v13, %v5779_v43  ;;  %v10318_v23 = vld [vmem:[#allocation11 + $0x72c] sm:$0xf]  ;;  %v9153_v43 = vld [vmem:[#allocation11 + $0x738] sm:$0xf0] }
 0x36c   :  { %9345 = vmatmul.msk.bf16.vlgmr.msrb.gmra.mxu2 %vm11101_vm4, %v11109_v3  ;;  %v9444_v34 = vor.u32 %v10368_v50, %v9443_v20  ;;  %v9236_v3 = vor.u32 %v10338_v5, %v9233_v17  ;;  %v9381_v20 = vld [vmem:[#allocation14 + $0x38] sm:$0xf0]  ;;  %v10373_v50 = vld [vmem:[#allocation14 + $0xe4] sm:$0xf]  ;;  %v9137_v61 = vld [vmem:[#allocation11 + $0x718] sm:$0xf0] }
 0x36d   :  { %6221 = vmatpush.bf16.msra.mxu1 %v9452_v45  ;;  %v9392_v45 = vor.u32 %v10353_v15, %v9389_v9  ;;  %v9349_v7 = vxor.u32 2147483648, %v5787_v49  ;;  %v9156_v15 = vor.u32 %v10318_v23, %v9153_v43  ;;  %v10369_v9 = vld [vmem:[#allocation14 + $0xc4] sm:$0xf]  ;;  %v10367_v49 = vld [vmem:[#allocation14 + $0xb4] sm:$0xf] }
 0x36e   :  { %5682 = vmatpush.bf16.msra.mxu3 %v8644_v41  ;;  %v10362_v41 = vld [vmem:[#allocation14 + $0x84] sm:$0xf0] }
 0x36f   :  { %6209 = vmatpush.bf16.msra.mxu0 %v9380_v0  ;;  %v10334_v0 = vld [vmem:[#allocation11 + $0x7ac] sm:$0xf]  ;;  %vm11234_vm9 = vcmp.ge.s32.totalorder %v9349_v7, 3435973836 }
 0x370   :  { %v9220_v19 = vor.u32 %v10334_v0, %v9217_v39  ;;  %v11223_v52 = vpop.f32.mrf.mxu2  ;;  %v10349_v0 = vld [vmem:[#allocation14 + $0x24] sm:$0xf]  ;;  %v10371_v39 = vld [vmem:[#allocation14 + $0xd4] sm:$0xf]  ;;  %vm9609_vm10 = vmpackc.low %vm11234_vm9, %vm11234_vm9 }
 0x371   :  { %6222 = vmatpush.bf16.msra.mxu1 %v9444_v34 }
 0x372   :  { %5683 = vmatpush.bf16.msra.mxu3 %v8628_v48  ;;  %v10351_v48 = vld [vmem:[#allocation14 + $0x34] sm:$0xf] }
 0x373   :  { %6210 = vmatpush.bf16.msra.mxu0 %v9372_v11  ;;  %v9400_v11 = vor.u32 %v10355_v22, %v9397_v35  ;;  %v9384_v38 = vor.u32 %v10351_v48, %v9381_v20  ;;  %v9461_v35 = vld [vmem:[#allocation14 + $0xd8] sm:$0xf0]  ;;  %v10365_v20 = vld [vmem:[#allocation14 + $0xa4] sm:$0xf] }
 0x374   :  { %v9464_v13 = vor.u32 %v10371_v39, %v9461_v35 }
 0x375   :  { %9336 = vmatmul.msk.bf16.vlgmr.msra.gmra.mxu3 %vm11018_vm11, %v11022_v30  ;;  %6223 = vmatpush.bf16.msra.mxu1 %v9436_v14  ;;  %v9419_v30 = vld [vmem:[#allocation14 + $0x80] sm:$0xf]  ;;  %v9373_v14 = vld [vmem:[#allocation14 + $0x28] sm:$0xf0] }
 0x376   :  { %5728 = vmatpush.bf16.msrb.mxu3 %v9252_v1  ;;  %v9420_v37 = vor.u32 %v10362_v41, %v9419_v30  ;;  %v9469_v1 = vld [vmem:[#allocation14 + $0xe8] sm:$0xf0]  ;;  %v9376_v22 = vor.u32 %v10349_v0, %v9373_v14  ;;  %v10392_v0 = vld [vmem:[#allocation14 + $0x174] sm:$0xf0]  ;;  %v10361_v14 = vld [vmem:[#allocation14 + $0x84] sm:$0xf] }
 0x377   :  { %6211 = vmatpush.bf16.msra.mxu0 %v9364_v36  ;;  %v9185_v36 = vld [vmem:[#allocation11 + $0x778] sm:$0xf0]  ;;  %v9472_v17 = vor.u32 %v10373_v50, %v9469_v1  ;;  %v9453_v30 = vld [vmem:[#allocation14 + $0xc8] sm:$0xf0] }
 0x378   :  { %v9188_v5 = vor.u32 %v10326_v2, %v9185_v36  ;;  %v10345_v36 = vld [vmem:[#allocation14 + $0x4] sm:$0xf]  ;;  %v9437_v50 = vld [vmem:[#allocation14 + $0xa8] sm:$0xf0] }
 0x379   :  { %6224 = vmatpush.bf16.msra.mxu1 %v9428_v32  ;;  %v5764_v32 = vxor.u32 %v5760_v59, %v5756_v46  ;;  %v9440_v1 = vor.u32 %v10365_v20, %v9437_v50  ;;  %v10378_v20 = vld [vmem:[#allocation14 + $0x104] sm:$0xf0] }
 0x37a   :  { %5729 = vmatpush.bf16.msrb.mxu3 %v9236_v3  ;;  %v5518_v3 = vpop.f32.mrf.mxu2 }
 0x37b   :  { %6212 = vmatpush.bf16.msra.mxu0 %v9356_v55  ;;  %v5542_v60 = vpop.f32.mrf.mxu0  ;;  %v5413_v55 = vadd.f32 %v11205_v8, %v11173_v51  ;;  %v9172_v8 = vor.u32 %v10322_v28, %v9169_v4  ;;  %v5768_v2 = vmul.u32 2146121005, %v5764_v32  ;;  %v5465_v28 = vadd.f32 %v11215_v40, %v11188_v63  ;;  %v9539_v3 = vld [vmem:[#allocation14 + $0x170] sm:$0xf]  ;;  %v9421_v63 = vld [vmem:[#allocation14 + $0x88] sm:$0xf0] }
 0x37c   :  { %v5543_v29 = vadd.f32 %v5542_v60, %v4039_v18  ;;  %v9456_v60 = vor.u32 %v10369_v9, %v9453_v30  ;;  %v9424_v40 = vor.u32 %v10361_v14, %v9421_v63 }
 0x37d   :  { %v5555_v44 = vpop.f32.mrf.mxu1  ;;  %6225 = vmatpush.bf16.msra.mxu1 %v9420_v37  ;;  %v10314_v37 = vld [vmem:[#allocation11 + $0x70c] sm:$0xf]  ;;  %v5772_v48 = vshrl.u32 %v5768_v2, 15 }
 0x37e   :  { %5730 = vmatpush.bf16.msrb.mxu3 %v9220_v19  ;;  %v11232_v34 = vadd.f32 %v5555_v44, %v5543_v29  ;;  %v9140_v46 = vor.u32 %v10314_v37, %v9137_v61  ;;  %v10384_v61 = vld [vmem:[#allocation14 + $0x134] sm:$0xf0] }
 0x37f   :  { %6257 = vmatpush.bf16.msrb.mxu0 %v9416_v58  ;;  %v5425_v58 = vpop.f32.mrf.mxu3 }
 0x380   :  { %v5426_v53 = vadd.f32 %v5425_v58, %v5413_v55  ;;  %v9429_v58 = vld [vmem:[#allocation14 + $0x98] sm:$0xf0] }
 0x381   :  { %6270 = vmatpush.bf16.msrb.mxu1 %v9480_v21  ;;  %v9445_v21 = vld [vmem:[#allocation14 + $0xb8] sm:$0xf0] }
 0x382   :  { %5731 = vmatpush.bf16.msrb.mxu3 %v9204_v42  ;;  %vm5741_vm7 = vcmp.ge.f32.partialorder %v5426_v53, 0.0  ;;  %v5745_v51 = vmul.f32 0.2, %v5426_v53  ;;  %v9448_v29 = vor.u32 %v10367_v49, %v9445_v21 }
 0x383   :  { %6258 = vmatpush.bf16.msrb.mxu0 %v9408_v24  ;;  %v5544_v24 = vpop.f32.mrf.mxu0 }
 0x384   :  { %v5749_v19 = vsel %vm5741_vm7, %v5426_v53, %v5745_v51  ;;  %v10390_v24 = vld [vmem:[#allocation14 + $0x164] sm:$0xf0] }
 0x385   :  { %6271 = vmatpush.bf16.msrb.mxu1 %v9472_v17  ;;  %v5557_v31 = vpop.f32.mrf.mxu1  ;;  %v5803_v18 = vmul.f32 1.4285715, %v5749_v19  ;;  %v10363_v17 = vld [vmem:[#allocation14 + $0x94] sm:$0xf]  ;;  %v9523_v19 = vld [vmem:[#allocation14 + $0x150] sm:$0xf] }
 0x386   :  { %5732 = vmatpush.bf16.msrb.mxu3 %v9188_v5  ;;  %v5776_v5 = vxor.u32 %v5772_v48, %v5768_v2  ;;  %v9432_v7 = vor.u32 %v10363_v17, %v9429_v58  ;;  %v10388_v31 = vld [vmem:[#allocation14 + $0x154] sm:$0xf0]  ;;  %v9499_v2 = vld [vmem:[#allocation14 + $0x120] sm:$0xf]  ;;  %v4040_v17 = vperm.slane %v11225_v10, 3 }
 0x387   :  { %6259 = vmatpush.bf16.msrb.mxu0 %v9400_v11  ;;  %v9365_v11 = vld [vmem:[#allocation14 + $0x18] sm:$0xf0]  ;;  %v9610_v41 = vpack.c.bf16 %v5803_v18, %v5803_v18  ;;  %v5427_v42 = vpop.f32.mrf.mxu3  ;;  %v10386_v18 = vld [vmem:[#allocation14 + $0x144] sm:$0xf0]  ;;  %v9483_v48 = vld [vmem:[#allocation14 + $0x100] sm:$0xf] }
 0x388   :  { %v9368_v16 = vor.u32 %v10347_v62, %v9365_v11  ;;  %v9524_v11 = vor.u32 %v10388_v31, %v9523_v19  ;;  %v9509_v19 = vld [vmem:[#allocation14 + $0x138] sm:$0xf0] }
 0x389   :  { %6272 = vmatpush.bf16.msrb.mxu1 %v9464_v13  ;;  %9611 = vmatmul.msk.bf16.vlgmr.msra.gmra.mxu0 %vm9609_vm10, %v9610_v41  ;;  %v9515_v13 = vld [vmem:[#allocation14 + $0x140] sm:$0xf] }
 0x38a   :  { %5733 = vmatpush.bf16.msrb.mxu3 %v9172_v8  ;;  %v9540_v8 = vor.u32 %v10392_v0, %v9539_v3 }
 0x38b   :  { %6260 = vmatpush.bf16.msrb.mxu0 %v9392_v45  ;;  %v9357_v45 = vld [vmem:[#allocation14 + $0x8] sm:$0xf0] }
 0x38c   :  { %v9360_v44 = vor.u32 %v10345_v36, %v9357_v45  ;;  %6231 = vmatpush.bf16.msra.mxu2 %v9540_v8  ;;  %v10382_v36 = vld [vmem:[#allocation14 + $0x124] sm:$0xf0]  ;;  %v9525_v8 = vld [vmem:[#allocation14 + $0x158] sm:$0xf0] }
 0x38d   :  { %6273 = vmatpush.bf16.msrb.mxu1 %v9456_v60  ;;  %v9500_v21 = vor.u32 %v10382_v36, %v9499_v2  ;;  %v10408_v2 = vld [vmem:[#allocation14 + $0x1f4] sm:$0xf0] }
 0x38e   :  { %5734 = vmatpush.bf16.msrb.mxu3 %v9156_v15  ;;  %v11251_v59 = vpop.f32.mrf.mxu2 }
 0x38f   :  { %6261 = vmatpush.bf16.msrb.mxu0 %v9384_v38  ;;  %v5477_v55 = vpop.f32.mrf.mxu3  ;;  %v5780_v38 = vmul.u32 2221713035, %v5776_v5  ;;  %v9541_v5 = vld [vmem:[#allocation14 + $0x178] sm:$0xf0] }
 0x390   :  { %v5478_v4 = vadd.f32 %v5477_v55, %v5465_v28  ;;  %v10391_v55 = vld [vmem:[#allocation14 + $0x174] sm:$0xf]  ;;  %v10389_v28 = vld [vmem:[#allocation14 + $0x164] sm:$0xf] }
 0x391   :  { %6274 = vmatpush.bf16.msrb.mxu1 %v9448_v29  ;;  %v5784_v51 = vshrl.u32 %v5780_v38, 16  ;;  %v10380_v29 = vld [vmem:[#allocation14 + $0x114] sm:$0xf0]  ;;  %v9544_v58 = vor.u32 %v10391_v55, %v9541_v5 }
 0x392   :  { %5735 = vmatpush.bf16.msrb.mxu3 %v9140_v46  ;;  %v5491_v53 = vadd.f32 %v11211_v25, %v5478_v4  ;;  %v9531_v25 = vld [vmem:[#allocation14 + $0x160] sm:$0xf]  ;;  %v9491_v46 = vld [vmem:[#allocation14 + $0x110] sm:$0xf]  ;;  %v9533_v4 = vld [vmem:[#allocation14 + $0x168] sm:$0xf0] }
 0x393   :  { %6262 = vmatpush.bf16.msrb.mxu0 %v9376_v22  ;;  %v5788_v43 = vxor.u32 %v5784_v51, %v5780_v38  ;;  %v9532_v22 = vor.u32 %v10390_v24, %v9531_v25  ;;  %v5757_v38 = vxor.u32 %v11207_v12, %v10918_v56  ;;  %v10387_v51 = vld [vmem:[#allocation14 + $0x154] sm:$0xf]  ;;  %v10385_v24 = vld [vmem:[#allocation14 + $0x144] sm:$0xf]  ;;  %v10404_v55 = vld [vmem:[#allocation14 + $0x1d4] sm:$0xf0] }
 0x395   :  { %9348 = vmatmul.msk.bf16.vlgmr.msrb.gmra.mxu3 %vm11137_vm8, %v11141_v47  ;;  %6275 = vmatpush.bf16.msrb.mxu1 %v9440_v1  ;;  %v5504_v47 = vadd.f32 %v11213_v33, %v5491_v53  ;;  %v9350_v6 = vxor.u32 2147483648, %v5788_v43  ;;  %v9516_v33 = vor.u32 %v10386_v18, %v9515_v13  ;;  %v9484_v1 = vor.u32 %v10378_v20, %v9483_v48  ;;  %v9517_v43 = vld [vmem:[#allocation14 + $0x148] sm:$0xf0] }
 0x396   :  { %v5570_v35 = vpop.f32.mrf.mxu2  ;;  %6232 = vmatpush.bf16.msra.mxu2 %v9532_v22  ;;  %v5761_v10 = vshrl.u32 %v5757_v38, 16  ;;  %v9520_v22 = vor.u32 %v10385_v24, %v9517_v43  ;;  %v9555_v43 = vld [vmem:[#allocation14 + $0x190] sm:$0xf] }
 0x397   :  { %6263 = vmatpush.bf16.msrb.mxu0 %v9368_v16  ;;  %v5479_v23 = vpop.f32.mrf.mxu3  ;;  %v5517_v32 = vadd.f32 %v11223_v52, %v5504_v47  ;;  %vm11265_vm12 = vcmp.ge.s32.totalorder %v9350_v6, 3435973836  ;;  %v9507_v52 = vld [vmem:[#allocation14 + $0x130] sm:$0xf]  ;;  %v10381_v6 = vld [vmem:[#allocation14 + $0x124] sm:$0xf] }
 0x398   :  { %v9508_v60 = vor.u32 %v10384_v61, %v9507_v52  ;;  %vm9612_vm13 = vmpackc.low %vm11265_vm12, %vm11265_vm12  ;;  %v5765_v56 = vxor.u32 %v5761_v10, %v5757_v38  ;;  %v10377_v52 = vld [vmem:[#allocation14 + $0x104] sm:$0xf]  ;;  %v9485_v61 = vld [vmem:[#allocation14 + $0x108] sm:$0xf0] }
 0x399   :  { %6276 = vmatpush.bf16.msrb.mxu1 %v9432_v7  ;;  %v9536_v7 = vor.u32 %v10389_v28, %v9533_v4  ;;  %v9579_v4 = vld [vmem:[#allocation14 + $0x1c0] sm:$0xf] }
 0x39a   :  { %6233 = vmatpush.bf16.msra.mxu2 %v9524_v11  ;;  %v5769_v35 = vmul.u32 2146121005, %v5765_v56  ;;  %v9501_v11 = vld [vmem:[#allocation14 + $0x128] sm:$0xf0]  ;;  %v10398_v56 = vld [vmem:[#allocation14 + $0x1a4] sm:$0xf0] }
 0x39b   :  { %6264 = vmatpush.bf16.msrb.mxu0 %v9360_v44  ;;  %v11254_v39 = vpop.f32.mrf.mxu0  ;;  %v9492_v44 = vor.u32 %v10380_v29, %v9491_v46  ;;  %v9504_v18 = vor.u32 %v10381_v6, %v9501_v11  ;;  %v9595_v29 = vld [vmem:[#allocation14 + $0x1e0] sm:$0xf] }
 0x39c   :  { %v5773_v13 = vshrl.u32 %v5769_v35, 15 }
 0x39d   :  { %v11261_v54 = vpop.f32.mrf.mxu1  ;;  %6277 = vmatpush.bf16.msrb.mxu1 %v9424_v40  ;;  %v9528_v40 = vor.u32 %v10387_v51, %v9525_v8  ;;  %v10400_v51 = vld [vmem:[#allocation14 + $0x1b4] sm:$0xf0] }
 0x39e   :  { %9623 = vmatmul.msk.bf16.vlgmr.msrb.gmra.mxu0 %vm9609_vm10, %v9610_v41  ;;  %6234 = vmatpush.bf16.msra.mxu2 %v9516_v33  ;;  %v5777_v33 = vxor.u32 %v5773_v13, %v5769_v35  ;;  %v10405_v13 = vld [vmem:[#allocation14 + $0x1e4] sm:$0xf] }
 0x39f   :  { %v5529_v62 = vpop.f32.mrf.mxu3 }
 0x3a0   :  { %v5530_v15 = vadd.f32 %v5529_v62, %v5517_v32  ;;  %v10383_v32 = vld [vmem:[#allocation14 + $0x134] sm:$0xf] }
 0x3a1   :  { %v9512_v62 = vor.u32 %v10383_v32, %v9509_v19  ;;  %v9547_v32 = vld [vmem:[#allocation14 + $0x180] sm:$0xf]  ;;  %v10394_v19 = vld [vmem:[#allocation14 + $0x184] sm:$0xf0] }
 0x3a2   :  { %vm5742_vm11 = vcmp.ge.f32.partialorder %v5530_v15, 0.0  ;;  %v5746_v30 = vmul.f32 0.2, %v5530_v15  ;;  %6235 = vmatpush.bf16.msra.mxu2 %v9508_v60  ;;  %v9603_v60 = vld [vmem:[#allocation14 + $0x1f0] sm:$0xf]  ;;  %v9548_v6 = vor.u32 %v10394_v19, %v9547_v32 }
 0x3a3   :  { %v5596_v9 = vpop.f32.mrf.mxu0 }
 0x3a4   :  { %v5750_v37 = vsel %vm5742_vm11, %v5530_v15, %v5746_v30  ;;  %v10379_v15 = vld [vmem:[#allocation14 + $0x114] sm:$0xf]  ;;  %v9493_v9 = vld [vmem:[#allocation14 + $0x118] sm:$0xf0] }
 0x3a5   :  { %v5609_v41 = vpop.f32.mrf.mxu1  ;;  %v5804_v16 = vmul.f32 1.4285715, %v5750_v37  ;;  %v9496_v30 = vor.u32 %v10379_v15, %v9493_v9  ;;  %v5781_v37 = vmul.u32 2221713035, %v5777_v33  ;;  %v5758_v33 = vxor.u32 %v11207_v12, %v10926_v26  ;;  %v10399_v12 = vld [vmem:[#allocation14 + $0x1b4] sm:$0xf] }
 0x3a6   :  { %6236 = vmatpush.bf16.msra.mxu2 %v9500_v21  ;;  %v5569_v41 = vadd.f32 %v11251_v59, %v11232_v34  ;;  %v10406_v34 = vld [vmem:[#allocation14 + $0x1e4] sm:$0xf0] }
 0x3a7   :  { %v9613_v45 = vpack.c.bf16 %v5804_v16, %v5804_v16  ;;  %v5531_v49 = vpop.f32.mrf.mxu3  ;;  %v9488_v16 = vor.u32 %v10377_v52, %v9485_v61  ;;  %v5785_v21 = vshrl.u32 %v5781_v37, 16  ;;  %v9596_v48 = vor.u32 %v10406_v34, %v9595_v29  ;;  %v10397_v29 = vld [vmem:[#allocation14 + $0x1a4] sm:$0xf]  ;;  %v9565_v34 = vld [vmem:[#allocation14 + $0x1a8] sm:$0xf0] }
 0x3a8   :  { %v9604_v49 = vor.u32 %v10408_v2, %v9603_v60  ;;  %v10401_v60 = vld [vmem:[#allocation14 + $0x1c4] sm:$0xf]  ;;  %v9581_v2 = vld [vmem:[#allocation14 + $0x1c8] sm:$0xf0] }
 0x3a9   :  { %9614 = vmatmul.msk.bf16.vlgmr.msra.gmra.mxu1 %vm9612_vm13, %v9613_v45  ;;  %v5789_v20 = vxor.u32 %v5785_v21, %v5781_v37 }
 0x3aa   :  { %6237 = vmatpush.bf16.msra.mxu2 %v9492_v44  ;;  %6244 = vmatpush.bf16.msra.mxu3 %v9604_v49  ;;  %v9573_v49 = vld [vmem:[#allocation14 + $0x1b8] sm:$0xf0] }
 0x3ab   :  { %v9351_v28 = vxor.u32 2147483648, %v5789_v20  ;;  %v9576_v21 = vor.u32 %v10399_v12, %v9573_v49  ;;  %v9568_v20 = vor.u32 %v10397_v29, %v9565_v34 }
 0x3ad   :  { %vm11300_vm15 = vcmp.ge.s32.totalorder %v9351_v28, 3435973836 }
 0x3ae   :  { %v11277_v50 = vpop.f32.mrf.mxu2  ;;  %6238 = vmatpush.bf16.msra.mxu2 %v9484_v1  ;;  %6245 = vmatpush.bf16.msra.mxu3 %v9596_v48  ;;  %v9587_v1 = vld [vmem:[#allocation14 + $0x1d0] sm:$0xf]  ;;  %vm9615_vm0 = vmpackc.low %vm11300_vm15, %vm11300_vm15 }
 0x3b2   :  { %6283 = vmatpush.bf16.msrb.mxu2 %v9544_v58 }
 0x3b6   :  { %6284 = vmatpush.bf16.msrb.mxu2 %v9536_v7  ;;  %v5622_v23 = vpop.f32.mrf.mxu2  ;;  %v10402_v7 = vld [vmem:[#allocation14 + $0x1c4] sm:$0xf0] }
 0x3b8   :  { %v5581_v63 = vpop.f32.mrf.mxu3 }
 0x3b9   :  { %9626 = vmatmul.msk.bf16.vlgmr.msrb.gmra.mxu1 %vm9612_vm13, %v9613_v45  ;;  %v5582_v42 = vadd.f32 %v5581_v63, %v5569_v41  ;;  %v10403_v41 = vld [vmem:[#allocation14 + $0x1d4] sm:$0xf]  ;;  %vm6406_vm13 = vcmask 57344  }
 0x3ba   :  { %6285 = vmatpush.bf16.msrb.mxu2 %v9528_v40  ;;  %v9563_v40 = vld [vmem:[#allocation14 + $0x1a0] sm:$0xf] }
 0x3bb   :  { %v5646_v53 = vpop.f32.mrf.mxu0  ;;  %v5595_v36 = vadd.f32 %v11254_v39, %v5582_v42  ;;  %v9564_v24 = vor.u32 %v10398_v56, %v9563_v40  ;;  %v9589_v42 = vld [vmem:[#allocation14 + $0x1d8] sm:$0xf0] }
 0x3bc   :  { %v5647_v0 = vadd.f32 %v5646_v53, %v4040_v17  ;;  %v9588_v17 = vor.u32 %v10404_v55, %v9587_v1  ;;  %v9580_v53 = vor.u32 %v10402_v7, %v9579_v4  ;;  %v9592_v37 = vor.u32 %v10403_v41, %v9589_v42  ;;  %v10395_v1 = vld [vmem:[#allocation14 + $0x194] sm:$0xf]  ;;  %v9557_v55 = vld [vmem:[#allocation14 + $0x198] sm:$0xf0]  ;;  %v10393_v4 = vld [vmem:[#allocation14 + $0x184] sm:$0xf] }
 0x3bd   :  { %v5659_v3 = vpop.f32.mrf.mxu1  ;;  %v5608_v44 = vadd.f32 %v11261_v54, %v5595_v36  ;;  %v9584_v36 = vor.u32 %v10401_v60, %v9581_v2  ;;  %v9549_v7 = vld [vmem:[#allocation14 + $0x188] sm:$0xf0] }
 0x3be   :  { %v11287_v14 = vadd.f32 %v5659_v3, %v5647_v0  ;;  %6286 = vmatpush.bf16.msrb.mxu2 %v9520_v22  ;;  %6246 = vmatpush.bf16.msra.mxu3 %v9588_v17  ;;  %v10396_v22 = vld [vmem:[#allocation14 + $0x194] sm:$0xf0] }
 0x3bf   :  { %v5621_v39 = vadd.f32 %v11277_v50, %v5608_v44  ;;  %v9571_v50 = vld [vmem:[#allocation14 + $0x1b0] sm:$0xf]  ;;  %v9556_v35 = vor.u32 %v10396_v22, %v9555_v43 }
 0x3c0   :  { %v5583_v31 = vpop.f32.mrf.mxu3  ;;  %v9572_v63 = vor.u32 %v10400_v51, %v9571_v50 }
 0x3c1   :  { %v10407_v31 = vld [vmem:[#allocation14 + $0x1f4] sm:$0xf] }
 0x3c2   :  { %6287 = vmatpush.bf16.msrb.mxu2 %v9512_v62  ;;  %6247 = vmatpush.bf16.msra.mxu3 %v9580_v53  ;;  %v9605_v62 = vld [vmem:[#allocation14 + $0x1f8] sm:$0xf0]  ;;  %v9552_v53 = vor.u32 %v10393_v4, %v9549_v7 }
 0x3c3   :  { %v5648_v47 = vpop.f32.mrf.mxu0  ;;  %v9608_v11 = vor.u32 %v10407_v31, %v9605_v62 }
 0x3c5   :  { %v5661_v25 = vpop.f32.mrf.mxu1 }
 0x3c6   :  { %6288 = vmatpush.bf16.msrb.mxu2 %v9504_v18  ;;  %6248 = vmatpush.bf16.msra.mxu3 %v9572_v63  ;;  %v9597_v18 = vld [vmem:[#allocation14 + $0x1e8] sm:$0xf0] }
 0x3c7   :  { %v9600_v9 = vor.u32 %v10405_v13, %v9597_v18 }
 0x3ca   :  { %6289 = vmatpush.bf16.msrb.mxu2 %v9496_v30  ;;  %6249 = vmatpush.bf16.msra.mxu3 %v9564_v24  ;;  %v5762_v30 = vshrl.u32 %v5758_v33, 16 }
 0x3ce   :  { %v11292_v45 = vpop.f32.mrf.mxu2  ;;  %6290 = vmatpush.bf16.msrb.mxu2 %v9488_v16  ;;  %6250 = vmatpush.bf16.msra.mxu3 %v9556_v35  ;;  %v5766_v16 = vxor.u32 %v5762_v30, %v5758_v33 }
 0x3cf   :  { %v5673_v17 = vadd.f32 %v11292_v45, %v11287_v14 }
 0x3d0   :  { %v5770_v26 = vmul.u32 2146121005, %v5766_v16  ;;  %v6345_v16 = vld [vmem:[#allocation17] sm:$0x3] }
 0x3d1   :  { %6356 = vst [vmem:[#allocation1] ss:$9 sm:$0xff] %v6345_v16 }
 0x3d2   :  { %6251 = vmatpush.bf16.msra.mxu3 %v9548_v6  ;;  %v5774_v48 = vshrl.u32 %v5770_v26, 15 }
 0x3d6   :  { %v5674_v5 = vpop.f32.mrf.mxu2  ;;  %6296 = vmatpush.bf16.msrb.mxu3 %v9608_v11 }
 0x3d7   :  { %v9560_v5 = vor.u32 %v10395_v1, %v9557_v55  ;;  %v6348_v1 = vld [vmem:[#allocation4] sm:$0x1]  ;;  %v10675_v55 = vmov 0  }
 0x3d8   :  { %v5633_v58 = vpop.f32.mrf.mxu3  ;;  %10425 = vset.pattern.permute.xlu0 %v10675_v55 }
 0x3d9   :  { %v5634_v38 = vadd.f32 %v5633_v58, %v5621_v39  ;;  %v5778_v39 = vxor.u32 %v5774_v48, %v5770_v26  ;;  %6351 = vperm.xlu0 %10425, %v6348_v1  }
 0x3da   :  { %6297 = vmatpush.bf16.msrb.mxu3 %v9600_v9  ;;  %v6316_v9 = vstv %s6315_s17 }
 0x3db   :  { %v11294_v46 = vpop.f32.mrf.mxu0  ;;  %vm5743_vm14 = vcmp.ge.f32.partialorder %v5634_v38, 0.0  ;;  %v5747_v0 = vmul.f32 0.2, %v5634_v38  ;;  %v6317_v33 = vxor.u32 %v6316_v9, %v10888_v27 }
 0x3dd   :  { %v11296_v59 = vpop.f32.mrf.mxu1  ;;  %v5751_v23 = vsel %vm5743_vm14, %v5634_v38, %v5747_v0  ;;  %v5782_v38 = vmul.u32 2221713035, %v5778_v39  ;;  %v6319_v41 = vshrl.u32 %v6317_v33, 16 }
 0x3de   :  { %v5805_v8 = vmul.f32 1.4285715, %v5751_v23  ;;  %6298 = vmatpush.bf16.msrb.mxu3 %v9592_v37 }
 0x3df   :  { %v5786_v0 = vshrl.u32 %v5782_v38, 16  ;;  %v6321_v42 = vxor.u32 %v6319_v41, %v6317_v33 }
 0x3e0   :  { %v9616_v47 = vpack.c.bf16 %v5805_v8, %v5805_v8  ;;  %v5635_v25 = vpop.f32.mrf.mxu3 }
 0x3e1   :  { %v5790_v23 = vxor.u32 %v5786_v0, %v5782_v38  ;;  %v6323_v37 = vmul.u32 2146121005, %v6321_v42  ;;  %v6357_v38 = vld [vmem:[#allocation1] sm:$0xff] }
 0x3e2   :  { %9617 = vmatmul.msk.bf16.vlgmr.msra.gmra.mxu2 %vm9615_vm0, %v9616_v47  ;;  %6299 = vmatpush.bf16.msrb.mxu3 %v9584_v36 }
 0x3e3   :  { %v5700_v3 = vpop.f32.mrf.mxu0  ;;  %v9352_v8 = vxor.u32 2147483648, %v5790_v23 }
 0x3e5   :  { %v5713_v54 = vpop.f32.mrf.mxu1  ;;  %vm5802_vm2 = vcmp.ge.s32.totalorder %v9352_v8, 3435973836 }
 0x3e6   :  { %6300 = vmatpush.bf16.msrb.mxu3 %v9576_v21  ;;  %vm9618_vm3 = vmpackc.low %vm5802_vm2, %vm5802_vm2 }
 0x3ea   :  { %6301 = vmatpush.bf16.msrb.mxu3 %v9568_v20 }
 0x3ee   :  { %6302 = vmatpush.bf16.msrb.mxu3 %v9560_v5 }
 0x3ef   :  { %v5724_v15 = vpop.f32.mrf.mxu2 }
 0x3f2   :  { %9629 = vmatmul.msk.bf16.vlgmr.msrb.gmra.mxu2 %vm9615_vm0, %v9616_v47  ;;  %6303 = vmatpush.bf16.msrb.mxu3 %v9552_v53 }
 0x3f7   :  { %v5726_v61 = vpop.f32.mrf.mxu2 }
 0x3f8   :  { %v5685_v52 = vpop.f32.mrf.mxu3  ;;  %v6318_v61 = vxor.u32 %v6316_v9, %v10903_v57 }
 0x3f9   :  { %v5686_v28 = vadd.f32 %v5685_v52, %v5673_v17  ;;  %v6325_v52 = vshrl.u32 %v6323_v37, 15 }
 0x3fa   :  { %v6320_v2 = vshrl.u32 %v6318_v61, 16 }
 0x3fb   :  { %v5699_v3 = vadd.f32 %v11294_v46, %v5686_v28  ;;  %v5879_v46 = vld [vmem:[#allocation16] sm:$0x3]  ;;  %v6327_v60 = vxor.u32 %v6325_v52, %v6323_v37 }
 0x3fc   :  { %v5881_v43 = vperm.slane %v5879_v46, 0  ;;  %v5882_v19 = vperm.slane %v5879_v46, 1  ;;  %v6322_v26 = vxor.u32 %v6320_v2, %v6318_v61 }
 0x3fd   :  { %v5712_v10 = vadd.f32 %v11296_v59, %v5699_v3  ;;  %v6329_v36 = vmul.u32 2221713035, %v6327_v60 }
 0x3fe   :  { %v6324_v49 = vmul.u32 2146121005, %v6322_v26 }
 0x3ff   :  { %v5725_v50 = vadd.f32 %v5724_v15, %v5712_v10  ;;  %v6331_v12 = vshrl.u32 %v6329_v36, 16 }
 0x400   :  { %v5687_v44 = vpop.f32.mrf.mxu3  ;;  %v6326_v29 = vshrl.u32 %v6324_v49, 15 }
 0x401   :  { %v6333_v21 = vxor.u32 %v6331_v12, %v6329_v36 }
 0x402   :  { %v6328_v48 = vxor.u32 %v6326_v29, %v6324_v49 }
 0x403   :  { %v9633_v27 = vxor.u32 2147483648, %v6333_v21 }
 0x404   :  { %v6330_v39 = vmul.u32 2221713035, %v6328_v48 }
 0x405   :  { %vm6337_vm5 = vcmp.ge.s32.totalorder %v9633_v27, 3435973836 }
 0x406   :  { %v6214_v58 = vpop.f32.mrf.mxu0  ;;  %vm9635_vm6 = vmpackc.low %vm6337_vm5, %vm6337_vm5  ;;  %v6332_v4 = vshrl.u32 %v6330_v39, 16 }
 0x407   :  { %v6215_v22 = vadd.f32 %v6214_v58, %v5881_v43 }
 0x408   :  { %v6334_v7 = vxor.u32 %v6332_v4, %v6330_v39 }
 0x40a   :  { %v9634_v0 = vxor.u32 2147483648, %v6334_v7 }
 0x40c   :  { %vm6340_vm7 = vcmp.ge.s32.totalorder %v9634_v0, 3435973836 }
 0x40d   :  { %vm9638_vm9 = vmpackc.low %vm6340_vm7, %vm6340_vm7 }
 0x40e   :  { %v6216_v54 = vpop.f32.mrf.mxu0 }
 0x418   :  { %v5737_v51 = vpop.f32.mrf.mxu3 }
 0x419   :  { %v5738_v63 = vadd.f32 %v5737_v51, %v5725_v50 }
 0x41b   :  { %v6266_v14 = vpop.f32.mrf.mxu0  ;;  %vm5744_vm1 = vcmp.ge.f32.partialorder %v5738_v63, 0.0  ;;  %v5748_v45 = vmul.f32 0.2, %v5738_v63 }
 0x41c   :  { %v6267_v31 = vadd.f32 %v6266_v14, %v5882_v19 }
 0x41d   :  { %v5752_v40 = vsel %vm5744_vm1, %v5738_v63, %v5748_v45  ;;  %v6358_v63 = vld [vmem:[#allocation1 + $0x9] sm:$0xff] }
 0x41e   :  { %v5806_v56 = vmul.f32 1.4285715, %v5752_v40 }
 0x420   :  { %v9619_v47 = vpack.c.bf16 %v5806_v56, %v5806_v56  ;;  %v5739_v25 = vpop.f32.mrf.mxu3 }
 0x422   :  { %9620 = vmatmul.msk.bf16.vlgmr.msra.gmra.mxu3 %vm9618_vm3, %v9619_v47 }
 0x423   :  { %v6268_v24 = vpop.f32.mrf.mxu0 }
 0x426   :  { %v6227_v59 = vpop.f32.mrf.mxu1 }
 0x427   :  { %v6228_v35 = vadd.f32 %v6227_v59, %v6215_v22 }
 0x42e   :  { %v6229_v32 = vpop.f32.mrf.mxu1 }
 0x432   :  { %9632 = vmatmul.msk.bf16.vlgmr.msrb.gmra.mxu3 %vm9618_vm3, %v9619_v47 }
 0x436   :  { %v6279_v62 = vpop.f32.mrf.mxu1 }
 0x437   :  { %v6280_v6 = vadd.f32 %v6279_v62, %v6267_v31 }
 0x43e   :  { %v6281_v11 = vpop.f32.mrf.mxu1 }
 0x44b   :  { %v6352_v45 = vpop.permute.xlu0 %6351 }
 0x44c   :  { %v6354_v56 = vperm.slane %v6352_v45, 0 }
 0x465   :  { %v6240_v13 = vpop.f32.mrf.mxu2 }
 0x466   :  { %v6241_v34 = vadd.f32 %v6240_v13, %v6228_v35 }
 0x46d   :  { %v6242_v18 = vpop.f32.mrf.mxu2 }
 0x475   :  { %v6292_v15 = vpop.f32.mrf.mxu2 }
 0x476   :  { %v6293_v53 = vadd.f32 %v6292_v15, %v6280_v6 }
 0x47d   :  { %v6294_v30 = vpop.f32.mrf.mxu2 }
 0x4a5   :  { %v6253_v44 = vpop.f32.mrf.mxu3 }
 0x4a6   :  { %v6254_v20 = vadd.f32 %v6253_v44, %v6241_v34 }
 0x4a8   :  { %vm6309_vm4 = vcmp.ge.f32.partialorder %v6254_v20, 0.0  ;;  %v6311_v57 = vmul.f32 0.2, %v6254_v20 }
 0x4aa   :  { %v6313_v5 = vsel %vm6309_vm4, %v6254_v20, %v6311_v57 }
 0x4ab   :  { %v6341_v17 = vmul.f32 1.4285715, %v6313_v5 }
 0x4ad   :  { %v9636_v58 = vpack.c.bf16 %v6341_v17, %v6341_v17  ;;  %v6255_v28 = vpop.f32.mrf.mxu3 }
 0x4af   :  { %9637 = vmatpush.bf16.xpose.msk.msra.mxu0 %vm9635_vm6, %v9636_v58 }
 0x4b5   :  { %v6305_v3 = vpop.f32.mrf.mxu3 }
 0x4b6   :  { %v6306_v54 = vadd.f32 %v6305_v3, %v6293_v53  ;;  %6369 = vmatmul.bf16.vlgmr.msra.gmra.mxu0 %v6357_v38 }
 0x4b8   :  { %vm6310_vm8 = vcmp.ge.f32.partialorder %v6306_v54, 0.0  ;;  %v6312_v10 = vmul.f32 0.2, %v6306_v54 }
 0x4ba   :  { %v6314_v23 = vsel %vm6310_vm8, %v6306_v54, %v6312_v10 }
 0x4bb   :  { %v6342_v50 = vmul.f32 1.4285715, %v6314_v23 }
 0x4bd   :  { %v9639_v51 = vpack.c.bf16 %v6342_v50, %v6342_v50  ;;  %v6307_v8 = vpop.f32.mrf.mxu3 }
 0x4bf   :  { %9640 = vmatpush.bf16.xpose.msk.msra.mxu1 %vm9638_vm9, %v9639_v51 }
 0x4c6   :  { %6382 = vmatmul.bf16.vlgmr.msra.gmra.mxu1 %v6358_v63 }
 0x533   :  { %v6370_v14 = vpop.f32.mrf.mxu0 }
 0x534   :  { %v6371_v47 = vadd.f32 %v6370_v14, %v6354_v56 }
 0x53b   :  { %v6372_v40 = vpop.f32.mrf.mxu0 }
 0x543   :  { %v6383_v25 = vpop.f32.mrf.mxu1 }
 0x544   :  { %v6384_v46 = vadd.f32 %v6383_v25, %v6371_v47 }
 0x546   :  { %v6387_v24 = vsub.f32 0.0, %v6384_v46 }
 0x548   :  { %v6388_v43 = vmul.f32 1.442695, %v6387_v24 }
 0x54a   :  { %10426 = vpow2.f32 %v6388_v43 }
 0x54b   :  { %v6385_v22 = vpop.f32.mrf.mxu1 }
 0x550   :  { %v10427_v59 = vpop.eup %10426 }
 0x551   :  { %v6390_v35 = vadd.f32 1.0, %v10427_v59 }
 0x553   :  { %10428 = vrcp.f32 %v6390_v35  ;;  %v6402_v62 = vand.u32 2147483648, %v6390_v35  ;;  %v6400_v11 = vand.u32 2147483647, %v6390_v35  ;;  %vm6396_vm11 = vweird.f32 %v6390_v35 }
 0x555   :  { %v6403_v18 = vor.u32 1.1754944e-38, %v6402_v62  ;;  %vm6401_vm14 = vcmp.eq.f32.partialorder %v6400_v11, 8.507059e+37 }
 0x559   :  { %v10429_v32 = vpop.eup %10428 }
 0x55a   :  { %v6392_v19 = vmul.f32 %v10429_v32, %v6390_v35  ;;  %vm6397_vm10 = vweird.f32 %v10429_v32 }
 0x55b   :  { %vm6398_vm12 = vmor %vm6396_vm11, %vm6397_vm10 }
 0x55c   :  { %v6393_v31 = vsub.f32 1.0, %v6392_v19 }
 0x55e   :  { %v6394_v6 = vmul.f32 %v10429_v32, %v6393_v31 }
 0x560   :  { %v6395_v13 = vadd.f32 %v10429_v32, %v6394_v6 }
 0x562   :  { %v6399_v15 = vsel %vm6398_vm12, %v10429_v32, %v6395_v13 }
 0x563   :  { %v6404_v9 = vsel %vm6401_vm14, %v6403_v18, %v6399_v15 }
 0x564   :  { %6407 = vst.msk [vmem:[#allocation19] sm:$0x1] %vm6406_vm13, %v6404_v9 }
 0x565   :  { %6418 = dma.vmem_to_hbm [thread:$0]  %s6414_s18, 16, %s6416_s6, [#allocation7]  }
 0x566   :  { %10659 = dma.done.wait [#allocation7], 16  }
 0x567   :  { %10660 = vsyncadd [#allocation7], 4294967280 }
 0x568   :  { %6423 = vsyncpa [#allocation6], 1 }
 0x569   :  { %6424 = vsyncpa [#allocation9], 1 }
 0x56a   :  { %6425 = vsyncpa [#allocation12], 1 }
 0x56b   :  { %6426 = vsyncpa [#allocation15], 1 }
 0x56c   :  { %6427 = vsyncpa [#allocation18], 1 }
 0x56d   :  { %6428 = vsyncpa [#allocation7], 1 }

</bundles_post_ra>
